<compile_context>
chip_gen: v7x
topology: tpu7x:2x2x1
jax: 0.10.0
libtpu: 0.0.40
codegen_flags: <defaults>
</compile_context>

<pallas_src>
import math

import jax
import jax.numpy as jnp
from jax.experimental import pallas as pl

EPS = 1e-5


# ---------------------------------------------------------------------------
# Fused conv (single K-packed matmul) + BatchNorm(batch stats) + res + ReLU
# ---------------------------------------------------------------------------
def _make_conv_bn_kernel(has_res, relu, m_real):
    inv_m = 1.0 / float(m_real)

    def kernel(*refs):
        x_ref, w_ref = refs[0], refs[1]
        res_ref = refs[2] if has_res else None
        o_ref = refs[3] if has_res else refs[2]

        # conv: one K-packed MXU matmul (bf16 in, f32 accumulation).
        y = jnp.dot(x_ref[...], w_ref[...], preferred_element_type=jnp.float32)

        # BatchNorm2d, training mode: per-channel batch statistics, biased
        # variance, gamma=1 / beta=0 (module init), eps=1e-5.
        mean = jnp.sum(y, axis=0, keepdims=True) * inv_m
        var = jnp.sum(y * y, axis=0, keepdims=True) * inv_m - mean * mean
        var = jnp.maximum(var, 0.0)        # guard E[y^2]-E[y]^2 cancellation
        out = (y - mean) * jax.lax.rsqrt(var + EPS)

        if has_res:
            out = out + res_ref[...].astype(jnp.float32)
        if relu:
            out = jnp.maximum(out, 0.0)
        o_ref[...] = out.astype(o_ref.dtype)

    return kernel


def fused_conv_bn(x2d, w2d, res2d=None, relu=True, out_dtype=jnp.bfloat16):
    """x2d: (M, K) K-packed activation slab (taps / skip groups concatenated
    along K).  w2d: (K, Cout).  Computes conv -> BN(batch stats) -> (+res) ->
    (ReLU) in one grid-less Pallas kernel: the whole layer is resident in VMEM
    (largest layer here is ~1.5 MiB of operands)."""
    m, k = x2d.shape
    cout = w2d.shape[-1]
    inputs = [x2d.astype(jnp.bfloat16), w2d.astype(jnp.bfloat16)]
    if res2d is not None:
        inputs.append(res2d.astype(jnp.bfloat16))

    kernel = _make_conv_bn_kernel(res2d is not None, relu, m)
    bytes_accessed = (m * k + k * cout + m * cout) * 2 \
        + (m * cout * 2 if res2d is not None else 0)
    return pl.pallas_call(
        kernel,
        out_shape=jax.ShapeDtypeStruct((m, cout), out_dtype),
        cost_estimate=pl.CostEstimate(flops=int(2 * m * k * cout),
                                      transcendentals=int(cout),
                                      bytes_accessed=int(bytes_accessed)),
    )(*inputs)


# ---------------------------------------------------------------------------
# Max-pool kernel (9 shifted taps, elementwise max tree on the VPU)
# ---------------------------------------------------------------------------
def _maxpool9_kernel(*refs):
    o_ref = refs[9]
    y = refs[0][...]
    for t in range(1, 9):
        y = jnp.maximum(y, refs[t][...])
    o_ref[...] = y


# ---------------------------------------------------------------------------
# Data-movement glue (NHWC): pad / tap extraction / upsample
# ---------------------------------------------------------------------------
def _replication_pad1(x):
    # nn.ReplicationPad2d(1)
    return jnp.pad(x, ((0, 0), (1, 1), (1, 1), (0, 0)), mode="edge")


def _extract_3x3_patches(xp, stride, ho, wo):
    """xp: padded (B, H+2, W+2, C) -> 9 strided taps, each (B, ho, wo, C)."""
    b, _, _, c = xp.shape
    taps = []
    for ky in range(3):
        for kx in range(3):
            taps.append(jax.lax.slice(
                xp,
                (0, ky, kx, 0),
                (b, ky + stride * (ho - 1) + 1, kx + stride * (wo - 1) + 1, c),
                (1, stride, stride, 1)))
    return taps


def upsample2x(x):
    # nn.Upsample(scale_factor=2), default mode='nearest'
    x = jnp.repeat(x, 2, axis=1)
    return jnp.repeat(x, 2, axis=2)


# ---------------------------------------------------------------------------
# Conv / pool wrappers
# ---------------------------------------------------------------------------
def conv3x3_bn(xs, w, stride=1, relu=True, res=None):
    """ReplicationPad2d(1) + Conv2d(3x3, stride, bias=False) over the implicit
    channel-concat of `xs`, fused with BN(batch stats) (+res) (+ReLU).
    All 9 taps (and skip groups) are packed along K into one slab so the
    kernel runs a single MXU matmul per layer."""
    b, h, wdt, _ = xs[0].shape
    cout = w.shape[-1]
    ho = (h + 2 - 3) // stride + 1
    wo = (wdt + 2 - 3) // stride + 1
    m = b * ho * wo

    slabs, w_slabs, coff = [], [], 0
    for x in xs:
        cin = x.shape[-1]
        xp = _replication_pad1(x.astype(jnp.bfloat16))
        taps = [t.reshape(m, cin)
                for t in _extract_3x3_patches(xp, stride, ho, wo)]
        slabs.append(jnp.concatenate(taps, axis=-1))                # (M, 9*cin)
        w_slabs.append(w[:, :, coff:coff + cin, :].reshape(9 * cin, cout))
        coff += cin
    x2d = slabs[0] if len(slabs) == 1 else jnp.concatenate(slabs, axis=-1)
    w2d = w_slabs[0] if len(w_slabs) == 1 else jnp.concatenate(w_slabs, axis=0)
    res2d = None if res is None else res.reshape(m, cout)
    y = fused_conv_bn(x2d, w2d, res2d=res2d, relu=relu)
    return y.reshape(b, ho, wo, cout)


def conv1x1_bn(x, w, stride=1, relu=False):
    """Conv2d(1x1, stride, bias=False) + BN (ResNet downsample path)."""
    if stride > 1:
        x = x[:, ::stride, ::stride, :]
    b, h, wdt, cin = x.shape
    cout = w.shape[-1]
    m = b * h * wdt
    y = fused_conv_bn(x.reshape(m, cin), w, relu=relu)
    return y.reshape(b, h, wdt, cout)


def maxpool3x3_s2(x):
    """ReplicationPad2d(1) + MaxPool2d(kernel_size=3, stride=2)."""
    b, h, w, c = x.shape
    xp = _replication_pad1(x)
    ho = (h + 2 - 3) // 2 + 1
    wo = (w + 2 - 3) // 2 + 1
    m = b * ho * wo
    taps = [t.reshape(m, c) for t in _extract_3x3_patches(xp, 2, ho, wo)]
    out = pl.pallas_call(
        _maxpool9_kernel,
        out_shape=jax.ShapeDtypeStruct((m, c), x.dtype),
    )(*taps)
    return out.reshape(b, ho, wo, c)


# ---------------------------------------------------------------------------
# Model blocks
# ---------------------------------------------------------------------------
def basic_block(x, p, stride=1, has_downsample=False):
    out = conv3x3_bn([x], p["conv1"], stride=stride, relu=True)
    if has_downsample:
        identity = conv1x1_bn(x, p["ds"], stride=stride, relu=False)
    else:
        identity = x
    # conv2 -> bn2 -> (+identity) -> relu, fused in one Pallas kernel
    return conv3x3_bn([out], p["conv2"], stride=1, relu=True, res=identity)


def decoder_block(xs, w):
    # conv(+BN+ReLU) over the implicit concat of xs, then nearest 2x upsample
    return upsample2x(conv3x3_bn(xs, w, stride=1, relu=True))


def resunet_forward(x_nchw, params):
    x = jnp.transpose(x_nchw, (0, 2, 3, 1))          # -> NHWC

    # ---- encoder (ResNet BasicBlock, layers=[1,1,1], mode=0) ----
    e1 = conv3x3_bn([x], params["layer0"], stride=2, relu=True)              # d1
    d2 = maxpool3x3_s2(e1)                                                   # d2
    e2 = basic_block(d2, params["layer1_0"], stride=1)                       # d3
    e3 = basic_block(e2, params["layer2_0"], stride=2, has_downsample=True)  # d4
    e4 = basic_block(e3, params["layer3_0"], stride=2, has_downsample=True)  # d5

    # ---- decoder (skip "concat" realised as extra K-slab groups) ----
    center = decoder_block([e4], params["center"])
    d2o = decoder_block([center, e3], params["decoder1"])
    d3o = decoder_block([d2o, e2], params["decoder2"])
    d4o = decoder_block([d3o, e1], params["decoder3"])

    return jnp.transpose(d4o, (0, 3, 1, 2)).astype(jnp.float32)   # -> NCHW f32


# ---------------------------------------------------------------------------
# Deterministic parameter init (matches module init recipe, layer=[1,1,1])
# ---------------------------------------------------------------------------
def make_params(key, in_channel=4):
    keys = iter(jax.random.split(key, 16))

    def conv3(cin, cout):
        std = math.sqrt(2.0 / (3 * 3 * cout))
        return jax.random.normal(next(keys), (3, 3, cin, cout), jnp.float32) * std

    def conv1(cin, cout):
        std = math.sqrt(2.0 / (1 * 1 * cout))
        return jax.random.normal(next(keys), (cin, cout), jnp.float32) * std

    return {
        "layer0": conv3(in_channel, 64),
        "layer1_0": {"conv1": conv3(64, 64), "conv2": conv3(64, 64)},
        "layer2_0": {"conv1": conv3(64, 128), "conv2": conv3(128, 128),
                     "ds": conv1(64, 128)},
        "layer3_0": {"conv1": conv3(128, 256), "conv2": conv3(256, 256),
                     "ds": conv1(128, 256)},
        "center": conv3(256, 256),           # DecoderBlock(256 -> 256)
        "decoder1": conv3(256 + 128, 128),
        "decoder2": conv3(128 + 64, 64),
        "decoder3": conv3(64 + 64, 128),     # out = filters[0] * 2
    }


if __name__ == "__main__":
    key = jax.random.PRNGKey(0)
    kp, kx = jax.random.split(key)
    params = make_params(kp, in_channel=4)

    # PyTorch-style NCHW input: batch=2, in_channel=4, spatial 16x16
    x = jax.random.normal(kx, (2, 4, 16, 16), jnp.float32)

    fwd = jax.jit(lambda inp: resunet_forward(inp, params))
    out = fwd(x)
    jax.block_until_ready(out)

    assert out.shape == (2, 128, 16, 16), out.shape
    assert jnp.all(jnp.isfinite(out))
    print("KERNEL_OK")
</pallas_src>

<mosaic_0001>
module attributes {stable_mosaic.version = 11 : i64} {
  func.func @kernel(%arg0: memref<128x36xbf16, #tpu.memory_space<vmem>>, %arg1: memref<36x64xbf16, #tpu.memory_space<vmem>>, %arg2: memref<128x64xbf16, #tpu.memory_space<vmem>>) attributes {dimension_semantics = [], scalar_prefetch = 0 : i64, scratch_operands = 0 : i64, tpu.core_type = #tpu.core_type<tc>} {
    %c0 = arith.constant 0 : index
    %c0_0 = arith.constant 0 : index
    %0 = vector.load %arg0[%c0, %c0_0] : memref<128x36xbf16, #tpu.memory_space<vmem>>, vector<128x36xbf16>
    %c0_1 = arith.constant 0 : index
    %c0_2 = arith.constant 0 : index
    %1 = vector.load %arg1[%c0_1, %c0_2] : memref<36x64xbf16, #tpu.memory_space<vmem>>, vector<36x64xbf16>
    %cst = arith.constant dense<0.000000e+00> : vector<128x64xf32>
    %2 = tpu.matmul %0, %1, %cst {dimension_numbers = #tpu.dot_dimension_numbers<[1], [0], [0], [1], [0, 0, 1, 1], [], []>} : vector<128x36xbf16>, vector<36x64xbf16>, vector<128x64xf32> -> vector<128x64xf32>
    %cst_3 = arith.constant dense<0.000000e+00> : vector<64xf32>
    %3 = vector.multi_reduction <add>, %2, %cst_3 [0] : vector<128x64xf32> to vector<64xf32>
    %4 = vector.shape_cast %3 : vector<64xf32> to vector<1x64xf32>
    %cst_4 = arith.constant 7.812500e-03 : f32
    %5 = vector.broadcast %cst_4 : f32 to vector<1x64xf32>
    %6 = arith.mulf %4, %5 : vector<1x64xf32>
    %7 = arith.mulf %2, %2 : vector<128x64xf32>
    %cst_5 = arith.constant dense<0.000000e+00> : vector<64xf32>
    %8 = vector.multi_reduction <add>, %7, %cst_5 [0] : vector<128x64xf32> to vector<64xf32>
    %9 = vector.shape_cast %8 : vector<64xf32> to vector<1x64xf32>
    %cst_6 = arith.constant 7.812500e-03 : f32
    %10 = vector.broadcast %cst_6 : f32 to vector<1x64xf32>
    %11 = arith.mulf %9, %10 : vector<1x64xf32>
    %12 = arith.mulf %6, %6 : vector<1x64xf32>
    %13 = arith.subf %11, %12 : vector<1x64xf32>
    %cst_7 = arith.constant 0.000000e+00 : f32
    %14 = vector.broadcast %cst_7 : f32 to vector<1x64xf32>
    %15 = arith.maximumf %13, %14 : vector<1x64xf32>
    %16 = vector.broadcast %6 : vector<1x64xf32> to vector<128x64xf32>
    %17 = arith.subf %2, %16 : vector<128x64xf32>
    %cst_8 = arith.constant 9.99999974E-6 : f32
    %18 = vector.broadcast %cst_8 : f32 to vector<1x64xf32>
    %19 = arith.addf %15, %18 : vector<1x64xf32>
    %20 = math.rsqrt %19 : vector<1x64xf32>
    %21 = vector.broadcast %20 : vector<1x64xf32> to vector<128x64xf32>
    %22 = arith.mulf %17, %21 : vector<128x64xf32>
    %cst_9 = arith.constant 0.000000e+00 : f32
    %23 = vector.broadcast %cst_9 : f32 to vector<128x64xf32>
    %24 = arith.maximumf %22, %23 : vector<128x64xf32>
    %25 = arith.truncf %24 : vector<128x64xf32> to vector<128x64xbf16>
    %c0_10 = arith.constant 0 : index
    %c0_11 = arith.constant 0 : index
    %26 = vector.load %arg2[%c0_10, %c0_11] : memref<128x64xbf16, #tpu.memory_space<vmem>>, vector<128x64xbf16>
    tpu.vector_store %arg2[%c0_10, %c0_11], %25 {strides = array<i32>} : memref<128x64xbf16, #tpu.memory_space<vmem>>, vector<128x64xbf16>,
    return
  }
}

module attributes {stable_mosaic.version = 11 : i64} {
  func.func @_maxpool9_kernel(%arg0: memref<32x64xbf16, #tpu.memory_space<vmem>>, %arg1: memref<32x64xbf16, #tpu.memory_space<vmem>>, %arg2: memref<32x64xbf16, #tpu.memory_space<vmem>>, %arg3: memref<32x64xbf16, #tpu.memory_space<vmem>>, %arg4: memref<32x64xbf16, #tpu.memory_space<vmem>>, %arg5: memref<32x64xbf16, #tpu.memory_space<vmem>>, %arg6: memref<32x64xbf16, #tpu.memory_space<vmem>>, %arg7: memref<32x64xbf16, #tpu.memory_space<vmem>>, %arg8: memref<32x64xbf16, #tpu.memory_space<vmem>>, %arg9: memref<32x64xbf16, #tpu.memory_space<vmem>>) attributes {dimension_semantics = [], scalar_prefetch = 0 : i64, scratch_operands = 0 : i64, tpu.core_type = #tpu.core_type<tc>} {
    %c0 = arith.constant 0 : index
    %c0_0 = arith.constant 0 : index
    %0 = vector.load %arg0[%c0, %c0_0] : memref<32x64xbf16, #tpu.memory_space<vmem>>, vector<32x64xbf16>
    %c0_1 = arith.constant 0 : index
    %c0_2 = arith.constant 0 : index
    %1 = vector.load %arg1[%c0_1, %c0_2] : memref<32x64xbf16, #tpu.memory_space<vmem>>, vector<32x64xbf16>
    %2 = arith.maximumf %0, %1 : vector<32x64xbf16>
    %c0_3 = arith.constant 0 : index
    %c0_4 = arith.constant 0 : index
    %3 = vector.load %arg2[%c0_3, %c0_4] : memref<32x64xbf16, #tpu.memory_space<vmem>>, vector<32x64xbf16>
    %4 = arith.maximumf %2, %3 : vector<32x64xbf16>
    %c0_5 = arith.constant 0 : index
    %c0_6 = arith.constant 0 : index
    %5 = vector.load %arg3[%c0_5, %c0_6] : memref<32x64xbf16, #tpu.memory_space<vmem>>, vector<32x64xbf16>
    %6 = arith.maximumf %4, %5 : vector<32x64xbf16>
    %c0_7 = arith.constant 0 : index
    %c0_8 = arith.constant 0 : index
    %7 = vector.load %arg4[%c0_7, %c0_8] : memref<32x64xbf16, #tpu.memory_space<vmem>>, vector<32x64xbf16>
    %8 = arith.maximumf %6, %7 : vector<32x64xbf16>
    %c0_9 = arith.constant 0 : index
    %c0_10 = arith.constant 0 : index
    %9 = vector.load %arg5[%c0_9, %c0_10] : memref<32x64xbf16, #tpu.memory_space<vmem>>, vector<32x64xbf16>
    %10 = arith.maximumf %8, %9 : vector<32x64xbf16>
    %c0_11 = arith.constant 0 : index
    %c0_12 = arith.constant 0 : index
    %11 = vector.load %arg6[%c0_11, %c0_12] : memref<32x64xbf16, #tpu.memory_space<vmem>>, vector<32x64xbf16>
    %12 = arith.maximumf %10, %11 : vector<32x64xbf16>
    %c0_13 = arith.constant 0 : index
    %c0_14 = arith.constant 0 : index
    %13 = vector.load %arg7[%c0_13, %c0_14] : memref<32x64xbf16, #tpu.memory_space<vmem>>, vector<32x64xbf16>
    %14 = arith.maximumf %12, %13 : vector<32x64xbf16>
    %c0_15 = arith.constant 0 : index
    %c0_16 = arith.constant 0 : index
    %15 = vector.load %arg8[%c0_15, %c0_16] : memref<32x64xbf16, #tpu.memory_space<vmem>>, vector<32x64xbf16>
    %16 = arith.maximumf %14, %15 : vector<32x64xbf16>
    %c0_17 = arith.constant 0 : index
    %c0_18 = arith.constant 0 : index
    %17 = vector.load %arg9[%c0_17, %c0_18] : memref<32x64xbf16, #tpu.memory_space<vmem>>, vector<32x64xbf16>
    tpu.vector_store %arg9[%c0_17, %c0_18], %16 {strides = array<i32>} : memref<32x64xbf16, #tpu.memory_space<vmem>>, vector<32x64xbf16>,
    return
  }
}

module attributes {stable_mosaic.version = 11 : i64} {
  func.func @kernel(%arg0: memref<32x576xbf16, #tpu.memory_space<vmem>>, %arg1: memref<576x64xbf16, #tpu.memory_space<vmem>>, %arg2: memref<32x64xbf16, #tpu.memory_space<vmem>>, %arg3: memref<32x64xbf16, #tpu.memory_space<vmem>>) attributes {dimension_semantics = [], scalar_prefetch = 0 : i64, scratch_operands = 0 : i64, tpu.core_type = #tpu.core_type<tc>} {
    %c0 = arith.constant 0 : index
    %c0_0 = arith.constant 0 : index
    %0 = vector.load %arg0[%c0, %c0_0] : memref<32x576xbf16, #tpu.memory_space<vmem>>, vector<32x576xbf16>
    %c0_1 = arith.constant 0 : index
    %c0_2 = arith.constant 0 : index
    %1 = vector.load %arg1[%c0_1, %c0_2] : memref<576x64xbf16, #tpu.memory_space<vmem>>, vector<576x64xbf16>
    %cst = arith.constant dense<0.000000e+00> : vector<32x64xf32>
    %2 = tpu.matmul %0, %1, %cst {dimension_numbers = #tpu.dot_dimension_numbers<[1], [0], [0], [1], [0, 0, 1, 1], [], []>} : vector<32x576xbf16>, vector<576x64xbf16>, vector<32x64xf32> -> vector<32x64xf32>
    %cst_3 = arith.constant dense<0.000000e+00> : vector<64xf32>
    %3 = vector.multi_reduction <add>, %2, %cst_3 [0] : vector<32x64xf32> to vector<64xf32>
    %4 = vector.shape_cast %3 : vector<64xf32> to vector<1x64xf32>
    %cst_4 = arith.constant 3.125000e-02 : f32
    %5 = vector.broadcast %cst_4 : f32 to vector<1x64xf32>
    %6 = arith.mulf %4, %5 : vector<1x64xf32>
    %7 = arith.mulf %2, %2 : vector<32x64xf32>
    %cst_5 = arith.constant dense<0.000000e+00> : vector<64xf32>
    %8 = vector.multi_reduction <add>, %7, %cst_5 [0] : vector<32x64xf32> to vector<64xf32>
    %9 = vector.shape_cast %8 : vector<64xf32> to vector<1x64xf32>
    %cst_6 = arith.constant 3.125000e-02 : f32
    %10 = vector.broadcast %cst_6 : f32 to vector<1x64xf32>
    %11 = arith.mulf %9, %10 : vector<1x64xf32>
    %12 = arith.mulf %6, %6 : vector<1x64xf32>
    %13 = arith.subf %11, %12 : vector<1x64xf32>
    %cst_7 = arith.constant 0.000000e+00 : f32
    %14 = vector.broadcast %cst_7 : f32 to vector<1x64xf32>
    %15 = arith.maximumf %13, %14 : vector<1x64xf32>
    %16 = vector.broadcast %6 : vector<1x64xf32> to vector<32x64xf32>
    %17 = arith.subf %2, %16 : vector<32x64xf32>
    %cst_8 = arith.constant 9.99999974E-6 : f32
    %18 = vector.broadcast %cst_8 : f32 to vector<1x64xf32>
    %19 = arith.addf %15, %18 : vector<1x64xf32>
    %20 = math.rsqrt %19 : vector<1x64xf32>
    %21 = vector.broadcast %20 : vector<1x64xf32> to vector<32x64xf32>
    %22 = arith.mulf %17, %21 : vector<32x64xf32>
    %c0_9 = arith.constant 0 : index
    %c0_10 = arith.constant 0 : index
    %23 = vector.load %arg2[%c0_9, %c0_10] : memref<32x64xbf16, #tpu.memory_space<vmem>>, vector<32x64xbf16>
    %24 = arith.extf %23 : vector<32x64xbf16> to vector<32x64xf32>
    %25 = arith.addf %22, %24 : vector<32x64xf32>
    %cst_11 = arith.constant 0.000000e+00 : f32
    %26 = vector.broadcast %cst_11 : f32 to vector<32x64xf32>
    %27 = arith.maximumf %25, %26 : vector<32x64xf32>
    %28 = arith.truncf %27 : vector<32x64xf32> to vector<32x64xbf16>
    %c0_12 = arith.constant 0 : index
    %c0_13 = arith.constant 0 : index
    %29 = vector.load %arg3[%c0_12, %c0_13] : memref<32x64xbf16, #tpu.memory_space<vmem>>, vector<32x64xbf16>
    tpu.vector_store %arg3[%c0_12, %c0_13], %28 {strides = array<i32>} : memref<32x64xbf16, #tpu.memory_space<vmem>>, vector<32x64xbf16>,
    return
  }
}

module attributes {stable_mosaic.version = 11 : i64} {
  func.func @kernel(%arg0: memref<32x576xbf16, #tpu.memory_space<vmem>>, %arg1: memref<576x64xbf16, #tpu.memory_space<vmem>>, %arg2: memref<32x64xbf16, #tpu.memory_space<vmem>>) attributes {dimension_semantics = [], scalar_prefetch = 0 : i64, scratch_operands = 0 : i64, tpu.core_type = #tpu.core_type<tc>} {
    %c0 = arith.constant 0 : index
    %c0_0 = arith.constant 0 : index
    %0 = vector.load %arg0[%c0, %c0_0] : memref<32x576xbf16, #tpu.memory_space<vmem>>, vector<32x576xbf16>
    %c0_1 = arith.constant 0 : index
    %c0_2 = arith.constant 0 : index
    %1 = vector.load %arg1[%c0_1, %c0_2] : memref<576x64xbf16, #tpu.memory_space<vmem>>, vector<576x64xbf16>
    %cst = arith.constant dense<0.000000e+00> : vector<32x64xf32>
    %2 = tpu.matmul %0, %1, %cst {dimension_numbers = #tpu.dot_dimension_numbers<[1], [0], [0], [1], [0, 0, 1, 1], [], []>} : vector<32x576xbf16>, vector<576x64xbf16>, vector<32x64xf32> -> vector<32x64xf32>
    %cst_3 = arith.constant dense<0.000000e+00> : vector<64xf32>
    %3 = vector.multi_reduction <add>, %2, %cst_3 [0] : vector<32x64xf32> to vector<64xf32>
    %4 = vector.shape_cast %3 : vector<64xf32> to vector<1x64xf32>
    %cst_4 = arith.constant 3.125000e-02 : f32
    %5 = vector.broadcast %cst_4 : f32 to vector<1x64xf32>
    %6 = arith.mulf %4, %5 : vector<1x64xf32>
    %7 = arith.mulf %2, %2 : vector<32x64xf32>
    %cst_5 = arith.constant dense<0.000000e+00> : vector<64xf32>
    %8 = vector.multi_reduction <add>, %7, %cst_5 [0] : vector<32x64xf32> to vector<64xf32>
    %9 = vector.shape_cast %8 : vector<64xf32> to vector<1x64xf32>
    %cst_6 = arith.constant 3.125000e-02 : f32
    %10 = vector.broadcast %cst_6 : f32 to vector<1x64xf32>
    %11 = arith.mulf %9, %10 : vector<1x64xf32>
    %12 = arith.mulf %6, %6 : vector<1x64xf32>
    %13 = arith.subf %11, %12 : vector<1x64xf32>
    %cst_7 = arith.constant 0.000000e+00 : f32
    %14 = vector.broadcast %cst_7 : f32 to vector<1x64xf32>
    %15 = arith.maximumf %13, %14 : vector<1x64xf32>
    %16 = vector.broadcast %6 : vector<1x64xf32> to vector<32x64xf32>
    %17 = arith.subf %2, %16 : vector<32x64xf32>
    %cst_8 = arith.constant 9.99999974E-6 : f32
    %18 = vector.broadcast %cst_8 : f32 to vector<1x64xf32>
    %19 = arith.addf %15, %18 : vector<1x64xf32>
    %20 = math.rsqrt %19 : vector<1x64xf32>
    %21 = vector.broadcast %20 : vector<1x64xf32> to vector<32x64xf32>
    %22 = arith.mulf %17, %21 : vector<32x64xf32>
    %cst_9 = arith.constant 0.000000e+00 : f32
    %23 = vector.broadcast %cst_9 : f32 to vector<32x64xf32>
    %24 = arith.maximumf %22, %23 : vector<32x64xf32>
    %25 = arith.truncf %24 : vector<32x64xf32> to vector<32x64xbf16>
    %c0_10 = arith.constant 0 : index
    %c0_11 = arith.constant 0 : index
    %26 = vector.load %arg2[%c0_10, %c0_11] : memref<32x64xbf16, #tpu.memory_space<vmem>>, vector<32x64xbf16>
    tpu.vector_store %arg2[%c0_10, %c0_11], %25 {strides = array<i32>} : memref<32x64xbf16, #tpu.memory_space<vmem>>, vector<32x64xbf16>,
    return
  }
}

module attributes {stable_mosaic.version = 11 : i64} {
  func.func @kernel(%arg0: memref<8x576xbf16, #tpu.memory_space<vmem>>, %arg1: memref<576x128xbf16, #tpu.memory_space<vmem>>, %arg2: memref<8x128xbf16, #tpu.memory_space<vmem>>) attributes {dimension_semantics = [], scalar_prefetch = 0 : i64, scratch_operands = 0 : i64, tpu.core_type = #tpu.core_type<tc>} {
    %c0 = arith.constant 0 : index
    %c0_0 = arith.constant 0 : index
    %0 = vector.load %arg0[%c0, %c0_0] : memref<8x576xbf16, #tpu.memory_space<vmem>>, vector<8x576xbf16>
    %c0_1 = arith.constant 0 : index
    %c0_2 = arith.constant 0 : index
    %1 = vector.load %arg1[%c0_1, %c0_2] : memref<576x128xbf16, #tpu.memory_space<vmem>>, vector<576x128xbf16>
    %cst = arith.constant dense<0.000000e+00> : vector<8x128xf32>
    %2 = tpu.matmul %0, %1, %cst {dimension_numbers = #tpu.dot_dimension_numbers<[1], [0], [0], [1], [0, 0, 1, 1], [], []>} : vector<8x576xbf16>, vector<576x128xbf16>, vector<8x128xf32> -> vector<8x128xf32>
    %cst_3 = arith.constant dense<0.000000e+00> : vector<128xf32>
    %3 = vector.multi_reduction <add>, %2, %cst_3 [0] : vector<8x128xf32> to vector<128xf32>
    %4 = vector.shape_cast %3 : vector<128xf32> to vector<1x128xf32>
    %cst_4 = arith.constant 1.250000e-01 : f32
    %5 = vector.broadcast %cst_4 : f32 to vector<1x128xf32>
    %6 = arith.mulf %4, %5 : vector<1x128xf32>
    %7 = arith.mulf %2, %2 : vector<8x128xf32>
    %cst_5 = arith.constant dense<0.000000e+00> : vector<128xf32>
    %8 = vector.multi_reduction <add>, %7, %cst_5 [0] : vector<8x128xf32> to vector<128xf32>
    %9 = vector.shape_cast %8 : vector<128xf32> to vector<1x128xf32>
    %cst_6 = arith.constant 1.250000e-01 : f32
    %10 = vector.broadcast %cst_6 : f32 to vector<1x128xf32>
    %11 = arith.mulf %9, %10 : vector<1x128xf32>
    %12 = arith.mulf %6, %6 : vector<1x128xf32>
    %13 = arith.subf %11, %12 : vector<1x128xf32>
    %cst_7 = arith.constant 0.000000e+00 : f32
    %14 = vector.broadcast %cst_7 : f32 to vector<1x128xf32>
    %15 = arith.maximumf %13, %14 : vector<1x128xf32>
    %16 = vector.broadcast %6 : vector<1x128xf32> to vector<8x128xf32>
    %17 = arith.subf %2, %16 : vector<8x128xf32>
    %cst_8 = arith.constant 9.99999974E-6 : f32
    %18 = vector.broadcast %cst_8 : f32 to vector<1x128xf32>
    %19 = arith.addf %15, %18 : vector<1x128xf32>
    %20 = math.rsqrt %19 : vector<1x128xf32>
    %21 = vector.broadcast %20 : vector<1x128xf32> to vector<8x128xf32>
    %22 = arith.mulf %17, %21 : vector<8x128xf32>
    %cst_9 = arith.constant 0.000000e+00 : f32
    %23 = vector.broadcast %cst_9 : f32 to vector<8x128xf32>
    %24 = arith.maximumf %22, %23 : vector<8x128xf32>
    %25 = arith.truncf %24 : vector<8x128xf32> to vector<8x128xbf16>
    %c0_10 = arith.constant 0 : index
    %c0_11 = arith.constant 0 : index
    %26 = vector.load %arg2[%c0_10, %c0_11] : memref<8x128xbf16, #tpu.memory_space<vmem>>, vector<8x128xbf16>
    tpu.vector_store %arg2[%c0_10, %c0_11], %25 {strides = array<i32>} : memref<8x128xbf16, #tpu.memory_space<vmem>>, vector<8x128xbf16>,
    return
  }
}

module attributes {stable_mosaic.version = 11 : i64} {
  func.func @kernel(%arg0: memref<8x1152xbf16, #tpu.memory_space<vmem>>, %arg1: memref<1152x128xbf16, #tpu.memory_space<vmem>>, %arg2: memref<8x128xbf16, #tpu.memory_space<vmem>>, %arg3: memref<8x128xbf16, #tpu.memory_space<vmem>>) attributes {dimension_semantics = [], scalar_prefetch = 0 : i64, scratch_operands = 0 : i64, tpu.core_type = #tpu.core_type<tc>} {
    %c0 = arith.constant 0 : index
    %c0_0 = arith.constant 0 : index
    %0 = vector.load %arg0[%c0, %c0_0] : memref<8x1152xbf16, #tpu.memory_space<vmem>>, vector<8x1152xbf16>
    %c0_1 = arith.constant 0 : index
    %c0_2 = arith.constant 0 : index
    %1 = vector.load %arg1[%c0_1, %c0_2] : memref<1152x128xbf16, #tpu.memory_space<vmem>>, vector<1152x128xbf16>
    %cst = arith.constant dense<0.000000e+00> : vector<8x128xf32>
    %2 = tpu.matmul %0, %1, %cst {dimension_numbers = #tpu.dot_dimension_numbers<[1], [0], [0], [1], [0, 0, 1, 1], [], []>} : vector<8x1152xbf16>, vector<1152x128xbf16>, vector<8x128xf32> -> vector<8x128xf32>
    %cst_3 = arith.constant dense<0.000000e+00> : vector<128xf32>
    %3 = vector.multi_reduction <add>, %2, %cst_3 [0] : vector<8x128xf32> to vector<128xf32>
    %4 = vector.shape_cast %3 : vector<128xf32> to vector<1x128xf32>
    %cst_4 = arith.constant 1.250000e-01 : f32
    %5 = vector.broadcast %cst_4 : f32 to vector<1x128xf32>
    %6 = arith.mulf %4, %5 : vector<1x128xf32>
    %7 = arith.mulf %2, %2 : vector<8x128xf32>
    %cst_5 = arith.constant dense<0.000000e+00> : vector<128xf32>
    %8 = vector.multi_reduction <add>, %7, %cst_5 [0] : vector<8x128xf32> to vector<128xf32>
    %9 = vector.shape_cast %8 : vector<128xf32> to vector<1x128xf32>
    %cst_6 = arith.constant 1.250000e-01 : f32
    %10 = vector.broadcast %cst_6 : f32 to vector<1x128xf32>
    %11 = arith.mulf %9, %10 : vector<1x128xf32>
    %12 = arith.mulf %6, %6 : vector<1x128xf32>
    %13 = arith.subf %11, %12 : vector<1x128xf32>
    %cst_7 = arith.constant 0.000000e+00 : f32
    %14 = vector.broadcast %cst_7 : f32 to vector<1x128xf32>
    %15 = arith.maximumf %13, %14 : vector<1x128xf32>
    %16 = vector.broadcast %6 : vector<1x128xf32> to vector<8x128xf32>
    %17 = arith.subf %2, %16 : vector<8x128xf32>
    %cst_8 = arith.constant 9.99999974E-6 : f32
    %18 = vector.broadcast %cst_8 : f32 to vector<1x128xf32>
    %19 = arith.addf %15, %18 : vector<1x128xf32>
    %20 = math.rsqrt %19 : vector<1x128xf32>
    %21 = vector.broadcast %20 : vector<1x128xf32> to vector<8x128xf32>
    %22 = arith.mulf %17, %21 : vector<8x128xf32>
    %c0_9 = arith.constant 0 : index
    %c0_10 = arith.constant 0 : index
    %23 = vector.load %arg2[%c0_9, %c0_10] : memref<8x128xbf16, #tpu.memory_space<vmem>>, vector<8x128xbf16>
    %24 = arith.extf %23 : vector<8x128xbf16> to vector<8x128xf32>
    %25 = arith.addf %22, %24 : vector<8x128xf32>
    %cst_11 = arith.constant 0.000000e+00 : f32
    %26 = vector.broadcast %cst_11 : f32 to vector<8x128xf32>
    %27 = arith.maximumf %25, %26 : vector<8x128xf32>
    %28 = arith.truncf %27 : vector<8x128xf32> to vector<8x128xbf16>
    %c0_12 = arith.constant 0 : index
    %c0_13 = arith.constant 0 : index
    %29 = vector.load %arg3[%c0_12, %c0_13] : memref<8x128xbf16, #tpu.memory_space<vmem>>, vector<8x128xbf16>
    tpu.vector_store %arg3[%c0_12, %c0_13], %28 {strides = array<i32>} : memref<8x128xbf16, #tpu.memory_space<vmem>>, vector<8x128xbf16>,
    return
  }
}

module attributes {stable_mosaic.version = 11 : i64} {
  func.func @kernel(%arg0: memref<8x64xbf16, #tpu.memory_space<vmem>>, %arg1: memref<64x128xbf16, #tpu.memory_space<vmem>>, %arg2: memref<8x128xbf16, #tpu.memory_space<vmem>>) attributes {dimension_semantics = [], scalar_prefetch = 0 : i64, scratch_operands = 0 : i64, tpu.core_type = #tpu.core_type<tc>} {
    %c0 = arith.constant 0 : index
    %c0_0 = arith.constant 0 : index
    %0 = vector.load %arg0[%c0, %c0_0] : memref<8x64xbf16, #tpu.memory_space<vmem>>, vector<8x64xbf16>
    %c0_1 = arith.constant 0 : index
    %c0_2 = arith.constant 0 : index
    %1 = vector.load %arg1[%c0_1, %c0_2] : memref<64x128xbf16, #tpu.memory_space<vmem>>, vector<64x128xbf16>
    %cst = arith.constant dense<0.000000e+00> : vector<8x128xf32>
    %2 = tpu.matmul %0, %1, %cst {dimension_numbers = #tpu.dot_dimension_numbers<[1], [0], [0], [1], [0, 0, 1, 1], [], []>} : vector<8x64xbf16>, vector<64x128xbf16>, vector<8x128xf32> -> vector<8x128xf32>
    %cst_3 = arith.constant dense<0.000000e+00> : vector<128xf32>
    %3 = vector.multi_reduction <add>, %2, %cst_3 [0] : vector<8x128xf32> to vector<128xf32>
    %4 = vector.shape_cast %3 : vector<128xf32> to vector<1x128xf32>
    %cst_4 = arith.constant 1.250000e-01 : f32
    %5 = vector.broadcast %cst_4 : f32 to vector<1x128xf32>
    %6 = arith.mulf %4, %5 : vector<1x128xf32>
    %7 = arith.mulf %2, %2 : vector<8x128xf32>
    %cst_5 = arith.constant dense<0.000000e+00> : vector<128xf32>
    %8 = vector.multi_reduction <add>, %7, %cst_5 [0] : vector<8x128xf32> to vector<128xf32>
    %9 = vector.shape_cast %8 : vector<128xf32> to vector<1x128xf32>
    %cst_6 = arith.constant 1.250000e-01 : f32
    %10 = vector.broadcast %cst_6 : f32 to vector<1x128xf32>
    %11 = arith.mulf %9, %10 : vector<1x128xf32>
    %12 = arith.mulf %6, %6 : vector<1x128xf32>
    %13 = arith.subf %11, %12 : vector<1x128xf32>
    %cst_7 = arith.constant 0.000000e+00 : f32
    %14 = vector.broadcast %cst_7 : f32 to vector<1x128xf32>
    %15 = arith.maximumf %13, %14 : vector<1x128xf32>
    %16 = vector.broadcast %6 : vector<1x128xf32> to vector<8x128xf32>
    %17 = arith.subf %2, %16 : vector<8x128xf32>
    %cst_8 = arith.constant 9.99999974E-6 : f32
    %18 = vector.broadcast %cst_8 : f32 to vector<1x128xf32>
    %19 = arith.addf %15, %18 : vector<1x128xf32>
    %20 = math.rsqrt %19 : vector<1x128xf32>
    %21 = vector.broadcast %20 : vector<1x128xf32> to vector<8x128xf32>
    %22 = arith.mulf %17, %21 : vector<8x128xf32>
    %23 = arith.truncf %22 : vector<8x128xf32> to vector<8x128xbf16>
    %c0_9 = arith.constant 0 : index
    %c0_10 = arith.constant 0 : index
    %24 = vector.load %arg2[%c0_9, %c0_10] : memref<8x128xbf16, #tpu.memory_space<vmem>>, vector<8x128xbf16>
    tpu.vector_store %arg2[%c0_9, %c0_10], %23 {strides = array<i32>} : memref<8x128xbf16, #tpu.memory_space<vmem>>, vector<8x128xbf16>,
    return
  }
}

module attributes {stable_mosaic.version = 11 : i64} {
  func.func @kernel(%arg0: memref<2x1152xbf16, #tpu.memory_space<vmem>>, %arg1: memref<1152x256xbf16, #tpu.memory_space<vmem>>, %arg2: memref<2x256xbf16, #tpu.memory_space<vmem>>) attributes {dimension_semantics = [], scalar_prefetch = 0 : i64, scratch_operands = 0 : i64, tpu.core_type = #tpu.core_type<tc>} {
    %c0 = arith.constant 0 : index
    %c0_0 = arith.constant 0 : index
    %0 = vector.load %arg0[%c0, %c0_0] : memref<2x1152xbf16, #tpu.memory_space<vmem>>, vector<2x1152xbf16>
    %c0_1 = arith.constant 0 : index
    %c0_2 = arith.constant 0 : index
    %1 = vector.load %arg1[%c0_1, %c0_2] : memref<1152x256xbf16, #tpu.memory_space<vmem>>, vector<1152x256xbf16>
    %cst = arith.constant dense<0.000000e+00> : vector<2x256xf32>
    %2 = tpu.matmul %0, %1, %cst {dimension_numbers = #tpu.dot_dimension_numbers<[1], [0], [0], [1], [0, 0, 1, 1], [], []>} : vector<2x1152xbf16>, vector<1152x256xbf16>, vector<2x256xf32> -> vector<2x256xf32>
    %cst_3 = arith.constant dense<0.000000e+00> : vector<256xf32>
    %3 = vector.multi_reduction <add>, %2, %cst_3 [0] : vector<2x256xf32> to vector<256xf32>
    %4 = vector.shape_cast %3 : vector<256xf32> to vector<1x256xf32>
    %cst_4 = arith.constant 5.000000e-01 : f32
    %5 = vector.broadcast %cst_4 : f32 to vector<1x256xf32>
    %6 = arith.mulf %4, %5 : vector<1x256xf32>
    %7 = arith.mulf %2, %2 : vector<2x256xf32>
    %cst_5 = arith.constant dense<0.000000e+00> : vector<256xf32>
    %8 = vector.multi_reduction <add>, %7, %cst_5 [0] : vector<2x256xf32> to vector<256xf32>
    %9 = vector.shape_cast %8 : vector<256xf32> to vector<1x256xf32>
    %cst_6 = arith.constant 5.000000e-01 : f32
    %10 = vector.broadcast %cst_6 : f32 to vector<1x256xf32>
    %11 = arith.mulf %9, %10 : vector<1x256xf32>
    %12 = arith.mulf %6, %6 : vector<1x256xf32>
    %13 = arith.subf %11, %12 : vector<1x256xf32>
    %cst_7 = arith.constant 0.000000e+00 : f32
    %14 = vector.broadcast %cst_7 : f32 to vector<1x256xf32>
    %15 = arith.maximumf %13, %14 : vector<1x256xf32>
    %16 = vector.broadcast %6 : vector<1x256xf32> to vector<2x256xf32>
    %17 = arith.subf %2, %16 : vector<2x256xf32>
    %cst_8 = arith.constant 9.99999974E-6 : f32
    %18 = vector.broadcast %cst_8 : f32 to vector<1x256xf32>
    %19 = arith.addf %15, %18 : vector<1x256xf32>
    %20 = math.rsqrt %19 : vector<1x256xf32>
    %21 = vector.broadcast %20 : vector<1x256xf32> to vector<2x256xf32>
    %22 = arith.mulf %17, %21 : vector<2x256xf32>
    %cst_9 = arith.constant 0.000000e+00 : f32
    %23 = vector.broadcast %cst_9 : f32 to vector<2x256xf32>
    %24 = arith.maximumf %22, %23 : vector<2x256xf32>
    %25 = arith.truncf %24 : vector<2x256xf32> to vector<2x256xbf16>
    %c0_10 = arith.constant 0 : index
    %c0_11 = arith.constant 0 : index
    %26 = vector.load %arg2[%c0_10, %c0_11] : memref<2x256xbf16, #tpu.memory_space<vmem>>, vector<2x256xbf16>
    tpu.vector_store %arg2[%c0_10, %c0_11], %25 {strides = array<i32>} : memref<2x256xbf16, #tpu.memory_space<vmem>>, vector<2x256xbf16>,
    return
  }
}

module attributes {stable_mosaic.version = 11 : i64} {
  func.func @kernel(%arg0: memref<2x128xbf16, #tpu.memory_space<vmem>>, %arg1: memref<128x256xbf16, #tpu.memory_space<vmem>>, %arg2: memref<2x256xbf16, #tpu.memory_space<vmem>>) attributes {dimension_semantics = [], scalar_prefetch = 0 : i64, scratch_operands = 0 : i64, tpu.core_type = #tpu.core_type<tc>} {
    %c0 = arith.constant 0 : index
    %c0_0 = arith.constant 0 : index
    %0 = vector.load %arg0[%c0, %c0_0] : memref<2x128xbf16, #tpu.memory_space<vmem>>, vector<2x128xbf16>
    %c0_1 = arith.constant 0 : index
    %c0_2 = arith.constant 0 : index
    %1 = vector.load %arg1[%c0_1, %c0_2] : memref<128x256xbf16, #tpu.memory_space<vmem>>, vector<128x256xbf16>
    %cst = arith.constant dense<0.000000e+00> : vector<2x256xf32>
    %2 = tpu.matmul %0, %1, %cst {dimension_numbers = #tpu.dot_dimension_numbers<[1], [0], [0], [1], [0, 0, 1, 1], [], []>} : vector<2x128xbf16>, vector<128x256xbf16>, vector<2x256xf32> -> vector<2x256xf32>
    %cst_3 = arith.constant dense<0.000000e+00> : vector<256xf32>
    %3 = vector.multi_reduction <add>, %2, %cst_3 [0] : vector<2x256xf32> to vector<256xf32>
    %4 = vector.shape_cast %3 : vector<256xf32> to vector<1x256xf32>
    %cst_4 = arith.constant 5.000000e-01 : f32
    %5 = vector.broadcast %cst_4 : f32 to vector<1x256xf32>
    %6 = arith.mulf %4, %5 : vector<1x256xf32>
    %7 = arith.mulf %2, %2 : vector<2x256xf32>
    %cst_5 = arith.constant dense<0.000000e+00> : vector<256xf32>
    %8 = vector.multi_reduction <add>, %7, %cst_5 [0] : vector<2x256xf32> to vector<256xf32>
    %9 = vector.shape_cast %8 : vector<256xf32> to vector<1x256xf32>
    %cst_6 = arith.constant 5.000000e-01 : f32
    %10 = vector.broadcast %cst_6 : f32 to vector<1x256xf32>
    %11 = arith.mulf %9, %10 : vector<1x256xf32>
    %12 = arith.mulf %6, %6 : vector<1x256xf32>
    %13 = arith.subf %11, %12 : vector<1x256xf32>
    %cst_7 = arith.constant 0.000000e+00 : f32
    %14 = vector.broadcast %cst_7 : f32 to vector<1x256xf32>
    %15 = arith.maximumf %13, %14 : vector<1x256xf32>
    %16 = vector.broadcast %6 : vector<1x256xf32> to vector<2x256xf32>
    %17 = arith.subf %2, %16 : vector<2x256xf32>
    %cst_8 = arith.constant 9.99999974E-6 : f32
    %18 = vector.broadcast %cst_8 : f32 to vector<1x256xf32>
    %19 = arith.addf %15, %18 : vector<1x256xf32>
    %20 = math.rsqrt %19 : vector<1x256xf32>
    %21 = vector.broadcast %20 : vector<1x256xf32> to vector<2x256xf32>
    %22 = arith.mulf %17, %21 : vector<2x256xf32>
    %23 = arith.truncf %22 : vector<2x256xf32> to vector<2x256xbf16>
    %c0_9 = arith.constant 0 : index
    %c0_10 = arith.constant 0 : index
    %24 = vector.load %arg2[%c0_9, %c0_10] : memref<2x256xbf16, #tpu.memory_space<vmem>>, vector<2x256xbf16>
    tpu.vector_store %arg2[%c0_9, %c0_10], %23 {strides = array<i32>} : memref<2x256xbf16, #tpu.memory_space<vmem>>, vector<2x256xbf16>,
    return
  }
}

module attributes {stable_mosaic.version = 11 : i64} {
  func.func @kernel(%arg0: memref<2x2304xbf16, #tpu.memory_space<vmem>>, %arg1: memref<2304x256xbf16, #tpu.memory_space<vmem>>, %arg2: memref<2x256xbf16, #tpu.memory_space<vmem>>, %arg3: memref<2x256xbf16, #tpu.memory_space<vmem>>) attributes {dimension_semantics = [], scalar_prefetch = 0 : i64, scratch_operands = 0 : i64, tpu.core_type = #tpu.core_type<tc>} {
    %c0 = arith.constant 0 : index
    %c0_0 = arith.constant 0 : index
    %0 = vector.load %arg0[%c0, %c0_0] : memref<2x2304xbf16, #tpu.memory_space<vmem>>, vector<2x2304xbf16>
    %c0_1 = arith.constant 0 : index
    %c0_2 = arith.constant 0 : index
    %1 = vector.load %arg1[%c0_1, %c0_2] : memref<2304x256xbf16, #tpu.memory_space<vmem>>, vector<2304x256xbf16>
    %cst = arith.constant dense<0.000000e+00> : vector<2x256xf32>
    %2 = tpu.matmul %0, %1, %cst {dimension_numbers = #tpu.dot_dimension_numbers<[1], [0], [0], [1], [0, 0, 1, 1], [], []>} : vector<2x2304xbf16>, vector<2304x256xbf16>, vector<2x256xf32> -> vector<2x256xf32>
    %cst_3 = arith.constant dense<0.000000e+00> : vector<256xf32>
    %3 = vector.multi_reduction <add>, %2, %cst_3 [0] : vector<2x256xf32> to vector<256xf32>
    %4 = vector.shape_cast %3 : vector<256xf32> to vector<1x256xf32>
    %cst_4 = arith.constant 5.000000e-01 : f32
    %5 = vector.broadcast %cst_4 : f32 to vector<1x256xf32>
    %6 = arith.mulf %4, %5 : vector<1x256xf32>
    %7 = arith.mulf %2, %2 : vector<2x256xf32>
    %cst_5 = arith.constant dense<0.000000e+00> : vector<256xf32>
    %8 = vector.multi_reduction <add>, %7, %cst_5 [0] : vector<2x256xf32> to vector<256xf32>
    %9 = vector.shape_cast %8 : vector<256xf32> to vector<1x256xf32>
    %cst_6 = arith.constant 5.000000e-01 : f32
    %10 = vector.broadcast %cst_6 : f32 to vector<1x256xf32>
    %11 = arith.mulf %9, %10 : vector<1x256xf32>
    %12 = arith.mulf %6, %6 : vector<1x256xf32>
    %13 = arith.subf %11, %12 : vector<1x256xf32>
    %cst_7 = arith.constant 0.000000e+00 : f32
    %14 = vector.broadcast %cst_7 : f32 to vector<1x256xf32>
    %15 = arith.maximumf %13, %14 : vector<1x256xf32>
    %16 = vector.broadcast %6 : vector<1x256xf32> to vector<2x256xf32>
    %17 = arith.subf %2, %16 : vector<2x256xf32>
    %cst_8 = arith.constant 9.99999974E-6 : f32
    %18 = vector.broadcast %cst_8 : f32 to vector<1x256xf32>
    %19 = arith.addf %15, %18 : vector<1x256xf32>
    %20 = math.rsqrt %19 : vector<1x256xf32>
    %21 = vector.broadcast %20 : vector<1x256xf32> to vector<2x256xf32>
    %22 = arith.mulf %17, %21 : vector<2x256xf32>
    %c0_9 = arith.constant 0 : index
    %c0_10 = arith.constant 0 : index
    %23 = vector.load %arg2[%c0_9, %c0_10] : memref<2x256xbf16, #tpu.memory_space<vmem>>, vector<2x256xbf16>
    %24 = arith.extf %23 : vector<2x256xbf16> to vector<2x256xf32>
    %25 = arith.addf %22, %24 : vector<2x256xf32>
    %cst_11 = arith.constant 0.000000e+00 : f32
    %26 = vector.broadcast %cst_11 : f32 to vector<2x256xf32>
    %27 = arith.maximumf %25, %26 : vector<2x256xf32>
    %28 = arith.truncf %27 : vector<2x256xf32> to vector<2x256xbf16>
    %c0_12 = arith.constant 0 : index
    %c0_13 = arith.constant 0 : index
    %29 = vector.load %arg3[%c0_12, %c0_13] : memref<2x256xbf16, #tpu.memory_space<vmem>>, vector<2x256xbf16>
    tpu.vector_store %arg3[%c0_12, %c0_13], %28 {strides = array<i32>} : memref<2x256xbf16, #tpu.memory_space<vmem>>, vector<2x256xbf16>,
    return
  }
}

module attributes {stable_mosaic.version = 11 : i64} {
  func.func @kernel(%arg0: memref<2x2304xbf16, #tpu.memory_space<vmem>>, %arg1: memref<2304x256xbf16, #tpu.memory_space<vmem>>, %arg2: memref<2x256xbf16, #tpu.memory_space<vmem>>) attributes {dimension_semantics = [], scalar_prefetch = 0 : i64, scratch_operands = 0 : i64, tpu.core_type = #tpu.core_type<tc>} {
    %c0 = arith.constant 0 : index
    %c0_0 = arith.constant 0 : index
    %0 = vector.load %arg0[%c0, %c0_0] : memref<2x2304xbf16, #tpu.memory_space<vmem>>, vector<2x2304xbf16>
    %c0_1 = arith.constant 0 : index
    %c0_2 = arith.constant 0 : index
    %1 = vector.load %arg1[%c0_1, %c0_2] : memref<2304x256xbf16, #tpu.memory_space<vmem>>, vector<2304x256xbf16>
    %cst = arith.constant dense<0.000000e+00> : vector<2x256xf32>
    %2 = tpu.matmul %0, %1, %cst {dimension_numbers = #tpu.dot_dimension_numbers<[1], [0], [0], [1], [0, 0, 1, 1], [], []>} : vector<2x2304xbf16>, vector<2304x256xbf16>, vector<2x256xf32> -> vector<2x256xf32>
    %cst_3 = arith.constant dense<0.000000e+00> : vector<256xf32>
    %3 = vector.multi_reduction <add>, %2, %cst_3 [0] : vector<2x256xf32> to vector<256xf32>
    %4 = vector.shape_cast %3 : vector<256xf32> to vector<1x256xf32>
    %cst_4 = arith.constant 5.000000e-01 : f32
    %5 = vector.broadcast %cst_4 : f32 to vector<1x256xf32>
    %6 = arith.mulf %4, %5 : vector<1x256xf32>
    %7 = arith.mulf %2, %2 : vector<2x256xf32>
    %cst_5 = arith.constant dense<0.000000e+00> : vector<256xf32>
    %8 = vector.multi_reduction <add>, %7, %cst_5 [0] : vector<2x256xf32> to vector<256xf32>
    %9 = vector.shape_cast %8 : vector<256xf32> to vector<1x256xf32>
    %cst_6 = arith.constant 5.000000e-01 : f32
    %10 = vector.broadcast %cst_6 : f32 to vector<1x256xf32>
    %11 = arith.mulf %9, %10 : vector<1x256xf32>
    %12 = arith.mulf %6, %6 : vector<1x256xf32>
    %13 = arith.subf %11, %12 : vector<1x256xf32>
    %cst_7 = arith.constant 0.000000e+00 : f32
    %14 = vector.broadcast %cst_7 : f32 to vector<1x256xf32>
    %15 = arith.maximumf %13, %14 : vector<1x256xf32>
    %16 = vector.broadcast %6 : vector<1x256xf32> to vector<2x256xf32>
    %17 = arith.subf %2, %16 : vector<2x256xf32>
    %cst_8 = arith.constant 9.99999974E-6 : f32
    %18 = vector.broadcast %cst_8 : f32 to vector<1x256xf32>
    %19 = arith.addf %15, %18 : vector<1x256xf32>
    %20 = math.rsqrt %19 : vector<1x256xf32>
    %21 = vector.broadcast %20 : vector<1x256xf32> to vector<2x256xf32>
    %22 = arith.mulf %17, %21 : vector<2x256xf32>
    %cst_9 = arith.constant 0.000000e+00 : f32
    %23 = vector.broadcast %cst_9 : f32 to vector<2x256xf32>
    %24 = arith.maximumf %22, %23 : vector<2x256xf32>
    %25 = arith.truncf %24 : vector<2x256xf32> to vector<2x256xbf16>
    %c0_10 = arith.constant 0 : index
    %c0_11 = arith.constant 0 : index
    %26 = vector.load %arg2[%c0_10, %c0_11] : memref<2x256xbf16, #tpu.memory_space<vmem>>, vector<2x256xbf16>
    tpu.vector_store %arg2[%c0_10, %c0_11], %25 {strides = array<i32>} : memref<2x256xbf16, #tpu.memory_space<vmem>>, vector<2x256xbf16>,
    return
  }
}

module attributes {stable_mosaic.version = 11 : i64} {
  func.func @kernel(%arg0: memref<8x3456xbf16, #tpu.memory_space<vmem>>, %arg1: memref<3456x128xbf16, #tpu.memory_space<vmem>>, %arg2: memref<8x128xbf16, #tpu.memory_space<vmem>>) attributes {dimension_semantics = [], scalar_prefetch = 0 : i64, scratch_operands = 0 : i64, tpu.core_type = #tpu.core_type<tc>} {
    %c0 = arith.constant 0 : index
    %c0_0 = arith.constant 0 : index
    %0 = vector.load %arg0[%c0, %c0_0] : memref<8x3456xbf16, #tpu.memory_space<vmem>>, vector<8x3456xbf16>
    %c0_1 = arith.constant 0 : index
    %c0_2 = arith.constant 0 : index
    %1 = vector.load %arg1[%c0_1, %c0_2] : memref<3456x128xbf16, #tpu.memory_space<vmem>>, vector<3456x128xbf16>
    %cst = arith.constant dense<0.000000e+00> : vector<8x128xf32>
    %2 = tpu.matmul %0, %1, %cst {dimension_numbers = #tpu.dot_dimension_numbers<[1], [0], [0], [1], [0, 0, 1, 1], [], []>} : vector<8x3456xbf16>, vector<3456x128xbf16>, vector<8x128xf32> -> vector<8x128xf32>
    %cst_3 = arith.constant dense<0.000000e+00> : vector<128xf32>
    %3 = vector.multi_reduction <add>, %2, %cst_3 [0] : vector<8x128xf32> to vector<128xf32>
    %4 = vector.shape_cast %3 : vector<128xf32> to vector<1x128xf32>
    %cst_4 = arith.constant 1.250000e-01 : f32
    %5 = vector.broadcast %cst_4 : f32 to vector<1x128xf32>
    %6 = arith.mulf %4, %5 : vector<1x128xf32>
    %7 = arith.mulf %2, %2 : vector<8x128xf32>
    %cst_5 = arith.constant dense<0.000000e+00> : vector<128xf32>
    %8 = vector.multi_reduction <add>, %7, %cst_5 [0] : vector<8x128xf32> to vector<128xf32>
    %9 = vector.shape_cast %8 : vector<128xf32> to vector<1x128xf32>
    %cst_6 = arith.constant 1.250000e-01 : f32
    %10 = vector.broadcast %cst_6 : f32 to vector<1x128xf32>
    %11 = arith.mulf %9, %10 : vector<1x128xf32>
    %12 = arith.mulf %6, %6 : vector<1x128xf32>
    %13 = arith.subf %11, %12 : vector<1x128xf32>
    %cst_7 = arith.constant 0.000000e+00 : f32
    %14 = vector.broadcast %cst_7 : f32 to vector<1x128xf32>
    %15 = arith.maximumf %13, %14 : vector<1x128xf32>
    %16 = vector.broadcast %6 : vector<1x128xf32> to vector<8x128xf32>
    %17 = arith.subf %2, %16 : vector<8x128xf32>
    %cst_8 = arith.constant 9.99999974E-6 : f32
    %18 = vector.broadcast %cst_8 : f32 to vector<1x128xf32>
    %19 = arith.addf %15, %18 : vector<1x128xf32>
    %20 = math.rsqrt %19 : vector<1x128xf32>
    %21 = vector.broadcast %20 : vector<1x128xf32> to vector<8x128xf32>
    %22 = arith.mulf %17, %21 : vector<8x128xf32>
    %cst_9 = arith.constant 0.000000e+00 : f32
    %23 = vector.broadcast %cst_9 : f32 to vector<8x128xf32>
    %24 = arith.maximumf %22, %23 : vector<8x128xf32>
    %25 = arith.truncf %24 : vector<8x128xf32> to vector<8x128xbf16>
    %c0_10 = arith.constant 0 : index
    %c0_11 = arith.constant 0 : index
    %26 = vector.load %arg2[%c0_10, %c0_11] : memref<8x128xbf16, #tpu.memory_space<vmem>>, vector<8x128xbf16>
    tpu.vector_store %arg2[%c0_10, %c0_11], %25 {strides = array<i32>} : memref<8x128xbf16, #tpu.memory_space<vmem>>, vector<8x128xbf16>,
    return
  }
}

module attributes {stable_mosaic.version = 11 : i64} {
  func.func @kernel(%arg0: memref<32x1728xbf16, #tpu.memory_space<vmem>>, %arg1: memref<1728x64xbf16, #tpu.memory_space<vmem>>, %arg2: memref<32x64xbf16, #tpu.memory_space<vmem>>) attributes {dimension_semantics = [], scalar_prefetch = 0 : i64, scratch_operands = 0 : i64, tpu.core_type = #tpu.core_type<tc>} {
    %c0 = arith.constant 0 : index
    %c0_0 = arith.constant 0 : index
    %0 = vector.load %arg0[%c0, %c0_0] : memref<32x1728xbf16, #tpu.memory_space<vmem>>, vector<32x1728xbf16>
    %c0_1 = arith.constant 0 : index
    %c0_2 = arith.constant 0 : index
    %1 = vector.load %arg1[%c0_1, %c0_2] : memref<1728x64xbf16, #tpu.memory_space<vmem>>, vector<1728x64xbf16>
    %cst = arith.constant dense<0.000000e+00> : vector<32x64xf32>
    %2 = tpu.matmul %0, %1, %cst {dimension_numbers = #tpu.dot_dimension_numbers<[1], [0], [0], [1], [0, 0, 1, 1], [], []>} : vector<32x1728xbf16>, vector<1728x64xbf16>, vector<32x64xf32> -> vector<32x64xf32>
    %cst_3 = arith.constant dense<0.000000e+00> : vector<64xf32>
    %3 = vector.multi_reduction <add>, %2, %cst_3 [0] : vector<32x64xf32> to vector<64xf32>
    %4 = vector.shape_cast %3 : vector<64xf32> to vector<1x64xf32>
    %cst_4 = arith.constant 3.125000e-02 : f32
    %5 = vector.broadcast %cst_4 : f32 to vector<1x64xf32>
    %6 = arith.mulf %4, %5 : vector<1x64xf32>
    %7 = arith.mulf %2, %2 : vector<32x64xf32>
    %cst_5 = arith.constant dense<0.000000e+00> : vector<64xf32>
    %8 = vector.multi_reduction <add>, %7, %cst_5 [0] : vector<32x64xf32> to vector<64xf32>
    %9 = vector.shape_cast %8 : vector<64xf32> to vector<1x64xf32>
    %cst_6 = arith.constant 3.125000e-02 : f32
    %10 = vector.broadcast %cst_6 : f32 to vector<1x64xf32>
    %11 = arith.mulf %9, %10 : vector<1x64xf32>
    %12 = arith.mulf %6, %6 : vector<1x64xf32>
    %13 = arith.subf %11, %12 : vector<1x64xf32>
    %cst_7 = arith.constant 0.000000e+00 : f32
    %14 = vector.broadcast %cst_7 : f32 to vector<1x64xf32>
    %15 = arith.maximumf %13, %14 : vector<1x64xf32>
    %16 = vector.broadcast %6 : vector<1x64xf32> to vector<32x64xf32>
    %17 = arith.subf %2, %16 : vector<32x64xf32>
    %cst_8 = arith.constant 9.99999974E-6 : f32
    %18 = vector.broadcast %cst_8 : f32 to vector<1x64xf32>
    %19 = arith.addf %15, %18 : vector<1x64xf32>
    %20 = math.rsqrt %19 : vector<1x64xf32>
    %21 = vector.broadcast %20 : vector<1x64xf32> to vector<32x64xf32>
    %22 = arith.mulf %17, %21 : vector<32x64xf32>
    %cst_9 = arith.constant 0.000000e+00 : f32
    %23 = vector.broadcast %cst_9 : f32 to vector<32x64xf32>
    %24 = arith.maximumf %22, %23 : vector<32x64xf32>
    %25 = arith.truncf %24 : vector<32x64xf32> to vector<32x64xbf16>
    %c0_10 = arith.constant 0 : index
    %c0_11 = arith.constant 0 : index
    %26 = vector.load %arg2[%c0_10, %c0_11] : memref<32x64xbf16, #tpu.memory_space<vmem>>, vector<32x64xbf16>
    tpu.vector_store %arg2[%c0_10, %c0_11], %25 {strides = array<i32>} : memref<32x64xbf16, #tpu.memory_space<vmem>>, vector<32x64xbf16>,
    return
  }
}

module attributes {stable_mosaic.version = 11 : i64} {
  func.func @kernel(%arg0: memref<128x1152xbf16, #tpu.memory_space<vmem>>, %arg1: memref<1152x128xbf16, #tpu.memory_space<vmem>>, %arg2: memref<128x128xbf16, #tpu.memory_space<vmem>>) attributes {dimension_semantics = [], scalar_prefetch = 0 : i64, scratch_operands = 0 : i64, tpu.core_type = #tpu.core_type<tc>} {
    %c0 = arith.constant 0 : index
    %c0_0 = arith.constant 0 : index
    %0 = vector.load %arg0[%c0, %c0_0] : memref<128x1152xbf16, #tpu.memory_space<vmem>>, vector<128x1152xbf16>
    %c0_1 = arith.constant 0 : index
    %c0_2 = arith.constant 0 : index
    %1 = vector.load %arg1[%c0_1, %c0_2] : memref<1152x128xbf16, #tpu.memory_space<vmem>>, vector<1152x128xbf16>
    %cst = arith.constant dense<0.000000e+00> : vector<128x128xf32>
    %2 = tpu.matmul %0, %1, %cst {dimension_numbers = #tpu.dot_dimension_numbers<[1], [0], [0], [1], [0, 0, 1, 1], [], []>} : vector<128x1152xbf16>, vector<1152x128xbf16>, vector<128x128xf32> -> vector<128x128xf32>
    %cst_3 = arith.constant dense<0.000000e+00> : vector<128xf32>
    %3 = vector.multi_reduction <add>, %2, %cst_3 [0] : vector<128x128xf32> to vector<128xf32>
    %4 = vector.shape_cast %3 : vector<128xf32> to vector<1x128xf32>
    %cst_4 = arith.constant 7.812500e-03 : f32
    %5 = vector.broadcast %cst_4 : f32 to vector<1x128xf32>
    %6 = arith.mulf %4, %5 : vector<1x128xf32>
    %7 = arith.mulf %2, %2 : vector<128x128xf32>
    %cst_5 = arith.constant dense<0.000000e+00> : vector<128xf32>
    %8 = vector.multi_reduction <add>, %7, %cst_5 [0] : vector<128x128xf32> to vector<128xf32>
    %9 = vector.shape_cast %8 : vector<128xf32> to vector<1x128xf32>
    %cst_6 = arith.constant 7.812500e-03 : f32
    %10 = vector.broadcast %cst_6 : f32 to vector<1x128xf32>
    %11 = arith.mulf %9, %10 : vector<1x128xf32>
    %12 = arith.mulf %6, %6 : vector<1x128xf32>
    %13 = arith.subf %11, %12 : vector<1x128xf32>
    %cst_7 = arith.constant 0.000000e+00 : f32
    %14 = vector.broadcast %cst_7 : f32 to vector<1x128xf32>
    %15 = arith.maximumf %13, %14 : vector<1x128xf32>
    %16 = vector.broadcast %6 : vector<1x128xf32> to vector<128x128xf32>
    %17 = arith.subf %2, %16 : vector<128x128xf32>
    %cst_8 = arith.constant 9.99999974E-6 : f32
    %18 = vector.broadcast %cst_8 : f32 to vector<1x128xf32>
    %19 = arith.addf %15, %18 : vector<1x128xf32>
    %20 = math.rsqrt %19 : vector<1x128xf32>
    %21 = vector.broadcast %20 : vector<1x128xf32> to vector<128x128xf32>
    %22 = arith.mulf %17, %21 : vector<128x128xf32>
    %cst_9 = arith.constant 0.000000e+00 : f32
    %23 = vector.broadcast %cst_9 : f32 to vector<128x128xf32>
    %24 = arith.maximumf %22, %23 : vector<128x128xf32>
    %25 = arith.truncf %24 : vector<128x128xf32> to vector<128x128xbf16>
    %c0_10 = arith.constant 0 : index
    %c0_11 = arith.constant 0 : index
    %26 = vector.load %arg2[%c0_10, %c0_11] : memref<128x128xbf16, #tpu.memory_space<vmem>>, vector<128x128xbf16>
    tpu.vector_store %arg2[%c0_10, %c0_11], %25 {strides = array<i32>} : memref<128x128xbf16, #tpu.memory_space<vmem>>, vector<128x128xbf16>,
    return
  }
}

</mosaic_0001>

<bundles_post_ra>
// kernel: _lambda_.14
= control target key start
LH: loop header
LB: loop body
LE: loop exit
PB: predicated region body
PF: predicated region fallthrough
CT: control target
= control target key end

     0   :  { %vm88_vm0 = vcmask 293888   ;;  %vm113_vm1 = vcmask 1041408   ;;  %vm214_vm2 = vcmask 523264   ;;  %vm424_vm3 = vcmask 519168   ;;  %s798_s1 = inlined_call_operand.vmem [shape: bf16[36,64], index: 1, kind: input, shape index: {}]   ;;  %s799_s0 = inlined_call_operand.vmem [shape: bf16[128,36], index: 0, kind: input, shape index: {}]   ;;  %s800_s2 = inlined_call_operand.vmem [shape: bf16[128,64], index: 2, kind: output, shape index: {}]  }
   0x1   :  { %v537_v0 = vld [vmem:[%s798_s1] sm:$0xff]   ;;  %v538_v1 = vld [vmem:[%s798_s1 + $0x8] sm:$0xff]   ;;  %v539_v2 = vld [vmem:[%s798_s1 + $0x10] ss:$0 sps:$4 sm:$0x33]  }
   0x2   :  { %507 = vmatprep.subr.bf16.mxu0 %v537_v0  ;;  %v540_v3 = vld [vmem:[%s799_s0] sm:$0xff]   ;;  %529 = vmatprep.subr.bf16.mxu1 %v537_v0  ;;  %v115_v5 = vsel %vm113_vm1, %v539_v2, 0  ;;  %v541_v6 = vld [vmem:[%s799_s0 + $0x8] sm:$0xff]   ;;  %v542_v8 = vld [vmem:[%s799_s0 + $0x10] sm:$0xff]  }
   0x3   :  { %508 = vmatpush3.bf16.msra.mxu0 %v537_v0  ;;  %532 = vmatpush3.bf16.msra.mxu1 %v537_v0  ;;  %v544_v4 = vld [vmem:[%s799_s0 + $0x20] sm:$0xff]   ;;  %v545_v7 = vld [vmem:[%s799_s0 + $0x28] sm:$0xff]   ;;  %v546_v9 = vld [vmem:[%s799_s0 + $0x30] sm:$0xff]  }
   0x4   :  { %509 = vmatprep.subr.bf16.mxu0 %v538_v1  ;;  %513 = vmatprep.mubr.msk.bf16.mxu0 %vm88_vm0, %v540_v3  ;;  %v543_v10 = vld [vmem:[%s799_s0 + $0x18] sm:$0xff]  }
   0x5   :  { %530 = vmatprep.subr.bf16.mxu1 %v538_v1  ;;  %521 = vmatprep.mubr.msk.bf16.mxu1 %vm88_vm0, %v544_v4  ;;  %v547_v11 = vld [vmem:[%s799_s0 + $0x38] sm:$0xff]  }
   0x7   :  { %510 = vmatpush3.bf16.msra.mxu0 %v538_v1  ;;  %533 = vmatpush3.bf16.msra.mxu1 %v538_v1 }
   0x8   :  { %535 = vmatprep.subr.msk.bf16.mxu0 %vm113_vm1, %v539_v2  ;;  %536 = vmatprep.subr.msk.bf16.mxu1 %vm113_vm1, %v539_v2 }
   0xb   :  { %512 = vmatpush3.bf16.msra.mxu0 %v115_v5  ;;  %534 = vmatpush3.bf16.msra.mxu1 %v115_v5 }
   0xe   :  { %514 = vmatmul.mubr.msk.bf16.vlgmr.msra.gmra.mrb[0].mxu0 %vm88_vm0, %v541_v6  ;;  %522 = vmatmul.mubr.msk.bf16.vlgmr.msra.gmra.mrb[0].mxu1 %vm88_vm0, %v545_v7 }
   0xf   :  { %517 = vmatprep.mubr.msk.bf16.mxu0 %vm88_vm0, %v542_v8  ;;  %525 = vmatprep.mubr.msk.bf16.mxu1 %vm88_vm0, %v546_v9 }
  0x16   :  { %518 = vmatmul.mubr.msk.bf16.gmra.mrb[4].mxu0 %vm88_vm0, %v543_v10  ;;  %526 = vmatmul.mubr.msk.bf16.gmra.mrb[4].mxu1 %vm88_vm0, %v547_v11 }
  0xe1   :  { %v606_v12 = vpop.f32.mrb[0].mxu0  ;;  %v608_v13 = vpop.f32.mrb[0].mxu1 }
  0xe2   :  { %v610_v14 = vpop.f32.mrb[1].mxu0  ;;  %v612_v15 = vpop.f32.mrb[1].mxu1  ;;  %v255_v21 = vmul.f32 %v606_v12, %v606_v12  ;;  %v218_v26 = vsel %vm214_vm2, %v606_v12, 0.0  ;;  %v263_v7 = vmul.f32 %v608_v13, %v608_v13  ;;  %v234_v11 = vsel %vm214_vm2, %v608_v13, 0.0 }
  0xe3   :  { %v253_v16 = vmul.f32 %v610_v14, %v610_v14  ;;  %v616_v17 = vpop.f32.mrb[2].mxu0  ;;  %v618_v18 = vpop.f32.mrb[2].mxu1  ;;  %v215_v22 = vsel %vm214_vm2, %v610_v14, 0.0  ;;  %v261_v58 = vmul.f32 %v612_v15, %v612_v15  ;;  %v230_v63 = vsel %vm214_vm2, %v612_v15, 0.0 }
  0xe4   :  { %v620_v19 = vpop.f32.mrb[3].mxu0  ;;  %v622_v20 = vpop.f32.mrb[3].mxu1  ;;  %v256_v28 = vmul.f32 %v616_v17, %v616_v17  ;;  %v272_v32 = vsel %vm214_vm2, %v255_v21, 0.0  ;;  %v220_v33 = vsel %vm214_vm2, %v616_v17, 0.0 }
  0xe5   :  { %v216_v23 = vsel %vm214_vm2, %v620_v19, 0.0  ;;  %v254_v24 = vmul.f32 %v620_v19, %v620_v19  ;;  %v269_v27 = vsel %vm214_vm2, %v253_v16, 0.0  ;;  %v284_v3 = vsel %vm214_vm2, %v261_v58, 0.0 }
  0xe6   :  { %v217_v25 = vadd.f32 %v216_v23, %v215_v22  ;;  %v274_v40 = vsel %vm214_vm2, %v256_v28, 0.0  ;;  %v262_v4 = vmul.f32 %v622_v20, %v622_v20  ;;  %v232_v8 = vsel %vm214_vm2, %v622_v20, 0.0 }
  0xe7   :  { %v270_v29 = vsel %vm214_vm2, %v254_v24, 0.0  ;;  %v264_v16 = vmul.f32 %v618_v18, %v618_v18 }
  0xe8   :  { %v219_v30 = vadd.f32 %v218_v26, %v217_v25  ;;  %v271_v31 = vadd.f32 %v270_v29, %v269_v27  ;;  %v286_v21 = vsel %vm214_vm2, %v262_v4, 0.0  ;;  %v288_v25 = vsel %vm214_vm2, %v263_v7, 0.0 }
  0xe9   :  { %v641_v34 = vpop.f32.mrb[4].mxu0  ;;  %v643_v35 = vpop.f32.mrb[4].mxu1  ;;  %v236_v26 = vsel %vm214_vm2, %v618_v18, 0.0 }
  0xea   :  { %v273_v36 = vadd.f32 %v272_v32, %v271_v31  ;;  %v645_v37 = vpop.f32.mrb[5].mxu0  ;;  %v221_v38 = vadd.f32 %v220_v33, %v219_v30  ;;  %v647_v39 = vpop.f32.mrb[5].mxu1  ;;  %v259_v49 = vmul.f32 %v641_v34, %v641_v34  ;;  %v226_v55 = vsel %vm214_vm2, %v641_v34, 0.0 }
  0xeb   :  { %v222_v41 = vsel %vm214_vm2, %v645_v37, 0.0  ;;  %v257_v42 = vmul.f32 %v645_v37, %v645_v37  ;;  %v654_v43 = vpop.f32.mrb[6].mxu0  ;;  %v656_v44 = vpop.f32.mrb[6].mxu1  ;;  %v265_v22 = vmul.f32 %v647_v39, %v647_v39  ;;  %v238_v27 = vsel %vm214_vm2, %v647_v39, 0.0 }
  0xec   :  { %v223_v45 = vadd.f32 %v222_v41, %v221_v38  ;;  %v275_v46 = vadd.f32 %v274_v40, %v273_v36  ;;  %v658_v47 = vpop.f32.mrb[7].mxu0  ;;  %v660_v48 = vpop.f32.mrb[7].mxu1  ;;  %v260_v56 = vmul.f32 %v654_v43, %v654_v43  ;;  %v280_v61 = vsel %vm214_vm2, %v259_v49, 0.0 }
  0xed   :  { %v276_v50 = vsel %vm214_vm2, %v257_v42, 0.0  ;;  %v224_v51 = vsel %vm214_vm2, %v658_v47, 0.0  ;;  %v258_v52 = vmul.f32 %v658_v47, %v658_v47  ;;  %v228_v62 = vsel %vm214_vm2, %v654_v43, 0.0 }
  0xee   :  { %v277_v53 = vadd.f32 %v276_v50, %v275_v46  ;;  %v225_v54 = vadd.f32 %v224_v51, %v223_v45  ;;  %v282_v2 = vsel %vm214_vm2, %v260_v56, 0.0  ;;  %v290_v30 = vsel %vm214_vm2, %v264_v16, 0.0 }
  0xef   :  { %v278_v57 = vsel %vm214_vm2, %v258_v52, 0.0  ;;  %v292_v31 = vsel %vm214_vm2, %v265_v22, 0.0  ;;  %v266_v32 = vmul.f32 %v660_v48, %v660_v48  ;;  %v267_v38 = vmul.f32 %v643_v35, %v643_v35 }
  0xf0   :  { %v227_v59 = vadd.f32 %v226_v55, %v225_v54  ;;  %v279_v60 = vadd.f32 %v278_v57, %v277_v53  ;;  %v240_v40 = vsel %vm214_vm2, %v660_v48, 0.0  ;;  %v242_v45 = vsel %vm214_vm2, %v643_v35, 0.0 }
  0xf1   :  { %v268_v46 = vmul.f32 %v656_v44, %v656_v44  ;;  %v294_v49 = vsel %vm214_vm2, %v266_v32, 0.0  ;;  %v296_v52 = vsel %vm214_vm2, %v267_v38, 0.0  ;;  %v244_v53 = vsel %vm214_vm2, %v656_v44, 0.0 }
  0xf2   :  { %v281_v0 = vadd.f32 %v280_v61, %v279_v60  ;;  %v229_v1 = vadd.f32 %v228_v62, %v227_v59 }
  0xf3   :  { %v298_v56 = vsel %vm214_vm2, %v268_v46, 0.0 }
  0xf4   :  { %v231_v5 = vadd.f32 %v230_v63, %v229_v1  ;;  %v283_v6 = vadd.f32 %v282_v2, %v281_v0 }
  0xf6   :  { %v285_v9 = vadd.f32 %v284_v3, %v283_v6  ;;  %v233_v10 = vadd.f32 %v232_v8, %v231_v5 }
  0xf8   :  { %v235_v23 = vadd.f32 %v234_v11, %v233_v10  ;;  %v287_v24 = vadd.f32 %v286_v21, %v285_v9 }
  0xfa   :  { %v289_v28 = vadd.f32 %v288_v25, %v287_v24  ;;  %v237_v29 = vadd.f32 %v236_v26, %v235_v23 }
  0xfc   :  { %v239_v33 = vadd.f32 %v238_v27, %v237_v29  ;;  %v291_v36 = vadd.f32 %v290_v30, %v289_v28 }
  0xfe   :  { %v293_v41 = vadd.f32 %v292_v31, %v291_v36  ;;  %v241_v42 = vadd.f32 %v240_v40, %v239_v33 }
 0x100   :  { %v243_v50 = vadd.f32 %v242_v45, %v241_v42  ;;  %v295_v51 = vadd.f32 %v294_v49, %v293_v41 }
 0x102   :  { %v245_v54 = vadd.f32 %v244_v53, %v243_v50  ;;  %v297_v55 = vadd.f32 %v296_v52, %v295_v51 }
 0x104   :  { %v246_v57 = vrot.slane %v245_v54, 4  ;;  %v299_v58 = vadd.f32 %v298_v56, %v297_v55 }
 0x106   :  { %v247_v59 = vadd.f32 %v246_v57, %v245_v54  ;;  %v300_v60 = vrot.slane %v299_v58, 4 }
 0x108   :  { %v248_v61 = vrot.slane %v247_v59, 2  ;;  %v301_v62 = vadd.f32 %v300_v60, %v299_v58 }
 0x10a   :  { %v249_v63 = vadd.f32 %v248_v61, %v247_v59  ;;  %v302_v0 = vrot.slane %v301_v62, 2 }
 0x10c   :  { %v250_v1 = vrot.slane %v249_v63, 1  ;;  %v303_v2 = vadd.f32 %v302_v0, %v301_v62 }
 0x10e   :  { %v251_v3 = vadd.f32 %v250_v1, %v249_v63  ;;  %v304_v4 = vrot.slane %v303_v2, 1 }
 0x110   :  { %v252_v5 = vmul.f32 0.0078125, %v251_v3  ;;  %v305_v6 = vadd.f32 %v304_v4, %v303_v2 }
 0x112   :  { %v306_v7 = vmul.f32 0.0078125, %v305_v6  ;;  %v307_v8 = vmul.f32 %v252_v5, %v252_v5  ;;  %v310_v9 = vsub.f32 %v610_v14, %v252_v5  ;;  %v311_v10 = vsub.f32 %v620_v19, %v252_v5 }
 0x113   :  { %v312_v11 = vsub.f32 %v606_v12, %v252_v5  ;;  %v313_v16 = vsub.f32 %v616_v17, %v252_v5  ;;  %v314_v21 = vsub.f32 %v645_v37, %v252_v5  ;;  %v315_v22 = vsub.f32 %v658_v47, %v252_v5 }
 0x114   :  { %v308_v23 = vsub.f32 %v306_v7, %v307_v8  ;;  %v316_v24 = vsub.f32 %v641_v34, %v252_v5  ;;  %v317_v25 = vsub.f32 %v654_v43, %v252_v5  ;;  %v318_v26 = vsub.f32 %v612_v15, %v252_v5 }
 0x115   :  { %v319_v27 = vsub.f32 %v622_v20, %v252_v5  ;;  %v320_v14 = vsub.f32 %v608_v13, %v252_v5  ;;  %v321_v19 = vsub.f32 %v618_v18, %v252_v5  ;;  %v322_v12 = vsub.f32 %v647_v39, %v252_v5 }
 0x116   :  { %v309_v17 = vmax.f32 %v308_v23, 0.0  ;;  %v323_v37 = vsub.f32 %v660_v48, %v252_v5  ;;  %v324_v47 = vsub.f32 %v643_v35, %v252_v5  ;;  %v325_v28 = vsub.f32 %v656_v44, %v252_v5 }
 0x118   :  { %v326_v34 = vadd.f32 1e-05, %v309_v17 }
 0x11a   :  { %548 = vrsqrt.f32 %v326_v34 }
 0x124   :  { %v549_v43 = vpop.eup %548 }
 0x125   :  { %v328_v15 = vmul.f32 %v549_v43, %v310_v9  ;;  %v329_v29 = vmul.f32 %v549_v43, %v311_v10  ;;  %v330_v20 = vmul.f32 %v549_v43, %v312_v11  ;;  %v331_v30 = vmul.f32 %v549_v43, %v313_v16 }
 0x126   :  { %v332_v13 = vmul.f32 %v549_v43, %v314_v21  ;;  %v333_v31 = vmul.f32 %v549_v43, %v315_v22  ;;  %v334_v18 = vmul.f32 %v549_v43, %v316_v24  ;;  %v335_v32 = vmul.f32 %v549_v43, %v317_v25 }
 0x127   :  { %v336_v39 = vmul.f32 %v549_v43, %v318_v26  ;;  %v337_v33 = vmul.f32 %v549_v43, %v319_v27  ;;  %v338_v36 = vmul.f32 %v549_v43, %v320_v14  ;;  %v339_v48 = vmul.f32 %v549_v43, %v321_v19 }
 0x128   :  { %v340_v38 = vmul.f32 %v549_v43, %v322_v12  ;;  %v341_v35 = vmul.f32 %v549_v43, %v323_v37  ;;  %v342_v40 = vmul.f32 %v549_v43, %v324_v47  ;;  %v343_v44 = vmul.f32 %v549_v43, %v325_v28 }
 0x129   :  { %v344_v41 = vmax.f32 %v328_v15, 0.0  ;;  %v345_v42 = vmax.f32 %v329_v29, 0.0  ;;  %v346_v45 = vmax.f32 %v330_v20, 0.0  ;;  %v347_v46 = vmax.f32 %v331_v30, 0.0 }
 0x12a   :  { %v348_v49 = vmax.f32 %v332_v13, 0.0  ;;  %v349_v50 = vmax.f32 %v333_v31, 0.0  ;;  %v350_v51 = vmax.f32 %v334_v18, 0.0  ;;  %v351_v52 = vmax.f32 %v335_v32, 0.0 }
 0x12b   :  { %v352_v53 = vmax.f32 %v336_v39, 0.0  ;;  %v353_v54 = vmax.f32 %v337_v33, 0.0  ;;  %v354_v55 = vmax.f32 %v338_v36, 0.0  ;;  %v355_v56 = vmax.f32 %v339_v48, 0.0 }
 0x12c   :  { %v356_v57 = vmax.f32 %v340_v38, 0.0  ;;  %v357_v58 = vmax.f32 %v341_v35, 0.0  ;;  %v358_v59 = vmax.f32 %v342_v40, 0.0  ;;  %v359_v60 = vmax.f32 %v343_v44, 0.0 }
 0x12d   :  { %v480_v61 = vpack.c.bf16 %v344_v41, %v344_v41  ;;  %v481_v62 = vpack.c.bf16 %v345_v42, %v345_v42  ;;  %v482_v63 = vpack.c.bf16 %v346_v45, %v346_v45  ;;  %v483_v0 = vpack.c.bf16 %v347_v46, %v347_v46 }
 0x12e   :  { %v484_v1 = vpack.c.bf16 %v348_v49, %v348_v49  ;;  %v485_v2 = vpack.c.bf16 %v349_v50, %v349_v50  ;;  %v486_v3 = vpack.c.bf16 %v350_v51, %v350_v51  ;;  %v487_v4 = vpack.c.bf16 %v351_v52, %v351_v52 }
 0x12f   :  { %v488_v5 = vpack.c.bf16 %v352_v53, %v352_v53  ;;  %v489_v6 = vpack.c.bf16 %v353_v54, %v353_v54  ;;  %v490_v7 = vpack.c.bf16 %v354_v55, %v354_v55  ;;  %v491_v8 = vpack.c.bf16 %v355_v56, %v355_v56  ;;  %425 = vst.msk [vmem:[%s800_s2] sm:$0xf] %vm424_vm3, %v480_v61 }
 0x130   :  { %426 = vst.msk [vmem:[%s800_s2 + $0x4] sm:$0xf] %vm424_vm3, %v481_v62  ;;  %427 = vst.msk [vmem:[%s800_s2 + $0x8] sm:$0xf] %vm424_vm3, %v482_v63  ;;  %v492_v9 = vpack.c.bf16 %v356_v57, %v356_v57  ;;  %v493_v10 = vpack.c.bf16 %v357_v58, %v357_v58  ;;  %v494_v11 = vpack.c.bf16 %v358_v59, %v358_v59 }
 0x131   :  { %428 = vst.msk [vmem:[%s800_s2 + $0xc] sm:$0xf] %vm424_vm3, %v483_v0  ;;  %v495_v16 = vpack.c.bf16 %v359_v60, %v359_v60  ;;  %429 = vst.msk [vmem:[%s800_s2 + $0x10] sm:$0xf] %vm424_vm3, %v484_v1 }
 0x132   :  { %430 = vst.msk [vmem:[%s800_s2 + $0x14] sm:$0xf] %vm424_vm3, %v485_v2  ;;  %431 = vst.msk [vmem:[%s800_s2 + $0x18] sm:$0xf] %vm424_vm3, %v486_v3 }
 0x133   :  { %432 = vst.msk [vmem:[%s800_s2 + $0x1c] sm:$0xf] %vm424_vm3, %v487_v4  ;;  %433 = vst.msk [vmem:[%s800_s2 + $0x20] sm:$0xf] %vm424_vm3, %v488_v5 }
 0x134   :  { %434 = vst.msk [vmem:[%s800_s2 + $0x24] sm:$0xf] %vm424_vm3, %v489_v6  ;;  %435 = vst.msk [vmem:[%s800_s2 + $0x28] sm:$0xf] %vm424_vm3, %v490_v7 }
 0x135   :  { %436 = vst.msk [vmem:[%s800_s2 + $0x2c] sm:$0xf] %vm424_vm3, %v491_v8  ;;  %437 = vst.msk [vmem:[%s800_s2 + $0x30] sm:$0xf] %vm424_vm3, %v492_v9 }
 0x136   :  { %438 = vst.msk [vmem:[%s800_s2 + $0x34] sm:$0xf] %vm424_vm3, %v493_v10  ;;  %439 = vst.msk [vmem:[%s800_s2 + $0x38] sm:$0xf] %vm424_vm3, %v494_v11 }
 0x137   :  { %440 = vst.msk [vmem:[%s800_s2 + $0x3c] sm:$0xf] %vm424_vm3, %v495_v16 }

// kernel: _lambda_.15
= control target key start
LH: loop header
LB: loop body
LE: loop exit
PB: predicated region body
PF: predicated region fallthrough
CT: control target
= control target key end

     0   :  { %vm100_vm0 = vcmask 519168   ;;  %s283_s0 = inlined_call_operand.vmem [shape: bf16[32,64], index: 0, kind: input, shape index: {}]   ;;  %s284_s1 = inlined_call_operand.vmem [shape: bf16[32,64], index: 1, kind: input, shape index: {}]   ;;  %s285_s2 = inlined_call_operand.vmem [shape: bf16[32,64], index: 2, kind: input, shape index: {}]   ;;  %s286_s3 = inlined_call_operand.vmem [shape: bf16[32,64], index: 3, kind: input, shape index: {}]   ;;  %s287_s4 = inlined_call_operand.vmem [shape: bf16[32,64], index: 4, kind: input, shape index: {}]   ;;  %s288_s5 = inlined_call_operand.vmem [shape: bf16[32,64], index: 5, kind: input, shape index: {}]   ;;  %s289_s6 = inlined_call_operand.vmem [shape: bf16[32,64], index: 6, kind: input, shape index: {}]   ;;  %s290_s7 = inlined_call_operand.vmem [shape: bf16[32,64], index: 7, kind: input, shape index: {}]   ;;  %s291_s8 = inlined_call_operand.vmem [shape: bf16[32,64], index: 8, kind: input, shape index: {}]   ;;  %s292_s9 = inlined_call_operand.vmem [shape: bf16[32,64], index: 9, kind: output, shape index: {}]  }
   0x1   :  { %v32_v0 = vld [vmem:[%s283_s0] sm:$0xf]  ;;  %v33_v6 = vld [vmem:[%s283_s0 + $0x4] sm:$0xf]  ;;  %v34_v15 = vld [vmem:[%s283_s0 + $0x8] sm:$0xf] }
   0x2   :  { %v36_v1 = vld [vmem:[%s284_s1] sm:$0xf]  ;;  %v37_v7 = vld [vmem:[%s284_s1 + $0x4] sm:$0xf]  ;;  %v38_v16 = vld [vmem:[%s284_s1 + $0x8] sm:$0xf] }
   0x3   :  { %v44_v2 = vld [vmem:[%s285_s2] sm:$0xf]  ;;  %v40_v3 = vmax.bf16 %v36_v1, %v32_v0  ;;  %v45_v8 = vld [vmem:[%s285_s2 + $0x4] sm:$0xf]  ;;  %v41_v10 = vmax.bf16 %v37_v7, %v33_v6  ;;  %v46_v17 = vld [vmem:[%s285_s2 + $0x8] sm:$0xf]  ;;  %v42_v20 = vmax.bf16 %v38_v16, %v34_v15 }
   0x4   :  { %v52_v4 = vld [vmem:[%s286_s3] sm:$0xf]  ;;  %v53_v13 = vld [vmem:[%s286_s3 + $0x4] sm:$0xf]  ;;  %v54_v24 = vld [vmem:[%s286_s3 + $0x8] sm:$0xf] }
   0x5   :  { %v48_v5 = vmax.bf16 %v44_v2, %v40_v3  ;;  %v60_v9 = vld [vmem:[%s287_s4] sm:$0xf]  ;;  %v49_v14 = vmax.bf16 %v45_v8, %v41_v10  ;;  %v61_v19 = vld [vmem:[%s287_s4 + $0x4] sm:$0xf]  ;;  %v50_v26 = vmax.bf16 %v46_v17, %v42_v20  ;;  %v35_v27 = vld [vmem:[%s283_s0 + $0xc] sm:$0xf] }
   0x6   :  { %v68_v12 = vld [vmem:[%s288_s5] sm:$0xf]  ;;  %v69_v23 = vld [vmem:[%s288_s5 + $0x4] sm:$0xf]  ;;  %v39_v28 = vld [vmem:[%s284_s1 + $0xc] sm:$0xf] }
   0x7   :  { %v56_v11 = vmax.bf16 %v52_v4, %v48_v5  ;;  %v76_v21 = vld [vmem:[%s289_s6] sm:$0xf]  ;;  %v57_v22 = vmax.bf16 %v53_v13, %v49_v14  ;;  %v47_v29 = vld [vmem:[%s285_s2 + $0xc] sm:$0xf]  ;;  %v62_v32 = vld [vmem:[%s287_s4 + $0x8] sm:$0xf]  ;;  %v43_v33 = vmax.bf16 %v39_v28, %v35_v27  ;;  %v58_v36 = vmax.bf16 %v54_v24, %v50_v26 }
   0x8   :  { %v84_v30 = vld [vmem:[%s290_s7] sm:$0xf]  ;;  %v77_v35 = vld [vmem:[%s289_s6 + $0x4] sm:$0xf]  ;;  %v55_v37 = vld [vmem:[%s286_s3 + $0xc] sm:$0xf] }
   0x9   :  { %v64_v18 = vmax.bf16 %v60_v9, %v56_v11  ;;  %v65_v31 = vmax.bf16 %v61_v19, %v57_v22  ;;  %v92_v38 = vld [vmem:[%s291_s8] sm:$0xf]  ;;  %v70_v40 = vld [vmem:[%s288_s5 + $0x8] sm:$0xf]  ;;  %v51_v41 = vmax.bf16 %v47_v29, %v43_v33  ;;  %v85_v43 = vld [vmem:[%s290_s7 + $0x4] sm:$0xf]  ;;  %v66_v44 = vmax.bf16 %v62_v32, %v58_v36 }
   0xa   :  { %v63_v45 = vld [vmem:[%s287_s4 + $0xc] sm:$0xf]  ;;  %v78_v47 = vld [vmem:[%s289_s6 + $0x8] sm:$0xf]  ;;  %v93_v50 = vld [vmem:[%s291_s8 + $0x4] sm:$0xf] }
   0xb   :  { %v72_v25 = vmax.bf16 %v68_v12, %v64_v18  ;;  %v73_v39 = vmax.bf16 %v69_v23, %v65_v31  ;;  %v59_v48 = vmax.bf16 %v55_v37, %v51_v41  ;;  %v74_v51 = vmax.bf16 %v70_v40, %v66_v44  ;;  %v71_v52 = vld [vmem:[%s288_s5 + $0xc] sm:$0xf]  ;;  %v86_v54 = vld [vmem:[%s290_s7 + $0x8] sm:$0xf] }
   0xc   :  { %v79_v57 = vld [vmem:[%s289_s6 + $0xc] sm:$0xf]  ;;  %v94_v59 = vld [vmem:[%s291_s8 + $0x8] sm:$0xf] }
   0xd   :  { %v80_v34 = vmax.bf16 %v76_v21, %v72_v25  ;;  %v81_v46 = vmax.bf16 %v77_v35, %v73_v39  ;;  %v67_v55 = vmax.bf16 %v63_v45, %v59_v48  ;;  %v82_v56 = vmax.bf16 %v78_v47, %v74_v51  ;;  %v87_v62 = vld [vmem:[%s290_s7 + $0xc] sm:$0xf] }
   0xe   :  { %v95_v1 = vld [vmem:[%s291_s8 + $0xc] sm:$0xf] }
   0xf   :  { %v88_v42 = vmax.bf16 %v84_v30, %v80_v34  ;;  %v89_v53 = vmax.bf16 %v85_v43, %v81_v46  ;;  %v75_v60 = vmax.bf16 %v71_v52, %v67_v55  ;;  %v90_v61 = vmax.bf16 %v86_v54, %v82_v56 }
  0x11   :  { %v96_v49 = vmax.bf16 %v92_v38, %v88_v42  ;;  %v97_v58 = vmax.bf16 %v93_v50, %v89_v53  ;;  %v83_v63 = vmax.bf16 %v79_v57, %v75_v60  ;;  %v98_v0 = vmax.bf16 %v94_v59, %v90_v61 }
  0x13   :  { %101 = vst.msk [vmem:[%s292_s9] sm:$0xf] %vm100_vm0, %v96_v49  ;;  %102 = vst.msk [vmem:[%s292_s9 + $0x4] sm:$0xf] %vm100_vm0, %v97_v58  ;;  %v91_v2 = vmax.bf16 %v87_v62, %v83_v63 }
  0x14   :  { %103 = vst.msk [vmem:[%s292_s9 + $0x8] sm:$0xf] %vm100_vm0, %v98_v0 }
  0x15   :  { %v99_v3 = vmax.bf16 %v95_v1, %v91_v2 }
  0x17   :  { %104 = vst.msk [vmem:[%s292_s9 + $0xc] sm:$0xf] %vm100_vm0, %v99_v3 }

// kernel: _lambda_.17
= control target key start
LH: loop header
LB: loop body
LE: loop exit
PB: predicated region body
PF: predicated region fallthrough
CT: control target
= control target key end

     0   :  { %vm365_vm0 = vcmask 523264   ;;  %vm596_vm1 = vcmask 519168   ;;  %s982_s1 = inlined_call_operand.vmem [shape: bf16[576,64], index: 1, kind: input, shape index: {}]   ;;  %s983_s0 = inlined_call_operand.vmem [shape: bf16[32,576], index: 0, kind: input, shape index: {}]   ;;  %s984_s2 = inlined_call_operand.vmem [shape: bf16[32,64], index: 2, kind: input, shape index: {}]   ;;  %s985_s3 = inlined_call_operand.vmem [shape: bf16[32,64], index: 3, kind: output, shape index: {}]  }
   0x1   :  { %v744_v0 = vld [vmem:[%s982_s1 + $0x40] sm:$0xff]   ;;  %v748_v4 = vld [vmem:[%s982_s1 + $0x48] sm:$0xff]   ;;  %v752_v8 = vld [vmem:[%s982_s1 + $0x50] sm:$0xff]  }
   0x2   :  { %v745_v1 = vld [vmem:[%s982_s1 + $0xc0] sm:$0xff]   ;;  %670 = vmatprep.subr.bf16.mxu0 %v744_v0  ;;  %v749_v5 = vld [vmem:[%s982_s1 + $0xc8] sm:$0xff]   ;;  %v753_v9 = vld [vmem:[%s982_s1 + $0xd0] sm:$0xff]  }
   0x3   :  { %v746_v2 = vld [vmem:[%s982_s1] sm:$0xff]   ;;  %698 = vmatprep.subr.bf16.mxu1 %v745_v1  ;;  %v750_v6 = vld [vmem:[%s982_s1 + $0x8] sm:$0xff]   ;;  %v754_v10 = vld [vmem:[%s982_s1 + $0x10] sm:$0xff]  }
   0x4   :  { %v747_v3 = vld [vmem:[%s982_s1 + $0x80] sm:$0xff]   ;;  %671 = vmatpush3.bf16.msra.mxu0 %v746_v2  ;;  %v751_v7 = vld [vmem:[%s982_s1 + $0x88] sm:$0xff]   ;;  %v755_v11 = vld [vmem:[%s982_s1 + $0x90] sm:$0xff]  }
   0x5   :  { %699 = vmatpush3.bf16.msra.mxu1 %v747_v3  ;;  %672 = vmatprep.subr.bf16.mxu0 %v748_v4  ;;  %v756_v12 = vld [vmem:[%s982_s1 + $0x58] sm:$0xff]   ;;  %v760_v16 = vld [vmem:[%s982_s1 + $0x60] sm:$0xff]   ;;  %v764_v20 = vld [vmem:[%s982_s1 + $0x68] sm:$0xff]  }
   0x6   :  { %700 = vmatprep.subr.bf16.mxu1 %v749_v5  ;;  %v757_v13 = vld [vmem:[%s982_s1 + $0xd8] sm:$0xff]   ;;  %v761_v17 = vld [vmem:[%s982_s1 + $0xe0] sm:$0xff]   ;;  %v765_v21 = vld [vmem:[%s982_s1 + $0xe8] sm:$0xff]  }
   0x7   :  { %v758_v14 = vld [vmem:[%s982_s1 + $0x18] sm:$0xff]   ;;  %v762_v18 = vld [vmem:[%s982_s1 + $0x20] sm:$0xff]   ;;  %v766_v22 = vld [vmem:[%s982_s1 + $0x28] sm:$0xff]  }
   0x8   :  { %673 = vmatpush3.bf16.msra.mxu0 %v750_v6  ;;  %v759_v15 = vld [vmem:[%s982_s1 + $0x98] sm:$0xff]   ;;  %v763_v19 = vld [vmem:[%s982_s1 + $0xa0] sm:$0xff]   ;;  %v767_v23 = vld [vmem:[%s982_s1 + $0xa8] sm:$0xff]  }
   0x9   :  { %701 = vmatpush3.bf16.msra.mxu1 %v751_v7  ;;  %674 = vmatprep.subr.bf16.mxu0 %v752_v8  ;;  %v768_v24 = vld [vmem:[%s982_s1 + $0x70] sm:$0xff]   ;;  %v772_v28 = vld [vmem:[%s982_s1 + $0x78] sm:$0xff]   ;;  %v781_v35 = vld [vmem:[%s983_s0 + $0xc] ss:$20 sps:$4 sm:$0xff]  }
   0xa   :  { %702 = vmatprep.subr.bf16.mxu1 %v753_v9  ;;  %v769_v25 = vld [vmem:[%s982_s1 + $0xf0] sm:$0xff]   ;;  %v773_v29 = vld [vmem:[%s982_s1 + $0xf8] sm:$0xff]   ;;  %v782_v36 = vld [vmem:[%s982_s1 + $0x100] sm:$0xff]   ;;  %453 = vmatprep.mubr.bf16.mxu1 %v781_v35 }
   0xb   :  { %v770_v26 = vld [vmem:[%s982_s1 + $0x30] sm:$0xff]   ;;  %v774_v30 = vld [vmem:[%s982_s1 + $0x38] sm:$0xff]   ;;  %v783_v37 = vld [vmem:[%s982_s1 + $0x108] sm:$0xff]  }
   0xc   :  { %675 = vmatpush3.bf16.msra.mxu0 %v754_v10  ;;  %v771_v27 = vld [vmem:[%s982_s1 + $0xb0] sm:$0xff]   ;;  %v775_v31 = vld [vmem:[%s982_s1 + $0xb8] sm:$0xff]   ;;  %v784_v38 = vld [vmem:[%s983_s0 + $0x2c] ss:$20 sps:$4 sm:$0xff]  }
   0xd   :  { %703 = vmatpush3.bf16.msra.mxu1 %v755_v11  ;;  %676 = vmatprep.subr.bf16.mxu0 %v756_v12  ;;  %v776_v32 = vld [vmem:[%s983_s0] ss:$20 sps:$4 sm:$0xff]   ;;  %v778_v33 = vld [vmem:[%s983_s0 + $0x4] ss:$20 sps:$4 sm:$0xff]   ;;  %v779_v34 = vld [vmem:[%s983_s0 + $0x8] ss:$20 sps:$4 sm:$0xff]  }
   0xe   :  { %704 = vmatprep.subr.bf16.mxu1 %v757_v13  ;;  %404 = vmatprep.mubr.bf16.mxu0 %v778_v33  ;;  %v786_v39 = vld [vmem:[%s983_s0 + $0x34] ss:$20 sps:$4 sm:$0xff]   ;;  %v789_v42 = vld [vmem:[%s983_s0 + $0x30] ss:$20 sps:$4 sm:$0xff]   ;;  %v791_v44 = vld [vmem:[%s982_s1 + $0x118] sm:$0xff]  }
   0xf   :  { %v788_v40 = vld [vmem:[%s983_s0 + $0x28] ss:$20 sps:$4 sm:$0xff]   ;;  %v790_v41 = vld [vmem:[%s982_s1 + $0x110] sm:$0xff]   ;;  %v793_v45 = vld [vmem:[%s983_s0 + $0x38] ss:$20 sps:$4 sm:$0xff]  }
  0x10   :  { %677 = vmatpush3.bf16.msra.mxu0 %v758_v14  ;;  %v792_v43 = vld [vmem:[%s983_s0 + $0x10] ss:$20 sps:$4 sm:$0xff]  }
  0x11   :  { %705 = vmatpush3.bf16.msra.mxu1 %v759_v15  ;;  %678 = vmatprep.subr.bf16.mxu0 %v760_v16 }
  0x12   :  { %706 = vmatprep.subr.bf16.mxu1 %v761_v17 }
  0x14   :  { %679 = vmatpush3.bf16.msra.mxu0 %v762_v18 }
  0x15   :  { %707 = vmatpush3.bf16.msra.mxu1 %v763_v19  ;;  %680 = vmatprep.subr.bf16.mxu0 %v764_v20 }
  0x16   :  { %708 = vmatprep.subr.bf16.mxu1 %v765_v21 }
  0x18   :  { %681 = vmatpush3.bf16.msra.mxu0 %v766_v22 }
  0x19   :  { %709 = vmatpush3.bf16.msra.mxu1 %v767_v23  ;;  %682 = vmatprep.subr.bf16.mxu0 %v768_v24 }
  0x1a   :  { %710 = vmatprep.subr.bf16.mxu1 %v769_v25 }
  0x1c   :  { %683 = vmatpush3.bf16.msra.mxu0 %v770_v26 }
  0x1d   :  { %711 = vmatpush3.bf16.msra.mxu1 %v771_v27  ;;  %684 = vmatprep.subr.bf16.mxu0 %v772_v28 }
  0x1e   :  { %712 = vmatprep.subr.bf16.mxu1 %v773_v29 }
  0x20   :  { %685 = vmatpush3.bf16.msra.mxu0 %v774_v30 }
  0x21   :  { %713 = vmatpush3.bf16.msra.mxu1 %v775_v31  ;;  %732 = vmatprep.subr.bf16.mxu0 %v782_v36 }
  0x23   :  { %405 = vmatmul.mubr.bf16.vlgmr.msra.gmra.mrb[0].mxu0 %v776_v32 }
  0x24   :  { %454 = vmatmul.mubr.bf16.vlgmr.msra.gmra.mrb[0].mxu1 %v779_v34  ;;  %733 = vmatpush3.bf16.msra.mxu0 %v782_v36 }
  0x25   :  { %734 = vmatprep.subr.bf16.mxu0 %v783_v37  ;;  %412 = vmatprep.mubr.bf16.mxu0 %v784_v38 }
  0x26   :  { %461 = vmatprep.mubr.bf16.mxu1 %v786_v39 }
  0x28   :  { %735 = vmatpush3.bf16.msra.mxu0 %v783_v37 }
  0x29   :  { %736 = vmatprep.subr.bf16.mxu0 %v790_v41 }
  0x2b   :  { %413 = vmatmul.mubr.bf16.gmra.mrb[4].mxu0 %v788_v40 }
  0x2c   :  { %462 = vmatmul.mubr.bf16.gmra.mrb[4].mxu1 %v789_v42  ;;  %740 = vmatprep.mubr.msk.bf16.mxu0 %vm365_vm0, %v792_v43 }
  0x2d   :  { %737 = vmatpush3.bf16.msra.mxu0 %v790_v41 }
  0x2e   :  { %738 = vmatprep.subr.bf16.mxu0 %v791_v44 }
  0x31   :  { %739 = vmatpush3.bf16.msra.mxu0 %v791_v44 }
  0x34   :  { %741 = vmatmul.mubr.msk.bf16.vlgmr.msra.gmra.mrb[8].mxu0 %vm365_vm0, %v793_v45 }
  0xf6   :  { %v686_v46 = vpop.f32.mrb[0].mxu0 }
  0xf7   :  { %v714_v47 = vpop.f32.mrb[0].mxu1  ;;  %v687_v48 = vpop.f32.mrb[1].mxu0 }
  0xf8   :  { %v688_v49 = vadd.f32 %v687_v48, %v686_v46  ;;  %v715_v50 = vpop.f32.mrb[1].mxu1  ;;  %v689_v51 = vpop.f32.mrb[2].mxu0 }
  0xf9   :  { %v716_v52 = vadd.f32 %v715_v50, %v714_v47  ;;  %v717_v53 = vpop.f32.mrb[2].mxu1  ;;  %v690_v54 = vpop.f32.mrb[3].mxu0 }
  0xfa   :  { %v691_v55 = vadd.f32 %v690_v54, %v689_v51  ;;  %v718_v56 = vpop.f32.mrb[3].mxu1 }
  0xfb   :  { %v719_v57 = vadd.f32 %v718_v56, %v717_v53  ;;  %v456_v58 = vadd.f32 %v716_v52, %v688_v49 }
  0xfd   :  { %v459_v59 = vadd.f32 %v719_v57, %v691_v55 }
  0xfe   :  { %v692_v60 = vpop.f32.mrb[4].mxu0 }
  0xff   :  { %v720_v61 = vpop.f32.mrb[4].mxu1  ;;  %v693_v62 = vpop.f32.mrb[5].mxu0 }
 0x100   :  { %v694_v63 = vadd.f32 %v693_v62, %v692_v60  ;;  %v721_v0 = vpop.f32.mrb[5].mxu1  ;;  %v695_v1 = vpop.f32.mrb[6].mxu0 }
 0x101   :  { %v722_v2 = vadd.f32 %v721_v0, %v720_v61  ;;  %v723_v3 = vpop.f32.mrb[6].mxu1  ;;  %v696_v4 = vpop.f32.mrb[7].mxu0 }
 0x102   :  { %v697_v5 = vadd.f32 %v696_v4, %v695_v1  ;;  %v724_v6 = vpop.f32.mrb[7].mxu1 }
 0x103   :  { %v725_v7 = vadd.f32 %v724_v6, %v723_v3  ;;  %v464_v8 = vadd.f32 %v722_v2, %v694_v63 }
 0x105   :  { %v467_v9 = vadd.f32 %v725_v7, %v697_v5 }
 0x107   :  { %v742_v10 = vpop.f32.mrb[8].mxu0 }
 0x108   :  { %v513_v11 = vadd.f32 %v742_v10, %v464_v8  ;;  %v504_v12 = vpop.f32.mrb[9].mxu0 }
 0x109   :  { %v505_v13 = vadd.f32 %v504_v12, %v456_v58  ;;  %v743_v14 = vpop.f32.mrb[10].mxu0  ;;  %v662_v58 = vld [vmem:[%s984_s2] sm:$0xff]  }
 0x10a   :  { %v516_v15 = vadd.f32 %v743_v14, %v467_v9  ;;  %v507_v16 = vpop.f32.mrb[11].mxu0  ;;  %v535_v19 = vmul.f32 %v513_v11, %v513_v11  ;;  %v522_v24 = vsel %vm365_vm0, %v513_v11, 0.0  ;;  %v663_v60 = vunpack.c.l.bf16 %v662_v58 }
 0x10b   :  { %v533_v17 = vmul.f32 %v505_v13, %v505_v13  ;;  %v508_v18 = vadd.f32 %v507_v16, %v459_v59  ;;  %v519_v20 = vsel %vm365_vm0, %v505_v13, 0.0  ;;  %v669_v59 = vld [vmem:[%s984_s2 + $0x8] sm:$0xff]   ;;  %v664_v61 = vunpack.c.h.bf16 %v662_v58 }
 0x10c   :  { %v536_v26 = vmul.f32 %v516_v15, %v516_v15  ;;  %v540_v30 = vsel %vm365_vm0, %v535_v19, 0.0  ;;  %v524_v31 = vsel %vm365_vm0, %v516_v15, 0.0  ;;  %v667_v62 = vunpack.c.l.bf16 %v669_v59 }
 0x10d   :  { %v520_v21 = vsel %vm365_vm0, %v508_v18, 0.0  ;;  %v534_v22 = vmul.f32 %v508_v18, %v508_v18  ;;  %v537_v25 = vsel %vm365_vm0, %v533_v17, 0.0  ;;  %v668_v63 = vunpack.c.h.bf16 %v669_v59 }
 0x10e   :  { %v521_v23 = vadd.f32 %v520_v21, %v519_v20  ;;  %v542_v34 = vsel %vm365_vm0, %v536_v26, 0.0 }
 0x10f   :  { %v538_v27 = vsel %vm365_vm0, %v534_v22, 0.0 }
 0x110   :  { %v523_v28 = vadd.f32 %v522_v24, %v521_v23  ;;  %v539_v29 = vadd.f32 %v538_v27, %v537_v25 }
 0x112   :  { %v525_v32 = vadd.f32 %v524_v31, %v523_v28  ;;  %v541_v33 = vadd.f32 %v540_v30, %v539_v29 }
 0x114   :  { %v526_v35 = vrot.slane %v525_v32, 4  ;;  %v543_v36 = vadd.f32 %v542_v34, %v541_v33 }
 0x116   :  { %v527_v37 = vadd.f32 %v526_v35, %v525_v32  ;;  %v544_v38 = vrot.slane %v543_v36, 4 }
 0x118   :  { %v528_v39 = vrot.slane %v527_v37, 2  ;;  %v545_v40 = vadd.f32 %v544_v38, %v543_v36 }
 0x11a   :  { %v529_v41 = vadd.f32 %v528_v39, %v527_v37  ;;  %v546_v42 = vrot.slane %v545_v40, 2 }
 0x11c   :  { %v530_v43 = vrot.slane %v529_v41, 1  ;;  %v547_v44 = vadd.f32 %v546_v42, %v545_v40 }
 0x11e   :  { %v531_v45 = vadd.f32 %v530_v43, %v529_v41  ;;  %v548_v46 = vrot.slane %v547_v44, 1 }
 0x120   :  { %v532_v47 = vmul.f32 0.03125, %v531_v45  ;;  %v549_v48 = vadd.f32 %v548_v46, %v547_v44 }
 0x122   :  { %v550_v49 = vmul.f32 0.03125, %v549_v48  ;;  %v551_v50 = vmul.f32 %v532_v47, %v532_v47  ;;  %v554_v51 = vsub.f32 %v505_v13, %v532_v47  ;;  %v555_v52 = vsub.f32 %v508_v18, %v532_v47 }
 0x123   :  { %v556_v53 = vsub.f32 %v513_v11, %v532_v47  ;;  %v557_v54 = vsub.f32 %v516_v15, %v532_v47 }
 0x124   :  { %v552_v55 = vsub.f32 %v550_v49, %v551_v50 }
 0x126   :  { %v553_v56 = vmax.f32 %v552_v55, 0.0 }
 0x128   :  { %v558_v57 = vadd.f32 1e-05, %v553_v56 }
 0x12a   :  { %794 = vrsqrt.f32 %v558_v57 }
 0x134   :  { %v795_v0 = vpop.eup %794 }
 0x135   :  { %v560_v1 = vmul.f32 %v795_v0, %v554_v51  ;;  %v561_v2 = vmul.f32 %v795_v0, %v555_v52  ;;  %v562_v3 = vmul.f32 %v795_v0, %v556_v53  ;;  %v563_v4 = vmul.f32 %v795_v0, %v557_v54 }
 0x137   :  { %v572_v5 = vadd.f32 %v663_v60, %v560_v1  ;;  %v573_v6 = vadd.f32 %v664_v61, %v561_v2  ;;  %v574_v7 = vadd.f32 %v667_v62, %v562_v3  ;;  %v575_v8 = vadd.f32 %v668_v63, %v563_v4 }
 0x139   :  { %v576_v9 = vmax.f32 %v572_v5, 0.0  ;;  %v577_v10 = vmax.f32 %v573_v6, 0.0  ;;  %v578_v11 = vmax.f32 %v574_v7, 0.0  ;;  %v579_v12 = vmax.f32 %v575_v8, 0.0 }
 0x13b   :  { %v657_v13 = vpack.c.bf16 %v576_v9, %v576_v9  ;;  %v658_v14 = vpack.c.bf16 %v577_v10, %v577_v10  ;;  %v659_v15 = vpack.c.bf16 %v578_v11, %v578_v11  ;;  %v660_v16 = vpack.c.bf16 %v579_v12, %v579_v12 }
 0x13d   :  { %597 = vst.msk [vmem:[%s985_s3] sm:$0xf] %vm596_vm1, %v657_v13  ;;  %598 = vst.msk [vmem:[%s985_s3 + $0x4] sm:$0xf] %vm596_vm1, %v658_v14 }
 0x13e   :  { %599 = vst.msk [vmem:[%s985_s3 + $0x8] sm:$0xf] %vm596_vm1, %v659_v15  ;;  %600 = vst.msk [vmem:[%s985_s3 + $0xc] sm:$0xf] %vm596_vm1, %v660_v16 }

// kernel: _lambda_.16
= control target key start
LH: loop header
LB: loop body
LE: loop exit
PB: predicated region body
PF: predicated region fallthrough
CT: control target
= control target key end

     0   :  { %vm362_vm0 = vcmask 523264   ;;  %vm581_vm1 = vcmask 519168   ;;  %s947_s1 = inlined_call_operand.vmem [shape: bf16[576,64], index: 1, kind: input, shape index: {}]   ;;  %s948_s0 = inlined_call_operand.vmem [shape: bf16[32,576], index: 0, kind: input, shape index: {}]   ;;  %s949_s2 = inlined_call_operand.vmem [shape: bf16[32,64], index: 2, kind: output, shape index: {}]  }
   0x1   :  { %v720_v0 = vld [vmem:[%s947_s1 + $0x40] sm:$0xff]   ;;  %v724_v4 = vld [vmem:[%s947_s1 + $0x48] sm:$0xff]   ;;  %v728_v8 = vld [vmem:[%s947_s1 + $0x50] sm:$0xff]  }
   0x2   :  { %v721_v1 = vld [vmem:[%s947_s1 + $0xc0] sm:$0xff]   ;;  %646 = vmatprep.subr.bf16.mxu0 %v720_v0  ;;  %v725_v5 = vld [vmem:[%s947_s1 + $0xc8] sm:$0xff]   ;;  %v729_v9 = vld [vmem:[%s947_s1 + $0xd0] sm:$0xff]  }
   0x3   :  { %v722_v2 = vld [vmem:[%s947_s1] sm:$0xff]   ;;  %674 = vmatprep.subr.bf16.mxu1 %v721_v1  ;;  %v726_v6 = vld [vmem:[%s947_s1 + $0x8] sm:$0xff]   ;;  %v730_v10 = vld [vmem:[%s947_s1 + $0x10] sm:$0xff]  }
   0x4   :  { %v723_v3 = vld [vmem:[%s947_s1 + $0x80] sm:$0xff]   ;;  %647 = vmatpush3.bf16.msra.mxu0 %v722_v2  ;;  %v727_v7 = vld [vmem:[%s947_s1 + $0x88] sm:$0xff]   ;;  %v731_v11 = vld [vmem:[%s947_s1 + $0x90] sm:$0xff]  }
   0x5   :  { %675 = vmatpush3.bf16.msra.mxu1 %v723_v3  ;;  %648 = vmatprep.subr.bf16.mxu0 %v724_v4  ;;  %v732_v12 = vld [vmem:[%s947_s1 + $0x58] sm:$0xff]   ;;  %v736_v16 = vld [vmem:[%s947_s1 + $0x60] sm:$0xff]   ;;  %v740_v20 = vld [vmem:[%s947_s1 + $0x68] sm:$0xff]  }
   0x6   :  { %676 = vmatprep.subr.bf16.mxu1 %v725_v5  ;;  %v733_v13 = vld [vmem:[%s947_s1 + $0xd8] sm:$0xff]   ;;  %v737_v17 = vld [vmem:[%s947_s1 + $0xe0] sm:$0xff]   ;;  %v741_v21 = vld [vmem:[%s947_s1 + $0xe8] sm:$0xff]  }
   0x7   :  { %v734_v14 = vld [vmem:[%s947_s1 + $0x18] sm:$0xff]   ;;  %v738_v18 = vld [vmem:[%s947_s1 + $0x20] sm:$0xff]   ;;  %v742_v22 = vld [vmem:[%s947_s1 + $0x28] sm:$0xff]  }
   0x8   :  { %649 = vmatpush3.bf16.msra.mxu0 %v726_v6  ;;  %v735_v15 = vld [vmem:[%s947_s1 + $0x98] sm:$0xff]   ;;  %v739_v19 = vld [vmem:[%s947_s1 + $0xa0] sm:$0xff]   ;;  %v743_v23 = vld [vmem:[%s947_s1 + $0xa8] sm:$0xff]  }
   0x9   :  { %677 = vmatpush3.bf16.msra.mxu1 %v727_v7  ;;  %650 = vmatprep.subr.bf16.mxu0 %v728_v8  ;;  %v744_v24 = vld [vmem:[%s947_s1 + $0x70] sm:$0xff]   ;;  %v748_v28 = vld [vmem:[%s947_s1 + $0x78] sm:$0xff]   ;;  %v757_v35 = vld [vmem:[%s948_s0 + $0xc] ss:$20 sps:$4 sm:$0xff]  }
   0xa   :  { %678 = vmatprep.subr.bf16.mxu1 %v729_v9  ;;  %v745_v25 = vld [vmem:[%s947_s1 + $0xf0] sm:$0xff]   ;;  %v749_v29 = vld [vmem:[%s947_s1 + $0xf8] sm:$0xff]   ;;  %v758_v36 = vld [vmem:[%s947_s1 + $0x100] sm:$0xff]   ;;  %450 = vmatprep.mubr.bf16.mxu1 %v757_v35 }
   0xb   :  { %v746_v26 = vld [vmem:[%s947_s1 + $0x30] sm:$0xff]   ;;  %v750_v30 = vld [vmem:[%s947_s1 + $0x38] sm:$0xff]   ;;  %v759_v37 = vld [vmem:[%s947_s1 + $0x108] sm:$0xff]  }
   0xc   :  { %651 = vmatpush3.bf16.msra.mxu0 %v730_v10  ;;  %v747_v27 = vld [vmem:[%s947_s1 + $0xb0] sm:$0xff]   ;;  %v751_v31 = vld [vmem:[%s947_s1 + $0xb8] sm:$0xff]   ;;  %v760_v38 = vld [vmem:[%s948_s0 + $0x2c] ss:$20 sps:$4 sm:$0xff]  }
   0xd   :  { %679 = vmatpush3.bf16.msra.mxu1 %v731_v11  ;;  %652 = vmatprep.subr.bf16.mxu0 %v732_v12  ;;  %v752_v32 = vld [vmem:[%s948_s0] ss:$20 sps:$4 sm:$0xff]   ;;  %v754_v33 = vld [vmem:[%s948_s0 + $0x4] ss:$20 sps:$4 sm:$0xff]   ;;  %v755_v34 = vld [vmem:[%s948_s0 + $0x8] ss:$20 sps:$4 sm:$0xff]  }
   0xe   :  { %680 = vmatprep.subr.bf16.mxu1 %v733_v13  ;;  %401 = vmatprep.mubr.bf16.mxu0 %v754_v33  ;;  %v762_v39 = vld [vmem:[%s948_s0 + $0x34] ss:$20 sps:$4 sm:$0xff]   ;;  %v765_v42 = vld [vmem:[%s948_s0 + $0x30] ss:$20 sps:$4 sm:$0xff]   ;;  %v767_v44 = vld [vmem:[%s947_s1 + $0x118] sm:$0xff]  }
   0xf   :  { %v764_v40 = vld [vmem:[%s948_s0 + $0x28] ss:$20 sps:$4 sm:$0xff]   ;;  %v766_v41 = vld [vmem:[%s947_s1 + $0x110] sm:$0xff]   ;;  %v769_v45 = vld [vmem:[%s948_s0 + $0x38] ss:$20 sps:$4 sm:$0xff]  }
  0x10   :  { %653 = vmatpush3.bf16.msra.mxu0 %v734_v14  ;;  %v768_v43 = vld [vmem:[%s948_s0 + $0x10] ss:$20 sps:$4 sm:$0xff]  }
  0x11   :  { %681 = vmatpush3.bf16.msra.mxu1 %v735_v15  ;;  %654 = vmatprep.subr.bf16.mxu0 %v736_v16 }
  0x12   :  { %682 = vmatprep.subr.bf16.mxu1 %v737_v17 }
  0x14   :  { %655 = vmatpush3.bf16.msra.mxu0 %v738_v18 }
  0x15   :  { %683 = vmatpush3.bf16.msra.mxu1 %v739_v19  ;;  %656 = vmatprep.subr.bf16.mxu0 %v740_v20 }
  0x16   :  { %684 = vmatprep.subr.bf16.mxu1 %v741_v21 }
  0x18   :  { %657 = vmatpush3.bf16.msra.mxu0 %v742_v22 }
  0x19   :  { %685 = vmatpush3.bf16.msra.mxu1 %v743_v23  ;;  %658 = vmatprep.subr.bf16.mxu0 %v744_v24 }
  0x1a   :  { %686 = vmatprep.subr.bf16.mxu1 %v745_v25 }
  0x1c   :  { %659 = vmatpush3.bf16.msra.mxu0 %v746_v26 }
  0x1d   :  { %687 = vmatpush3.bf16.msra.mxu1 %v747_v27  ;;  %660 = vmatprep.subr.bf16.mxu0 %v748_v28 }
  0x1e   :  { %688 = vmatprep.subr.bf16.mxu1 %v749_v29 }
  0x20   :  { %661 = vmatpush3.bf16.msra.mxu0 %v750_v30 }
  0x21   :  { %689 = vmatpush3.bf16.msra.mxu1 %v751_v31  ;;  %708 = vmatprep.subr.bf16.mxu0 %v758_v36 }
  0x23   :  { %402 = vmatmul.mubr.bf16.vlgmr.msra.gmra.mrb[0].mxu0 %v752_v32 }
  0x24   :  { %451 = vmatmul.mubr.bf16.vlgmr.msra.gmra.mrb[0].mxu1 %v755_v34  ;;  %709 = vmatpush3.bf16.msra.mxu0 %v758_v36 }
  0x25   :  { %710 = vmatprep.subr.bf16.mxu0 %v759_v37  ;;  %409 = vmatprep.mubr.bf16.mxu0 %v760_v38 }
  0x26   :  { %458 = vmatprep.mubr.bf16.mxu1 %v762_v39 }
  0x28   :  { %711 = vmatpush3.bf16.msra.mxu0 %v759_v37 }
  0x29   :  { %712 = vmatprep.subr.bf16.mxu0 %v766_v41 }
  0x2b   :  { %410 = vmatmul.mubr.bf16.gmra.mrb[4].mxu0 %v764_v40 }
  0x2c   :  { %459 = vmatmul.mubr.bf16.gmra.mrb[4].mxu1 %v765_v42  ;;  %716 = vmatprep.mubr.msk.bf16.mxu0 %vm362_vm0, %v768_v43 }
  0x2d   :  { %713 = vmatpush3.bf16.msra.mxu0 %v766_v41 }
  0x2e   :  { %714 = vmatprep.subr.bf16.mxu0 %v767_v44 }
  0x31   :  { %715 = vmatpush3.bf16.msra.mxu0 %v767_v44 }
  0x34   :  { %717 = vmatmul.mubr.msk.bf16.vlgmr.msra.gmra.mrb[8].mxu0 %vm362_vm0, %v769_v45 }
  0xf6   :  { %v662_v46 = vpop.f32.mrb[0].mxu0 }
  0xf7   :  { %v690_v47 = vpop.f32.mrb[0].mxu1  ;;  %v663_v48 = vpop.f32.mrb[1].mxu0 }
  0xf8   :  { %v664_v49 = vadd.f32 %v663_v48, %v662_v46  ;;  %v691_v50 = vpop.f32.mrb[1].mxu1  ;;  %v665_v51 = vpop.f32.mrb[2].mxu0 }
  0xf9   :  { %v692_v52 = vadd.f32 %v691_v50, %v690_v47  ;;  %v693_v53 = vpop.f32.mrb[2].mxu1  ;;  %v666_v54 = vpop.f32.mrb[3].mxu0 }
  0xfa   :  { %v667_v55 = vadd.f32 %v666_v54, %v665_v51  ;;  %v694_v56 = vpop.f32.mrb[3].mxu1 }
  0xfb   :  { %v695_v57 = vadd.f32 %v694_v56, %v693_v53  ;;  %v453_v58 = vadd.f32 %v692_v52, %v664_v49 }
  0xfd   :  { %v456_v59 = vadd.f32 %v695_v57, %v667_v55 }
  0xfe   :  { %v668_v60 = vpop.f32.mrb[4].mxu0 }
  0xff   :  { %v696_v61 = vpop.f32.mrb[4].mxu1  ;;  %v669_v62 = vpop.f32.mrb[5].mxu0 }
 0x100   :  { %v670_v63 = vadd.f32 %v669_v62, %v668_v60  ;;  %v697_v0 = vpop.f32.mrb[5].mxu1  ;;  %v671_v1 = vpop.f32.mrb[6].mxu0 }
 0x101   :  { %v698_v2 = vadd.f32 %v697_v0, %v696_v61  ;;  %v699_v3 = vpop.f32.mrb[6].mxu1  ;;  %v672_v4 = vpop.f32.mrb[7].mxu0 }
 0x102   :  { %v673_v5 = vadd.f32 %v672_v4, %v671_v1  ;;  %v700_v6 = vpop.f32.mrb[7].mxu1 }
 0x103   :  { %v701_v7 = vadd.f32 %v700_v6, %v699_v3  ;;  %v461_v8 = vadd.f32 %v698_v2, %v670_v63 }
 0x105   :  { %v464_v9 = vadd.f32 %v701_v7, %v673_v5 }
 0x107   :  { %v718_v10 = vpop.f32.mrb[8].mxu0 }
 0x108   :  { %v510_v11 = vadd.f32 %v718_v10, %v461_v8  ;;  %v501_v12 = vpop.f32.mrb[9].mxu0 }
 0x109   :  { %v502_v13 = vadd.f32 %v501_v12, %v453_v58  ;;  %v719_v14 = vpop.f32.mrb[10].mxu0 }
 0x10a   :  { %v513_v15 = vadd.f32 %v719_v14, %v464_v9  ;;  %v504_v16 = vpop.f32.mrb[11].mxu0  ;;  %v532_v19 = vmul.f32 %v510_v11, %v510_v11  ;;  %v519_v24 = vsel %vm362_vm0, %v510_v11, 0.0 }
 0x10b   :  { %v530_v17 = vmul.f32 %v502_v13, %v502_v13  ;;  %v505_v18 = vadd.f32 %v504_v16, %v456_v59  ;;  %v516_v20 = vsel %vm362_vm0, %v502_v13, 0.0 }
 0x10c   :  { %v533_v26 = vmul.f32 %v513_v15, %v513_v15  ;;  %v537_v30 = vsel %vm362_vm0, %v532_v19, 0.0  ;;  %v521_v31 = vsel %vm362_vm0, %v513_v15, 0.0 }
 0x10d   :  { %v517_v21 = vsel %vm362_vm0, %v505_v18, 0.0  ;;  %v531_v22 = vmul.f32 %v505_v18, %v505_v18  ;;  %v534_v25 = vsel %vm362_vm0, %v530_v17, 0.0 }
 0x10e   :  { %v518_v23 = vadd.f32 %v517_v21, %v516_v20  ;;  %v539_v34 = vsel %vm362_vm0, %v533_v26, 0.0 }
 0x10f   :  { %v535_v27 = vsel %vm362_vm0, %v531_v22, 0.0 }
 0x110   :  { %v520_v28 = vadd.f32 %v519_v24, %v518_v23  ;;  %v536_v29 = vadd.f32 %v535_v27, %v534_v25 }
 0x112   :  { %v522_v32 = vadd.f32 %v521_v31, %v520_v28  ;;  %v538_v33 = vadd.f32 %v537_v30, %v536_v29 }
 0x114   :  { %v523_v35 = vrot.slane %v522_v32, 4  ;;  %v540_v36 = vadd.f32 %v539_v34, %v538_v33 }
 0x116   :  { %v524_v37 = vadd.f32 %v523_v35, %v522_v32  ;;  %v541_v38 = vrot.slane %v540_v36, 4 }
 0x118   :  { %v525_v39 = vrot.slane %v524_v37, 2  ;;  %v542_v40 = vadd.f32 %v541_v38, %v540_v36 }
 0x11a   :  { %v526_v41 = vadd.f32 %v525_v39, %v524_v37  ;;  %v543_v42 = vrot.slane %v542_v40, 2 }
 0x11c   :  { %v527_v43 = vrot.slane %v526_v41, 1  ;;  %v544_v44 = vadd.f32 %v543_v42, %v542_v40 }
 0x11e   :  { %v528_v45 = vadd.f32 %v527_v43, %v526_v41  ;;  %v545_v46 = vrot.slane %v544_v44, 1 }
 0x120   :  { %v529_v47 = vmul.f32 0.03125, %v528_v45  ;;  %v546_v48 = vadd.f32 %v545_v46, %v544_v44 }
 0x122   :  { %v547_v49 = vmul.f32 0.03125, %v546_v48  ;;  %v548_v50 = vmul.f32 %v529_v47, %v529_v47  ;;  %v551_v51 = vsub.f32 %v502_v13, %v529_v47  ;;  %v552_v52 = vsub.f32 %v505_v18, %v529_v47 }
 0x123   :  { %v553_v53 = vsub.f32 %v510_v11, %v529_v47  ;;  %v554_v54 = vsub.f32 %v513_v15, %v529_v47 }
 0x124   :  { %v549_v55 = vsub.f32 %v547_v49, %v548_v50 }
 0x126   :  { %v550_v56 = vmax.f32 %v549_v55, 0.0 }
 0x128   :  { %v555_v57 = vadd.f32 1e-05, %v550_v56 }
 0x12a   :  { %770 = vrsqrt.f32 %v555_v57 }
 0x134   :  { %v771_v58 = vpop.eup %770 }
 0x135   :  { %v557_v59 = vmul.f32 %v771_v58, %v551_v51  ;;  %v558_v60 = vmul.f32 %v771_v58, %v552_v52  ;;  %v559_v61 = vmul.f32 %v771_v58, %v553_v53  ;;  %v560_v62 = vmul.f32 %v771_v58, %v554_v54 }
 0x137   :  { %v561_v63 = vmax.f32 %v557_v59, 0.0  ;;  %v562_v0 = vmax.f32 %v558_v60, 0.0  ;;  %v563_v1 = vmax.f32 %v559_v61, 0.0  ;;  %v564_v2 = vmax.f32 %v560_v62, 0.0 }
 0x139   :  { %v642_v3 = vpack.c.bf16 %v561_v63, %v561_v63  ;;  %v643_v4 = vpack.c.bf16 %v562_v0, %v562_v0  ;;  %v644_v5 = vpack.c.bf16 %v563_v1, %v563_v1  ;;  %v645_v6 = vpack.c.bf16 %v564_v2, %v564_v2 }
 0x13b   :  { %582 = vst.msk [vmem:[%s949_s2] sm:$0xf] %vm581_vm1, %v642_v3  ;;  %583 = vst.msk [vmem:[%s949_s2 + $0x4] sm:$0xf] %vm581_vm1, %v643_v4 }
 0x13c   :  { %584 = vst.msk [vmem:[%s949_s2 + $0x8] sm:$0xf] %vm581_vm1, %v644_v5  ;;  %585 = vst.msk [vmem:[%s949_s2 + $0xc] sm:$0xf] %vm581_vm1, %v645_v6 }

// kernel: _lambda_.18
= control target key start
LH: loop header
LB: loop body
LE: loop exit
PB: predicated region body
PF: predicated region fallthrough
CT: control target
= control target key end

     0   :  { %v621_v36 = vmov 0.0   ;;  %vm622_vm0 = vmmov 0   ;;  %vm320_vm1 = vcmask 523264   ;;  %s758_s1 = inlined_call_operand.vmem [shape: bf16[576,128], index: 1, kind: input, shape index: {}]   ;;  %s759_s0 = inlined_call_operand.vmem [shape: bf16[8,576], index: 0, kind: input, shape index: {}]   ;;  %s760_s2 = inlined_call_operand.vmem [shape: bf16[8,128], index: 2, kind: output, shape index: {}]  }
   0x1   :  { %v578_v0 = vld [vmem:[%s758_s1 + $0x40] sm:$0xff]   ;;  %v582_v4 = vld [vmem:[%s758_s1 + $0x48] sm:$0xff]   ;;  %v586_v8 = vld [vmem:[%s758_s1 + $0x50] sm:$0xff]  }
   0x2   :  { %v579_v1 = vld [vmem:[%s758_s1 + $0xc0] sm:$0xff]   ;;  %515 = vmatprep.subr.bf16.mxu0 %v578_v0  ;;  %v583_v5 = vld [vmem:[%s758_s1 + $0xc8] sm:$0xff]   ;;  %v587_v9 = vld [vmem:[%s758_s1 + $0xd0] sm:$0xff]  }
   0x3   :  { %v580_v2 = vld [vmem:[%s758_s1] sm:$0xff]   ;;  %537 = vmatprep.subr.bf16.mxu1 %v579_v1  ;;  %v584_v6 = vld [vmem:[%s758_s1 + $0x8] sm:$0xff]   ;;  %v588_v10 = vld [vmem:[%s758_s1 + $0x10] sm:$0xff]  }
   0x4   :  { %v581_v3 = vld [vmem:[%s758_s1 + $0x80] sm:$0xff]   ;;  %516 = vmatpush3.bf16.msra.mxu0 %v580_v2  ;;  %v585_v7 = vld [vmem:[%s758_s1 + $0x88] sm:$0xff]   ;;  %v589_v11 = vld [vmem:[%s758_s1 + $0x90] sm:$0xff]  }
   0x5   :  { %538 = vmatpush3.bf16.msra.mxu1 %v581_v3  ;;  %517 = vmatprep.subr.bf16.mxu0 %v582_v4  ;;  %v590_v12 = vld [vmem:[%s758_s1 + $0x58] sm:$0xff]   ;;  %v594_v16 = vld [vmem:[%s758_s1 + $0x60] sm:$0xff]   ;;  %v598_v20 = vld [vmem:[%s758_s1 + $0x68] sm:$0xff]  }
   0x6   :  { %539 = vmatprep.subr.bf16.mxu1 %v583_v5  ;;  %v591_v13 = vld [vmem:[%s758_s1 + $0xd8] sm:$0xff]   ;;  %v595_v17 = vld [vmem:[%s758_s1 + $0xe0] sm:$0xff]   ;;  %v599_v21 = vld [vmem:[%s758_s1 + $0xe8] sm:$0xff]  }
   0x7   :  { %v592_v14 = vld [vmem:[%s758_s1 + $0x18] sm:$0xff]   ;;  %v596_v18 = vld [vmem:[%s758_s1 + $0x20] sm:$0xff]   ;;  %v600_v22 = vld [vmem:[%s758_s1 + $0x28] sm:$0xff]  }
   0x8   :  { %518 = vmatpush3.bf16.msra.mxu0 %v584_v6  ;;  %v593_v15 = vld [vmem:[%s758_s1 + $0x98] sm:$0xff]   ;;  %v597_v19 = vld [vmem:[%s758_s1 + $0xa0] sm:$0xff]   ;;  %v601_v23 = vld [vmem:[%s758_s1 + $0xa8] sm:$0xff]  }
   0x9   :  { %540 = vmatpush3.bf16.msra.mxu1 %v585_v7  ;;  %519 = vmatprep.subr.bf16.mxu0 %v586_v8  ;;  %v602_v24 = vld [vmem:[%s758_s1 + $0x70] sm:$0xff]   ;;  %v606_v28 = vld [vmem:[%s758_s1 + $0x78] sm:$0xff]   ;;  %v12_v32 = vld [vmem:[%s759_s0] sm:$0xff] }
   0xa   :  { %541 = vmatprep.subr.bf16.mxu1 %v587_v9  ;;  %v603_v25 = vld [vmem:[%s758_s1 + $0xf0] sm:$0xff]   ;;  %v607_v29 = vld [vmem:[%s758_s1 + $0xf8] sm:$0xff]   ;;  %v473_v33 = vcombine.low %v12_v32, %v12_v32  ;;  %v474_v34 = vcombine.high %v12_v32, %v12_v32  ;;  %v13_v35 = vld [vmem:[%s759_s0 + $0x8] sm:$0xff] }
   0xb   :  { %v604_v26 = vld [vmem:[%s758_s1 + $0x30] sm:$0xff]   ;;  %v608_v30 = vld [vmem:[%s758_s1 + $0x38] sm:$0xff]   ;;  %v475_v37 = vcombine.low %v13_v35, %v13_v35  ;;  %v476_v38 = vcombine.high %v13_v35, %v13_v35  ;;  %v615_v39 = vld [vmem:[%s758_s1 + $0x100] sm:$0xff]  }
   0xc   :  { %520 = vmatpush3.bf16.msra.mxu0 %v588_v10  ;;  %v605_v27 = vld [vmem:[%s758_s1 + $0xb0] sm:$0xff]   ;;  %v609_v31 = vld [vmem:[%s758_s1 + $0xb8] sm:$0xff]   ;;  %356 = vmatprep.mubr.bf16.mxu0 %v474_v34  ;;  %v616_v40 = vld [vmem:[%s758_s1 + $0x108] sm:$0xff]  }
   0xd   :  { %542 = vmatpush3.bf16.msra.mxu1 %v589_v11  ;;  %521 = vmatprep.subr.bf16.mxu0 %v590_v12  ;;  %v617_v41 = vld [vmem:[%s758_s1 + $0x110] sm:$0xff]   ;;  %v618_v42 = vld [vmem:[%s758_s1 + $0x118] sm:$0xff]  }
   0xe   :  { %543 = vmatprep.subr.bf16.mxu1 %v591_v13  ;;  %396 = vmatprep.mubr.bf16.mxu1 %v476_v38  ;;  %v612_v43 = vld [vmem:[%s759_s0 + $0x10] ss:$0 sps:$4 sm:$0xff]  }
  0x10   :  { %522 = vmatpush3.bf16.msra.mxu0 %v592_v14 }
  0x11   :  { %544 = vmatpush3.bf16.msra.mxu1 %v593_v15  ;;  %523 = vmatprep.subr.bf16.mxu0 %v594_v16 }
  0x12   :  { %545 = vmatprep.subr.bf16.mxu1 %v595_v17 }
  0x14   :  { %524 = vmatpush3.bf16.msra.mxu0 %v596_v18 }
  0x15   :  { %546 = vmatpush3.bf16.msra.mxu1 %v597_v19  ;;  %525 = vmatprep.subr.bf16.mxu0 %v598_v20 }
  0x16   :  { %547 = vmatprep.subr.bf16.mxu1 %v599_v21 }
  0x18   :  { %526 = vmatpush3.bf16.msra.mxu0 %v600_v22 }
  0x19   :  { %548 = vmatpush3.bf16.msra.mxu1 %v601_v23  ;;  %527 = vmatprep.subr.bf16.mxu0 %v602_v24 }
  0x1a   :  { %549 = vmatprep.subr.bf16.mxu1 %v603_v25 }
  0x1c   :  { %528 = vmatpush3.bf16.msra.mxu0 %v604_v26 }
  0x1d   :  { %550 = vmatpush3.bf16.msra.mxu1 %v605_v27  ;;  %529 = vmatprep.subr.bf16.mxu0 %v606_v28 }
  0x1e   :  { %551 = vmatprep.subr.bf16.mxu1 %v607_v29 }
  0x20   :  { %530 = vmatpush3.bf16.msra.mxu0 %v608_v30 }
  0x21   :  { %552 = vmatpush3.bf16.msra.mxu1 %v609_v31  ;;  %564 = vmatprep.subr.bf16.mxu0 %v621_v36 }
  0x23   :  { %357 = vmatmul.mubr.bf16.vlgmr.msra.gmra.mrb[0].mxu0 %v473_v33 }
  0x24   :  { %397 = vmatmul.mubr.bf16.vlgmr.msra.gmra.mrb[0].mxu1 %v475_v37  ;;  %565 = vmatpush3.bf16.msra.mxu0 %v615_v39 }
  0x25   :  { %566 = vmatprep.subr.bf16.mxu0 %v621_v36  ;;  %572 = vmatprep.mubr.msk.bf16.mxu0 %vm622_vm0, %v621_v36 }
  0x28   :  { %567 = vmatpush3.bf16.msra.mxu0 %v616_v40 }
  0x29   :  { %568 = vmatprep.subr.bf16.mxu0 %v621_v36 }
  0x2c   :  { %569 = vmatpush3.bf16.msra.mxu0 %v617_v41 }
  0x2d   :  { %570 = vmatprep.subr.bf16.mxu0 %v621_v36 }
  0x30   :  { %571 = vmatpush3.bf16.msra.mxu0 %v618_v42 }
  0x33   :  { %573 = vmatmul.mubr.msk.bf16.vlgmr.msra.gmra.mrb[4].mxu0 %vm320_vm1, %v612_v43 }
  0xf6   :  { %v531_v44 = vpop.f32.mrb[0].mxu0 }
  0xf7   :  { %v553_v45 = vpop.f32.mrb[0].mxu1  ;;  %v532_v46 = vpop.f32.mrb[1].mxu0 }
  0xf8   :  { %v533_v47 = vadd.f32 %v532_v46, %v531_v44  ;;  %v554_v48 = vpop.f32.mrb[1].mxu1  ;;  %v534_v49 = vpop.f32.mrb[2].mxu0 }
  0xf9   :  { %v555_v50 = vadd.f32 %v554_v48, %v553_v45  ;;  %v535_v51 = vpop.f32.mrb[3].mxu0  ;;  %v556_v52 = vpop.f32.mrb[2].mxu1 }
  0xfa   :  { %v557_v53 = vpop.f32.mrb[3].mxu1 }
  0xfb   :  { %v399_v54 = vadd.f32 %v555_v50, %v533_v47 }
 0x106   :  { %v438_v55 = vpop.f32.mrb[4].mxu0 }
 0x107   :  { %v439_v56 = vadd.f32 %v438_v55, %v399_v54  ;;  %v574_v57 = vpop.f32.mrb[5].mxu0 }
 0x108   :  { %v441_v58 = vpop.f32.mrb[6].mxu0 }
 0x109   :  { %v444_v59 = vrot.slane %v439_v56, 4  ;;  %v451_v60 = vmul.f32 %v439_v56, %v439_v56  ;;  %v575_v61 = vpop.f32.mrb[7].mxu0 }
 0x10b   :  { %v445_v62 = vadd.f32 %v444_v59, %v439_v56  ;;  %v452_v63 = vrot.slane %v451_v60, 4 }
 0x10d   :  { %v446_v0 = vrot.slane %v445_v62, 2  ;;  %v453_v1 = vadd.f32 %v452_v63, %v451_v60 }
 0x10f   :  { %v447_v2 = vadd.f32 %v446_v0, %v445_v62  ;;  %v454_v3 = vrot.slane %v453_v1, 2 }
 0x111   :  { %v448_v4 = vrot.slane %v447_v2, 1  ;;  %v455_v5 = vadd.f32 %v454_v3, %v453_v1 }
 0x113   :  { %v449_v6 = vadd.f32 %v448_v4, %v447_v2  ;;  %v456_v7 = vrot.slane %v455_v5, 1 }
 0x115   :  { %v450_v8 = vmul.f32 0.125, %v449_v6  ;;  %v457_v9 = vadd.f32 %v456_v7, %v455_v5 }
 0x117   :  { %v458_v10 = vmul.f32 0.125, %v457_v9  ;;  %v459_v11 = vmul.f32 %v450_v8, %v450_v8  ;;  %v462_v15 = vsub.f32 %v439_v56, %v450_v8 }
 0x119   :  { %v460_v12 = vsub.f32 %v458_v10, %v459_v11 }
 0x11b   :  { %v461_v13 = vmax.f32 %v460_v12, 0.0 }
 0x11d   :  { %v463_v14 = vadd.f32 1e-05, %v461_v13 }
 0x11f   :  { %619 = vrsqrt.f32 %v463_v14 }
 0x129   :  { %v620_v16 = vpop.eup %619 }
 0x12a   :  { %v465_v17 = vmul.f32 %v620_v16, %v462_v15 }
 0x12c   :  { %v466_v18 = vmax.f32 %v465_v17, 0.0 }
 0x12e   :  { %v467_v19 = vpack.c.bf16 %v466_v18, %v466_v18 }
 0x130   :  { %468 = vst [vmem:[%s760_s2] sm:$0xf] %v467_v19 }

// kernel: _lambda_.19
= control target key start
LH: loop header
LB: loop body
LE: loop exit
PB: predicated region body
PF: predicated region fallthrough
CT: control target
= control target key end

     0   :  { %v147_v0 = vmov 0.0   ;;  %vm148_vm0 = vmmov 0   ;;  %vm45_vm1 = vcmask 523264   ;;  %s182_s1 = inlined_call_operand.vmem [shape: bf16[64,128], index: 1, kind: input, shape index: {}]   ;;  %s183_s0 = inlined_call_operand.vmem [shape: bf16[8,64], index: 0, kind: input, shape index: {}]   ;;  %s184_s2 = inlined_call_operand.vmem [shape: bf16[8,128], index: 2, kind: output, shape index: {}]  }
   0x1   :  { %127 = vmatprep.subr.bf16.mxu0 %v147_v0  ;;  %v141_v1 = vld [vmem:[%s182_s1] sm:$0xff]   ;;  %135 = vmatprep.mubr.msk.bf16.mxu0 %vm148_vm0, %v147_v0  ;;  %v142_v2 = vld [vmem:[%s182_s1 + $0x8] sm:$0xff]   ;;  %v143_v3 = vld [vmem:[%s182_s1 + $0x10] sm:$0xff]  }
   0x2   :  { %128 = vmatpush3.bf16.msra.mxu0 %v141_v1  ;;  %v144_v4 = vld [vmem:[%s182_s1 + $0x18] sm:$0xff]   ;;  %v12_v5 = vld [vmem:[%s183_s0] sm:$0xf] }
   0x3   :  { %129 = vmatprep.subr.bf16.mxu0 %v147_v0 }
   0x6   :  { %130 = vmatpush3.bf16.msra.mxu0 %v142_v2 }
   0x7   :  { %131 = vmatprep.subr.bf16.mxu0 %v147_v0 }
   0xa   :  { %132 = vmatpush3.bf16.msra.mxu0 %v143_v3 }
   0xb   :  { %133 = vmatprep.subr.bf16.mxu0 %v147_v0 }
   0xe   :  { %134 = vmatpush3.bf16.msra.mxu0 %v144_v4 }
  0x11   :  { %136 = vmatmul.mubr.msk.bf16.vlgmr.msra.gmra.mrb[0].mxu0 %vm45_vm1, %v12_v5 }
  0xe4   :  { %v83_v6 = vpop.f32.mrb[0].mxu0 }
  0xe5   :  { %v89_v7 = vrot.slane %v83_v6, 4  ;;  %v96_v8 = vmul.f32 %v83_v6, %v83_v6  ;;  %v137_v9 = vpop.f32.mrb[1].mxu0 }
  0xe6   :  { %v86_v10 = vpop.f32.mrb[2].mxu0 }
  0xe7   :  { %v90_v11 = vadd.f32 %v89_v7, %v83_v6  ;;  %v97_v12 = vrot.slane %v96_v8, 4  ;;  %v138_v13 = vpop.f32.mrb[3].mxu0 }
  0xe9   :  { %v91_v14 = vrot.slane %v90_v11, 2  ;;  %v98_v15 = vadd.f32 %v97_v12, %v96_v8 }
  0xeb   :  { %v92_v16 = vadd.f32 %v91_v14, %v90_v11  ;;  %v99_v17 = vrot.slane %v98_v15, 2 }
  0xed   :  { %v93_v18 = vrot.slane %v92_v16, 1  ;;  %v100_v19 = vadd.f32 %v99_v17, %v98_v15 }
  0xef   :  { %v94_v20 = vadd.f32 %v93_v18, %v92_v16  ;;  %v101_v21 = vrot.slane %v100_v19, 1 }
  0xf1   :  { %v95_v22 = vmul.f32 0.125, %v94_v20  ;;  %v102_v23 = vadd.f32 %v101_v21, %v100_v19 }
  0xf3   :  { %v103_v24 = vmul.f32 0.125, %v102_v23  ;;  %v104_v25 = vmul.f32 %v95_v22, %v95_v22  ;;  %v107_v29 = vsub.f32 %v83_v6, %v95_v22 }
  0xf5   :  { %v105_v26 = vsub.f32 %v103_v24, %v104_v25 }
  0xf7   :  { %v106_v27 = vmax.f32 %v105_v26, 0.0 }
  0xf9   :  { %v108_v28 = vadd.f32 1e-05, %v106_v27 }
  0xfb   :  { %145 = vrsqrt.f32 %v108_v28 }
 0x105   :  { %v146_v30 = vpop.eup %145 }
 0x106   :  { %v110_v31 = vmul.f32 %v146_v30, %v107_v29 }
 0x108   :  { %v111_v32 = vpack.c.bf16 %v110_v31, %v110_v31 }
 0x10a   :  { %112 = vst [vmem:[%s184_s2] sm:$0xf] %v111_v32 }

// kernel: _lambda_.20
= control target key start
LH: loop header
LB: loop body
LE: loop exit
PB: predicated region body
PF: predicated region fallthrough
CT: control target
= control target key end

     0   :  { %vm1144_vm0 = vmmov 0   ;;  %s1402_s1 = inlined_call_operand.vmem [shape: bf16[1152,128], index: 1, kind: input, shape index: {}]   ;;  %s1403_s0 = inlined_call_operand.vmem [shape: bf16[8,1152], index: 0, kind: input, shape index: {}]   ;;  %s1404_s2 = inlined_call_operand.vmem [shape: bf16[8,128], index: 2, kind: input, shape index: {}]   ;;  %s1405_s3 = inlined_call_operand.vmem [shape: bf16[8,128], index: 3, kind: output, shape index: {}]  }
   0x1   :  { %v1060_v0 = vld [vmem:[%s1402_s1 + $0x40] sm:$0xff]   ;;  %v1064_v4 = vld [vmem:[%s1402_s1 + $0x48] sm:$0xff]   ;;  %v1068_v8 = vld [vmem:[%s1402_s1 + $0x50] sm:$0xff]  }
   0x2   :  { %v1061_v1 = vld [vmem:[%s1402_s1 + $0xc0] sm:$0xff]   ;;  %941 = vmatprep.subr.bf16.mxu0 %v1060_v0  ;;  %v1065_v5 = vld [vmem:[%s1402_s1 + $0xc8] sm:$0xff]   ;;  %v1069_v9 = vld [vmem:[%s1402_s1 + $0xd0] sm:$0xff]  }
   0x3   :  { %v1062_v2 = vld [vmem:[%s1402_s1] sm:$0xff]   ;;  %963 = vmatprep.subr.bf16.mxu1 %v1061_v1  ;;  %v1066_v6 = vld [vmem:[%s1402_s1 + $0x8] sm:$0xff]   ;;  %v1070_v10 = vld [vmem:[%s1402_s1 + $0x10] sm:$0xff]  }
   0x4   :  { %v1063_v3 = vld [vmem:[%s1402_s1 + $0x80] sm:$0xff]   ;;  %942 = vmatpush3.bf16.msra.mxu0 %v1062_v2  ;;  %v1067_v7 = vld [vmem:[%s1402_s1 + $0x88] sm:$0xff]   ;;  %v1071_v11 = vld [vmem:[%s1402_s1 + $0x90] sm:$0xff]  }
   0x5   :  { %964 = vmatpush3.bf16.msra.mxu1 %v1063_v3  ;;  %943 = vmatprep.subr.bf16.mxu0 %v1064_v4  ;;  %v1072_v12 = vld [vmem:[%s1402_s1 + $0x58] sm:$0xff]   ;;  %v1076_v16 = vld [vmem:[%s1402_s1 + $0x60] sm:$0xff]   ;;  %v1080_v20 = vld [vmem:[%s1402_s1 + $0x68] sm:$0xff]  }
   0x6   :  { %965 = vmatprep.subr.bf16.mxu1 %v1065_v5  ;;  %v1073_v13 = vld [vmem:[%s1402_s1 + $0xd8] sm:$0xff]   ;;  %v1077_v17 = vld [vmem:[%s1402_s1 + $0xe0] sm:$0xff]   ;;  %v1081_v21 = vld [vmem:[%s1402_s1 + $0xe8] sm:$0xff]  }
   0x7   :  { %v1074_v14 = vld [vmem:[%s1402_s1 + $0x18] sm:$0xff]   ;;  %v1078_v18 = vld [vmem:[%s1402_s1 + $0x20] sm:$0xff]   ;;  %v1082_v22 = vld [vmem:[%s1402_s1 + $0x28] sm:$0xff]  }
   0x8   :  { %944 = vmatpush3.bf16.msra.mxu0 %v1066_v6  ;;  %v1075_v15 = vld [vmem:[%s1402_s1 + $0x98] sm:$0xff]   ;;  %v1079_v19 = vld [vmem:[%s1402_s1 + $0xa0] sm:$0xff]   ;;  %v1083_v23 = vld [vmem:[%s1402_s1 + $0xa8] sm:$0xff]  }
   0x9   :  { %966 = vmatpush3.bf16.msra.mxu1 %v1067_v7  ;;  %945 = vmatprep.subr.bf16.mxu0 %v1068_v8  ;;  %v1084_v24 = vld [vmem:[%s1402_s1 + $0x70] sm:$0xff]   ;;  %v1088_v28 = vld [vmem:[%s1402_s1 + $0x78] sm:$0xff]   ;;  %v15_v32 = vld [vmem:[%s1403_s0] sm:$0xff] }
   0xa   :  { %967 = vmatprep.subr.bf16.mxu1 %v1069_v9  ;;  %v1085_v25 = vld [vmem:[%s1402_s1 + $0xf0] sm:$0xff]   ;;  %v1089_v29 = vld [vmem:[%s1402_s1 + $0xf8] sm:$0xff]   ;;  %v16_v33 = vld [vmem:[%s1403_s0 + $0x8] sm:$0xff]  ;;  %v860_v34 = vcombine.low %v15_v32, %v15_v32  ;;  %v861_v35 = vcombine.high %v15_v32, %v15_v32 }
   0xb   :  { %v1086_v26 = vld [vmem:[%s1402_s1 + $0x30] sm:$0xff]   ;;  %v1090_v30 = vld [vmem:[%s1402_s1 + $0x38] sm:$0xff]   ;;  %v862_v36 = vcombine.low %v16_v33, %v16_v33  ;;  %v863_v37 = vcombine.high %v16_v33, %v16_v33  ;;  %v1096_v38 = vld [vmem:[%s1402_s1 + $0x140] sm:$0xff]  }
   0xc   :  { %946 = vmatpush3.bf16.msra.mxu0 %v1070_v10  ;;  %v1087_v27 = vld [vmem:[%s1402_s1 + $0xb0] sm:$0xff]   ;;  %v1091_v31 = vld [vmem:[%s1402_s1 + $0xb8] sm:$0xff]   ;;  %v1097_v39 = vld [vmem:[%s1402_s1 + $0x100] sm:$0xff]   ;;  %660 = vmatprep.mubr.bf16.mxu0 %v861_v35 }
   0xd   :  { %968 = vmatpush3.bf16.msra.mxu1 %v1071_v11  ;;  %947 = vmatprep.subr.bf16.mxu0 %v1072_v12  ;;  %v1098_v40 = vld [vmem:[%s1402_s1 + $0x1c0] sm:$0xff]   ;;  %v1100_v42 = vld [vmem:[%s1402_s1 + $0x148] sm:$0xff]   ;;  %v1104_v46 = vld [vmem:[%s1402_s1 + $0x150] sm:$0xff]  }
   0xe   :  { %969 = vmatprep.subr.bf16.mxu1 %v1073_v13  ;;  %700 = vmatprep.mubr.bf16.mxu1 %v863_v37  ;;  %v1099_v41 = vld [vmem:[%s1402_s1 + $0x180] sm:$0xff]   ;;  %v1101_v43 = vld [vmem:[%s1402_s1 + $0x108] sm:$0xff]   ;;  %v1105_v47 = vld [vmem:[%s1402_s1 + $0x110] sm:$0xff]   ;;  %v1143_v13 = vmov 0.0  }
   0xf   :  { %v1102_v44 = vld [vmem:[%s1402_s1 + $0x1c8] sm:$0xff]   ;;  %v1106_v48 = vld [vmem:[%s1402_s1 + $0x1d0] sm:$0xff]   ;;  %v1108_v50 = vld [vmem:[%s1402_s1 + $0x158] sm:$0xff]  }
  0x10   :  { %948 = vmatpush3.bf16.msra.mxu0 %v1074_v14  ;;  %v1103_v45 = vld [vmem:[%s1402_s1 + $0x188] sm:$0xff]   ;;  %v1107_v49 = vld [vmem:[%s1402_s1 + $0x190] sm:$0xff]   ;;  %v1109_v51 = vld [vmem:[%s1402_s1 + $0x118] sm:$0xff]  }
  0x11   :  { %970 = vmatpush3.bf16.msra.mxu1 %v1075_v15  ;;  %949 = vmatprep.subr.bf16.mxu0 %v1076_v16  ;;  %v1110_v52 = vld [vmem:[%s1402_s1 + $0x1d8] sm:$0xff]   ;;  %v1112_v54 = vld [vmem:[%s1402_s1 + $0x160] sm:$0xff]   ;;  %v1116_v58 = vld [vmem:[%s1402_s1 + $0x168] sm:$0xff]  }
  0x12   :  { %971 = vmatprep.subr.bf16.mxu1 %v1077_v17  ;;  %v1111_v53 = vld [vmem:[%s1402_s1 + $0x198] sm:$0xff]   ;;  %v1113_v55 = vld [vmem:[%s1402_s1 + $0x120] sm:$0xff]   ;;  %v1117_v59 = vld [vmem:[%s1402_s1 + $0x128] sm:$0xff]  }
  0x13   :  { %v1114_v56 = vld [vmem:[%s1402_s1 + $0x1e0] sm:$0xff]   ;;  %v1118_v60 = vld [vmem:[%s1402_s1 + $0x1e8] sm:$0xff]   ;;  %v1120_v62 = vld [vmem:[%s1402_s1 + $0x170] sm:$0xff]  }
  0x14   :  { %950 = vmatpush3.bf16.msra.mxu0 %v1078_v18  ;;  %v1115_v57 = vld [vmem:[%s1402_s1 + $0x1a0] sm:$0xff]   ;;  %v1119_v61 = vld [vmem:[%s1402_s1 + $0x1a8] sm:$0xff]   ;;  %v1121_v63 = vld [vmem:[%s1402_s1 + $0x130] sm:$0xff]  }
  0x15   :  { %972 = vmatpush3.bf16.msra.mxu1 %v1079_v19  ;;  %951 = vmatprep.subr.bf16.mxu0 %v1080_v20  ;;  %v1122_v0 = vld [vmem:[%s1402_s1 + $0x1f0] sm:$0xff]   ;;  %v1124_v2 = vld [vmem:[%s1402_s1 + $0x178] sm:$0xff]   ;;  %v1132_v12 = vld [vmem:[%s1402_s1 + $0x200] sm:$0xff]  }
  0x16   :  { %973 = vmatprep.subr.bf16.mxu1 %v1081_v21  ;;  %v1123_v1 = vld [vmem:[%s1402_s1 + $0x1b0] sm:$0xff]   ;;  %v1125_v3 = vld [vmem:[%s1402_s1 + $0x138] sm:$0xff]   ;;  %v1133_v14 = vld [vmem:[%s1402_s1 + $0x208] sm:$0xff]  }
  0x17   :  { %v1126_v4 = vld [vmem:[%s1402_s1 + $0x1f8] sm:$0xff]   ;;  %v17_v5 = vld [vmem:[%s1403_s0 + $0x10] sm:$0xff]  ;;  %v1136_v17 = vld [vmem:[%s1402_s1 + $0x220] sm:$0xff]  }
  0x18   :  { %952 = vmatpush3.bf16.msra.mxu0 %v1082_v22  ;;  %v865_v6 = vcombine.high %v17_v5, %v17_v5  ;;  %v1129_v7 = vld [vmem:[%s1402_s1 + $0x1b8] sm:$0xff]   ;;  %v864_v8 = vcombine.low %v17_v5, %v17_v5  ;;  %v1134_v15 = vld [vmem:[%s1402_s1 + $0x210] sm:$0xff]   ;;  %v1137_v18 = vld [vmem:[%s1402_s1 + $0x228] sm:$0xff]  }
  0x19   :  { %974 = vmatpush3.bf16.msra.mxu1 %v1083_v23  ;;  %953 = vmatprep.subr.bf16.mxu0 %v1084_v24  ;;  %v18_v9 = vld [vmem:[%s1403_s0 + $0x18] sm:$0xff]  ;;  %v1138_v19 = vld [vmem:[%s1402_s1 + $0x230] sm:$0xff]   ;;  %v1140_v21 = vld [vmem:[%s1403_s0 + $0x20] ss:$0 sps:$4 sm:$0xff]  }
  0x1a   :  { %975 = vmatprep.subr.bf16.mxu1 %v1085_v25  ;;  %v866_v10 = vcombine.low %v18_v9, %v18_v9  ;;  %v867_v11 = vcombine.high %v18_v9, %v18_v9  ;;  %v1135_v16 = vld [vmem:[%s1402_s1 + $0x218] sm:$0xff]   ;;  %v850_v5 = vld [vmem:[%s1404_s2] sm:$0xf] }
  0x1b   :  { %v1139_v20 = vld [vmem:[%s1402_s1 + $0x238] sm:$0xff]  }
  0x1c   :  { %954 = vmatpush3.bf16.msra.mxu0 %v1086_v26 }
  0x1d   :  { %976 = vmatpush3.bf16.msra.mxu1 %v1087_v27  ;;  %955 = vmatprep.subr.bf16.mxu0 %v1088_v28 }
  0x1e   :  { %977 = vmatprep.subr.bf16.mxu1 %v1089_v29 }
  0x20   :  { %956 = vmatpush3.bf16.msra.mxu0 %v1090_v30 }
  0x21   :  { %978 = vmatpush3.bf16.msra.mxu1 %v1091_v31  ;;  %985 = vmatprep.subr.bf16.mxu0 %v1096_v38 }
  0x22   :  { %1007 = vmatprep.subr.bf16.mxu1 %v1098_v40 }
  0x23   :  { %661 = vmatmul.mubr.bf16.vlgmr.msra.gmra.mrb[0].mxu0 %v860_v34 }
  0x24   :  { %701 = vmatmul.mubr.bf16.vlgmr.msra.gmra.mrb[0].mxu1 %v862_v36  ;;  %986 = vmatpush3.bf16.msra.mxu0 %v1097_v39 }
  0x25   :  { %1008 = vmatpush3.bf16.msra.mxu1 %v1099_v41  ;;  %987 = vmatprep.subr.bf16.mxu0 %v1100_v42 }
  0x26   :  { %1009 = vmatprep.subr.bf16.mxu1 %v1102_v44  ;;  %740 = vmatprep.mubr.bf16.mxu0 %v865_v6 }
  0x27   :  { %780 = vmatprep.mubr.bf16.mxu1 %v867_v11 }
  0x28   :  { %988 = vmatpush3.bf16.msra.mxu0 %v1101_v43 }
  0x29   :  { %1010 = vmatpush3.bf16.msra.mxu1 %v1103_v45  ;;  %989 = vmatprep.subr.bf16.mxu0 %v1104_v46 }
  0x2a   :  { %1011 = vmatprep.subr.bf16.mxu1 %v1106_v48 }
  0x2c   :  { %990 = vmatpush3.bf16.msra.mxu0 %v1105_v47 }
  0x2d   :  { %1012 = vmatpush3.bf16.msra.mxu1 %v1107_v49  ;;  %991 = vmatprep.subr.bf16.mxu0 %v1108_v50 }
  0x2e   :  { %1013 = vmatprep.subr.bf16.mxu1 %v1110_v52 }
  0x30   :  { %992 = vmatpush3.bf16.msra.mxu0 %v1109_v51 }
  0x31   :  { %1014 = vmatpush3.bf16.msra.mxu1 %v1111_v53  ;;  %993 = vmatprep.subr.bf16.mxu0 %v1112_v54 }
  0x32   :  { %1015 = vmatprep.subr.bf16.mxu1 %v1114_v56 }
  0x34   :  { %994 = vmatpush3.bf16.msra.mxu0 %v1113_v55 }
  0x35   :  { %1016 = vmatpush3.bf16.msra.mxu1 %v1115_v57  ;;  %995 = vmatprep.subr.bf16.mxu0 %v1116_v58 }
  0x36   :  { %1017 = vmatprep.subr.bf16.mxu1 %v1118_v60 }
  0x38   :  { %996 = vmatpush3.bf16.msra.mxu0 %v1117_v59 }
  0x39   :  { %1018 = vmatpush3.bf16.msra.mxu1 %v1119_v61  ;;  %997 = vmatprep.subr.bf16.mxu0 %v1120_v62 }
  0x3a   :  { %1019 = vmatprep.subr.bf16.mxu1 %v1122_v0 }
  0x3c   :  { %998 = vmatpush3.bf16.msra.mxu0 %v1121_v63 }
  0x3d   :  { %1020 = vmatpush3.bf16.msra.mxu1 %v1123_v1  ;;  %999 = vmatprep.subr.bf16.mxu0 %v1124_v2 }
  0x3e   :  { %1021 = vmatprep.subr.bf16.mxu1 %v1126_v4 }
  0x40   :  { %1000 = vmatpush3.bf16.msra.mxu0 %v1125_v3 }
  0x41   :  { %1022 = vmatpush3.bf16.msra.mxu1 %v1129_v7  ;;  %1038 = vmatprep.subr.bf16.mxu0 %v1143_v13  ;;  %v851_v7 = vunpack.c.l.bf16 %v850_v5 }
  0x43   :  { %741 = vmatmul.mubr.bf16.vlgmr.msra.gmra.mrb[4].mxu0 %v864_v8 }
  0x44   :  { %1039 = vmatpush3.bf16.msra.mxu0 %v1132_v12  ;;  %781 = vmatmul.mubr.bf16.vlgmr.msra.gmra.mrb[4].mxu1 %v866_v10 }
  0x45   :  { %1040 = vmatprep.subr.bf16.mxu0 %v1143_v13  ;;  %1054 = vmatprep.mubr.msk.bf16.mxu0 %vm1144_vm0, %v1143_v13 }
  0x48   :  { %1041 = vmatpush3.bf16.msra.mxu0 %v1133_v14 }
  0x49   :  { %1042 = vmatprep.subr.bf16.mxu0 %v1143_v13 }
  0x4c   :  { %1043 = vmatpush3.bf16.msra.mxu0 %v1134_v15 }
  0x4d   :  { %1044 = vmatprep.subr.bf16.mxu0 %v1143_v13 }
  0x50   :  { %1045 = vmatpush3.bf16.msra.mxu0 %v1135_v16 }
  0x51   :  { %1046 = vmatprep.subr.bf16.mxu0 %v1143_v13 }
  0x54   :  { %1047 = vmatpush3.bf16.msra.mxu0 %v1136_v17 }
  0x55   :  { %1048 = vmatprep.subr.bf16.mxu0 %v1143_v13 }
  0x58   :  { %1049 = vmatpush3.bf16.msra.mxu0 %v1137_v18 }
  0x59   :  { %1050 = vmatprep.subr.bf16.mxu0 %v1143_v13 }
  0x5c   :  { %1051 = vmatpush3.bf16.msra.mxu0 %v1138_v19 }
  0x5d   :  { %1052 = vmatprep.subr.bf16.mxu0 %v1143_v13 }
  0x60   :  { %1053 = vmatpush3.bf16.msra.mxu0 %v1139_v20 }
  0x63   :  { %1055 = vmatmul.mubr.bf16.vlgmr.msra.gmra.mrb[8].mxu0 %v1140_v21 }
  0xf6   :  { %v957_v22 = vpop.f32.mrb[0].mxu0 }
  0xf7   :  { %v979_v23 = vpop.f32.mrb[0].mxu1  ;;  %v958_v24 = vpop.f32.mrb[1].mxu0 }
  0xf8   :  { %v980_v25 = vpop.f32.mrb[1].mxu1  ;;  %v959_v26 = vadd.f32 %v958_v24, %v957_v22  ;;  %v960_v28 = vpop.f32.mrb[2].mxu0 }
  0xf9   :  { %v981_v27 = vadd.f32 %v980_v25, %v979_v23  ;;  %v982_v29 = vpop.f32.mrb[2].mxu1  ;;  %v961_v30 = vpop.f32.mrb[3].mxu0 }
  0xfa   :  { %v983_v31 = vpop.f32.mrb[3].mxu1 }
  0xfb   :  { %v703_v32 = vadd.f32 %v981_v27, %v959_v26 }
 0x116   :  { %v1001_v33 = vpop.f32.mrb[4].mxu0 }
 0x117   :  { %v1002_v34 = vpop.f32.mrb[5].mxu0  ;;  %v1023_v35 = vpop.f32.mrb[4].mxu1 }
 0x118   :  { %v1003_v36 = vadd.f32 %v1002_v34, %v1001_v33  ;;  %v1004_v37 = vpop.f32.mrb[6].mxu0  ;;  %v1024_v38 = vpop.f32.mrb[5].mxu1 }
 0x119   :  { %v1005_v39 = vpop.f32.mrb[7].mxu0  ;;  %v1025_v40 = vadd.f32 %v1024_v38, %v1023_v35  ;;  %v1026_v41 = vpop.f32.mrb[6].mxu1 }
 0x11a   :  { %v743_v42 = vadd.f32 %v1003_v36, %v703_v32  ;;  %v1027_v43 = vpop.f32.mrb[7].mxu1 }
 0x11c   :  { %v783_v44 = vadd.f32 %v1025_v40, %v743_v42 }
 0x136   :  { %v822_v45 = vpop.f32.mrb[8].mxu0 }
 0x137   :  { %v823_v46 = vadd.f32 %v822_v45, %v783_v44  ;;  %v1056_v47 = vpop.f32.mrb[9].mxu0 }
 0x138   :  { %v825_v48 = vpop.f32.mrb[10].mxu0 }
 0x139   :  { %v828_v49 = vrot.slane %v823_v46, 4  ;;  %v835_v50 = vmul.f32 %v823_v46, %v823_v46  ;;  %v1057_v51 = vpop.f32.mrb[11].mxu0 }
 0x13b   :  { %v829_v52 = vadd.f32 %v828_v49, %v823_v46  ;;  %v836_v53 = vrot.slane %v835_v50, 4 }
 0x13d   :  { %v830_v54 = vrot.slane %v829_v52, 2  ;;  %v837_v55 = vadd.f32 %v836_v53, %v835_v50 }
 0x13f   :  { %v831_v56 = vadd.f32 %v830_v54, %v829_v52  ;;  %v838_v57 = vrot.slane %v837_v55, 2 }
 0x141   :  { %v832_v58 = vrot.slane %v831_v56, 1  ;;  %v839_v59 = vadd.f32 %v838_v57, %v837_v55 }
 0x143   :  { %v833_v60 = vadd.f32 %v832_v58, %v831_v56  ;;  %v840_v61 = vrot.slane %v839_v59, 1 }
 0x145   :  { %v834_v62 = vmul.f32 0.125, %v833_v60  ;;  %v841_v63 = vadd.f32 %v840_v61, %v839_v59 }
 0x147   :  { %v842_v0 = vmul.f32 0.125, %v841_v63  ;;  %v843_v1 = vmul.f32 %v834_v62, %v834_v62  ;;  %v846_v6 = vsub.f32 %v823_v46, %v834_v62 }
 0x149   :  { %v844_v2 = vsub.f32 %v842_v0, %v843_v1 }
 0x14b   :  { %v845_v3 = vmax.f32 %v844_v2, 0.0 }
 0x14d   :  { %v847_v4 = vadd.f32 1e-05, %v845_v3 }
 0x14f   :  { %1141 = vrsqrt.f32 %v847_v4 }
 0x159   :  { %v1142_v8 = vpop.eup %1141 }
 0x15a   :  { %v849_v9 = vmul.f32 %v1142_v8, %v846_v6 }
 0x15c   :  { %v852_v10 = vadd.f32 %v851_v7, %v849_v9 }
 0x15e   :  { %v853_v11 = vmax.f32 %v852_v10, 0.0 }
 0x160   :  { %v854_v12 = vpack.c.bf16 %v853_v11, %v853_v11 }
 0x162   :  { %855 = vst [vmem:[%s1405_s3] sm:$0xf] %v854_v12 }

// kernel: _lambda_.22
= control target key start
LH: loop header
LB: loop body
LE: loop exit
PB: predicated region body
PF: predicated region fallthrough
CT: control target
= control target key end

     0   :  { %v272_v1 = vmov 0   ;;  %vm150_vm0 = vcmask 1041408   ;;  %s343_s1 = inlined_call_operand.vmem [shape: bf16[128,256], index: 1, kind: input, shape index: {}]   ;;  %s344_s0 = inlined_call_operand.vmem [shape: bf16[2,128], index: 0, kind: input, shape index: {}]   ;;  %s345_s2 = inlined_call_operand.vmem [shape: bf16[2,256], index: 2, kind: output, shape index: {}]  }
   0x1   :  { %v244_v0 = vld [vmem:[%s343_s1 + $0x4] ss:$8 sps:$4 sm:$0xff]   ;;  %141 = vmatprep.mubr.bf16.mxu0 %v272_v1  ;;  %v246_v2 = vld [vmem:[%s343_s1] ss:$8 sps:$4 sm:$0xff]   ;;  %v247_v3 = vld [vmem:[%s343_s1 + $0x14] ss:$8 sps:$4 sm:$0xff]  }
   0x2   :  { %109 = vmatprep.subr.bf16.mxu0 %v244_v0  ;;  %v249_v4 = vld [vmem:[%s343_s1 + $0x10] ss:$8 sps:$4 sm:$0xff]   ;;  %v250_v5 = vld [vmem:[%s343_s1 + $0x24] ss:$8 sps:$4 sm:$0xff]   ;;  %v252_v6 = vld [vmem:[%s343_s1 + $0x20] ss:$8 sps:$4 sm:$0xff]  }
   0x3   :  { %110 = vmatpush1.bf16.msra.mxu0 %v246_v2  ;;  %v253_v7 = vld [vmem:[%s343_s1 + $0x34] ss:$8 sps:$4 sm:$0xff]   ;;  %v255_v8 = vld [vmem:[%s343_s1 + $0x30] ss:$8 sps:$4 sm:$0xff]   ;;  %v256_v9 = vld [vmem:[%s343_s1 + $0x44] ss:$8 sps:$4 sm:$0xff]   ;;  %v207_v2 = vlaneseq }
   0x4   :  { %111 = vmatprep.subr.bf16.mxu0 %v247_v3  ;;  %v258_v10 = vld [vmem:[%s343_s1 + $0x40] ss:$8 sps:$4 sm:$0xff]   ;;  %v259_v11 = vld [vmem:[%s343_s1 + $0x54] ss:$8 sps:$4 sm:$0xff]   ;;  %v261_v12 = vld [vmem:[%s343_s1 + $0x50] ss:$8 sps:$4 sm:$0xff]  }
   0x5   :  { %v262_v13 = vld [vmem:[%s343_s1 + $0x64] ss:$8 sps:$4 sm:$0xff]   ;;  %v264_v14 = vld [vmem:[%s343_s1 + $0x60] ss:$8 sps:$4 sm:$0xff]   ;;  %v265_v15 = vld [vmem:[%s343_s1 + $0x74] ss:$8 sps:$4 sm:$0xff]  }
   0x6   :  { %v267_v16 = vld [vmem:[%s343_s1 + $0x70] ss:$8 sps:$4 sm:$0xff]   ;;  %v12_v17 = vld [vmem:[%s344_s0] sm:$0x1]  ;;  %v273_v0 = vmov 1966171168  }
   0x7   :  { %112 = vmatpush1.bf16.msra.mxu0 %v249_v4  ;;  %v205_v1 = vunpack.c.l.s4 %v273_v0  ;;  %v208_v4 = vshrl.u32 %v207_v2, 7 }
   0x8   :  { %113 = vmatprep.subr.bf16.mxu0 %v250_v5 }
   0x9   :  { %v206_v3 = vunpack.c.0.s8 %v205_v1 }
   0xb   :  { %114 = vmatpush1.bf16.msra.mxu0 %v252_v6 }
   0xc   :  { %115 = vmatprep.subr.bf16.mxu0 %v253_v7 }
   0xf   :  { %116 = vmatpush1.bf16.msra.mxu0 %v255_v8 }
  0x10   :  { %117 = vmatprep.subr.bf16.mxu0 %v256_v9 }
  0x13   :  { %118 = vmatpush1.bf16.msra.mxu0 %v258_v10 }
  0x14   :  { %119 = vmatprep.subr.bf16.mxu0 %v259_v11  ;;  %v209_v11 = vsub.s32 %v206_v3, %v208_v4 }
  0x17   :  { %120 = vmatpush1.bf16.msra.mxu0 %v261_v12 }
  0x18   :  { %121 = vmatprep.subr.bf16.mxu0 %v262_v13 }
  0x1b   :  { %122 = vmatpush1.bf16.msra.mxu0 %v264_v14 }
  0x1c   :  { %123 = vmatprep.subr.bf16.mxu0 %v265_v15 }
  0x1f   :  { %124 = vmatpush1.bf16.msra.mxu0 %v267_v16 }
  0x22   :  { %142 = vmatmul.mubr.bf16.vlgmr.msra.gmra.mrb[0].mxu0 %v12_v17 }
  0xf5   :  { %v143_v18 = vpop.f32.mrb[0].mxu0 }
  0xf6   :  { %v151_v19 = vsel %vm150_vm0, %v143_v18, 0.0  ;;  %v167_v20 = vmul.f32 %v143_v18, %v143_v18  ;;  %v145_v21 = vpop.f32.mrb[1].mxu0 }
  0xf7   :  { %v152_v22 = vrot.slane %v151_v19, 4  ;;  %v158_v23 = vsel %vm150_vm0, %v145_v21, 0.0  ;;  %v168_v24 = vmul.f32 %v145_v21, %v145_v21  ;;  %v147_v25 = vpop.f32.mrb[2].mxu0 }
  0xf8   :  { %v169_v26 = vsel %vm150_vm0, %v167_v20, 0.0  ;;  %v159_v27 = vrot.slane %v158_v23, 4  ;;  %v148_v28 = vpop.f32.mrb[3].mxu0 }
  0xf9   :  { %v153_v29 = vadd.f32 %v152_v22, %v151_v19  ;;  %v170_v30 = vrot.slane %v169_v26, 4  ;;  %v176_v31 = vsel %vm150_vm0, %v168_v24, 0.0 }
  0xfa   :  { %v160_v32 = vadd.f32 %v159_v27, %v158_v23  ;;  %v177_v33 = vrot.slane %v176_v31, 4 }
  0xfb   :  { %v154_v34 = vrot.slane %v153_v29, 2  ;;  %v171_v35 = vadd.f32 %v170_v30, %v169_v26 }
  0xfc   :  { %v161_v36 = vrot.slane %v160_v32, 2  ;;  %v178_v37 = vadd.f32 %v177_v33, %v176_v31 }
  0xfd   :  { %v155_v38 = vadd.f32 %v154_v34, %v153_v29  ;;  %v172_v39 = vrot.slane %v171_v35, 2 }
  0xfe   :  { %v162_v40 = vadd.f32 %v161_v36, %v160_v32  ;;  %v179_v41 = vrot.slane %v178_v37, 2 }
  0xff   :  { %v156_v42 = vrot.slane %v155_v38, 1  ;;  %v173_v43 = vadd.f32 %v172_v39, %v171_v35 }
 0x100   :  { %v163_v44 = vrot.slane %v162_v40, 1  ;;  %v180_v45 = vadd.f32 %v179_v41, %v178_v37 }
 0x101   :  { %v157_v46 = vadd.f32 %v156_v42, %v155_v38  ;;  %v174_v47 = vrot.slane %v173_v43, 1 }
 0x102   :  { %v164_v48 = vadd.f32 %v163_v44, %v162_v40  ;;  %v181_v49 = vrot.slane %v180_v45, 1 }
 0x103   :  { %v165_v50 = vmul.f32 0.5, %v157_v46  ;;  %v175_v51 = vadd.f32 %v174_v47, %v173_v43 }
 0x104   :  { %v166_v52 = vmul.f32 0.5, %v164_v48  ;;  %v182_v53 = vadd.f32 %v181_v49, %v180_v45 }
 0x105   :  { %v183_v54 = vmul.f32 0.5, %v175_v51  ;;  %v185_v55 = vmul.f32 %v165_v50, %v165_v50  ;;  %v191_v5 = vsub.f32 %v143_v18, %v165_v50 }
 0x106   :  { %v184_v56 = vmul.f32 0.5, %v182_v53  ;;  %v186_v57 = vmul.f32 %v166_v52, %v166_v52  ;;  %v192_v7 = vsub.f32 %v145_v21, %v166_v52 }
 0x107   :  { %v187_v58 = vsub.f32 %v183_v54, %v185_v55 }
 0x108   :  { %v188_v59 = vsub.f32 %v184_v56, %v186_v57 }
 0x109   :  { %v189_v60 = vmax.f32 %v187_v58, 0.0 }
 0x10a   :  { %v190_v61 = vmax.f32 %v188_v59, 0.0 }
 0x10b   :  { %v193_v62 = vadd.f32 1e-05, %v189_v60 }
 0x10c   :  { %v194_v63 = vadd.f32 1e-05, %v190_v61 }
 0x10d   :  { %268 = vrsqrt.f32 %v193_v62 }
 0x10e   :  { %270 = vrsqrt.f32 %v194_v63 }
 0x117   :  { %v269_v6 = vpop.eup %268 }
 0x118   :  { %v271_v8 = vpop.eup %270  ;;  %v197_v9 = vmul.f32 %v269_v6, %v191_v5 }
 0x119   :  { %v198_v10 = vmul.f32 %v271_v8, %v192_v7 }
 0x11b   :  { %v240_v12 = vpack.c.bf16 %v198_v10, %v197_v9 }
 0x11d   :  { %v210_v13 = vrot.slane %v240_v12, %v209_v11 }
 0x11f   :  { %241 = vst.sshfl [vmem:[%s345_s2] sm:$0x5 pattern:$0x73625140] %v210_v13 }

// kernel: _lambda_.21
= control target key start
LH: loop header
LB: loop body
LE: loop exit
PB: predicated region body
PF: predicated region fallthrough
CT: control target
= control target key end

     0   :  { %v1617_v36 = vmov 1966171168   ;;  %v164_v38 = vlaneseq  ;;  %vm1157_vm0 = vcmask 1041408   ;;  %s2095_s1 = inlined_call_operand.vmem [shape: bf16[1152,256], index: 1, kind: input, shape index: {}]   ;;  %s2096_s0 = inlined_call_operand.vmem [shape: bf16[2,1152], index: 0, kind: input, shape index: {}]   ;;  %s2097_s2 = inlined_call_operand.vmem [shape: bf16[2,256], index: 2, kind: output, shape index: {}]  }
   0x1   :  { %v1396_v0 = vld [vmem:[%s2095_s1 + $0x4] ss:$8 sps:$4 sm:$0xff]   ;;  %v1400_v2 = vld [vmem:[%s2095_s1] ss:$8 sps:$4 sm:$0xff]   ;;  %v1402_v4 = vld [vmem:[%s2095_s1 + $0x14] ss:$8 sps:$4 sm:$0xff]   ;;  %v162_v37 = vunpack.c.l.s4 %v1617_v36 }
   0x2   :  { %v1398_v1 = vld [vmem:[%s2095_s1 + $0x204] ss:$8 sps:$4 sm:$0xff]   ;;  %952 = vmatprep.subr.bf16.mxu1 %v1396_v0  ;;  %v1401_v3 = vld [vmem:[%s2095_s1 + $0x200] ss:$8 sps:$4 sm:$0xff]   ;;  %v1404_v5 = vld [vmem:[%s2095_s1 + $0x214] ss:$8 sps:$4 sm:$0xff]  }
   0x3   :  { %1034 = vmatprep.subr.bf16.mxu0 %v1398_v1  ;;  %953 = vmatpush1.bf16.msra.mxu1 %v1400_v2  ;;  %v1406_v6 = vld [vmem:[%s2095_s1 + $0x10] ss:$8 sps:$4 sm:$0xff]   ;;  %v1408_v8 = vld [vmem:[%s2095_s1 + $0x24] ss:$8 sps:$4 sm:$0xff]   ;;  %v1412_v10 = vld [vmem:[%s2095_s1 + $0x20] ss:$8 sps:$4 sm:$0xff]   ;;  %v163_v42 = vunpack.c.0.s8 %v162_v37 }
   0x4   :  { %1035 = vmatpush1.bf16.msra.mxu0 %v1401_v3  ;;  %954 = vmatprep.subr.bf16.mxu1 %v1402_v4  ;;  %v1407_v7 = vld [vmem:[%s2095_s1 + $0x210] ss:$8 sps:$4 sm:$0xff]   ;;  %v1410_v9 = vld [vmem:[%s2095_s1 + $0x224] ss:$8 sps:$4 sm:$0xff]   ;;  %v1413_v11 = vld [vmem:[%s2095_s1 + $0x220] ss:$8 sps:$4 sm:$0xff]  }
   0x5   :  { %1036 = vmatprep.subr.bf16.mxu0 %v1404_v5  ;;  %v1414_v12 = vld [vmem:[%s2095_s1 + $0x34] ss:$8 sps:$4 sm:$0xff]   ;;  %v1418_v14 = vld [vmem:[%s2095_s1 + $0x30] ss:$8 sps:$4 sm:$0xff]   ;;  %v1420_v16 = vld [vmem:[%s2095_s1 + $0x44] ss:$8 sps:$4 sm:$0xff]  }
   0x6   :  { %v1416_v13 = vld [vmem:[%s2095_s1 + $0x234] ss:$8 sps:$4 sm:$0xff]   ;;  %v1419_v15 = vld [vmem:[%s2095_s1 + $0x230] ss:$8 sps:$4 sm:$0xff]   ;;  %v1422_v17 = vld [vmem:[%s2095_s1 + $0x244] ss:$8 sps:$4 sm:$0xff]  }
   0x7   :  { %955 = vmatpush1.bf16.msra.mxu1 %v1406_v6  ;;  %v1424_v18 = vld [vmem:[%s2095_s1 + $0x40] ss:$8 sps:$4 sm:$0xff]   ;;  %v1426_v20 = vld [vmem:[%s2095_s1 + $0x54] ss:$8 sps:$4 sm:$0xff]   ;;  %v1430_v22 = vld [vmem:[%s2095_s1 + $0x50] ss:$8 sps:$4 sm:$0xff]  }
   0x8   :  { %1037 = vmatpush1.bf16.msra.mxu0 %v1407_v7  ;;  %956 = vmatprep.subr.bf16.mxu1 %v1408_v8  ;;  %v1425_v19 = vld [vmem:[%s2095_s1 + $0x240] ss:$8 sps:$4 sm:$0xff]   ;;  %v1428_v21 = vld [vmem:[%s2095_s1 + $0x254] ss:$8 sps:$4 sm:$0xff]   ;;  %v1431_v23 = vld [vmem:[%s2095_s1 + $0x250] ss:$8 sps:$4 sm:$0xff]  }
   0x9   :  { %1038 = vmatprep.subr.bf16.mxu0 %v1410_v9  ;;  %v1432_v24 = vld [vmem:[%s2095_s1 + $0x64] ss:$8 sps:$4 sm:$0xff]   ;;  %v1436_v26 = vld [vmem:[%s2095_s1 + $0x60] ss:$8 sps:$4 sm:$0xff]   ;;  %v1438_v28 = vld [vmem:[%s2095_s1 + $0x74] ss:$8 sps:$4 sm:$0xff]  }
   0xa   :  { %v1434_v25 = vld [vmem:[%s2095_s1 + $0x264] ss:$8 sps:$4 sm:$0xff]   ;;  %v1437_v27 = vld [vmem:[%s2095_s1 + $0x260] ss:$8 sps:$4 sm:$0xff]   ;;  %v1440_v29 = vld [vmem:[%s2095_s1 + $0x274] ss:$8 sps:$4 sm:$0xff]  }
   0xb   :  { %957 = vmatpush1.bf16.msra.mxu1 %v1412_v10  ;;  %v1442_v30 = vld [vmem:[%s2095_s1 + $0x70] ss:$8 sps:$4 sm:$0xff]   ;;  %v1444_v32 = vld [vmem:[%s2095_s1 + $0x84] ss:$8 sps:$4 sm:$0xff]   ;;  %v1448_v34 = vld [vmem:[%s2095_s1 + $0x80] ss:$8 sps:$4 sm:$0xff]  }
   0xc   :  { %1039 = vmatpush1.bf16.msra.mxu0 %v1413_v11  ;;  %958 = vmatprep.subr.bf16.mxu1 %v1414_v12  ;;  %v1443_v31 = vld [vmem:[%s2095_s1 + $0x270] ss:$8 sps:$4 sm:$0xff]   ;;  %v1446_v33 = vld [vmem:[%s2095_s1 + $0x284] ss:$8 sps:$4 sm:$0xff]   ;;  %v1449_v35 = vld [vmem:[%s2095_s1 + $0x280] ss:$8 sps:$4 sm:$0xff]  }
   0xd   :  { %1040 = vmatprep.subr.bf16.mxu0 %v1416_v13  ;;  %v1450_v39 = vld [vmem:[%s2095_s1 + $0x94] ss:$8 sps:$4 sm:$0xff]   ;;  %v1454_v41 = vld [vmem:[%s2095_s1 + $0x90] ss:$8 sps:$4 sm:$0xff]   ;;  %v165_v43 = vshrl.u32 %v164_v38, 7  ;;  %v12_v52 = vld [vmem:[%s2096_s0] sm:$0xff] }
   0xe   :  { %v1452_v40 = vld [vmem:[%s2095_s1 + $0x294] ss:$8 sps:$4 sm:$0xff]   ;;  %v1455_v44 = vld [vmem:[%s2095_s1 + $0x290] ss:$8 sps:$4 sm:$0xff]   ;;  %v1456_v45 = vld [vmem:[%s2095_s1 + $0xa4] ss:$8 sps:$4 sm:$0xff]   ;;  %v160_v55 = vcombine.high %v12_v52, %v12_v52 }
   0xf   :  { %959 = vmatpush1.bf16.msra.mxu1 %v1418_v14  ;;  %v1458_v46 = vld [vmem:[%s2095_s1 + $0x2a4] ss:$8 sps:$4 sm:$0xff]   ;;  %v1460_v47 = vld [vmem:[%s2095_s1 + $0xa0] ss:$8 sps:$4 sm:$0xff]   ;;  %v1766_v49 = vsub.s32 %v163_v42, %v165_v43  ;;  %v1462_v50 = vld [vmem:[%s2095_s1 + $0xb4] ss:$8 sps:$4 sm:$0xff]  }
  0x10   :  { %1041 = vmatpush1.bf16.msra.mxu0 %v1419_v15  ;;  %960 = vmatprep.subr.bf16.mxu1 %v1420_v16  ;;  %v1461_v48 = vld [vmem:[%s2095_s1 + $0x2a0] ss:$8 sps:$4 sm:$0xff]   ;;  %v1464_v51 = vld [vmem:[%s2095_s1 + $0x2b4] ss:$8 sps:$4 sm:$0xff]   ;;  %v1466_v53 = vld [vmem:[%s2095_s1 + $0xb0] ss:$8 sps:$4 sm:$0xff]  }
  0x11   :  { %1042 = vmatprep.subr.bf16.mxu0 %v1422_v17  ;;  %v167_v54 = vrot.slane %v12_v52, %v1766_v49  ;;  %v1467_v56 = vld [vmem:[%s2095_s1 + $0x2b0] ss:$8 sps:$4 sm:$0xff]   ;;  %v1468_v57 = vld [vmem:[%s2095_s1 + $0xc4] ss:$8 sps:$4 sm:$0xff]   ;;  %v174_v60 = vrot.slane %v160_v55, %v1766_v49  ;;  %v1472_v61 = vld [vmem:[%s2095_s1 + $0xc0] ss:$8 sps:$4 sm:$0xff]  }
  0x12   :  { %v1470_v58 = vld [vmem:[%s2095_s1 + $0x2c4] ss:$8 sps:$4 sm:$0xff]   ;;  %v1473_v0 = vld [vmem:[%s2095_s1 + $0x2c0] ss:$8 sps:$4 sm:$0xff]   ;;  %v1474_v1 = vld [vmem:[%s2095_s1 + $0xd4] ss:$8 sps:$4 sm:$0xff]  }
  0x13   :  { %961 = vmatpush1.bf16.msra.mxu1 %v1424_v18  ;;  %v175_v59 = vcombine.high %v167_v54, %v167_v54  ;;  %v176_v63 = vcombine.high %v174_v60, %v174_v60  ;;  %v1476_v2 = vld [vmem:[%s2095_s1 + $0x2d4] ss:$8 sps:$4 sm:$0xff]   ;;  %v1478_v4 = vld [vmem:[%s2095_s1 + $0xd0] ss:$8 sps:$4 sm:$0xff]   ;;  %v1480_v6 = vld [vmem:[%s2095_s1 + $0xe4] ss:$8 sps:$4 sm:$0xff]   ;;  %v1845_v17 = vrot.slane %v167_v54, %v1766_v49  ;;  %v1848_v18 = vrot.slane %v174_v60, %v1766_v49 }
  0x14   :  { %1043 = vmatpush1.bf16.msra.mxu0 %v1425_v19  ;;  %962 = vmatprep.subr.bf16.mxu1 %v1426_v20  ;;  %v1479_v5 = vld [vmem:[%s2095_s1 + $0x2d0] ss:$8 sps:$4 sm:$0xff]   ;;  %v1482_v7 = vld [vmem:[%s2095_s1 + $0x2e4] ss:$8 sps:$4 sm:$0xff]   ;;  %v1484_v8 = vld [vmem:[%s2095_s1 + $0xe0] ss:$8 sps:$4 sm:$0xff]  }
  0x15   :  { %1044 = vmatprep.subr.bf16.mxu0 %v1428_v21  ;;  %v197_v62 = vrot.slane %v175_v59, %v1766_v49  ;;  %v204_v3 = vrot.slane %v176_v63, %v1766_v49  ;;  %v1485_v9 = vld [vmem:[%s2095_s1 + $0x2e0] ss:$8 sps:$4 sm:$0xff]   ;;  %v1486_v10 = vld [vmem:[%s2095_s1 + $0xf4] ss:$8 sps:$4 sm:$0xff]   ;;  %v1490_v12 = vld [vmem:[%s2095_s1 + $0xf0] ss:$8 sps:$4 sm:$0xff]  }
  0x16   :  { %v1488_v11 = vld [vmem:[%s2095_s1 + $0x2f4] ss:$8 sps:$4 sm:$0xff]   ;;  %v1491_v13 = vld [vmem:[%s2095_s1 + $0x2f0] ss:$8 sps:$4 sm:$0xff]   ;;  %v1494_v14 = vld [vmem:[%s2095_s1 + $0x104] ss:$8 sps:$4 sm:$0xff]  }
  0x17   :  { %963 = vmatpush1.bf16.msra.mxu1 %v1430_v22  ;;  %984 = vmatprep.mubr.bf16.mxu1 %v197_v62  ;;  %v1498_v15 = vld [vmem:[%s2095_s1 + $0x304] ss:$8 sps:$4 sm:$0xff]   ;;  %v1492_v16 = vld [vmem:[%s2095_s1 + $0x100] ss:$8 sps:$4 sm:$0xff]   ;;  %v1501_v20 = vld [vmem:[%s2095_s1 + $0x114] ss:$8 sps:$4 sm:$0xff]   ;;  %v207_v22 = vcombine.high %v197_v62, %v197_v62 }
  0x18   :  { %1045 = vmatpush1.bf16.msra.mxu0 %v1431_v23  ;;  %964 = vmatprep.subr.bf16.mxu1 %v1432_v24  ;;  %v1496_v19 = vld [vmem:[%s2095_s1 + $0x300] ss:$8 sps:$4 sm:$0xff]   ;;  %v1504_v21 = vld [vmem:[%s2095_s1 + $0x314] ss:$8 sps:$4 sm:$0xff]   ;;  %v208_v23 = vcombine.high %v204_v3, %v204_v3  ;;  %v1499_v24 = vld [vmem:[%s2095_s1 + $0x110] ss:$8 sps:$4 sm:$0xff]  }
  0x19   :  { %1046 = vmatprep.subr.bf16.mxu0 %v1434_v25  ;;  %1066 = vmatprep.mubr.bf16.mxu0 %v204_v3  ;;  %v1502_v25 = vld [vmem:[%s2095_s1 + $0x310] ss:$8 sps:$4 sm:$0xff]   ;;  %v1517_v36 = vld [vmem:[%s2095_s1 + $0x140] ss:$8 sps:$4 sm:$0xff]   ;;  %v1525_v38 = vld [vmem:[%s2095_s1 + $0x154] ss:$8 sps:$4 sm:$0xff]  }
  0x1a   :  { %v1520_v37 = vld [vmem:[%s2095_s1 + $0x340] ss:$8 sps:$4 sm:$0xff]   ;;  %v1531_v42 = vld [vmem:[%s2095_s1 + $0x164] ss:$8 sps:$4 sm:$0xff]   ;;  %v1549_v55 = vld [vmem:[%s2095_s1 + $0x194] ss:$8 sps:$4 sm:$0xff]  }
  0x1b   :  { %965 = vmatpush1.bf16.msra.mxu1 %v1436_v26  ;;  %v1507_v26 = vld [vmem:[%s2095_s1 + $0x124] ss:$8 sps:$4 sm:$0xff]   ;;  %v1544_v54 = vld [vmem:[%s2095_s1 + $0x380] ss:$8 sps:$4 sm:$0xff]   ;;  %v1561_v63 = vld [vmem:[%s2095_s1 + $0x1b4] ss:$8 sps:$4 sm:$0xff]  }
  0x1c   :  { %1047 = vmatpush1.bf16.msra.mxu0 %v1437_v27  ;;  %966 = vmatprep.subr.bf16.mxu1 %v1438_v28  ;;  %v1510_v27 = vld [vmem:[%s2095_s1 + $0x324] ss:$8 sps:$4 sm:$0xff]   ;;  %v1505_v28 = vld [vmem:[%s2095_s1 + $0x120] ss:$8 sps:$4 sm:$0xff]  }
  0x1d   :  { %1048 = vmatprep.subr.bf16.mxu0 %v1440_v29  ;;  %v1508_v29 = vld [vmem:[%s2095_s1 + $0x320] ss:$8 sps:$4 sm:$0xff]   ;;  %v1534_v43 = vld [vmem:[%s2095_s1 + $0x364] ss:$8 sps:$4 sm:$0xff]  }
  0x1e   :  { %v1546_v52 = vld [vmem:[%s2095_s1 + $0x384] ss:$8 sps:$4 sm:$0xff]   ;;  %v1556_v62 = vld [vmem:[%s2095_s1 + $0x3a0] ss:$8 sps:$4 sm:$0xff]  }
  0x1f   :  { %967 = vmatpush1.bf16.msra.mxu1 %v1442_v30  ;;  %v1513_v30 = vld [vmem:[%s2095_s1 + $0x134] ss:$8 sps:$4 sm:$0xff]   ;;  %v1555_v59 = vld [vmem:[%s2095_s1 + $0x1a4] ss:$8 sps:$4 sm:$0xff]  }
  0x20   :  { %1049 = vmatpush1.bf16.msra.mxu0 %v1443_v31  ;;  %968 = vmatprep.subr.bf16.mxu1 %v1444_v32  ;;  %v1516_v31 = vld [vmem:[%s2095_s1 + $0x334] ss:$8 sps:$4 sm:$0xff]   ;;  %v1511_v32 = vld [vmem:[%s2095_s1 + $0x130] ss:$8 sps:$4 sm:$0xff]   ;;  %v1558_v60 = vld [vmem:[%s2095_s1 + $0x3a4] ss:$8 sps:$4 sm:$0xff]  }
  0x21   :  { %1050 = vmatprep.subr.bf16.mxu0 %v1446_v33  ;;  %v1514_v33 = vld [vmem:[%s2095_s1 + $0x330] ss:$8 sps:$4 sm:$0xff]   ;;  %v1567_v3 = vld [vmem:[%s2095_s1 + $0x1c4] ss:$8 sps:$4 sm:$0xff]  }
  0x23   :  { %969 = vmatpush1.bf16.msra.mxu1 %v1448_v34  ;;  %v1519_v34 = vld [vmem:[%s2095_s1 + $0x144] ss:$8 sps:$4 sm:$0xff]  }
  0x24   :  { %1051 = vmatpush1.bf16.msra.mxu0 %v1449_v35  ;;  %970 = vmatprep.subr.bf16.mxu1 %v1450_v39  ;;  %v1522_v35 = vld [vmem:[%s2095_s1 + $0x344] ss:$8 sps:$4 sm:$0xff]   ;;  %v1528_v39 = vld [vmem:[%s2095_s1 + $0x354] ss:$8 sps:$4 sm:$0xff]  }
  0x25   :  { %1052 = vmatprep.subr.bf16.mxu0 %v1452_v40  ;;  %v1523_v40 = vld [vmem:[%s2095_s1 + $0x150] ss:$8 sps:$4 sm:$0xff]  }
  0x27   :  { %971 = vmatpush1.bf16.msra.mxu1 %v1454_v41  ;;  %v1526_v41 = vld [vmem:[%s2095_s1 + $0x350] ss:$8 sps:$4 sm:$0xff]  }
  0x28   :  { %1053 = vmatpush1.bf16.msra.mxu0 %v1455_v44  ;;  %972 = vmatprep.subr.bf16.mxu1 %v1456_v45  ;;  %v1529_v44 = vld [vmem:[%s2095_s1 + $0x160] ss:$8 sps:$4 sm:$0xff]  }
  0x29   :  { %1054 = vmatprep.subr.bf16.mxu0 %v1458_v46  ;;  %v1532_v45 = vld [vmem:[%s2095_s1 + $0x360] ss:$8 sps:$4 sm:$0xff]   ;;  %v1537_v46 = vld [vmem:[%s2095_s1 + $0x174] ss:$8 sps:$4 sm:$0xff]  }
  0x2b   :  { %973 = vmatpush1.bf16.msra.mxu1 %v1460_v47  ;;  %v1540_v47 = vld [vmem:[%s2095_s1 + $0x374] ss:$8 sps:$4 sm:$0xff]  }
  0x2c   :  { %1055 = vmatpush1.bf16.msra.mxu0 %v1461_v48  ;;  %974 = vmatprep.subr.bf16.mxu1 %v1462_v50  ;;  %v1535_v48 = vld [vmem:[%s2095_s1 + $0x170] ss:$8 sps:$4 sm:$0xff]  }
  0x2d   :  { %1056 = vmatprep.subr.bf16.mxu0 %v1464_v51  ;;  %v1538_v50 = vld [vmem:[%s2095_s1 + $0x370] ss:$8 sps:$4 sm:$0xff]   ;;  %v1543_v51 = vld [vmem:[%s2095_s1 + $0x184] ss:$8 sps:$4 sm:$0xff]  }
  0x2f   :  { %975 = vmatpush1.bf16.msra.mxu1 %v1466_v53  ;;  %v1541_v53 = vld [vmem:[%s2095_s1 + $0x180] ss:$8 sps:$4 sm:$0xff]  }
  0x30   :  { %1057 = vmatpush1.bf16.msra.mxu0 %v1467_v56  ;;  %976 = vmatprep.subr.bf16.mxu1 %v1468_v57  ;;  %v1552_v56 = vld [vmem:[%s2095_s1 + $0x394] ss:$8 sps:$4 sm:$0xff]   ;;  %v1547_v57 = vld [vmem:[%s2095_s1 + $0x190] ss:$8 sps:$4 sm:$0xff]  }
  0x31   :  { %1058 = vmatprep.subr.bf16.mxu0 %v1470_v58  ;;  %v1550_v58 = vld [vmem:[%s2095_s1 + $0x390] ss:$8 sps:$4 sm:$0xff]  }
  0x33   :  { %977 = vmatpush1.bf16.msra.mxu1 %v1472_v61  ;;  %v1553_v61 = vld [vmem:[%s2095_s1 + $0x1a0] ss:$8 sps:$4 sm:$0xff]  }
  0x34   :  { %1059 = vmatpush1.bf16.msra.mxu0 %v1473_v0  ;;  %978 = vmatprep.subr.bf16.mxu1 %v1474_v1  ;;  %v1564_v0 = vld [vmem:[%s2095_s1 + $0x3b4] ss:$8 sps:$4 sm:$0xff]   ;;  %v1559_v1 = vld [vmem:[%s2095_s1 + $0x1b0] ss:$8 sps:$4 sm:$0xff]  }
  0x35   :  { %1060 = vmatprep.subr.bf16.mxu0 %v1476_v2  ;;  %v1562_v2 = vld [vmem:[%s2095_s1 + $0x3b0] ss:$8 sps:$4 sm:$0xff]  }
  0x37   :  { %979 = vmatpush1.bf16.msra.mxu1 %v1478_v4  ;;  %v1570_v4 = vld [vmem:[%s2095_s1 + $0x3c4] ss:$8 sps:$4 sm:$0xff]  }
  0x38   :  { %1061 = vmatpush1.bf16.msra.mxu0 %v1479_v5  ;;  %980 = vmatprep.subr.bf16.mxu1 %v1480_v6  ;;  %v1565_v5 = vld [vmem:[%s2095_s1 + $0x1c0] ss:$8 sps:$4 sm:$0xff]  }
  0x39   :  { %1062 = vmatprep.subr.bf16.mxu0 %v1482_v7  ;;  %v1568_v6 = vld [vmem:[%s2095_s1 + $0x3c0] ss:$8 sps:$4 sm:$0xff]   ;;  %v1573_v7 = vld [vmem:[%s2095_s1 + $0x1d4] ss:$8 sps:$4 sm:$0xff]  }
  0x3b   :  { %981 = vmatpush1.bf16.msra.mxu1 %v1484_v8  ;;  %v1576_v8 = vld [vmem:[%s2095_s1 + $0x3d4] ss:$8 sps:$4 sm:$0xff]  }
  0x3c   :  { %1063 = vmatpush1.bf16.msra.mxu0 %v1485_v9  ;;  %982 = vmatprep.subr.bf16.mxu1 %v1486_v10  ;;  %v1571_v9 = vld [vmem:[%s2095_s1 + $0x1d0] ss:$8 sps:$4 sm:$0xff]  }
  0x3d   :  { %1064 = vmatprep.subr.bf16.mxu0 %v1488_v11  ;;  %v1574_v10 = vld [vmem:[%s2095_s1 + $0x3d0] ss:$8 sps:$4 sm:$0xff]   ;;  %v1579_v11 = vld [vmem:[%s2095_s1 + $0x1e4] ss:$8 sps:$4 sm:$0xff]  }
  0x3f   :  { %983 = vmatpush1.bf16.msra.mxu1 %v1490_v12  ;;  %v1582_v12 = vld [vmem:[%s2095_s1 + $0x3e4] ss:$8 sps:$4 sm:$0xff]  }
  0x40   :  { %1065 = vmatpush1.bf16.msra.mxu0 %v1491_v13  ;;  %993 = vmatprep.subr.bf16.mxu1 %v1494_v14  ;;  %v1577_v13 = vld [vmem:[%s2095_s1 + $0x1e0] ss:$8 sps:$4 sm:$0xff]  }
  0x41   :  { %1075 = vmatprep.subr.bf16.mxu0 %v1498_v15  ;;  %v1580_v14 = vld [vmem:[%s2095_s1 + $0x3e0] ss:$8 sps:$4 sm:$0xff]   ;;  %v1585_v15 = vld [vmem:[%s2095_s1 + $0x1f4] ss:$8 sps:$4 sm:$0xff]  }
  0x42   :  { %985 = vmatmul.mubr.bf16.vlgmr.msra.gmra.mrb[0].mxu1 %v1845_v17 }
  0x43   :  { %1067 = vmatmul.mubr.bf16.vlgmr.msra.gmra.mrb[0].mxu0 %v1848_v18  ;;  %994 = vmatpush1.bf16.msra.mxu1 %v1492_v16  ;;  %v1588_v16 = vld [vmem:[%s2095_s1 + $0x3f4] ss:$8 sps:$4 sm:$0xff]  }
  0x44   :  { %1076 = vmatpush1.bf16.msra.mxu0 %v1496_v19  ;;  %995 = vmatprep.subr.bf16.mxu1 %v1501_v20  ;;  %v1583_v19 = vld [vmem:[%s2095_s1 + $0x1f0] ss:$8 sps:$4 sm:$0xff]  }
  0x45   :  { %1077 = vmatprep.subr.bf16.mxu0 %v1504_v21  ;;  %1025 = vmatprep.mubr.bf16.mxu1 %v207_v22  ;;  %v1586_v20 = vld [vmem:[%s2095_s1 + $0x3f0] ss:$8 sps:$4 sm:$0xff]   ;;  %v1591_v21 = vld [vmem:[%s2095_s1 + $0x404] ss:$8 sps:$4 sm:$0xff]   ;;  %v205_v22 = vcombine.high %v1845_v17, %v1845_v17 }
  0x46   :  { %1107 = vmatprep.mubr.bf16.mxu0 %v208_v23  ;;  %v206_v23 = vcombine.high %v1848_v18, %v1848_v18  ;;  %v1592_v17 = vld [vmem:[%s2095_s1 + $0x410] ss:$8 sps:$4 sm:$0xff]   ;;  %v1597_v18 = vld [vmem:[%s2095_s1 + $0x424] ss:$8 sps:$4 sm:$0xff]  }
  0x47   :  { %996 = vmatpush1.bf16.msra.mxu1 %v1499_v24  ;;  %v1589_v24 = vld [vmem:[%s2095_s1 + $0x400] ss:$8 sps:$4 sm:$0xff]  }
  0x48   :  { %1078 = vmatpush1.bf16.msra.mxu0 %v1502_v25  ;;  %997 = vmatprep.subr.bf16.mxu1 %v1507_v26  ;;  %v1594_v25 = vld [vmem:[%s2095_s1 + $0x414] ss:$8 sps:$4 sm:$0xff]   ;;  %v1618_v26 = vmov 0  }
  0x49   :  { %1079 = vmatprep.subr.bf16.mxu0 %v1510_v27  ;;  %v1595_v27 = vld [vmem:[%s2095_s1 + $0x420] ss:$8 sps:$4 sm:$0xff]  }
  0x4b   :  { %998 = vmatpush1.bf16.msra.mxu1 %v1505_v28  ;;  %v1600_v28 = vld [vmem:[%s2095_s1 + $0x434] ss:$8 sps:$4 sm:$0xff]  }
  0x4c   :  { %1080 = vmatpush1.bf16.msra.mxu0 %v1508_v29  ;;  %999 = vmatprep.subr.bf16.mxu1 %v1513_v30  ;;  %v1598_v29 = vld [vmem:[%s2095_s1 + $0x430] ss:$8 sps:$4 sm:$0xff]   ;;  %v1603_v30 = vld [vmem:[%s2095_s1 + $0x444] ss:$8 sps:$4 sm:$0xff]  }
  0x4d   :  { %1081 = vmatprep.subr.bf16.mxu0 %v1516_v31  ;;  %v1601_v31 = vld [vmem:[%s2095_s1 + $0x440] ss:$8 sps:$4 sm:$0xff]  }
  0x4f   :  { %1000 = vmatpush1.bf16.msra.mxu1 %v1511_v32  ;;  %v1606_v32 = vld [vmem:[%s2095_s1 + $0x454] ss:$8 sps:$4 sm:$0xff]  }
  0x50   :  { %1082 = vmatpush1.bf16.msra.mxu0 %v1514_v33  ;;  %1001 = vmatprep.subr.bf16.mxu1 %v1519_v34  ;;  %v1604_v33 = vld [vmem:[%s2095_s1 + $0x450] ss:$8 sps:$4 sm:$0xff]   ;;  %v1609_v34 = vld [vmem:[%s2095_s1 + $0x464] ss:$8 sps:$4 sm:$0xff]  }
  0x51   :  { %1083 = vmatprep.subr.bf16.mxu0 %v1522_v35  ;;  %v1607_v35 = vld [vmem:[%s2095_s1 + $0x460] ss:$8 sps:$4 sm:$0xff]  }
  0x53   :  { %1002 = vmatpush1.bf16.msra.mxu1 %v1517_v36  ;;  %v1612_v36 = vld [vmem:[%s2095_s1 + $0x474] ss:$8 sps:$4 sm:$0xff]  }
  0x54   :  { %1084 = vmatpush1.bf16.msra.mxu0 %v1520_v37  ;;  %1003 = vmatprep.subr.bf16.mxu1 %v1525_v38  ;;  %v1610_v37 = vld [vmem:[%s2095_s1 + $0x470] ss:$8 sps:$4 sm:$0xff]   ;;  %v1233_v38 = vld.sshfl [vmem:[%s2096_s0 + $0x8] sm:$0x1 pattern:$0x75316420] }
  0x55   :  { %1085 = vmatprep.subr.bf16.mxu0 %v1528_v39  ;;  %v222_v39 = vrot.slane %v1233_v38, %v1766_v49 }
  0x57   :  { %1004 = vmatpush1.bf16.msra.mxu1 %v1523_v40 }
  0x58   :  { %1086 = vmatpush1.bf16.msra.mxu0 %v1526_v41  ;;  %1005 = vmatprep.subr.bf16.mxu1 %v1531_v42 }
  0x59   :  { %1087 = vmatprep.subr.bf16.mxu0 %v1534_v43 }
  0x5b   :  { %1006 = vmatpush1.bf16.msra.mxu1 %v1529_v44 }
  0x5c   :  { %1088 = vmatpush1.bf16.msra.mxu0 %v1532_v45  ;;  %1007 = vmatprep.subr.bf16.mxu1 %v1537_v46 }
  0x5d   :  { %1089 = vmatprep.subr.bf16.mxu0 %v1540_v47 }
  0x5f   :  { %1008 = vmatpush1.bf16.msra.mxu1 %v1535_v48 }
  0x60   :  { %1090 = vmatpush1.bf16.msra.mxu0 %v1538_v50  ;;  %1009 = vmatprep.subr.bf16.mxu1 %v1543_v51 }
  0x61   :  { %1091 = vmatprep.subr.bf16.mxu0 %v1546_v52 }
  0x63   :  { %1010 = vmatpush1.bf16.msra.mxu1 %v1541_v53 }
  0x64   :  { %1092 = vmatpush1.bf16.msra.mxu0 %v1544_v54  ;;  %1011 = vmatprep.subr.bf16.mxu1 %v1549_v55 }
  0x65   :  { %1093 = vmatprep.subr.bf16.mxu0 %v1552_v56 }
  0x67   :  { %1012 = vmatpush1.bf16.msra.mxu1 %v1547_v57 }
  0x68   :  { %1094 = vmatpush1.bf16.msra.mxu0 %v1550_v58  ;;  %1013 = vmatprep.subr.bf16.mxu1 %v1555_v59 }
  0x69   :  { %1095 = vmatprep.subr.bf16.mxu0 %v1558_v60 }
  0x6b   :  { %1014 = vmatpush1.bf16.msra.mxu1 %v1553_v61 }
  0x6c   :  { %1096 = vmatpush1.bf16.msra.mxu0 %v1556_v62  ;;  %1015 = vmatprep.subr.bf16.mxu1 %v1561_v63 }
  0x6d   :  { %1097 = vmatprep.subr.bf16.mxu0 %v1564_v0 }
  0x6f   :  { %1016 = vmatpush1.bf16.msra.mxu1 %v1559_v1 }
  0x70   :  { %1098 = vmatpush1.bf16.msra.mxu0 %v1562_v2  ;;  %1017 = vmatprep.subr.bf16.mxu1 %v1567_v3 }
  0x71   :  { %1099 = vmatprep.subr.bf16.mxu0 %v1570_v4 }
  0x73   :  { %1018 = vmatpush1.bf16.msra.mxu1 %v1565_v5 }
  0x74   :  { %1100 = vmatpush1.bf16.msra.mxu0 %v1568_v6  ;;  %1019 = vmatprep.subr.bf16.mxu1 %v1573_v7 }
  0x75   :  { %1101 = vmatprep.subr.bf16.mxu0 %v1576_v8 }
  0x77   :  { %1020 = vmatpush1.bf16.msra.mxu1 %v1571_v9 }
  0x78   :  { %1102 = vmatpush1.bf16.msra.mxu0 %v1574_v10  ;;  %1021 = vmatprep.subr.bf16.mxu1 %v1579_v11 }
  0x79   :  { %1103 = vmatprep.subr.bf16.mxu0 %v1582_v12 }
  0x7b   :  { %1022 = vmatpush1.bf16.msra.mxu1 %v1577_v13 }
  0x7c   :  { %1104 = vmatpush1.bf16.msra.mxu0 %v1580_v14  ;;  %1023 = vmatprep.subr.bf16.mxu1 %v1585_v15 }
  0x7d   :  { %1105 = vmatprep.subr.bf16.mxu0 %v1588_v16 }
  0x7f   :  { %1024 = vmatpush1.bf16.msra.mxu1 %v1583_v19 }
  0x80   :  { %1106 = vmatpush1.bf16.msra.mxu0 %v1586_v20 }
  0x81   :  { %1116 = vmatprep.subr.bf16.mxu0 %v1591_v21 }
  0x82   :  { %1026 = vmatmul.mubr.bf16.vlgmr.msra.gmra.mrb[0].mxu1 %v205_v22 }
  0x83   :  { %1108 = vmatmul.mubr.bf16.vlgmr.msra.gmra.mrb[0].mxu0 %v206_v23 }
  0x84   :  { %1117 = vmatpush1.bf16.msra.mxu0 %v1589_v24  ;;  %1148 = vmatprep.mubr.bf16.mxu0 %v1618_v26 }
  0x85   :  { %1118 = vmatprep.subr.bf16.mxu0 %v1594_v25 }
  0x88   :  { %1119 = vmatpush1.bf16.msra.mxu0 %v1592_v17 }
  0x89   :  { %1120 = vmatprep.subr.bf16.mxu0 %v1597_v18 }
  0x8c   :  { %1121 = vmatpush1.bf16.msra.mxu0 %v1595_v27 }
  0x8d   :  { %1122 = vmatprep.subr.bf16.mxu0 %v1600_v28 }
  0x90   :  { %1123 = vmatpush1.bf16.msra.mxu0 %v1598_v29 }
  0x91   :  { %1124 = vmatprep.subr.bf16.mxu0 %v1603_v30 }
  0x94   :  { %1125 = vmatpush1.bf16.msra.mxu0 %v1601_v31 }
  0x95   :  { %1126 = vmatprep.subr.bf16.mxu0 %v1606_v32 }
  0x98   :  { %1127 = vmatpush1.bf16.msra.mxu0 %v1604_v33 }
  0x99   :  { %1128 = vmatprep.subr.bf16.mxu0 %v1609_v34 }
  0x9c   :  { %1129 = vmatpush1.bf16.msra.mxu0 %v1607_v35 }
  0x9d   :  { %1130 = vmatprep.subr.bf16.mxu0 %v1612_v36 }
  0xa0   :  { %1131 = vmatpush1.bf16.msra.mxu0 %v1610_v37 }
  0xa3   :  { %1149 = vmatmul.mubr.bf16.vlgmr.msra.gmra.mrb[0].mxu0 %v222_v39 }
 0x155   :  { %v1027_v40 = vpop.f32.mrb[0].mxu1 }
 0x156   :  { %v1029_v41 = vpop.f32.mrb[1].mxu1 }
 0x157   :  { %v1031_v42 = vpop.f32.mrb[2].mxu1 }
 0x158   :  { %v1032_v43 = vpop.f32.mrb[3].mxu1 }
 0x176   :  { %v1150_v44 = vpop.f32.mrb[0].mxu0 }
 0x177   :  { %v1380_v45 = vadd.f32 %v1150_v44, %v1027_v40  ;;  %v1152_v46 = vpop.f32.mrb[1].mxu0 }
 0x178   :  { %v1381_v47 = vadd.f32 %v1152_v46, %v1029_v41  ;;  %v1154_v48 = vpop.f32.mrb[2].mxu0 }
 0x179   :  { %v1158_v50 = vsel %vm1157_vm0, %v1380_v45, 0.0  ;;  %v1174_v51 = vmul.f32 %v1380_v45, %v1380_v45  ;;  %v1155_v52 = vpop.f32.mrb[3].mxu0 }
 0x17a   :  { %v1159_v53 = vrot.slane %v1158_v50, 4  ;;  %v1165_v54 = vsel %vm1157_vm0, %v1381_v47, 0.0  ;;  %v1175_v55 = vmul.f32 %v1381_v47, %v1381_v47 }
 0x17b   :  { %v1176_v56 = vsel %vm1157_vm0, %v1174_v51, 0.0  ;;  %v1166_v57 = vrot.slane %v1165_v54, 4 }
 0x17c   :  { %v1160_v58 = vadd.f32 %v1159_v53, %v1158_v50  ;;  %v1177_v59 = vrot.slane %v1176_v56, 4  ;;  %v1183_v60 = vsel %vm1157_vm0, %v1175_v55, 0.0 }
 0x17d   :  { %v1167_v61 = vadd.f32 %v1166_v57, %v1165_v54  ;;  %v1184_v62 = vrot.slane %v1183_v60, 4 }
 0x17e   :  { %v1161_v63 = vrot.slane %v1160_v58, 2  ;;  %v1178_v0 = vadd.f32 %v1177_v59, %v1176_v56 }
 0x17f   :  { %v1168_v1 = vrot.slane %v1167_v61, 2  ;;  %v1185_v2 = vadd.f32 %v1184_v62, %v1183_v60 }
 0x180   :  { %v1162_v3 = vadd.f32 %v1161_v63, %v1160_v58  ;;  %v1179_v4 = vrot.slane %v1178_v0, 2 }
 0x181   :  { %v1169_v5 = vadd.f32 %v1168_v1, %v1167_v61  ;;  %v1186_v6 = vrot.slane %v1185_v2, 2 }
 0x182   :  { %v1163_v7 = vrot.slane %v1162_v3, 1  ;;  %v1180_v8 = vadd.f32 %v1179_v4, %v1178_v0 }
 0x183   :  { %v1170_v9 = vrot.slane %v1169_v5, 1  ;;  %v1187_v10 = vadd.f32 %v1186_v6, %v1185_v2 }
 0x184   :  { %v1164_v11 = vadd.f32 %v1163_v7, %v1162_v3  ;;  %v1181_v12 = vrot.slane %v1180_v8, 1 }
 0x185   :  { %v1171_v13 = vadd.f32 %v1170_v9, %v1169_v5  ;;  %v1188_v14 = vrot.slane %v1187_v10, 1 }
 0x186   :  { %v1172_v15 = vmul.f32 0.5, %v1164_v11  ;;  %v1182_v16 = vadd.f32 %v1181_v12, %v1180_v8 }
 0x187   :  { %v1173_v19 = vmul.f32 0.5, %v1171_v13  ;;  %v1189_v20 = vadd.f32 %v1188_v14, %v1187_v10 }
 0x188   :  { %v1190_v21 = vmul.f32 0.5, %v1182_v16  ;;  %v1192_v22 = vmul.f32 %v1172_v15, %v1172_v15  ;;  %v1198_v29 = vsub.f32 %v1380_v45, %v1172_v15 }
 0x189   :  { %v1191_v23 = vmul.f32 0.5, %v1189_v20  ;;  %v1193_v24 = vmul.f32 %v1173_v19, %v1173_v19  ;;  %v1199_v31 = vsub.f32 %v1381_v47, %v1173_v19 }
 0x18a   :  { %v1194_v25 = vsub.f32 %v1190_v21, %v1192_v22 }
 0x18b   :  { %v1195_v17 = vsub.f32 %v1191_v23, %v1193_v24 }
 0x18c   :  { %v1196_v26 = vmax.f32 %v1194_v25, 0.0 }
 0x18d   :  { %v1197_v18 = vmax.f32 %v1195_v17, 0.0 }
 0x18e   :  { %v1200_v27 = vadd.f32 1e-05, %v1196_v26 }
 0x18f   :  { %v1201_v28 = vadd.f32 1e-05, %v1197_v18 }
 0x190   :  { %1613 = vrsqrt.f32 %v1200_v27 }
 0x191   :  { %1615 = vrsqrt.f32 %v1201_v28 }
 0x19a   :  { %v1614_v30 = vpop.eup %1613 }
 0x19b   :  { %v1616_v32 = vpop.eup %1615  ;;  %v1204_v33 = vmul.f32 %v1614_v30, %v1198_v29 }
 0x19c   :  { %v1205_v34 = vmul.f32 %v1616_v32, %v1199_v31 }
 0x19d   :  { %v1206_v35 = vmax.f32 %v1204_v33, 0.0 }
 0x19e   :  { %v1207_v36 = vmax.f32 %v1205_v34, 0.0 }
 0x1a0   :  { %v1378_v37 = vpack.c.bf16 %v1207_v36, %v1206_v35 }
 0x1a2   :  { %v1219_v38 = vrot.slane %v1378_v37, %v1766_v49 }
 0x1a4   :  { %1379 = vst.sshfl [vmem:[%s2097_s2] sm:$0x5 pattern:$0x73625140] %v1219_v38 }

// kernel: _lambda_.23
= control target key start
LH: loop header
LB: loop body
LE: loop exit
PB: predicated region body
PF: predicated region fallthrough
CT: control target
= control target key end

     0   :  { %v3107_v36 = vmov 1966171168   ;;  %v312_v38 = vlaneseq  ;;  %vm2255_vm0 = vcmask 1041408   ;;  %s4090_s1 = inlined_call_operand.vmem [shape: bf16[2304,256], index: 1, kind: input, shape index: {}]   ;;  %s4091_s0 = inlined_call_operand.vmem [shape: bf16[2,2304], index: 0, kind: input, shape index: {}]   ;;  %s4092_s2 = inlined_call_operand.vmem [shape: bf16[2,256], index: 2, kind: input, shape index: {}]   ;;  %s4093_s3 = inlined_call_operand.vmem [shape: bf16[2,256], index: 3, kind: output, shape index: {}]  }
   0x1   :  { %v2669_v0 = vld [vmem:[%s4090_s1 + $0x4] ss:$8 sps:$4 sm:$0xff]   ;;  %v2673_v2 = vld [vmem:[%s4090_s1] ss:$8 sps:$4 sm:$0xff]   ;;  %v2675_v4 = vld [vmem:[%s4090_s1 + $0x14] ss:$8 sps:$4 sm:$0xff]   ;;  %v310_v37 = vunpack.c.l.s4 %v3107_v36 }
   0x2   :  { %v2671_v1 = vld [vmem:[%s4090_s1 + $0x404] ss:$8 sps:$4 sm:$0xff]   ;;  %1886 = vmatprep.subr.bf16.mxu1 %v2669_v0  ;;  %v2674_v3 = vld [vmem:[%s4090_s1 + $0x400] ss:$8 sps:$4 sm:$0xff]   ;;  %v2677_v5 = vld [vmem:[%s4090_s1 + $0x414] ss:$8 sps:$4 sm:$0xff]  }
   0x3   :  { %2050 = vmatprep.subr.bf16.mxu0 %v2671_v1  ;;  %1887 = vmatpush1.bf16.msra.mxu1 %v2673_v2  ;;  %v2679_v6 = vld [vmem:[%s4090_s1 + $0x10] ss:$8 sps:$4 sm:$0xff]   ;;  %v2681_v8 = vld [vmem:[%s4090_s1 + $0x24] ss:$8 sps:$4 sm:$0xff]   ;;  %v2685_v10 = vld [vmem:[%s4090_s1 + $0x20] ss:$8 sps:$4 sm:$0xff]   ;;  %v311_v42 = vunpack.c.0.s8 %v310_v37 }
   0x4   :  { %2051 = vmatpush1.bf16.msra.mxu0 %v2674_v3  ;;  %1888 = vmatprep.subr.bf16.mxu1 %v2675_v4  ;;  %v2680_v7 = vld [vmem:[%s4090_s1 + $0x410] ss:$8 sps:$4 sm:$0xff]   ;;  %v2683_v9 = vld [vmem:[%s4090_s1 + $0x424] ss:$8 sps:$4 sm:$0xff]   ;;  %v2686_v11 = vld [vmem:[%s4090_s1 + $0x420] ss:$8 sps:$4 sm:$0xff]  }
   0x5   :  { %2052 = vmatprep.subr.bf16.mxu0 %v2677_v5  ;;  %v2687_v12 = vld [vmem:[%s4090_s1 + $0x34] ss:$8 sps:$4 sm:$0xff]   ;;  %v2691_v14 = vld [vmem:[%s4090_s1 + $0x30] ss:$8 sps:$4 sm:$0xff]   ;;  %v2693_v16 = vld [vmem:[%s4090_s1 + $0x44] ss:$8 sps:$4 sm:$0xff]  }
   0x6   :  { %v2689_v13 = vld [vmem:[%s4090_s1 + $0x434] ss:$8 sps:$4 sm:$0xff]   ;;  %v2692_v15 = vld [vmem:[%s4090_s1 + $0x430] ss:$8 sps:$4 sm:$0xff]   ;;  %v2695_v17 = vld [vmem:[%s4090_s1 + $0x444] ss:$8 sps:$4 sm:$0xff]  }
   0x7   :  { %1889 = vmatpush1.bf16.msra.mxu1 %v2679_v6  ;;  %v2697_v18 = vld [vmem:[%s4090_s1 + $0x40] ss:$8 sps:$4 sm:$0xff]   ;;  %v2699_v20 = vld [vmem:[%s4090_s1 + $0x54] ss:$8 sps:$4 sm:$0xff]   ;;  %v2703_v22 = vld [vmem:[%s4090_s1 + $0x50] ss:$8 sps:$4 sm:$0xff]  }
   0x8   :  { %2053 = vmatpush1.bf16.msra.mxu0 %v2680_v7  ;;  %1890 = vmatprep.subr.bf16.mxu1 %v2681_v8  ;;  %v2698_v19 = vld [vmem:[%s4090_s1 + $0x440] ss:$8 sps:$4 sm:$0xff]   ;;  %v2701_v21 = vld [vmem:[%s4090_s1 + $0x454] ss:$8 sps:$4 sm:$0xff]   ;;  %v2704_v23 = vld [vmem:[%s4090_s1 + $0x450] ss:$8 sps:$4 sm:$0xff]  }
   0x9   :  { %2054 = vmatprep.subr.bf16.mxu0 %v2683_v9  ;;  %v2705_v24 = vld [vmem:[%s4090_s1 + $0x64] ss:$8 sps:$4 sm:$0xff]   ;;  %v2709_v26 = vld [vmem:[%s4090_s1 + $0x60] ss:$8 sps:$4 sm:$0xff]   ;;  %v2711_v28 = vld [vmem:[%s4090_s1 + $0x74] ss:$8 sps:$4 sm:$0xff]  }
   0xa   :  { %v2707_v25 = vld [vmem:[%s4090_s1 + $0x464] ss:$8 sps:$4 sm:$0xff]   ;;  %v2710_v27 = vld [vmem:[%s4090_s1 + $0x460] ss:$8 sps:$4 sm:$0xff]   ;;  %v2713_v29 = vld [vmem:[%s4090_s1 + $0x474] ss:$8 sps:$4 sm:$0xff]  }
   0xb   :  { %1891 = vmatpush1.bf16.msra.mxu1 %v2685_v10  ;;  %v2715_v30 = vld [vmem:[%s4090_s1 + $0x70] ss:$8 sps:$4 sm:$0xff]   ;;  %v2717_v32 = vld [vmem:[%s4090_s1 + $0x84] ss:$8 sps:$4 sm:$0xff]   ;;  %v2721_v34 = vld [vmem:[%s4090_s1 + $0x80] ss:$8 sps:$4 sm:$0xff]  }
   0xc   :  { %2055 = vmatpush1.bf16.msra.mxu0 %v2686_v11  ;;  %1892 = vmatprep.subr.bf16.mxu1 %v2687_v12  ;;  %v2716_v31 = vld [vmem:[%s4090_s1 + $0x470] ss:$8 sps:$4 sm:$0xff]   ;;  %v2719_v33 = vld [vmem:[%s4090_s1 + $0x484] ss:$8 sps:$4 sm:$0xff]   ;;  %v2722_v35 = vld [vmem:[%s4090_s1 + $0x480] ss:$8 sps:$4 sm:$0xff]  }
   0xd   :  { %2056 = vmatprep.subr.bf16.mxu0 %v2689_v13  ;;  %v2723_v39 = vld [vmem:[%s4090_s1 + $0x94] ss:$8 sps:$4 sm:$0xff]   ;;  %v2727_v41 = vld [vmem:[%s4090_s1 + $0x90] ss:$8 sps:$4 sm:$0xff]   ;;  %v3246_v43 = vshrl.u32 %v312_v38, 7  ;;  %v3275_v52 = vld [vmem:[%s4091_s0] sm:$0xff] }
   0xe   :  { %v2725_v40 = vld [vmem:[%s4090_s1 + $0x494] ss:$8 sps:$4 sm:$0xff]   ;;  %v2728_v44 = vld [vmem:[%s4090_s1 + $0x490] ss:$8 sps:$4 sm:$0xff]   ;;  %v2729_v45 = vld [vmem:[%s4090_s1 + $0xa4] ss:$8 sps:$4 sm:$0xff]  }
   0xf   :  { %1893 = vmatpush1.bf16.msra.mxu1 %v2691_v14  ;;  %v2731_v46 = vld [vmem:[%s4090_s1 + $0x4a4] ss:$8 sps:$4 sm:$0xff]   ;;  %v2733_v47 = vld [vmem:[%s4090_s1 + $0xa0] ss:$8 sps:$4 sm:$0xff]   ;;  %v3264_v49 = vsub.s32 %v311_v42, %v3246_v43  ;;  %v2735_v50 = vld [vmem:[%s4090_s1 + $0xb4] ss:$8 sps:$4 sm:$0xff]  }
  0x10   :  { %2057 = vmatpush1.bf16.msra.mxu0 %v2692_v15  ;;  %1894 = vmatprep.subr.bf16.mxu1 %v2693_v16  ;;  %v2734_v48 = vld [vmem:[%s4090_s1 + $0x4a0] ss:$8 sps:$4 sm:$0xff]   ;;  %v2737_v51 = vld [vmem:[%s4090_s1 + $0x4b4] ss:$8 sps:$4 sm:$0xff]   ;;  %v2739_v53 = vld [vmem:[%s4090_s1 + $0xb0] ss:$8 sps:$4 sm:$0xff]  }
  0x11   :  { %2058 = vmatprep.subr.bf16.mxu0 %v2695_v17  ;;  %v315_v54 = vrot.slane %v3275_v52, %v3264_v49  ;;  %v2740_v55 = vld [vmem:[%s4090_s1 + $0x4b0] ss:$8 sps:$4 sm:$0xff]   ;;  %v3288_v56 = vld [vmem:[%s4091_s0 + $0x8] sm:$0xff]  ;;  %v2747_v1 = vld [vmem:[%s4090_s1 + $0xd4] ss:$8 sps:$4 sm:$0xff]  }
  0x12   :  { %v2741_v57 = vld [vmem:[%s4090_s1 + $0xc4] ss:$8 sps:$4 sm:$0xff]   ;;  %v364_v60 = vrot.slane %v3288_v56, %v3264_v49  ;;  %v2745_v63 = vld [vmem:[%s4090_s1 + $0xc0] ss:$8 sps:$4 sm:$0xff]   ;;  %v2749_v2 = vld [vmem:[%s4090_s1 + $0x4d4] ss:$8 sps:$4 sm:$0xff]  }
  0x13   :  { %1895 = vmatpush1.bf16.msra.mxu1 %v2697_v18  ;;  %v2743_v58 = vld [vmem:[%s4090_s1 + $0x4c4] ss:$8 sps:$4 sm:$0xff]   ;;  %v323_v59 = vcombine.high %v315_v54, %v315_v54  ;;  %v2746_v0 = vld [vmem:[%s4090_s1 + $0x4c0] ss:$8 sps:$4 sm:$0xff]   ;;  %v2751_v4 = vld [vmem:[%s4090_s1 + $0xd0] ss:$8 sps:$4 sm:$0xff]   ;;  %v3349_v16 = vrot.slane %v315_v54, %v3264_v49 }
  0x14   :  { %2059 = vmatpush1.bf16.msra.mxu0 %v2698_v19  ;;  %1896 = vmatprep.subr.bf16.mxu1 %v2699_v20  ;;  %v372_v62 = vcombine.high %v364_v60, %v364_v60  ;;  %v2752_v5 = vld [vmem:[%s4090_s1 + $0x4d0] ss:$8 sps:$4 sm:$0xff]   ;;  %v2753_v6 = vld [vmem:[%s4090_s1 + $0xe4] ss:$8 sps:$4 sm:$0xff]   ;;  %v2757_v8 = vld [vmem:[%s4090_s1 + $0xe0] ss:$8 sps:$4 sm:$0xff]   ;;  %v3352_v17 = vrot.slane %v364_v60, %v3264_v49 }
  0x15   :  { %2060 = vmatprep.subr.bf16.mxu0 %v2701_v21  ;;  %v345_v61 = vrot.slane %v323_v59, %v3264_v49  ;;  %v2755_v7 = vld [vmem:[%s4090_s1 + $0x4e4] ss:$8 sps:$4 sm:$0xff]   ;;  %v2758_v9 = vld [vmem:[%s4090_s1 + $0x4e0] ss:$8 sps:$4 sm:$0xff]   ;;  %v2759_v10 = vld [vmem:[%s4090_s1 + $0xf4] ss:$8 sps:$4 sm:$0xff]  }
  0x16   :  { %v394_v3 = vrot.slane %v372_v62, %v3264_v49  ;;  %v2761_v11 = vld [vmem:[%s4090_s1 + $0x4f4] ss:$8 sps:$4 sm:$0xff]   ;;  %v2763_v12 = vld [vmem:[%s4090_s1 + $0xf0] ss:$8 sps:$4 sm:$0xff]   ;;  %v2768_v14 = vld [vmem:[%s4090_s1 + $0x104] ss:$8 sps:$4 sm:$0xff]  }
  0x17   :  { %1897 = vmatpush1.bf16.msra.mxu1 %v2703_v22  ;;  %1918 = vmatprep.mubr.bf16.mxu1 %v345_v61  ;;  %v2764_v13 = vld [vmem:[%s4090_s1 + $0x4f0] ss:$8 sps:$4 sm:$0xff]   ;;  %v2772_v15 = vld [vmem:[%s4090_s1 + $0x504] ss:$8 sps:$4 sm:$0xff]   ;;  %v2766_v18 = vld [vmem:[%s4090_s1 + $0x100] ss:$8 sps:$4 sm:$0xff]   ;;  %v355_v22 = vcombine.high %v345_v61, %v345_v61 }
  0x18   :  { %2061 = vmatpush1.bf16.msra.mxu0 %v2704_v23  ;;  %1898 = vmatprep.subr.bf16.mxu1 %v2705_v24  ;;  %v2770_v19 = vld [vmem:[%s4090_s1 + $0x500] ss:$8 sps:$4 sm:$0xff]   ;;  %v2775_v20 = vld [vmem:[%s4090_s1 + $0x114] ss:$8 sps:$4 sm:$0xff]   ;;  %v404_v23 = vcombine.high %v394_v3, %v394_v3  ;;  %v2773_v24 = vld [vmem:[%s4090_s1 + $0x110] ss:$8 sps:$4 sm:$0xff]  }
  0x19   :  { %2062 = vmatprep.subr.bf16.mxu0 %v2707_v25  ;;  %2082 = vmatprep.mubr.bf16.mxu0 %v394_v3  ;;  %v2778_v21 = vld [vmem:[%s4090_s1 + $0x514] ss:$8 sps:$4 sm:$0xff]   ;;  %v2776_v25 = vld [vmem:[%s4090_s1 + $0x510] ss:$8 sps:$4 sm:$0xff]   ;;  %v2791_v36 = vld [vmem:[%s4090_s1 + $0x140] ss:$8 sps:$4 sm:$0xff]  }
  0x1a   :  { %v2794_v37 = vld [vmem:[%s4090_s1 + $0x540] ss:$8 sps:$4 sm:$0xff]   ;;  %v2799_v38 = vld [vmem:[%s4090_s1 + $0x154] ss:$8 sps:$4 sm:$0xff]   ;;  %v2805_v42 = vld [vmem:[%s4090_s1 + $0x164] ss:$8 sps:$4 sm:$0xff]  }
  0x1b   :  { %1899 = vmatpush1.bf16.msra.mxu1 %v2709_v26  ;;  %v2781_v26 = vld [vmem:[%s4090_s1 + $0x124] ss:$8 sps:$4 sm:$0xff]   ;;  %v2826_v59 = vld [vmem:[%s4090_s1 + $0x594] ss:$8 sps:$4 sm:$0xff]   ;;  %v2821_v60 = vld [vmem:[%s4090_s1 + $0x190] ss:$8 sps:$4 sm:$0xff]  }
  0x1c   :  { %2063 = vmatpush1.bf16.msra.mxu0 %v2710_v27  ;;  %1900 = vmatprep.subr.bf16.mxu1 %v2711_v28  ;;  %v2784_v27 = vld [vmem:[%s4090_s1 + $0x524] ss:$8 sps:$4 sm:$0xff]   ;;  %v2779_v28 = vld [vmem:[%s4090_s1 + $0x120] ss:$8 sps:$4 sm:$0xff]   ;;  %v2824_v61 = vld [vmem:[%s4090_s1 + $0x590] ss:$8 sps:$4 sm:$0xff]  }
  0x1d   :  { %2064 = vmatprep.subr.bf16.mxu0 %v2713_v29  ;;  %v2782_v29 = vld [vmem:[%s4090_s1 + $0x520] ss:$8 sps:$4 sm:$0xff]   ;;  %v2820_v54 = vld [vmem:[%s4090_s1 + $0x584] ss:$8 sps:$4 sm:$0xff]   ;;  %v2838_v3 = vld [vmem:[%s4090_s1 + $0x5b4] ss:$8 sps:$4 sm:$0xff]  }
  0x1e   :  { %v2829_v62 = vld [vmem:[%s4090_s1 + $0x1a4] ss:$8 sps:$4 sm:$0xff]  }
  0x1f   :  { %1901 = vmatpush1.bf16.msra.mxu1 %v2715_v30  ;;  %v2787_v30 = vld [vmem:[%s4090_s1 + $0x134] ss:$8 sps:$4 sm:$0xff]  }
  0x20   :  { %2065 = vmatpush1.bf16.msra.mxu0 %v2716_v31  ;;  %1902 = vmatprep.subr.bf16.mxu1 %v2717_v32  ;;  %v2790_v31 = vld [vmem:[%s4090_s1 + $0x534] ss:$8 sps:$4 sm:$0xff]   ;;  %v2785_v32 = vld [vmem:[%s4090_s1 + $0x130] ss:$8 sps:$4 sm:$0xff]  }
  0x21   :  { %2066 = vmatprep.subr.bf16.mxu0 %v2719_v33  ;;  %v2788_v33 = vld [vmem:[%s4090_s1 + $0x530] ss:$8 sps:$4 sm:$0xff]  }
  0x23   :  { %1903 = vmatpush1.bf16.msra.mxu1 %v2721_v34  ;;  %v2793_v34 = vld [vmem:[%s4090_s1 + $0x144] ss:$8 sps:$4 sm:$0xff]  }
  0x24   :  { %2067 = vmatpush1.bf16.msra.mxu0 %v2722_v35  ;;  %1904 = vmatprep.subr.bf16.mxu1 %v2723_v39  ;;  %v2796_v35 = vld [vmem:[%s4090_s1 + $0x544] ss:$8 sps:$4 sm:$0xff]   ;;  %v2802_v39 = vld [vmem:[%s4090_s1 + $0x554] ss:$8 sps:$4 sm:$0xff]  }
  0x25   :  { %2068 = vmatprep.subr.bf16.mxu0 %v2725_v40  ;;  %v2797_v40 = vld [vmem:[%s4090_s1 + $0x150] ss:$8 sps:$4 sm:$0xff]  }
  0x27   :  { %1905 = vmatpush1.bf16.msra.mxu1 %v2727_v41  ;;  %v2800_v41 = vld [vmem:[%s4090_s1 + $0x550] ss:$8 sps:$4 sm:$0xff]  }
  0x28   :  { %2069 = vmatpush1.bf16.msra.mxu0 %v2728_v44  ;;  %1906 = vmatprep.subr.bf16.mxu1 %v2729_v45  ;;  %v2808_v44 = vld [vmem:[%s4090_s1 + $0x564] ss:$8 sps:$4 sm:$0xff]   ;;  %v2803_v45 = vld [vmem:[%s4090_s1 + $0x160] ss:$8 sps:$4 sm:$0xff]  }
  0x29   :  { %2070 = vmatprep.subr.bf16.mxu0 %v2731_v46  ;;  %v2806_v46 = vld [vmem:[%s4090_s1 + $0x560] ss:$8 sps:$4 sm:$0xff]  }
  0x2b   :  { %1907 = vmatpush1.bf16.msra.mxu1 %v2733_v47  ;;  %v2811_v47 = vld [vmem:[%s4090_s1 + $0x174] ss:$8 sps:$4 sm:$0xff]  }
  0x2c   :  { %2071 = vmatpush1.bf16.msra.mxu0 %v2734_v48  ;;  %1908 = vmatprep.subr.bf16.mxu1 %v2735_v50  ;;  %v2814_v48 = vld [vmem:[%s4090_s1 + $0x574] ss:$8 sps:$4 sm:$0xff]   ;;  %v2809_v50 = vld [vmem:[%s4090_s1 + $0x170] ss:$8 sps:$4 sm:$0xff]  }
  0x2d   :  { %2072 = vmatprep.subr.bf16.mxu0 %v2737_v51  ;;  %v2812_v51 = vld [vmem:[%s4090_s1 + $0x570] ss:$8 sps:$4 sm:$0xff]  }
  0x2f   :  { %1909 = vmatpush1.bf16.msra.mxu1 %v2739_v53  ;;  %v2817_v53 = vld [vmem:[%s4090_s1 + $0x184] ss:$8 sps:$4 sm:$0xff]  }
  0x30   :  { %2073 = vmatpush1.bf16.msra.mxu0 %v2740_v55  ;;  %1910 = vmatprep.subr.bf16.mxu1 %v2741_v57  ;;  %v2815_v55 = vld [vmem:[%s4090_s1 + $0x180] ss:$8 sps:$4 sm:$0xff]  }
  0x31   :  { %2074 = vmatprep.subr.bf16.mxu0 %v2743_v58  ;;  %v2818_v57 = vld [vmem:[%s4090_s1 + $0x580] ss:$8 sps:$4 sm:$0xff]   ;;  %v2823_v58 = vld [vmem:[%s4090_s1 + $0x194] ss:$8 sps:$4 sm:$0xff]  }
  0x33   :  { %1911 = vmatpush1.bf16.msra.mxu1 %v2745_v63  ;;  %v2832_v63 = vld [vmem:[%s4090_s1 + $0x5a4] ss:$8 sps:$4 sm:$0xff]  }
  0x34   :  { %2075 = vmatpush1.bf16.msra.mxu0 %v2746_v0  ;;  %1912 = vmatprep.subr.bf16.mxu1 %v2747_v1  ;;  %v2827_v0 = vld [vmem:[%s4090_s1 + $0x1a0] ss:$8 sps:$4 sm:$0xff]  }
  0x35   :  { %2076 = vmatprep.subr.bf16.mxu0 %v2749_v2  ;;  %v2830_v1 = vld [vmem:[%s4090_s1 + $0x5a0] ss:$8 sps:$4 sm:$0xff]   ;;  %v2835_v2 = vld [vmem:[%s4090_s1 + $0x1b4] ss:$8 sps:$4 sm:$0xff]  }
  0x37   :  { %1913 = vmatpush1.bf16.msra.mxu1 %v2751_v4  ;;  %v2833_v4 = vld [vmem:[%s4090_s1 + $0x1b0] ss:$8 sps:$4 sm:$0xff]  }
  0x38   :  { %2077 = vmatpush1.bf16.msra.mxu0 %v2752_v5  ;;  %1914 = vmatprep.subr.bf16.mxu1 %v2753_v6  ;;  %v2836_v5 = vld [vmem:[%s4090_s1 + $0x5b0] ss:$8 sps:$4 sm:$0xff]   ;;  %v2841_v6 = vld [vmem:[%s4090_s1 + $0x1c4] ss:$8 sps:$4 sm:$0xff]  }
  0x39   :  { %2078 = vmatprep.subr.bf16.mxu0 %v2755_v7  ;;  %v2844_v7 = vld [vmem:[%s4090_s1 + $0x5c4] ss:$8 sps:$4 sm:$0xff]  }
  0x3b   :  { %1915 = vmatpush1.bf16.msra.mxu1 %v2757_v8  ;;  %v2839_v8 = vld [vmem:[%s4090_s1 + $0x1c0] ss:$8 sps:$4 sm:$0xff]  }
  0x3c   :  { %2079 = vmatpush1.bf16.msra.mxu0 %v2758_v9  ;;  %1916 = vmatprep.subr.bf16.mxu1 %v2759_v10  ;;  %v2842_v9 = vld [vmem:[%s4090_s1 + $0x5c0] ss:$8 sps:$4 sm:$0xff]   ;;  %v2847_v10 = vld [vmem:[%s4090_s1 + $0x1d4] ss:$8 sps:$4 sm:$0xff]  }
  0x3d   :  { %2080 = vmatprep.subr.bf16.mxu0 %v2761_v11  ;;  %v2850_v11 = vld [vmem:[%s4090_s1 + $0x5d4] ss:$8 sps:$4 sm:$0xff]  }
  0x3f   :  { %1917 = vmatpush1.bf16.msra.mxu1 %v2763_v12  ;;  %v2845_v12 = vld [vmem:[%s4090_s1 + $0x1d0] ss:$8 sps:$4 sm:$0xff]  }
  0x40   :  { %2081 = vmatpush1.bf16.msra.mxu0 %v2764_v13  ;;  %1927 = vmatprep.subr.bf16.mxu1 %v2768_v14  ;;  %v2848_v13 = vld [vmem:[%s4090_s1 + $0x5d0] ss:$8 sps:$4 sm:$0xff]   ;;  %v2853_v14 = vld [vmem:[%s4090_s1 + $0x1e4] ss:$8 sps:$4 sm:$0xff]  }
  0x41   :  { %2091 = vmatprep.subr.bf16.mxu0 %v2772_v15  ;;  %v2856_v15 = vld [vmem:[%s4090_s1 + $0x5e4] ss:$8 sps:$4 sm:$0xff]  }
  0x42   :  { %1919 = vmatmul.mubr.bf16.vlgmr.msra.gmra.mrb[0].mxu1 %v3349_v16 }
  0x43   :  { %2083 = vmatmul.mubr.bf16.vlgmr.msra.gmra.mrb[0].mxu0 %v3352_v17  ;;  %1928 = vmatpush1.bf16.msra.mxu1 %v2766_v18  ;;  %v308_v18 = vcombine.high %v3275_v52, %v3275_v52  ;;  %v2862_v52 = vld [vmem:[%s4090_s1 + $0x5f4] ss:$8 sps:$4 sm:$0xff]  }
  0x44   :  { %2092 = vmatpush1.bf16.msra.mxu0 %v2770_v19  ;;  %1929 = vmatprep.subr.bf16.mxu1 %v2775_v20  ;;  %v357_v19 = vcombine.high %v3288_v56, %v3288_v56  ;;  %v2851_v20 = vld [vmem:[%s4090_s1 + $0x1e0] ss:$8 sps:$4 sm:$0xff]  }
  0x45   :  { %2093 = vmatprep.subr.bf16.mxu0 %v2778_v21  ;;  %1959 = vmatprep.mubr.bf16.mxu1 %v355_v22  ;;  %v2854_v21 = vld [vmem:[%s4090_s1 + $0x5e0] ss:$8 sps:$4 sm:$0xff]   ;;  %v2859_v22 = vld [vmem:[%s4090_s1 + $0x1f4] ss:$8 sps:$4 sm:$0xff]   ;;  %v3541_v56 = vrot.slane %v308_v18, %v3264_v49  ;;  %v2929_v18 = vld [vmem:[%s4090_s1 + $0x2b0] ss:$8 sps:$4 sm:$0xff]  }
  0x46   :  { %2123 = vmatprep.mubr.bf16.mxu0 %v404_v23  ;;  %v3544_v23 = vrot.slane %v357_v19, %v3264_v49  ;;  %v2932_v19 = vld [vmem:[%s4090_s1 + $0x6b0] ss:$8 sps:$4 sm:$0xff]  }
  0x47   :  { %1930 = vmatpush1.bf16.msra.mxu1 %v2773_v24  ;;  %v2857_v24 = vld [vmem:[%s4090_s1 + $0x1f0] ss:$8 sps:$4 sm:$0xff]  }
  0x48   :  { %2094 = vmatpush1.bf16.msra.mxu0 %v2776_v25  ;;  %1931 = vmatprep.subr.bf16.mxu1 %v2781_v26  ;;  %v2860_v25 = vld [vmem:[%s4090_s1 + $0x5f0] ss:$8 sps:$4 sm:$0xff]   ;;  %v2865_v26 = vld [vmem:[%s4090_s1 + $0x204] ss:$8 sps:$4 sm:$0xff]  }
  0x49   :  { %2095 = vmatprep.subr.bf16.mxu0 %v2784_v27  ;;  %v2868_v27 = vld [vmem:[%s4090_s1 + $0x604] ss:$8 sps:$4 sm:$0xff]  }
  0x4b   :  { %1932 = vmatpush1.bf16.msra.mxu1 %v2779_v28  ;;  %v324_v28 = vcombine.high %v3541_v56, %v3541_v56 }
  0x4c   :  { %2096 = vmatpush1.bf16.msra.mxu0 %v2782_v29  ;;  %1933 = vmatprep.subr.bf16.mxu1 %v2787_v30  ;;  %v373_v29 = vcombine.high %v3544_v23, %v3544_v23  ;;  %v353_v30 = vcombine.high %v3349_v16, %v3349_v16  ;;  %v2874_v16 = vld [vmem:[%s4090_s1 + $0x614] ss:$8 sps:$4 sm:$0xff]  }
  0x4d   :  { %2097 = vmatprep.subr.bf16.mxu0 %v2790_v31  ;;  %v402_v31 = vcombine.high %v3352_v17, %v3352_v17  ;;  %v3579_v17 = vrot.slane %v324_v28, %v3264_v49  ;;  %v2949_v28 = vld [vmem:[%s4090_s1 + $0x2e4] ss:$8 sps:$4 sm:$0xff]  }
  0x4f   :  { %1934 = vmatpush1.bf16.msra.mxu1 %v2785_v32  ;;  %v2863_v32 = vld [vmem:[%s4090_s1 + $0x200] ss:$8 sps:$4 sm:$0xff]  }
  0x50   :  { %2098 = vmatpush1.bf16.msra.mxu0 %v2788_v33  ;;  %1935 = vmatprep.subr.bf16.mxu1 %v2793_v34  ;;  %v2866_v33 = vld [vmem:[%s4090_s1 + $0x600] ss:$8 sps:$4 sm:$0xff]   ;;  %v2871_v34 = vld [vmem:[%s4090_s1 + $0x214] ss:$8 sps:$4 sm:$0xff]  }
  0x51   :  { %2099 = vmatprep.subr.bf16.mxu0 %v2796_v35  ;;  %v3582_v35 = vrot.slane %v373_v29, %v3264_v49  ;;  %v2952_v29 = vld [vmem:[%s4090_s1 + $0x6e4] ss:$8 sps:$4 sm:$0xff]  }
  0x53   :  { %1936 = vmatpush1.bf16.msra.mxu1 %v2791_v36  ;;  %v2869_v36 = vld [vmem:[%s4090_s1 + $0x210] ss:$8 sps:$4 sm:$0xff]  }
  0x54   :  { %2100 = vmatpush1.bf16.msra.mxu0 %v2794_v37  ;;  %1937 = vmatprep.subr.bf16.mxu1 %v2799_v38  ;;  %v2872_v37 = vld [vmem:[%s4090_s1 + $0x610] ss:$8 sps:$4 sm:$0xff]   ;;  %v2877_v38 = vld [vmem:[%s4090_s1 + $0x224] ss:$8 sps:$4 sm:$0xff]  }
  0x55   :  { %2101 = vmatprep.subr.bf16.mxu0 %v2802_v39  ;;  %v2880_v39 = vld [vmem:[%s4090_s1 + $0x624] ss:$8 sps:$4 sm:$0xff]  }
  0x57   :  { %1938 = vmatpush1.bf16.msra.mxu1 %v2797_v40  ;;  %v2875_v40 = vld [vmem:[%s4090_s1 + $0x220] ss:$8 sps:$4 sm:$0xff]  }
  0x58   :  { %2102 = vmatpush1.bf16.msra.mxu0 %v2800_v41  ;;  %1939 = vmatprep.subr.bf16.mxu1 %v2805_v42  ;;  %v2878_v41 = vld [vmem:[%s4090_s1 + $0x620] ss:$8 sps:$4 sm:$0xff]   ;;  %v2883_v42 = vld [vmem:[%s4090_s1 + $0x234] ss:$8 sps:$4 sm:$0xff]  }
  0x59   :  { %2103 = vmatprep.subr.bf16.mxu0 %v2808_v44  ;;  %v2886_v44 = vld [vmem:[%s4090_s1 + $0x634] ss:$8 sps:$4 sm:$0xff]  }
  0x5b   :  { %1940 = vmatpush1.bf16.msra.mxu1 %v2803_v45  ;;  %v2881_v45 = vld [vmem:[%s4090_s1 + $0x230] ss:$8 sps:$4 sm:$0xff]  }
  0x5c   :  { %2104 = vmatpush1.bf16.msra.mxu0 %v2806_v46  ;;  %1941 = vmatprep.subr.bf16.mxu1 %v2811_v47  ;;  %v2884_v46 = vld [vmem:[%s4090_s1 + $0x630] ss:$8 sps:$4 sm:$0xff]   ;;  %v2889_v47 = vld [vmem:[%s4090_s1 + $0x244] ss:$8 sps:$4 sm:$0xff]  }
  0x5d   :  { %2105 = vmatprep.subr.bf16.mxu0 %v2814_v48  ;;  %v2892_v48 = vld [vmem:[%s4090_s1 + $0x644] ss:$8 sps:$4 sm:$0xff]  }
  0x5f   :  { %1942 = vmatpush1.bf16.msra.mxu1 %v2809_v50  ;;  %v2887_v50 = vld [vmem:[%s4090_s1 + $0x240] ss:$8 sps:$4 sm:$0xff]  }
  0x60   :  { %2106 = vmatpush1.bf16.msra.mxu0 %v2812_v51  ;;  %1943 = vmatprep.subr.bf16.mxu1 %v2817_v53  ;;  %v2890_v51 = vld [vmem:[%s4090_s1 + $0x640] ss:$8 sps:$4 sm:$0xff]   ;;  %v2895_v53 = vld [vmem:[%s4090_s1 + $0x254] ss:$8 sps:$4 sm:$0xff]  }
  0x61   :  { %2107 = vmatprep.subr.bf16.mxu0 %v2820_v54  ;;  %v2898_v54 = vld [vmem:[%s4090_s1 + $0x654] ss:$8 sps:$4 sm:$0xff]  }
  0x63   :  { %1944 = vmatpush1.bf16.msra.mxu1 %v2815_v55  ;;  %v2893_v55 = vld [vmem:[%s4090_s1 + $0x250] ss:$8 sps:$4 sm:$0xff]  }
  0x64   :  { %2108 = vmatpush1.bf16.msra.mxu0 %v2818_v57  ;;  %1945 = vmatprep.subr.bf16.mxu1 %v2823_v58  ;;  %v2896_v57 = vld [vmem:[%s4090_s1 + $0x650] ss:$8 sps:$4 sm:$0xff]   ;;  %v2901_v58 = vld [vmem:[%s4090_s1 + $0x264] ss:$8 sps:$4 sm:$0xff]  }
  0x65   :  { %2109 = vmatprep.subr.bf16.mxu0 %v2826_v59  ;;  %v2904_v59 = vld [vmem:[%s4090_s1 + $0x664] ss:$8 sps:$4 sm:$0xff]  }
  0x67   :  { %1946 = vmatpush1.bf16.msra.mxu1 %v2821_v60  ;;  %v2899_v60 = vld [vmem:[%s4090_s1 + $0x260] ss:$8 sps:$4 sm:$0xff]  }
  0x68   :  { %2110 = vmatpush1.bf16.msra.mxu0 %v2824_v61  ;;  %1947 = vmatprep.subr.bf16.mxu1 %v2829_v62  ;;  %v2902_v61 = vld [vmem:[%s4090_s1 + $0x660] ss:$8 sps:$4 sm:$0xff]   ;;  %v2907_v62 = vld [vmem:[%s4090_s1 + $0x274] ss:$8 sps:$4 sm:$0xff]  }
  0x69   :  { %2111 = vmatprep.subr.bf16.mxu0 %v2832_v63  ;;  %v2910_v63 = vld [vmem:[%s4090_s1 + $0x674] ss:$8 sps:$4 sm:$0xff]  }
  0x6b   :  { %1948 = vmatpush1.bf16.msra.mxu1 %v2827_v0  ;;  %v2905_v0 = vld [vmem:[%s4090_s1 + $0x270] ss:$8 sps:$4 sm:$0xff]  }
  0x6c   :  { %2112 = vmatpush1.bf16.msra.mxu0 %v2830_v1  ;;  %1949 = vmatprep.subr.bf16.mxu1 %v2835_v2  ;;  %v2908_v1 = vld [vmem:[%s4090_s1 + $0x670] ss:$8 sps:$4 sm:$0xff]   ;;  %v2913_v2 = vld [vmem:[%s4090_s1 + $0x284] ss:$8 sps:$4 sm:$0xff]  }
  0x6d   :  { %2113 = vmatprep.subr.bf16.mxu0 %v2838_v3  ;;  %v2916_v3 = vld [vmem:[%s4090_s1 + $0x684] ss:$8 sps:$4 sm:$0xff]  }
  0x6f   :  { %1950 = vmatpush1.bf16.msra.mxu1 %v2833_v4  ;;  %v2911_v4 = vld [vmem:[%s4090_s1 + $0x280] ss:$8 sps:$4 sm:$0xff]  }
  0x70   :  { %2114 = vmatpush1.bf16.msra.mxu0 %v2836_v5  ;;  %1951 = vmatprep.subr.bf16.mxu1 %v2841_v6  ;;  %v2914_v5 = vld [vmem:[%s4090_s1 + $0x680] ss:$8 sps:$4 sm:$0xff]   ;;  %v2919_v6 = vld [vmem:[%s4090_s1 + $0x294] ss:$8 sps:$4 sm:$0xff]  }
  0x71   :  { %2115 = vmatprep.subr.bf16.mxu0 %v2844_v7  ;;  %v2922_v7 = vld [vmem:[%s4090_s1 + $0x694] ss:$8 sps:$4 sm:$0xff]  }
  0x73   :  { %1952 = vmatpush1.bf16.msra.mxu1 %v2839_v8  ;;  %v2917_v8 = vld [vmem:[%s4090_s1 + $0x290] ss:$8 sps:$4 sm:$0xff]  }
  0x74   :  { %2116 = vmatpush1.bf16.msra.mxu0 %v2842_v9  ;;  %1953 = vmatprep.subr.bf16.mxu1 %v2847_v10  ;;  %v2920_v9 = vld [vmem:[%s4090_s1 + $0x690] ss:$8 sps:$4 sm:$0xff]   ;;  %v2925_v10 = vld [vmem:[%s4090_s1 + $0x2a4] ss:$8 sps:$4 sm:$0xff]  }
  0x75   :  { %2117 = vmatprep.subr.bf16.mxu0 %v2850_v11  ;;  %v2928_v11 = vld [vmem:[%s4090_s1 + $0x6a4] ss:$8 sps:$4 sm:$0xff]  }
  0x77   :  { %1954 = vmatpush1.bf16.msra.mxu1 %v2845_v12  ;;  %v2923_v12 = vld [vmem:[%s4090_s1 + $0x2a0] ss:$8 sps:$4 sm:$0xff]  }
  0x78   :  { %2118 = vmatpush1.bf16.msra.mxu0 %v2848_v13  ;;  %1955 = vmatprep.subr.bf16.mxu1 %v2853_v14  ;;  %v2926_v13 = vld [vmem:[%s4090_s1 + $0x6a0] ss:$8 sps:$4 sm:$0xff]   ;;  %v2931_v14 = vld [vmem:[%s4090_s1 + $0x2b4] ss:$8 sps:$4 sm:$0xff]  }
  0x79   :  { %2119 = vmatprep.subr.bf16.mxu0 %v2856_v15  ;;  %v2934_v15 = vld [vmem:[%s4090_s1 + $0x6b4] ss:$8 sps:$4 sm:$0xff]  }
  0x7b   :  { %1956 = vmatpush1.bf16.msra.mxu1 %v2851_v20  ;;  %v2937_v20 = vld [vmem:[%s4090_s1 + $0x2c4] ss:$8 sps:$4 sm:$0xff]  }
  0x7c   :  { %2120 = vmatpush1.bf16.msra.mxu0 %v2854_v21  ;;  %1957 = vmatprep.subr.bf16.mxu1 %v2859_v22  ;;  %v2940_v21 = vld [vmem:[%s4090_s1 + $0x6c4] ss:$8 sps:$4 sm:$0xff]   ;;  %v2935_v22 = vld [vmem:[%s4090_s1 + $0x2c0] ss:$8 sps:$4 sm:$0xff]  }
  0x7d   :  { %2121 = vmatprep.subr.bf16.mxu0 %v2862_v52  ;;  %v2938_v52 = vld [vmem:[%s4090_s1 + $0x6c0] ss:$8 sps:$4 sm:$0xff]  }
  0x7f   :  { %1958 = vmatpush1.bf16.msra.mxu1 %v2857_v24  ;;  %v2943_v24 = vld [vmem:[%s4090_s1 + $0x2d4] ss:$8 sps:$4 sm:$0xff]  }
  0x80   :  { %2122 = vmatpush1.bf16.msra.mxu0 %v2860_v25  ;;  %1968 = vmatprep.subr.bf16.mxu1 %v2865_v26  ;;  %v2946_v25 = vld [vmem:[%s4090_s1 + $0x6d4] ss:$8 sps:$4 sm:$0xff]   ;;  %v2941_v26 = vld [vmem:[%s4090_s1 + $0x2d0] ss:$8 sps:$4 sm:$0xff]  }
  0x81   :  { %2132 = vmatprep.subr.bf16.mxu0 %v2868_v27  ;;  %v2944_v27 = vld [vmem:[%s4090_s1 + $0x6d0] ss:$8 sps:$4 sm:$0xff]  }
  0x82   :  { %1960 = vmatmul.mubr.bf16.vlgmr.msra.gmra.mrb[0].mxu1 %v353_v30  ;;  %v2947_v30 = vld [vmem:[%s4090_s1 + $0x2e0] ss:$8 sps:$4 sm:$0xff]  }
  0x83   :  { %2124 = vmatmul.mubr.bf16.vlgmr.msra.gmra.mrb[0].mxu0 %v402_v31  ;;  %1969 = vmatpush1.bf16.msra.mxu1 %v2863_v32  ;;  %v2950_v31 = vld [vmem:[%s4090_s1 + $0x6e0] ss:$8 sps:$4 sm:$0xff]   ;;  %v2955_v32 = vld [vmem:[%s4090_s1 + $0x2f4] ss:$8 sps:$4 sm:$0xff]  }
  0x84   :  { %2133 = vmatpush1.bf16.msra.mxu0 %v2866_v33  ;;  %1970 = vmatprep.subr.bf16.mxu1 %v2871_v34  ;;  %v2958_v33 = vld [vmem:[%s4090_s1 + $0x6f4] ss:$8 sps:$4 sm:$0xff]   ;;  %v2953_v34 = vld [vmem:[%s4090_s1 + $0x2f0] ss:$8 sps:$4 sm:$0xff]  }
  0x85   :  { %2134 = vmatprep.subr.bf16.mxu0 %v2874_v16  ;;  %2000 = vmatprep.mubr.bf16.mxu1 %v3579_v17  ;;  %v2956_v16 = vld [vmem:[%s4090_s1 + $0x6f0] ss:$8 sps:$4 sm:$0xff]  }
  0x86   :  { %2164 = vmatprep.mubr.bf16.mxu0 %v3582_v35 }
  0x87   :  { %1971 = vmatpush1.bf16.msra.mxu1 %v2869_v36  ;;  %v2961_v36 = vld [vmem:[%s4090_s1 + $0x304] ss:$8 sps:$4 sm:$0xff]  }
  0x88   :  { %2135 = vmatpush1.bf16.msra.mxu0 %v2872_v37  ;;  %1972 = vmatprep.subr.bf16.mxu1 %v2877_v38  ;;  %v2964_v37 = vld [vmem:[%s4090_s1 + $0x704] ss:$8 sps:$4 sm:$0xff]   ;;  %v3768_v38 = vrot.slane %v3541_v56, %v3264_v49  ;;  %v2967_v56 = vld [vmem:[%s4090_s1 + $0x314] ss:$8 sps:$4 sm:$0xff]  }
  0x89   :  { %2136 = vmatprep.subr.bf16.mxu0 %v2880_v39  ;;  %v3772_v39 = vrot.slane %v3544_v23, %v3264_v49  ;;  %v2970_v23 = vld [vmem:[%s4090_s1 + $0x714] ss:$8 sps:$4 sm:$0xff]  }
  0x8b   :  { %1973 = vmatpush1.bf16.msra.mxu1 %v2875_v40  ;;  %v2959_v40 = vld [vmem:[%s4090_s1 + $0x300] ss:$8 sps:$4 sm:$0xff]  }
  0x8c   :  { %2137 = vmatpush1.bf16.msra.mxu0 %v2878_v41  ;;  %1974 = vmatprep.subr.bf16.mxu1 %v2883_v42  ;;  %v2962_v41 = vld [vmem:[%s4090_s1 + $0x700] ss:$8 sps:$4 sm:$0xff]   ;;  %v356_v42 = vcombine.high %v3579_v17, %v3579_v17  ;;  %v2973_v17 = vld [vmem:[%s4090_s1 + $0x324] ss:$8 sps:$4 sm:$0xff]  }
  0x8d   :  { %2138 = vmatprep.subr.bf16.mxu0 %v2886_v44  ;;  %v405_v44 = vcombine.high %v3582_v35, %v3582_v35  ;;  %v2976_v35 = vld [vmem:[%s4090_s1 + $0x724] ss:$8 sps:$4 sm:$0xff]  }
  0x8f   :  { %1975 = vmatpush1.bf16.msra.mxu1 %v2881_v45  ;;  %v2965_v45 = vld [vmem:[%s4090_s1 + $0x310] ss:$8 sps:$4 sm:$0xff]  }
  0x90   :  { %2139 = vmatpush1.bf16.msra.mxu0 %v2884_v46  ;;  %1976 = vmatprep.subr.bf16.mxu1 %v2889_v47  ;;  %v2968_v46 = vld [vmem:[%s4090_s1 + $0x710] ss:$8 sps:$4 sm:$0xff]   ;;  %v2971_v47 = vld [vmem:[%s4090_s1 + $0x320] ss:$8 sps:$4 sm:$0xff]  }
  0x91   :  { %2140 = vmatprep.subr.bf16.mxu0 %v2892_v48  ;;  %v2974_v48 = vld [vmem:[%s4090_s1 + $0x720] ss:$8 sps:$4 sm:$0xff]  }
  0x93   :  { %1977 = vmatpush1.bf16.msra.mxu1 %v2887_v50  ;;  %v2979_v50 = vld [vmem:[%s4090_s1 + $0x334] ss:$8 sps:$4 sm:$0xff]  }
  0x94   :  { %2141 = vmatpush1.bf16.msra.mxu0 %v2890_v51  ;;  %1978 = vmatprep.subr.bf16.mxu1 %v2895_v53  ;;  %v2982_v51 = vld [vmem:[%s4090_s1 + $0x734] ss:$8 sps:$4 sm:$0xff]   ;;  %v2977_v53 = vld [vmem:[%s4090_s1 + $0x330] ss:$8 sps:$4 sm:$0xff]  }
  0x95   :  { %2142 = vmatprep.subr.bf16.mxu0 %v2898_v54  ;;  %v2980_v54 = vld [vmem:[%s4090_s1 + $0x730] ss:$8 sps:$4 sm:$0xff]  }
  0x97   :  { %1979 = vmatpush1.bf16.msra.mxu1 %v2893_v55  ;;  %v2985_v55 = vld [vmem:[%s4090_s1 + $0x344] ss:$8 sps:$4 sm:$0xff]  }
  0x98   :  { %2143 = vmatpush1.bf16.msra.mxu0 %v2896_v57  ;;  %1980 = vmatprep.subr.bf16.mxu1 %v2901_v58  ;;  %v2988_v57 = vld [vmem:[%s4090_s1 + $0x744] ss:$8 sps:$4 sm:$0xff]   ;;  %v2983_v58 = vld [vmem:[%s4090_s1 + $0x340] ss:$8 sps:$4 sm:$0xff]  }
  0x99   :  { %2144 = vmatprep.subr.bf16.mxu0 %v2904_v59  ;;  %v2986_v59 = vld [vmem:[%s4090_s1 + $0x740] ss:$8 sps:$4 sm:$0xff]  }
  0x9b   :  { %1981 = vmatpush1.bf16.msra.mxu1 %v2899_v60  ;;  %v2991_v60 = vld [vmem:[%s4090_s1 + $0x354] ss:$8 sps:$4 sm:$0xff]  }
  0x9c   :  { %2145 = vmatpush1.bf16.msra.mxu0 %v2902_v61  ;;  %1982 = vmatprep.subr.bf16.mxu1 %v2907_v62  ;;  %v2994_v61 = vld [vmem:[%s4090_s1 + $0x754] ss:$8 sps:$4 sm:$0xff]   ;;  %v2989_v62 = vld [vmem:[%s4090_s1 + $0x350] ss:$8 sps:$4 sm:$0xff]  }
  0x9d   :  { %2146 = vmatprep.subr.bf16.mxu0 %v2910_v63  ;;  %v2992_v63 = vld [vmem:[%s4090_s1 + $0x750] ss:$8 sps:$4 sm:$0xff]  }
  0x9f   :  { %1983 = vmatpush1.bf16.msra.mxu1 %v2905_v0  ;;  %v2997_v0 = vld [vmem:[%s4090_s1 + $0x364] ss:$8 sps:$4 sm:$0xff]  }
  0xa0   :  { %2147 = vmatpush1.bf16.msra.mxu0 %v2908_v1  ;;  %1984 = vmatprep.subr.bf16.mxu1 %v2913_v2  ;;  %v3000_v1 = vld [vmem:[%s4090_s1 + $0x764] ss:$8 sps:$4 sm:$0xff]   ;;  %v2995_v2 = vld [vmem:[%s4090_s1 + $0x360] ss:$8 sps:$4 sm:$0xff]  }
  0xa1   :  { %2148 = vmatprep.subr.bf16.mxu0 %v2916_v3  ;;  %v2998_v3 = vld [vmem:[%s4090_s1 + $0x760] ss:$8 sps:$4 sm:$0xff]  }
  0xa3   :  { %1985 = vmatpush1.bf16.msra.mxu1 %v2911_v4  ;;  %v3003_v4 = vld [vmem:[%s4090_s1 + $0x374] ss:$8 sps:$4 sm:$0xff]  }
  0xa4   :  { %2149 = vmatpush1.bf16.msra.mxu0 %v2914_v5  ;;  %1986 = vmatprep.subr.bf16.mxu1 %v2919_v6  ;;  %v3006_v5 = vld [vmem:[%s4090_s1 + $0x774] ss:$8 sps:$4 sm:$0xff]   ;;  %v3001_v6 = vld [vmem:[%s4090_s1 + $0x370] ss:$8 sps:$4 sm:$0xff]  }
  0xa5   :  { %2150 = vmatprep.subr.bf16.mxu0 %v2922_v7  ;;  %v3004_v7 = vld [vmem:[%s4090_s1 + $0x770] ss:$8 sps:$4 sm:$0xff]  }
  0xa7   :  { %1987 = vmatpush1.bf16.msra.mxu1 %v2917_v8  ;;  %v3009_v8 = vld [vmem:[%s4090_s1 + $0x384] ss:$8 sps:$4 sm:$0xff]  }
  0xa8   :  { %2151 = vmatpush1.bf16.msra.mxu0 %v2920_v9  ;;  %1988 = vmatprep.subr.bf16.mxu1 %v2925_v10  ;;  %v3012_v9 = vld [vmem:[%s4090_s1 + $0x784] ss:$8 sps:$4 sm:$0xff]   ;;  %v3007_v10 = vld [vmem:[%s4090_s1 + $0x380] ss:$8 sps:$4 sm:$0xff]  }
  0xa9   :  { %2152 = vmatprep.subr.bf16.mxu0 %v2928_v11  ;;  %v3010_v11 = vld [vmem:[%s4090_s1 + $0x780] ss:$8 sps:$4 sm:$0xff]  }
  0xab   :  { %1989 = vmatpush1.bf16.msra.mxu1 %v2923_v12  ;;  %v3015_v12 = vld [vmem:[%s4090_s1 + $0x394] ss:$8 sps:$4 sm:$0xff]  }
  0xac   :  { %2153 = vmatpush1.bf16.msra.mxu0 %v2926_v13  ;;  %1990 = vmatprep.subr.bf16.mxu1 %v2931_v14  ;;  %v3018_v13 = vld [vmem:[%s4090_s1 + $0x794] ss:$8 sps:$4 sm:$0xff]   ;;  %v3013_v14 = vld [vmem:[%s4090_s1 + $0x390] ss:$8 sps:$4 sm:$0xff]  }
  0xad   :  { %2154 = vmatprep.subr.bf16.mxu0 %v2934_v15  ;;  %v3016_v15 = vld [vmem:[%s4090_s1 + $0x790] ss:$8 sps:$4 sm:$0xff]  }
  0xaf   :  { %1991 = vmatpush1.bf16.msra.mxu1 %v2929_v18  ;;  %v3021_v18 = vld [vmem:[%s4090_s1 + $0x3a4] ss:$8 sps:$4 sm:$0xff]  }
  0xb0   :  { %2155 = vmatpush1.bf16.msra.mxu0 %v2932_v19  ;;  %1992 = vmatprep.subr.bf16.mxu1 %v2937_v20  ;;  %v3024_v19 = vld [vmem:[%s4090_s1 + $0x7a4] ss:$8 sps:$4 sm:$0xff]   ;;  %v3019_v20 = vld [vmem:[%s4090_s1 + $0x3a0] ss:$8 sps:$4 sm:$0xff]  }
  0xb1   :  { %2156 = vmatprep.subr.bf16.mxu0 %v2940_v21  ;;  %v3022_v21 = vld [vmem:[%s4090_s1 + $0x7a0] ss:$8 sps:$4 sm:$0xff]  }
  0xb3   :  { %1993 = vmatpush1.bf16.msra.mxu1 %v2935_v22  ;;  %v3027_v22 = vld [vmem:[%s4090_s1 + $0x3b4] ss:$8 sps:$4 sm:$0xff]  }
  0xb4   :  { %2157 = vmatpush1.bf16.msra.mxu0 %v2938_v52  ;;  %1994 = vmatprep.subr.bf16.mxu1 %v2943_v24  ;;  %v3030_v52 = vld [vmem:[%s4090_s1 + $0x7b4] ss:$8 sps:$4 sm:$0xff]   ;;  %v3025_v24 = vld [vmem:[%s4090_s1 + $0x3b0] ss:$8 sps:$4 sm:$0xff]  }
  0xb5   :  { %2158 = vmatprep.subr.bf16.mxu0 %v2946_v25  ;;  %v3028_v25 = vld [vmem:[%s4090_s1 + $0x7b0] ss:$8 sps:$4 sm:$0xff]  }
  0xb7   :  { %1995 = vmatpush1.bf16.msra.mxu1 %v2941_v26  ;;  %v3033_v26 = vld [vmem:[%s4090_s1 + $0x3c4] ss:$8 sps:$4 sm:$0xff]  }
  0xb8   :  { %2159 = vmatpush1.bf16.msra.mxu0 %v2944_v27  ;;  %1996 = vmatprep.subr.bf16.mxu1 %v2949_v28  ;;  %v3036_v27 = vld [vmem:[%s4090_s1 + $0x7c4] ss:$8 sps:$4 sm:$0xff]   ;;  %v3031_v28 = vld [vmem:[%s4090_s1 + $0x3c0] ss:$8 sps:$4 sm:$0xff]  }
  0xb9   :  { %2160 = vmatprep.subr.bf16.mxu0 %v2952_v29  ;;  %v3034_v29 = vld [vmem:[%s4090_s1 + $0x7c0] ss:$8 sps:$4 sm:$0xff]  }
  0xbb   :  { %1997 = vmatpush1.bf16.msra.mxu1 %v2947_v30  ;;  %v3039_v30 = vld [vmem:[%s4090_s1 + $0x3d4] ss:$8 sps:$4 sm:$0xff]  }
  0xbc   :  { %2161 = vmatpush1.bf16.msra.mxu0 %v2950_v31  ;;  %1998 = vmatprep.subr.bf16.mxu1 %v2955_v32  ;;  %v3042_v31 = vld [vmem:[%s4090_s1 + $0x7d4] ss:$8 sps:$4 sm:$0xff]   ;;  %v3037_v32 = vld [vmem:[%s4090_s1 + $0x3d0] ss:$8 sps:$4 sm:$0xff]  }
  0xbd   :  { %2162 = vmatprep.subr.bf16.mxu0 %v2958_v33  ;;  %v3040_v33 = vld [vmem:[%s4090_s1 + $0x7d0] ss:$8 sps:$4 sm:$0xff]  }
  0xbf   :  { %1999 = vmatpush1.bf16.msra.mxu1 %v2953_v34  ;;  %v3045_v34 = vld [vmem:[%s4090_s1 + $0x3e4] ss:$8 sps:$4 sm:$0xff]  }
  0xc0   :  { %2163 = vmatpush1.bf16.msra.mxu0 %v2956_v16  ;;  %2009 = vmatprep.subr.bf16.mxu1 %v2961_v36  ;;  %v3048_v16 = vld [vmem:[%s4090_s1 + $0x7e4] ss:$8 sps:$4 sm:$0xff]   ;;  %v3043_v36 = vld [vmem:[%s4090_s1 + $0x3e0] ss:$8 sps:$4 sm:$0xff]  }
  0xc1   :  { %2173 = vmatprep.subr.bf16.mxu0 %v2964_v37  ;;  %v3046_v37 = vld [vmem:[%s4090_s1 + $0x7e0] ss:$8 sps:$4 sm:$0xff]  }
  0xc2   :  { %2001 = vmatmul.mubr.bf16.vlgmr.msra.gmra.mrb[0].mxu1 %v3768_v38 }
  0xc3   :  { %2165 = vmatmul.mubr.bf16.vlgmr.msra.gmra.mrb[0].mxu0 %v3772_v39  ;;  %2010 = vmatpush1.bf16.msra.mxu1 %v2959_v40  ;;  %v3051_v40 = vld [vmem:[%s4090_s1 + $0x3f4] ss:$8 sps:$4 sm:$0xff]  }
  0xc4   :  { %2174 = vmatpush1.bf16.msra.mxu0 %v2962_v41  ;;  %2011 = vmatprep.subr.bf16.mxu1 %v2967_v56  ;;  %v3054_v41 = vld [vmem:[%s4090_s1 + $0x7f4] ss:$8 sps:$4 sm:$0xff]   ;;  %v3963_v56 = vld.sshfl [vmem:[%s4091_s0 + $0x10] sm:$0x11 pattern:$0x75316420] }
  0xc5   :  { %2175 = vmatprep.subr.bf16.mxu0 %v2970_v23  ;;  %2041 = vmatprep.mubr.bf16.mxu1 %v356_v42  ;;  %v3049_v23 = vld [vmem:[%s4090_s1 + $0x3f0] ss:$8 sps:$4 sm:$0xff]  }
  0xc6   :  { %2205 = vmatprep.mubr.bf16.mxu0 %v405_v44  ;;  %v3052_v42 = vld [vmem:[%s4090_s1 + $0x7f0] ss:$8 sps:$4 sm:$0xff]   ;;  %v413_v44 = vcombine.high %v3963_v56, %v3963_v56 }
  0xc7   :  { %2012 = vmatpush1.bf16.msra.mxu1 %v2965_v45  ;;  %v3057_v45 = vld [vmem:[%s4090_s1 + $0x804] ss:$8 sps:$4 sm:$0xff]  }
  0xc8   :  { %2176 = vmatpush1.bf16.msra.mxu0 %v2968_v46  ;;  %2013 = vmatprep.subr.bf16.mxu1 %v2973_v17  ;;  %v354_v46 = vcombine.high %v3768_v38, %v3768_v38  ;;  %v403_v17 = vcombine.high %v3772_v39, %v3772_v39  ;;  %v3058_v38 = vld [vmem:[%s4090_s1 + $0x810] ss:$8 sps:$4 sm:$0xff]   ;;  %v3063_v39 = vld [vmem:[%s4090_s1 + $0x824] ss:$8 sps:$4 sm:$0xff]  }
  0xc9   :  { %2177 = vmatprep.subr.bf16.mxu0 %v2976_v35  ;;  %v3055_v35 = vld [vmem:[%s4090_s1 + $0x800] ss:$8 sps:$4 sm:$0xff]  }
  0xcb   :  { %2014 = vmatpush1.bf16.msra.mxu1 %v2971_v47  ;;  %v427_v47 = vrot.slane %v413_v44, %v3264_v49 }
  0xcc   :  { %2178 = vmatpush1.bf16.msra.mxu0 %v2974_v48  ;;  %2015 = vmatprep.subr.bf16.mxu1 %v2979_v50  ;;  %v3060_v48 = vld [vmem:[%s4090_s1 + $0x814] ss:$8 sps:$4 sm:$0xff]   ;;  %v3061_v50 = vld [vmem:[%s4090_s1 + $0x820] ss:$8 sps:$4 sm:$0xff]  }
  0xcd   :  { %2179 = vmatprep.subr.bf16.mxu0 %v2982_v51  ;;  %v3066_v51 = vld [vmem:[%s4090_s1 + $0x834] ss:$8 sps:$4 sm:$0xff]  }
  0xcf   :  { %2016 = vmatpush1.bf16.msra.mxu1 %v2977_v53  ;;  %v3064_v53 = vld [vmem:[%s4090_s1 + $0x830] ss:$8 sps:$4 sm:$0xff]  }
  0xd0   :  { %2180 = vmatpush1.bf16.msra.mxu0 %v2980_v54  ;;  %2017 = vmatprep.subr.bf16.mxu1 %v2985_v55  ;;  %v3069_v54 = vld [vmem:[%s4090_s1 + $0x844] ss:$8 sps:$4 sm:$0xff]   ;;  %v3067_v55 = vld [vmem:[%s4090_s1 + $0x840] ss:$8 sps:$4 sm:$0xff]  }
  0xd1   :  { %2181 = vmatprep.subr.bf16.mxu0 %v2988_v57  ;;  %v3072_v57 = vld [vmem:[%s4090_s1 + $0x854] ss:$8 sps:$4 sm:$0xff]  }
  0xd3   :  { %2018 = vmatpush1.bf16.msra.mxu1 %v2983_v58  ;;  %v3070_v58 = vld [vmem:[%s4090_s1 + $0x850] ss:$8 sps:$4 sm:$0xff]  }
  0xd4   :  { %2182 = vmatpush1.bf16.msra.mxu0 %v2986_v59  ;;  %2019 = vmatprep.subr.bf16.mxu1 %v2991_v60  ;;  %v3075_v59 = vld [vmem:[%s4090_s1 + $0x864] ss:$8 sps:$4 sm:$0xff]   ;;  %v3073_v60 = vld [vmem:[%s4090_s1 + $0x860] ss:$8 sps:$4 sm:$0xff]  }
  0xd5   :  { %2183 = vmatprep.subr.bf16.mxu0 %v2994_v61  ;;  %v3078_v61 = vld [vmem:[%s4090_s1 + $0x874] ss:$8 sps:$4 sm:$0xff]  }
  0xd7   :  { %2020 = vmatpush1.bf16.msra.mxu1 %v2989_v62  ;;  %v3076_v62 = vld [vmem:[%s4090_s1 + $0x870] ss:$8 sps:$4 sm:$0xff]  }
  0xd8   :  { %2184 = vmatpush1.bf16.msra.mxu0 %v2992_v63  ;;  %2021 = vmatprep.subr.bf16.mxu1 %v2997_v0  ;;  %v3081_v63 = vld [vmem:[%s4090_s1 + $0x884] ss:$8 sps:$4 sm:$0xff]   ;;  %v3079_v0 = vld [vmem:[%s4090_s1 + $0x880] ss:$8 sps:$4 sm:$0xff]  }
  0xd9   :  { %2185 = vmatprep.subr.bf16.mxu0 %v3000_v1  ;;  %v3084_v1 = vld [vmem:[%s4090_s1 + $0x894] ss:$8 sps:$4 sm:$0xff]  }
  0xdb   :  { %2022 = vmatpush1.bf16.msra.mxu1 %v2995_v2  ;;  %v3082_v2 = vld [vmem:[%s4090_s1 + $0x890] ss:$8 sps:$4 sm:$0xff]  }
  0xdc   :  { %2186 = vmatpush1.bf16.msra.mxu0 %v2998_v3  ;;  %2023 = vmatprep.subr.bf16.mxu1 %v3003_v4  ;;  %v3087_v3 = vld [vmem:[%s4090_s1 + $0x8a4] ss:$8 sps:$4 sm:$0xff]   ;;  %v3085_v4 = vld [vmem:[%s4090_s1 + $0x8a0] ss:$8 sps:$4 sm:$0xff]  }
  0xdd   :  { %2187 = vmatprep.subr.bf16.mxu0 %v3006_v5  ;;  %v3090_v5 = vld [vmem:[%s4090_s1 + $0x8b4] ss:$8 sps:$4 sm:$0xff]  }
  0xdf   :  { %2024 = vmatpush1.bf16.msra.mxu1 %v3001_v6  ;;  %v3088_v6 = vld [vmem:[%s4090_s1 + $0x8b0] ss:$8 sps:$4 sm:$0xff]  }
  0xe0   :  { %2188 = vmatpush1.bf16.msra.mxu0 %v3004_v7  ;;  %2025 = vmatprep.subr.bf16.mxu1 %v3009_v8  ;;  %v3093_v7 = vld [vmem:[%s4090_s1 + $0x8c4] ss:$8 sps:$4 sm:$0xff]   ;;  %v3091_v8 = vld [vmem:[%s4090_s1 + $0x8c0] ss:$8 sps:$4 sm:$0xff]  }
  0xe1   :  { %2189 = vmatprep.subr.bf16.mxu0 %v3012_v9  ;;  %v3096_v9 = vld [vmem:[%s4090_s1 + $0x8d4] ss:$8 sps:$4 sm:$0xff]  }
  0xe3   :  { %2026 = vmatpush1.bf16.msra.mxu1 %v3007_v10  ;;  %v3094_v10 = vld [vmem:[%s4090_s1 + $0x8d0] ss:$8 sps:$4 sm:$0xff]  }
  0xe4   :  { %2190 = vmatpush1.bf16.msra.mxu0 %v3010_v11  ;;  %2027 = vmatprep.subr.bf16.mxu1 %v3015_v12  ;;  %v3099_v11 = vld [vmem:[%s4090_s1 + $0x8e4] ss:$8 sps:$4 sm:$0xff]   ;;  %v3097_v12 = vld [vmem:[%s4090_s1 + $0x8e0] ss:$8 sps:$4 sm:$0xff]  }
  0xe5   :  { %2191 = vmatprep.subr.bf16.mxu0 %v3018_v13  ;;  %v3102_v13 = vld [vmem:[%s4090_s1 + $0x8f4] ss:$8 sps:$4 sm:$0xff]  }
  0xe7   :  { %2028 = vmatpush1.bf16.msra.mxu1 %v3013_v14  ;;  %v3100_v14 = vld [vmem:[%s4090_s1 + $0x8f0] ss:$8 sps:$4 sm:$0xff]  }
  0xe8   :  { %2192 = vmatpush1.bf16.msra.mxu0 %v3016_v15  ;;  %2029 = vmatprep.subr.bf16.mxu1 %v3021_v18  ;;  %v420_v15 = vrot.slane %v3963_v56, %v3264_v49 }
  0xe9   :  { %2193 = vmatprep.subr.bf16.mxu0 %v3024_v19 }
  0xeb   :  { %2030 = vmatpush1.bf16.msra.mxu1 %v3019_v20 }
  0xec   :  { %2194 = vmatpush1.bf16.msra.mxu0 %v3022_v21  ;;  %2031 = vmatprep.subr.bf16.mxu1 %v3027_v22 }
  0xed   :  { %2195 = vmatprep.subr.bf16.mxu0 %v3030_v52 }
  0xef   :  { %2032 = vmatpush1.bf16.msra.mxu1 %v3025_v24 }
  0xf0   :  { %2196 = vmatpush1.bf16.msra.mxu0 %v3028_v25  ;;  %2033 = vmatprep.subr.bf16.mxu1 %v3033_v26 }
  0xf1   :  { %2197 = vmatprep.subr.bf16.mxu0 %v3036_v27 }
  0xf3   :  { %2034 = vmatpush1.bf16.msra.mxu1 %v3031_v28 }
  0xf4   :  { %2198 = vmatpush1.bf16.msra.mxu0 %v3034_v29  ;;  %2035 = vmatprep.subr.bf16.mxu1 %v3039_v30 }
  0xf5   :  { %2199 = vmatprep.subr.bf16.mxu0 %v3042_v31 }
  0xf7   :  { %2036 = vmatpush1.bf16.msra.mxu1 %v3037_v32 }
  0xf8   :  { %2200 = vmatpush1.bf16.msra.mxu0 %v3040_v33  ;;  %2037 = vmatprep.subr.bf16.mxu1 %v3045_v34 }
  0xf9   :  { %2201 = vmatprep.subr.bf16.mxu0 %v3048_v16 }
  0xfb   :  { %2038 = vmatpush1.bf16.msra.mxu1 %v3043_v36 }
  0xfc   :  { %2202 = vmatpush1.bf16.msra.mxu0 %v3046_v37  ;;  %2039 = vmatprep.subr.bf16.mxu1 %v3051_v40 }
  0xfd   :  { %2203 = vmatprep.subr.bf16.mxu0 %v3054_v41 }
  0xff   :  { %2040 = vmatpush1.bf16.msra.mxu1 %v3049_v23 }
 0x100   :  { %2204 = vmatpush1.bf16.msra.mxu0 %v3052_v42 }
 0x101   :  { %2214 = vmatprep.subr.bf16.mxu0 %v3057_v45 }
 0x102   :  { %2042 = vmatmul.mubr.bf16.vlgmr.msra.gmra.mrb[0].mxu1 %v354_v46 }
 0x103   :  { %2206 = vmatmul.mubr.bf16.vlgmr.msra.gmra.mrb[0].mxu0 %v403_v17 }
 0x104   :  { %2215 = vmatpush1.bf16.msra.mxu0 %v3055_v35  ;;  %2246 = vmatprep.mubr.bf16.mxu0 %v427_v47 }
 0x105   :  { %2216 = vmatprep.subr.bf16.mxu0 %v3060_v48 }
 0x108   :  { %2217 = vmatpush1.bf16.msra.mxu0 %v3058_v38 }
 0x109   :  { %2218 = vmatprep.subr.bf16.mxu0 %v3063_v39 }
 0x10c   :  { %2219 = vmatpush1.bf16.msra.mxu0 %v3061_v50 }
 0x10d   :  { %2220 = vmatprep.subr.bf16.mxu0 %v3066_v51 }
 0x110   :  { %2221 = vmatpush1.bf16.msra.mxu0 %v3064_v53 }
 0x111   :  { %2222 = vmatprep.subr.bf16.mxu0 %v3069_v54 }
 0x114   :  { %2223 = vmatpush1.bf16.msra.mxu0 %v3067_v55 }
 0x115   :  { %2224 = vmatprep.subr.bf16.mxu0 %v3072_v57 }
 0x118   :  { %2225 = vmatpush1.bf16.msra.mxu0 %v3070_v58 }
 0x119   :  { %2226 = vmatprep.subr.bf16.mxu0 %v3075_v59 }
 0x11c   :  { %2227 = vmatpush1.bf16.msra.mxu0 %v3073_v60 }
 0x11d   :  { %2228 = vmatprep.subr.bf16.mxu0 %v3078_v61 }
 0x120   :  { %2229 = vmatpush1.bf16.msra.mxu0 %v3076_v62 }
 0x121   :  { %2230 = vmatprep.subr.bf16.mxu0 %v3081_v63 }
 0x124   :  { %2231 = vmatpush1.bf16.msra.mxu0 %v3079_v0 }
 0x125   :  { %2232 = vmatprep.subr.bf16.mxu0 %v3084_v1  ;;  %v3108_v1 = vmov 1983009808  }
 0x128   :  { %2233 = vmatpush1.bf16.msra.mxu0 %v3082_v2  ;;  %v2308_v2 = vunpack.c.l.s4 %v3108_v1 }
 0x129   :  { %2234 = vmatprep.subr.bf16.mxu0 %v3087_v3 }
 0x12c   :  { %2235 = vmatpush1.bf16.msra.mxu0 %v3085_v4 }
 0x12d   :  { %2236 = vmatprep.subr.bf16.mxu0 %v3090_v5 }
 0x130   :  { %2237 = vmatpush1.bf16.msra.mxu0 %v3088_v6 }
 0x131   :  { %2238 = vmatprep.subr.bf16.mxu0 %v3093_v7  ;;  %v2309_v7 = vunpack.c.0.s8 %v2308_v2 }
 0x134   :  { %2239 = vmatpush1.bf16.msra.mxu0 %v3091_v8  ;;  %v2304_v8 = vld [vmem:[%s4092_s2] sm:$0x3] }
 0x135   :  { %2240 = vmatprep.subr.bf16.mxu0 %v3096_v9 }
 0x138   :  { %2241 = vmatpush1.bf16.msra.mxu0 %v3094_v10  ;;  %v2305_v10 = vunpack.c.l.bf16 %v2304_v8 }
 0x139   :  { %2242 = vmatprep.subr.bf16.mxu0 %v3099_v11  ;;  %v2312_v11 = vsub.s32 %v2309_v7, %v3246_v43 }
 0x13c   :  { %2243 = vmatpush1.bf16.msra.mxu0 %v3097_v12  ;;  %v2313_v12 = vrot.slane %v2305_v10, %v2312_v11 }
 0x13d   :  { %2244 = vmatprep.subr.bf16.mxu0 %v3102_v13 }
 0x140   :  { %2245 = vmatpush1.bf16.msra.mxu0 %v3100_v14 }
 0x143   :  { %2247 = vmatmul.mubr.bf16.vlgmr.msra.gmra.mrb[0].mxu0 %v420_v15 }
 0x1d5   :  { %v2043_v18 = vpop.f32.mrb[0].mxu1 }
 0x1d6   :  { %v2045_v19 = vpop.f32.mrb[1].mxu1 }
 0x1d7   :  { %v2047_v20 = vpop.f32.mrb[2].mxu1 }
 0x1d8   :  { %v2048_v21 = vpop.f32.mrb[3].mxu1 }
 0x216   :  { %v2248_v22 = vpop.f32.mrb[0].mxu0 }
 0x217   :  { %v4076_v52 = vadd.f32 %v2248_v22, %v2043_v18  ;;  %v2250_v24 = vpop.f32.mrb[1].mxu0  ;;  %v2314_v18 = vcombine.high %v2313_v12, %v2313_v12 }
 0x218   :  { %v2638_v25 = vadd.f32 %v2250_v24, %v2045_v19  ;;  %v2252_v26 = vpop.f32.mrb[2].mxu0 }
 0x219   :  { %v2256_v27 = vsel %vm2255_vm0, %v4076_v52, 0.0  ;;  %v2272_v28 = vmul.f32 %v4076_v52, %v4076_v52  ;;  %v2253_v29 = vpop.f32.mrb[3].mxu0 }
 0x21a   :  { %v2257_v30 = vrot.slane %v2256_v27, 4  ;;  %v2263_v31 = vsel %vm2255_vm0, %v2638_v25, 0.0  ;;  %v2273_v32 = vmul.f32 %v2638_v25, %v2638_v25 }
 0x21b   :  { %v2274_v33 = vsel %vm2255_vm0, %v2272_v28, 0.0  ;;  %v2264_v34 = vrot.slane %v2263_v31, 4 }
 0x21c   :  { %v2258_v16 = vadd.f32 %v2257_v30, %v2256_v27  ;;  %v2275_v36 = vrot.slane %v2274_v33, 4  ;;  %v2281_v37 = vsel %vm2255_vm0, %v2273_v32, 0.0 }
 0x21d   :  { %v2265_v40 = vadd.f32 %v2264_v34, %v2263_v31  ;;  %v2282_v41 = vrot.slane %v2281_v37, 4 }
 0x21e   :  { %v2259_v56 = vrot.slane %v2258_v16, 2  ;;  %v2276_v23 = vadd.f32 %v2275_v36, %v2274_v33 }
 0x21f   :  { %v2266_v42 = vrot.slane %v2265_v40, 2  ;;  %v2283_v44 = vadd.f32 %v2282_v41, %v2281_v37 }
 0x220   :  { %v2260_v45 = vadd.f32 %v2259_v56, %v2258_v16  ;;  %v2277_v46 = vrot.slane %v2276_v23, 2 }
 0x221   :  { %v2267_v17 = vadd.f32 %v2266_v42, %v2265_v40  ;;  %v2284_v35 = vrot.slane %v2283_v44, 2 }
 0x222   :  { %v2261_v47 = vrot.slane %v2260_v45, 1  ;;  %v2278_v48 = vadd.f32 %v2277_v46, %v2276_v23 }
 0x223   :  { %v2268_v38 = vrot.slane %v2267_v17, 1  ;;  %v2285_v39 = vadd.f32 %v2284_v35, %v2283_v44 }
 0x224   :  { %v2262_v50 = vadd.f32 %v2261_v47, %v2260_v45  ;;  %v2279_v51 = vrot.slane %v2278_v48, 1 }
 0x225   :  { %v2269_v53 = vadd.f32 %v2268_v38, %v2267_v17  ;;  %v2286_v54 = vrot.slane %v2285_v39, 1 }
 0x226   :  { %v2270_v55 = vmul.f32 0.5, %v2262_v50  ;;  %v2280_v57 = vadd.f32 %v2279_v51, %v2278_v48 }
 0x227   :  { %v2271_v58 = vmul.f32 0.5, %v2269_v53  ;;  %v2287_v59 = vadd.f32 %v2286_v54, %v2285_v39 }
 0x228   :  { %v2288_v60 = vmul.f32 0.5, %v2280_v57  ;;  %v2290_v61 = vmul.f32 %v2270_v55, %v2270_v55  ;;  %v2296_v13 = vsub.f32 %v4076_v52, %v2270_v55 }
 0x229   :  { %v2289_v62 = vmul.f32 0.5, %v2287_v59  ;;  %v2291_v63 = vmul.f32 %v2271_v58, %v2271_v58  ;;  %v2297_v15 = vsub.f32 %v2638_v25, %v2271_v58 }
 0x22a   :  { %v2292_v0 = vsub.f32 %v2288_v60, %v2290_v61 }
 0x22b   :  { %v2293_v3 = vsub.f32 %v2289_v62, %v2291_v63 }
 0x22c   :  { %v2294_v4 = vmax.f32 %v2292_v0, 0.0 }
 0x22d   :  { %v2295_v5 = vmax.f32 %v2293_v3, 0.0 }
 0x22e   :  { %v2298_v6 = vadd.f32 1e-05, %v2294_v4 }
 0x22f   :  { %v2299_v9 = vadd.f32 1e-05, %v2295_v5 }
 0x230   :  { %3103 = vrsqrt.f32 %v2298_v6 }
 0x231   :  { %3105 = vrsqrt.f32 %v2299_v9 }
 0x23a   :  { %v3104_v14 = vpop.eup %3103 }
 0x23b   :  { %v3106_v19 = vpop.eup %3105  ;;  %v2302_v20 = vmul.f32 %v3104_v14, %v2296_v13 }
 0x23c   :  { %v2303_v21 = vmul.f32 %v3106_v19, %v2297_v15 }
 0x23d   :  { %v2317_v22 = vadd.f32 %v2313_v12, %v2302_v20 }
 0x23e   :  { %v2318_v24 = vadd.f32 %v2314_v18, %v2303_v21 }
 0x23f   :  { %v2319_v26 = vmax.f32 %v2317_v22, 0.0 }
 0x240   :  { %v2320_v27 = vmax.f32 %v2318_v24, 0.0 }
 0x242   :  { %v2635_v28 = vpack.c.bf16 %v2320_v27, %v2319_v26 }
 0x244   :  { %v2332_v29 = vrot.slane %v2635_v28, %v3264_v49 }
 0x246   :  { %2636 = vst.sshfl [vmem:[%s4093_s3] sm:$0x5 pattern:$0x73625140] %v2332_v29 }

// kernel: _lambda_.24
= control target key start
LH: loop header
LB: loop body
LE: loop exit
PB: predicated region body
PF: predicated region fallthrough
CT: control target
= control target key end

     0   :  { %v3088_v36 = vmov 1966171168   ;;  %v309_v38 = vlaneseq  ;;  %vm2252_vm0 = vcmask 1041408   ;;  %s4052_s1 = inlined_call_operand.vmem [shape: bf16[2304,256], index: 1, kind: input, shape index: {}]   ;;  %s4053_s0 = inlined_call_operand.vmem [shape: bf16[2,2304], index: 0, kind: input, shape index: {}]   ;;  %s4054_s2 = inlined_call_operand.vmem [shape: bf16[2,256], index: 2, kind: output, shape index: {}]  }
   0x1   :  { %v2650_v0 = vld [vmem:[%s4052_s1 + $0x4] ss:$8 sps:$4 sm:$0xff]   ;;  %v2654_v2 = vld [vmem:[%s4052_s1] ss:$8 sps:$4 sm:$0xff]   ;;  %v2656_v4 = vld [vmem:[%s4052_s1 + $0x14] ss:$8 sps:$4 sm:$0xff]   ;;  %v307_v37 = vunpack.c.l.s4 %v3088_v36 }
   0x2   :  { %v2652_v1 = vld [vmem:[%s4052_s1 + $0x404] ss:$8 sps:$4 sm:$0xff]   ;;  %1883 = vmatprep.subr.bf16.mxu1 %v2650_v0  ;;  %v2655_v3 = vld [vmem:[%s4052_s1 + $0x400] ss:$8 sps:$4 sm:$0xff]   ;;  %v2658_v5 = vld [vmem:[%s4052_s1 + $0x414] ss:$8 sps:$4 sm:$0xff]  }
   0x3   :  { %2047 = vmatprep.subr.bf16.mxu0 %v2652_v1  ;;  %1884 = vmatpush1.bf16.msra.mxu1 %v2654_v2  ;;  %v2660_v6 = vld [vmem:[%s4052_s1 + $0x10] ss:$8 sps:$4 sm:$0xff]   ;;  %v2662_v8 = vld [vmem:[%s4052_s1 + $0x24] ss:$8 sps:$4 sm:$0xff]   ;;  %v2666_v10 = vld [vmem:[%s4052_s1 + $0x20] ss:$8 sps:$4 sm:$0xff]   ;;  %v308_v42 = vunpack.c.0.s8 %v307_v37 }
   0x4   :  { %2048 = vmatpush1.bf16.msra.mxu0 %v2655_v3  ;;  %1885 = vmatprep.subr.bf16.mxu1 %v2656_v4  ;;  %v2661_v7 = vld [vmem:[%s4052_s1 + $0x410] ss:$8 sps:$4 sm:$0xff]   ;;  %v2664_v9 = vld [vmem:[%s4052_s1 + $0x424] ss:$8 sps:$4 sm:$0xff]   ;;  %v2667_v11 = vld [vmem:[%s4052_s1 + $0x420] ss:$8 sps:$4 sm:$0xff]  }
   0x5   :  { %2049 = vmatprep.subr.bf16.mxu0 %v2658_v5  ;;  %v2668_v12 = vld [vmem:[%s4052_s1 + $0x34] ss:$8 sps:$4 sm:$0xff]   ;;  %v2672_v14 = vld [vmem:[%s4052_s1 + $0x30] ss:$8 sps:$4 sm:$0xff]   ;;  %v2674_v16 = vld [vmem:[%s4052_s1 + $0x44] ss:$8 sps:$4 sm:$0xff]  }
   0x6   :  { %v2670_v13 = vld [vmem:[%s4052_s1 + $0x434] ss:$8 sps:$4 sm:$0xff]   ;;  %v2673_v15 = vld [vmem:[%s4052_s1 + $0x430] ss:$8 sps:$4 sm:$0xff]   ;;  %v2676_v17 = vld [vmem:[%s4052_s1 + $0x444] ss:$8 sps:$4 sm:$0xff]  }
   0x7   :  { %1886 = vmatpush1.bf16.msra.mxu1 %v2660_v6  ;;  %v2678_v18 = vld [vmem:[%s4052_s1 + $0x40] ss:$8 sps:$4 sm:$0xff]   ;;  %v2680_v20 = vld [vmem:[%s4052_s1 + $0x54] ss:$8 sps:$4 sm:$0xff]   ;;  %v2684_v22 = vld [vmem:[%s4052_s1 + $0x50] ss:$8 sps:$4 sm:$0xff]  }
   0x8   :  { %2050 = vmatpush1.bf16.msra.mxu0 %v2661_v7  ;;  %1887 = vmatprep.subr.bf16.mxu1 %v2662_v8  ;;  %v2679_v19 = vld [vmem:[%s4052_s1 + $0x440] ss:$8 sps:$4 sm:$0xff]   ;;  %v2682_v21 = vld [vmem:[%s4052_s1 + $0x454] ss:$8 sps:$4 sm:$0xff]   ;;  %v2685_v23 = vld [vmem:[%s4052_s1 + $0x450] ss:$8 sps:$4 sm:$0xff]  }
   0x9   :  { %2051 = vmatprep.subr.bf16.mxu0 %v2664_v9  ;;  %v2686_v24 = vld [vmem:[%s4052_s1 + $0x64] ss:$8 sps:$4 sm:$0xff]   ;;  %v2690_v26 = vld [vmem:[%s4052_s1 + $0x60] ss:$8 sps:$4 sm:$0xff]   ;;  %v2692_v28 = vld [vmem:[%s4052_s1 + $0x74] ss:$8 sps:$4 sm:$0xff]  }
   0xa   :  { %v2688_v25 = vld [vmem:[%s4052_s1 + $0x464] ss:$8 sps:$4 sm:$0xff]   ;;  %v2691_v27 = vld [vmem:[%s4052_s1 + $0x460] ss:$8 sps:$4 sm:$0xff]   ;;  %v2694_v29 = vld [vmem:[%s4052_s1 + $0x474] ss:$8 sps:$4 sm:$0xff]  }
   0xb   :  { %1888 = vmatpush1.bf16.msra.mxu1 %v2666_v10  ;;  %v2696_v30 = vld [vmem:[%s4052_s1 + $0x70] ss:$8 sps:$4 sm:$0xff]   ;;  %v2698_v32 = vld [vmem:[%s4052_s1 + $0x84] ss:$8 sps:$4 sm:$0xff]   ;;  %v2702_v34 = vld [vmem:[%s4052_s1 + $0x80] ss:$8 sps:$4 sm:$0xff]  }
   0xc   :  { %2052 = vmatpush1.bf16.msra.mxu0 %v2667_v11  ;;  %1889 = vmatprep.subr.bf16.mxu1 %v2668_v12  ;;  %v2697_v31 = vld [vmem:[%s4052_s1 + $0x470] ss:$8 sps:$4 sm:$0xff]   ;;  %v2700_v33 = vld [vmem:[%s4052_s1 + $0x484] ss:$8 sps:$4 sm:$0xff]   ;;  %v2703_v35 = vld [vmem:[%s4052_s1 + $0x480] ss:$8 sps:$4 sm:$0xff]  }
   0xd   :  { %2053 = vmatprep.subr.bf16.mxu0 %v2670_v13  ;;  %v2704_v39 = vld [vmem:[%s4052_s1 + $0x94] ss:$8 sps:$4 sm:$0xff]   ;;  %v2708_v41 = vld [vmem:[%s4052_s1 + $0x90] ss:$8 sps:$4 sm:$0xff]   ;;  %v310_v43 = vshrl.u32 %v309_v38, 7  ;;  %v3247_v52 = vld [vmem:[%s4053_s0] sm:$0xff] }
   0xe   :  { %v2706_v40 = vld [vmem:[%s4052_s1 + $0x494] ss:$8 sps:$4 sm:$0xff]   ;;  %v2709_v44 = vld [vmem:[%s4052_s1 + $0x490] ss:$8 sps:$4 sm:$0xff]   ;;  %v2710_v45 = vld [vmem:[%s4052_s1 + $0xa4] ss:$8 sps:$4 sm:$0xff]  }
   0xf   :  { %1890 = vmatpush1.bf16.msra.mxu1 %v2672_v14  ;;  %v2712_v46 = vld [vmem:[%s4052_s1 + $0x4a4] ss:$8 sps:$4 sm:$0xff]   ;;  %v2714_v47 = vld [vmem:[%s4052_s1 + $0xa0] ss:$8 sps:$4 sm:$0xff]   ;;  %v3236_v49 = vsub.s32 %v308_v42, %v310_v43  ;;  %v2716_v50 = vld [vmem:[%s4052_s1 + $0xb4] ss:$8 sps:$4 sm:$0xff]  }
  0x10   :  { %2054 = vmatpush1.bf16.msra.mxu0 %v2673_v15  ;;  %1891 = vmatprep.subr.bf16.mxu1 %v2674_v16  ;;  %v2715_v48 = vld [vmem:[%s4052_s1 + $0x4a0] ss:$8 sps:$4 sm:$0xff]   ;;  %v2718_v51 = vld [vmem:[%s4052_s1 + $0x4b4] ss:$8 sps:$4 sm:$0xff]   ;;  %v2720_v53 = vld [vmem:[%s4052_s1 + $0xb0] ss:$8 sps:$4 sm:$0xff]  }
  0x11   :  { %2055 = vmatprep.subr.bf16.mxu0 %v2676_v17  ;;  %v312_v54 = vrot.slane %v3247_v52, %v3236_v49  ;;  %v2721_v55 = vld [vmem:[%s4052_s1 + $0x4b0] ss:$8 sps:$4 sm:$0xff]   ;;  %v3260_v56 = vld [vmem:[%s4053_s0 + $0x8] sm:$0xff]  ;;  %v2728_v1 = vld [vmem:[%s4052_s1 + $0xd4] ss:$8 sps:$4 sm:$0xff]  }
  0x12   :  { %v2722_v57 = vld [vmem:[%s4052_s1 + $0xc4] ss:$8 sps:$4 sm:$0xff]   ;;  %v361_v60 = vrot.slane %v3260_v56, %v3236_v49  ;;  %v2726_v63 = vld [vmem:[%s4052_s1 + $0xc0] ss:$8 sps:$4 sm:$0xff]   ;;  %v2730_v2 = vld [vmem:[%s4052_s1 + $0x4d4] ss:$8 sps:$4 sm:$0xff]  }
  0x13   :  { %1892 = vmatpush1.bf16.msra.mxu1 %v2678_v18  ;;  %v2724_v58 = vld [vmem:[%s4052_s1 + $0x4c4] ss:$8 sps:$4 sm:$0xff]   ;;  %v320_v59 = vcombine.high %v312_v54, %v312_v54  ;;  %v2727_v0 = vld [vmem:[%s4052_s1 + $0x4c0] ss:$8 sps:$4 sm:$0xff]   ;;  %v2732_v4 = vld [vmem:[%s4052_s1 + $0xd0] ss:$8 sps:$4 sm:$0xff]   ;;  %v3321_v16 = vrot.slane %v312_v54, %v3236_v49 }
  0x14   :  { %2056 = vmatpush1.bf16.msra.mxu0 %v2679_v19  ;;  %1893 = vmatprep.subr.bf16.mxu1 %v2680_v20  ;;  %v369_v62 = vcombine.high %v361_v60, %v361_v60  ;;  %v2733_v5 = vld [vmem:[%s4052_s1 + $0x4d0] ss:$8 sps:$4 sm:$0xff]   ;;  %v2734_v6 = vld [vmem:[%s4052_s1 + $0xe4] ss:$8 sps:$4 sm:$0xff]   ;;  %v2738_v8 = vld [vmem:[%s4052_s1 + $0xe0] ss:$8 sps:$4 sm:$0xff]   ;;  %v3324_v17 = vrot.slane %v361_v60, %v3236_v49 }
  0x15   :  { %2057 = vmatprep.subr.bf16.mxu0 %v2682_v21  ;;  %v342_v61 = vrot.slane %v320_v59, %v3236_v49  ;;  %v2736_v7 = vld [vmem:[%s4052_s1 + $0x4e4] ss:$8 sps:$4 sm:$0xff]   ;;  %v2739_v9 = vld [vmem:[%s4052_s1 + $0x4e0] ss:$8 sps:$4 sm:$0xff]   ;;  %v2740_v10 = vld [vmem:[%s4052_s1 + $0xf4] ss:$8 sps:$4 sm:$0xff]  }
  0x16   :  { %v391_v3 = vrot.slane %v369_v62, %v3236_v49  ;;  %v2742_v11 = vld [vmem:[%s4052_s1 + $0x4f4] ss:$8 sps:$4 sm:$0xff]   ;;  %v2744_v12 = vld [vmem:[%s4052_s1 + $0xf0] ss:$8 sps:$4 sm:$0xff]   ;;  %v2749_v14 = vld [vmem:[%s4052_s1 + $0x104] ss:$8 sps:$4 sm:$0xff]  }
  0x17   :  { %1894 = vmatpush1.bf16.msra.mxu1 %v2684_v22  ;;  %1915 = vmatprep.mubr.bf16.mxu1 %v342_v61  ;;  %v2745_v13 = vld [vmem:[%s4052_s1 + $0x4f0] ss:$8 sps:$4 sm:$0xff]   ;;  %v2753_v15 = vld [vmem:[%s4052_s1 + $0x504] ss:$8 sps:$4 sm:$0xff]   ;;  %v2747_v18 = vld [vmem:[%s4052_s1 + $0x100] ss:$8 sps:$4 sm:$0xff]   ;;  %v352_v22 = vcombine.high %v342_v61, %v342_v61 }
  0x18   :  { %2058 = vmatpush1.bf16.msra.mxu0 %v2685_v23  ;;  %1895 = vmatprep.subr.bf16.mxu1 %v2686_v24  ;;  %v2751_v19 = vld [vmem:[%s4052_s1 + $0x500] ss:$8 sps:$4 sm:$0xff]   ;;  %v2756_v20 = vld [vmem:[%s4052_s1 + $0x114] ss:$8 sps:$4 sm:$0xff]   ;;  %v401_v23 = vcombine.high %v391_v3, %v391_v3  ;;  %v2754_v24 = vld [vmem:[%s4052_s1 + $0x110] ss:$8 sps:$4 sm:$0xff]  }
  0x19   :  { %2059 = vmatprep.subr.bf16.mxu0 %v2688_v25  ;;  %2079 = vmatprep.mubr.bf16.mxu0 %v391_v3  ;;  %v2759_v21 = vld [vmem:[%s4052_s1 + $0x514] ss:$8 sps:$4 sm:$0xff]   ;;  %v2757_v25 = vld [vmem:[%s4052_s1 + $0x510] ss:$8 sps:$4 sm:$0xff]   ;;  %v2772_v36 = vld [vmem:[%s4052_s1 + $0x140] ss:$8 sps:$4 sm:$0xff]  }
  0x1a   :  { %v2775_v37 = vld [vmem:[%s4052_s1 + $0x540] ss:$8 sps:$4 sm:$0xff]   ;;  %v2780_v38 = vld [vmem:[%s4052_s1 + $0x154] ss:$8 sps:$4 sm:$0xff]   ;;  %v2786_v42 = vld [vmem:[%s4052_s1 + $0x164] ss:$8 sps:$4 sm:$0xff]  }
  0x1b   :  { %1896 = vmatpush1.bf16.msra.mxu1 %v2690_v26  ;;  %v2762_v26 = vld [vmem:[%s4052_s1 + $0x124] ss:$8 sps:$4 sm:$0xff]   ;;  %v2796_v54 = vld [vmem:[%s4052_s1 + $0x180] ss:$8 sps:$4 sm:$0xff]   ;;  %v2802_v59 = vld [vmem:[%s4052_s1 + $0x190] ss:$8 sps:$4 sm:$0xff]  }
  0x1c   :  { %2060 = vmatpush1.bf16.msra.mxu0 %v2691_v27  ;;  %1897 = vmatprep.subr.bf16.mxu1 %v2692_v28  ;;  %v2765_v27 = vld [vmem:[%s4052_s1 + $0x524] ss:$8 sps:$4 sm:$0xff]   ;;  %v2760_v28 = vld [vmem:[%s4052_s1 + $0x120] ss:$8 sps:$4 sm:$0xff]   ;;  %v2805_v60 = vld [vmem:[%s4052_s1 + $0x590] ss:$8 sps:$4 sm:$0xff]  }
  0x1d   :  { %2061 = vmatprep.subr.bf16.mxu0 %v2694_v29  ;;  %v2763_v29 = vld [vmem:[%s4052_s1 + $0x520] ss:$8 sps:$4 sm:$0xff]   ;;  %v2789_v43 = vld [vmem:[%s4052_s1 + $0x564] ss:$8 sps:$4 sm:$0xff]   ;;  %v2814_v3 = vld [vmem:[%s4052_s1 + $0x1b0] ss:$8 sps:$4 sm:$0xff]  }
  0x1e   :  { %v2810_v61 = vld [vmem:[%s4052_s1 + $0x1a4] ss:$8 sps:$4 sm:$0xff]  }
  0x1f   :  { %1898 = vmatpush1.bf16.msra.mxu1 %v2696_v30  ;;  %v2768_v30 = vld [vmem:[%s4052_s1 + $0x134] ss:$8 sps:$4 sm:$0xff]   ;;  %v2813_v62 = vld [vmem:[%s4052_s1 + $0x5a4] ss:$8 sps:$4 sm:$0xff]  }
  0x20   :  { %2062 = vmatpush1.bf16.msra.mxu0 %v2697_v31  ;;  %1899 = vmatprep.subr.bf16.mxu1 %v2698_v32  ;;  %v2771_v31 = vld [vmem:[%s4052_s1 + $0x534] ss:$8 sps:$4 sm:$0xff]   ;;  %v2766_v32 = vld [vmem:[%s4052_s1 + $0x130] ss:$8 sps:$4 sm:$0xff]  }
  0x21   :  { %2063 = vmatprep.subr.bf16.mxu0 %v2700_v33  ;;  %v2769_v33 = vld [vmem:[%s4052_s1 + $0x530] ss:$8 sps:$4 sm:$0xff]  }
  0x23   :  { %1900 = vmatpush1.bf16.msra.mxu1 %v2702_v34  ;;  %v2774_v34 = vld [vmem:[%s4052_s1 + $0x144] ss:$8 sps:$4 sm:$0xff]  }
  0x24   :  { %2064 = vmatpush1.bf16.msra.mxu0 %v2703_v35  ;;  %1901 = vmatprep.subr.bf16.mxu1 %v2704_v39  ;;  %v2777_v35 = vld [vmem:[%s4052_s1 + $0x544] ss:$8 sps:$4 sm:$0xff]   ;;  %v2783_v39 = vld [vmem:[%s4052_s1 + $0x554] ss:$8 sps:$4 sm:$0xff]  }
  0x25   :  { %2065 = vmatprep.subr.bf16.mxu0 %v2706_v40  ;;  %v2778_v40 = vld [vmem:[%s4052_s1 + $0x150] ss:$8 sps:$4 sm:$0xff]  }
  0x27   :  { %1902 = vmatpush1.bf16.msra.mxu1 %v2708_v41  ;;  %v2781_v41 = vld [vmem:[%s4052_s1 + $0x550] ss:$8 sps:$4 sm:$0xff]  }
  0x28   :  { %2066 = vmatpush1.bf16.msra.mxu0 %v2709_v44  ;;  %1903 = vmatprep.subr.bf16.mxu1 %v2710_v45  ;;  %v2784_v44 = vld [vmem:[%s4052_s1 + $0x160] ss:$8 sps:$4 sm:$0xff]  }
  0x29   :  { %2067 = vmatprep.subr.bf16.mxu0 %v2712_v46  ;;  %v2787_v45 = vld [vmem:[%s4052_s1 + $0x560] ss:$8 sps:$4 sm:$0xff]   ;;  %v2792_v46 = vld [vmem:[%s4052_s1 + $0x174] ss:$8 sps:$4 sm:$0xff]  }
  0x2b   :  { %1904 = vmatpush1.bf16.msra.mxu1 %v2714_v47  ;;  %v2795_v47 = vld [vmem:[%s4052_s1 + $0x574] ss:$8 sps:$4 sm:$0xff]  }
  0x2c   :  { %2068 = vmatpush1.bf16.msra.mxu0 %v2715_v48  ;;  %1905 = vmatprep.subr.bf16.mxu1 %v2716_v50  ;;  %v2790_v48 = vld [vmem:[%s4052_s1 + $0x170] ss:$8 sps:$4 sm:$0xff]  }
  0x2d   :  { %2069 = vmatprep.subr.bf16.mxu0 %v2718_v51  ;;  %v2793_v50 = vld [vmem:[%s4052_s1 + $0x570] ss:$8 sps:$4 sm:$0xff]   ;;  %v2798_v51 = vld [vmem:[%s4052_s1 + $0x184] ss:$8 sps:$4 sm:$0xff]  }
  0x2f   :  { %1906 = vmatpush1.bf16.msra.mxu1 %v2720_v53  ;;  %v2801_v53 = vld [vmem:[%s4052_s1 + $0x584] ss:$8 sps:$4 sm:$0xff]  }
  0x30   :  { %2070 = vmatpush1.bf16.msra.mxu0 %v2721_v55  ;;  %1907 = vmatprep.subr.bf16.mxu1 %v2722_v57  ;;  %v2799_v55 = vld [vmem:[%s4052_s1 + $0x580] ss:$8 sps:$4 sm:$0xff]   ;;  %v2804_v57 = vld [vmem:[%s4052_s1 + $0x194] ss:$8 sps:$4 sm:$0xff]  }
  0x31   :  { %2071 = vmatprep.subr.bf16.mxu0 %v2724_v58  ;;  %v2807_v58 = vld [vmem:[%s4052_s1 + $0x594] ss:$8 sps:$4 sm:$0xff]  }
  0x33   :  { %1908 = vmatpush1.bf16.msra.mxu1 %v2726_v63  ;;  %v2808_v63 = vld [vmem:[%s4052_s1 + $0x1a0] ss:$8 sps:$4 sm:$0xff]  }
  0x34   :  { %2072 = vmatpush1.bf16.msra.mxu0 %v2727_v0  ;;  %1909 = vmatprep.subr.bf16.mxu1 %v2728_v1  ;;  %v2811_v0 = vld [vmem:[%s4052_s1 + $0x5a0] ss:$8 sps:$4 sm:$0xff]   ;;  %v2816_v1 = vld [vmem:[%s4052_s1 + $0x1b4] ss:$8 sps:$4 sm:$0xff]  }
  0x35   :  { %2073 = vmatprep.subr.bf16.mxu0 %v2730_v2  ;;  %v2819_v2 = vld [vmem:[%s4052_s1 + $0x5b4] ss:$8 sps:$4 sm:$0xff]  }
  0x37   :  { %1910 = vmatpush1.bf16.msra.mxu1 %v2732_v4  ;;  %v2817_v4 = vld [vmem:[%s4052_s1 + $0x5b0] ss:$8 sps:$4 sm:$0xff]  }
  0x38   :  { %2074 = vmatpush1.bf16.msra.mxu0 %v2733_v5  ;;  %1911 = vmatprep.subr.bf16.mxu1 %v2734_v6  ;;  %v2822_v5 = vld [vmem:[%s4052_s1 + $0x1c4] ss:$8 sps:$4 sm:$0xff]  }
  0x39   :  { %2075 = vmatprep.subr.bf16.mxu0 %v2736_v7  ;;  %v2825_v6 = vld [vmem:[%s4052_s1 + $0x5c4] ss:$8 sps:$4 sm:$0xff]   ;;  %v2820_v7 = vld [vmem:[%s4052_s1 + $0x1c0] ss:$8 sps:$4 sm:$0xff]  }
  0x3b   :  { %1912 = vmatpush1.bf16.msra.mxu1 %v2738_v8  ;;  %v2823_v8 = vld [vmem:[%s4052_s1 + $0x5c0] ss:$8 sps:$4 sm:$0xff]  }
  0x3c   :  { %2076 = vmatpush1.bf16.msra.mxu0 %v2739_v9  ;;  %1913 = vmatprep.subr.bf16.mxu1 %v2740_v10  ;;  %v2828_v9 = vld [vmem:[%s4052_s1 + $0x1d4] ss:$8 sps:$4 sm:$0xff]  }
  0x3d   :  { %2077 = vmatprep.subr.bf16.mxu0 %v2742_v11  ;;  %v2831_v10 = vld [vmem:[%s4052_s1 + $0x5d4] ss:$8 sps:$4 sm:$0xff]   ;;  %v2826_v11 = vld [vmem:[%s4052_s1 + $0x1d0] ss:$8 sps:$4 sm:$0xff]  }
  0x3f   :  { %1914 = vmatpush1.bf16.msra.mxu1 %v2744_v12  ;;  %v2829_v12 = vld [vmem:[%s4052_s1 + $0x5d0] ss:$8 sps:$4 sm:$0xff]  }
  0x40   :  { %2078 = vmatpush1.bf16.msra.mxu0 %v2745_v13  ;;  %1924 = vmatprep.subr.bf16.mxu1 %v2749_v14  ;;  %v2834_v13 = vld [vmem:[%s4052_s1 + $0x1e4] ss:$8 sps:$4 sm:$0xff]  }
  0x41   :  { %2088 = vmatprep.subr.bf16.mxu0 %v2753_v15  ;;  %v2837_v14 = vld [vmem:[%s4052_s1 + $0x5e4] ss:$8 sps:$4 sm:$0xff]   ;;  %v305_v15 = vcombine.high %v3247_v52, %v3247_v52  ;;  %v2843_v52 = vld [vmem:[%s4052_s1 + $0x5f4] ss:$8 sps:$4 sm:$0xff]  }
  0x42   :  { %1916 = vmatmul.mubr.bf16.vlgmr.msra.gmra.mrb[0].mxu1 %v3321_v16 }
  0x43   :  { %2080 = vmatmul.mubr.bf16.vlgmr.msra.gmra.mrb[0].mxu0 %v3324_v17  ;;  %1925 = vmatpush1.bf16.msra.mxu1 %v2747_v18  ;;  %v354_v18 = vcombine.high %v3260_v56, %v3260_v56  ;;  %v3513_v56 = vrot.slane %v305_v15, %v3236_v49  ;;  %v2913_v15 = vld [vmem:[%s4052_s1 + $0x6b0] ss:$8 sps:$4 sm:$0xff]  }
  0x44   :  { %2089 = vmatpush1.bf16.msra.mxu0 %v2751_v19  ;;  %1926 = vmatprep.subr.bf16.mxu1 %v2756_v20  ;;  %v2832_v19 = vld [vmem:[%s4052_s1 + $0x1e0] ss:$8 sps:$4 sm:$0xff]  }
  0x45   :  { %2090 = vmatprep.subr.bf16.mxu0 %v2759_v21  ;;  %1956 = vmatprep.mubr.bf16.mxu1 %v352_v22  ;;  %v2835_v20 = vld [vmem:[%s4052_s1 + $0x5e0] ss:$8 sps:$4 sm:$0xff]   ;;  %v2840_v21 = vld [vmem:[%s4052_s1 + $0x1f4] ss:$8 sps:$4 sm:$0xff]   ;;  %v3516_v22 = vrot.slane %v354_v18, %v3236_v49  ;;  %v2918_v18 = vld [vmem:[%s4052_s1 + $0x2c4] ss:$8 sps:$4 sm:$0xff]  }
  0x46   :  { %2120 = vmatprep.mubr.bf16.mxu0 %v401_v23  ;;  %v2838_v23 = vld [vmem:[%s4052_s1 + $0x1f0] ss:$8 sps:$4 sm:$0xff]  }
  0x47   :  { %1927 = vmatpush1.bf16.msra.mxu1 %v2754_v24  ;;  %v2841_v24 = vld [vmem:[%s4052_s1 + $0x5f0] ss:$8 sps:$4 sm:$0xff]  }
  0x48   :  { %2091 = vmatpush1.bf16.msra.mxu0 %v2757_v25  ;;  %1928 = vmatprep.subr.bf16.mxu1 %v2762_v26  ;;  %v2846_v25 = vld [vmem:[%s4052_s1 + $0x204] ss:$8 sps:$4 sm:$0xff]  }
  0x49   :  { %2092 = vmatprep.subr.bf16.mxu0 %v2765_v27  ;;  %v2849_v26 = vld [vmem:[%s4052_s1 + $0x604] ss:$8 sps:$4 sm:$0xff]   ;;  %v321_v27 = vcombine.high %v3513_v56, %v3513_v56 }
  0x4b   :  { %1929 = vmatpush1.bf16.msra.mxu1 %v2760_v28  ;;  %v370_v28 = vcombine.high %v3516_v22, %v3516_v22 }
  0x4c   :  { %2093 = vmatpush1.bf16.msra.mxu0 %v2763_v29  ;;  %1930 = vmatprep.subr.bf16.mxu1 %v2768_v30  ;;  %v350_v29 = vcombine.high %v3321_v16, %v3321_v16  ;;  %v399_v30 = vcombine.high %v3324_v17, %v3324_v17  ;;  %v2855_v16 = vld [vmem:[%s4052_s1 + $0x614] ss:$8 sps:$4 sm:$0xff]   ;;  %v3551_v17 = vrot.slane %v321_v27, %v3236_v49  ;;  %v2933_v27 = vld [vmem:[%s4052_s1 + $0x6e4] ss:$8 sps:$4 sm:$0xff]  }
  0x4d   :  { %2094 = vmatprep.subr.bf16.mxu0 %v2771_v31  ;;  %v2844_v31 = vld [vmem:[%s4052_s1 + $0x200] ss:$8 sps:$4 sm:$0xff]  }
  0x4f   :  { %1931 = vmatpush1.bf16.msra.mxu1 %v2766_v32  ;;  %v2847_v32 = vld [vmem:[%s4052_s1 + $0x600] ss:$8 sps:$4 sm:$0xff]  }
  0x50   :  { %2095 = vmatpush1.bf16.msra.mxu0 %v2769_v33  ;;  %1932 = vmatprep.subr.bf16.mxu1 %v2774_v34  ;;  %v2852_v33 = vld [vmem:[%s4052_s1 + $0x214] ss:$8 sps:$4 sm:$0xff]   ;;  %v3554_v34 = vrot.slane %v370_v28, %v3236_v49  ;;  %v2928_v28 = vld [vmem:[%s4052_s1 + $0x2e0] ss:$8 sps:$4 sm:$0xff]  }
  0x51   :  { %2096 = vmatprep.subr.bf16.mxu0 %v2777_v35  ;;  %v2850_v35 = vld [vmem:[%s4052_s1 + $0x210] ss:$8 sps:$4 sm:$0xff]  }
  0x53   :  { %1933 = vmatpush1.bf16.msra.mxu1 %v2772_v36  ;;  %v2853_v36 = vld [vmem:[%s4052_s1 + $0x610] ss:$8 sps:$4 sm:$0xff]  }
  0x54   :  { %2097 = vmatpush1.bf16.msra.mxu0 %v2775_v37  ;;  %1934 = vmatprep.subr.bf16.mxu1 %v2780_v38  ;;  %v2858_v37 = vld [vmem:[%s4052_s1 + $0x224] ss:$8 sps:$4 sm:$0xff]  }
  0x55   :  { %2098 = vmatprep.subr.bf16.mxu0 %v2783_v39  ;;  %v2861_v38 = vld [vmem:[%s4052_s1 + $0x624] ss:$8 sps:$4 sm:$0xff]   ;;  %v2856_v39 = vld [vmem:[%s4052_s1 + $0x220] ss:$8 sps:$4 sm:$0xff]  }
  0x57   :  { %1935 = vmatpush1.bf16.msra.mxu1 %v2778_v40  ;;  %v2859_v40 = vld [vmem:[%s4052_s1 + $0x620] ss:$8 sps:$4 sm:$0xff]  }
  0x58   :  { %2099 = vmatpush1.bf16.msra.mxu0 %v2781_v41  ;;  %1936 = vmatprep.subr.bf16.mxu1 %v2786_v42  ;;  %v2864_v41 = vld [vmem:[%s4052_s1 + $0x234] ss:$8 sps:$4 sm:$0xff]  }
  0x59   :  { %2100 = vmatprep.subr.bf16.mxu0 %v2789_v43  ;;  %v2867_v42 = vld [vmem:[%s4052_s1 + $0x634] ss:$8 sps:$4 sm:$0xff]   ;;  %v2862_v43 = vld [vmem:[%s4052_s1 + $0x230] ss:$8 sps:$4 sm:$0xff]  }
  0x5b   :  { %1937 = vmatpush1.bf16.msra.mxu1 %v2784_v44  ;;  %v2865_v44 = vld [vmem:[%s4052_s1 + $0x630] ss:$8 sps:$4 sm:$0xff]  }
  0x5c   :  { %2101 = vmatpush1.bf16.msra.mxu0 %v2787_v45  ;;  %1938 = vmatprep.subr.bf16.mxu1 %v2792_v46  ;;  %v2870_v45 = vld [vmem:[%s4052_s1 + $0x244] ss:$8 sps:$4 sm:$0xff]  }
  0x5d   :  { %2102 = vmatprep.subr.bf16.mxu0 %v2795_v47  ;;  %v2873_v46 = vld [vmem:[%s4052_s1 + $0x644] ss:$8 sps:$4 sm:$0xff]   ;;  %v2868_v47 = vld [vmem:[%s4052_s1 + $0x240] ss:$8 sps:$4 sm:$0xff]  }
  0x5f   :  { %1939 = vmatpush1.bf16.msra.mxu1 %v2790_v48  ;;  %v2871_v48 = vld [vmem:[%s4052_s1 + $0x640] ss:$8 sps:$4 sm:$0xff]  }
  0x60   :  { %2103 = vmatpush1.bf16.msra.mxu0 %v2793_v50  ;;  %1940 = vmatprep.subr.bf16.mxu1 %v2798_v51  ;;  %v2876_v50 = vld [vmem:[%s4052_s1 + $0x254] ss:$8 sps:$4 sm:$0xff]  }
  0x61   :  { %2104 = vmatprep.subr.bf16.mxu0 %v2801_v53  ;;  %v2879_v51 = vld [vmem:[%s4052_s1 + $0x654] ss:$8 sps:$4 sm:$0xff]   ;;  %v2874_v53 = vld [vmem:[%s4052_s1 + $0x250] ss:$8 sps:$4 sm:$0xff]  }
  0x63   :  { %1941 = vmatpush1.bf16.msra.mxu1 %v2796_v54  ;;  %v2877_v54 = vld [vmem:[%s4052_s1 + $0x650] ss:$8 sps:$4 sm:$0xff]  }
  0x64   :  { %2105 = vmatpush1.bf16.msra.mxu0 %v2799_v55  ;;  %1942 = vmatprep.subr.bf16.mxu1 %v2804_v57  ;;  %v2882_v55 = vld [vmem:[%s4052_s1 + $0x264] ss:$8 sps:$4 sm:$0xff]  }
  0x65   :  { %2106 = vmatprep.subr.bf16.mxu0 %v2807_v58  ;;  %v2885_v57 = vld [vmem:[%s4052_s1 + $0x664] ss:$8 sps:$4 sm:$0xff]   ;;  %v2880_v58 = vld [vmem:[%s4052_s1 + $0x260] ss:$8 sps:$4 sm:$0xff]  }
  0x67   :  { %1943 = vmatpush1.bf16.msra.mxu1 %v2802_v59  ;;  %v2883_v59 = vld [vmem:[%s4052_s1 + $0x660] ss:$8 sps:$4 sm:$0xff]  }
  0x68   :  { %2107 = vmatpush1.bf16.msra.mxu0 %v2805_v60  ;;  %1944 = vmatprep.subr.bf16.mxu1 %v2810_v61  ;;  %v2888_v60 = vld [vmem:[%s4052_s1 + $0x274] ss:$8 sps:$4 sm:$0xff]  }
  0x69   :  { %2108 = vmatprep.subr.bf16.mxu0 %v2813_v62  ;;  %v2891_v61 = vld [vmem:[%s4052_s1 + $0x674] ss:$8 sps:$4 sm:$0xff]   ;;  %v2886_v62 = vld [vmem:[%s4052_s1 + $0x270] ss:$8 sps:$4 sm:$0xff]  }
  0x6b   :  { %1945 = vmatpush1.bf16.msra.mxu1 %v2808_v63  ;;  %v2889_v63 = vld [vmem:[%s4052_s1 + $0x670] ss:$8 sps:$4 sm:$0xff]  }
  0x6c   :  { %2109 = vmatpush1.bf16.msra.mxu0 %v2811_v0  ;;  %1946 = vmatprep.subr.bf16.mxu1 %v2816_v1  ;;  %v2894_v0 = vld [vmem:[%s4052_s1 + $0x284] ss:$8 sps:$4 sm:$0xff]  }
  0x6d   :  { %2110 = vmatprep.subr.bf16.mxu0 %v2819_v2  ;;  %v2897_v1 = vld [vmem:[%s4052_s1 + $0x684] ss:$8 sps:$4 sm:$0xff]   ;;  %v2892_v2 = vld [vmem:[%s4052_s1 + $0x280] ss:$8 sps:$4 sm:$0xff]  }
  0x6f   :  { %1947 = vmatpush1.bf16.msra.mxu1 %v2814_v3  ;;  %v2895_v3 = vld [vmem:[%s4052_s1 + $0x680] ss:$8 sps:$4 sm:$0xff]  }
  0x70   :  { %2111 = vmatpush1.bf16.msra.mxu0 %v2817_v4  ;;  %1948 = vmatprep.subr.bf16.mxu1 %v2822_v5  ;;  %v2900_v4 = vld [vmem:[%s4052_s1 + $0x294] ss:$8 sps:$4 sm:$0xff]  }
  0x71   :  { %2112 = vmatprep.subr.bf16.mxu0 %v2825_v6  ;;  %v2903_v5 = vld [vmem:[%s4052_s1 + $0x694] ss:$8 sps:$4 sm:$0xff]   ;;  %v2898_v6 = vld [vmem:[%s4052_s1 + $0x290] ss:$8 sps:$4 sm:$0xff]  }
  0x73   :  { %1949 = vmatpush1.bf16.msra.mxu1 %v2820_v7  ;;  %v2901_v7 = vld [vmem:[%s4052_s1 + $0x690] ss:$8 sps:$4 sm:$0xff]  }
  0x74   :  { %2113 = vmatpush1.bf16.msra.mxu0 %v2823_v8  ;;  %1950 = vmatprep.subr.bf16.mxu1 %v2828_v9  ;;  %v2906_v8 = vld [vmem:[%s4052_s1 + $0x2a4] ss:$8 sps:$4 sm:$0xff]  }
  0x75   :  { %2114 = vmatprep.subr.bf16.mxu0 %v2831_v10  ;;  %v2909_v9 = vld [vmem:[%s4052_s1 + $0x6a4] ss:$8 sps:$4 sm:$0xff]   ;;  %v2904_v10 = vld [vmem:[%s4052_s1 + $0x2a0] ss:$8 sps:$4 sm:$0xff]  }
  0x77   :  { %1951 = vmatpush1.bf16.msra.mxu1 %v2826_v11  ;;  %v2907_v11 = vld [vmem:[%s4052_s1 + $0x6a0] ss:$8 sps:$4 sm:$0xff]  }
  0x78   :  { %2115 = vmatpush1.bf16.msra.mxu0 %v2829_v12  ;;  %1952 = vmatprep.subr.bf16.mxu1 %v2834_v13  ;;  %v2912_v12 = vld [vmem:[%s4052_s1 + $0x2b4] ss:$8 sps:$4 sm:$0xff]  }
  0x79   :  { %2116 = vmatprep.subr.bf16.mxu0 %v2837_v14  ;;  %v2915_v13 = vld [vmem:[%s4052_s1 + $0x6b4] ss:$8 sps:$4 sm:$0xff]   ;;  %v2910_v14 = vld [vmem:[%s4052_s1 + $0x2b0] ss:$8 sps:$4 sm:$0xff]  }
  0x7b   :  { %1953 = vmatpush1.bf16.msra.mxu1 %v2832_v19  ;;  %v2921_v19 = vld [vmem:[%s4052_s1 + $0x6c4] ss:$8 sps:$4 sm:$0xff]  }
  0x7c   :  { %2117 = vmatpush1.bf16.msra.mxu0 %v2835_v20  ;;  %1954 = vmatprep.subr.bf16.mxu1 %v2840_v21  ;;  %v2916_v20 = vld [vmem:[%s4052_s1 + $0x2c0] ss:$8 sps:$4 sm:$0xff]  }
  0x7d   :  { %2118 = vmatprep.subr.bf16.mxu0 %v2843_v52  ;;  %v2919_v21 = vld [vmem:[%s4052_s1 + $0x6c0] ss:$8 sps:$4 sm:$0xff]   ;;  %v2924_v52 = vld [vmem:[%s4052_s1 + $0x2d4] ss:$8 sps:$4 sm:$0xff]  }
  0x7f   :  { %1955 = vmatpush1.bf16.msra.mxu1 %v2838_v23  ;;  %v2927_v23 = vld [vmem:[%s4052_s1 + $0x6d4] ss:$8 sps:$4 sm:$0xff]  }
  0x80   :  { %2119 = vmatpush1.bf16.msra.mxu0 %v2841_v24  ;;  %1965 = vmatprep.subr.bf16.mxu1 %v2846_v25  ;;  %v2922_v24 = vld [vmem:[%s4052_s1 + $0x2d0] ss:$8 sps:$4 sm:$0xff]  }
  0x81   :  { %2129 = vmatprep.subr.bf16.mxu0 %v2849_v26  ;;  %v2925_v25 = vld [vmem:[%s4052_s1 + $0x6d0] ss:$8 sps:$4 sm:$0xff]   ;;  %v2930_v26 = vld [vmem:[%s4052_s1 + $0x2e4] ss:$8 sps:$4 sm:$0xff]  }
  0x82   :  { %1957 = vmatmul.mubr.bf16.vlgmr.msra.gmra.mrb[0].mxu1 %v350_v29  ;;  %v2931_v29 = vld [vmem:[%s4052_s1 + $0x6e0] ss:$8 sps:$4 sm:$0xff]  }
  0x83   :  { %2121 = vmatmul.mubr.bf16.vlgmr.msra.gmra.mrb[0].mxu0 %v399_v30  ;;  %1966 = vmatpush1.bf16.msra.mxu1 %v2844_v31  ;;  %v2936_v30 = vld [vmem:[%s4052_s1 + $0x2f4] ss:$8 sps:$4 sm:$0xff]  }
  0x84   :  { %2130 = vmatpush1.bf16.msra.mxu0 %v2847_v32  ;;  %1967 = vmatprep.subr.bf16.mxu1 %v2852_v33  ;;  %v2939_v31 = vld [vmem:[%s4052_s1 + $0x6f4] ss:$8 sps:$4 sm:$0xff]   ;;  %v2934_v32 = vld [vmem:[%s4052_s1 + $0x2f0] ss:$8 sps:$4 sm:$0xff]  }
  0x85   :  { %2131 = vmatprep.subr.bf16.mxu0 %v2855_v16  ;;  %1997 = vmatprep.mubr.bf16.mxu1 %v3551_v17  ;;  %v2937_v33 = vld [vmem:[%s4052_s1 + $0x6f0] ss:$8 sps:$4 sm:$0xff]   ;;  %v2942_v16 = vld [vmem:[%s4052_s1 + $0x304] ss:$8 sps:$4 sm:$0xff]  }
  0x86   :  { %2161 = vmatprep.mubr.bf16.mxu0 %v3554_v34 }
  0x87   :  { %1968 = vmatpush1.bf16.msra.mxu1 %v2850_v35  ;;  %v2945_v35 = vld [vmem:[%s4052_s1 + $0x704] ss:$8 sps:$4 sm:$0xff]  }
  0x88   :  { %2132 = vmatpush1.bf16.msra.mxu0 %v2853_v36  ;;  %1969 = vmatprep.subr.bf16.mxu1 %v2858_v37  ;;  %v3740_v36 = vrot.slane %v3513_v56, %v3236_v49  ;;  %v3744_v37 = vrot.slane %v3516_v22, %v3236_v49  ;;  %v2948_v56 = vld [vmem:[%s4052_s1 + $0x314] ss:$8 sps:$4 sm:$0xff]  }
  0x89   :  { %2133 = vmatprep.subr.bf16.mxu0 %v2861_v38  ;;  %v2940_v38 = vld [vmem:[%s4052_s1 + $0x300] ss:$8 sps:$4 sm:$0xff]   ;;  %v2951_v22 = vld [vmem:[%s4052_s1 + $0x714] ss:$8 sps:$4 sm:$0xff]  }
  0x8b   :  { %1970 = vmatpush1.bf16.msra.mxu1 %v2856_v39  ;;  %v2943_v39 = vld [vmem:[%s4052_s1 + $0x700] ss:$8 sps:$4 sm:$0xff]  }
  0x8c   :  { %2134 = vmatpush1.bf16.msra.mxu0 %v2859_v40  ;;  %1971 = vmatprep.subr.bf16.mxu1 %v2864_v41  ;;  %v353_v40 = vcombine.high %v3551_v17, %v3551_v17  ;;  %v402_v41 = vcombine.high %v3554_v34, %v3554_v34  ;;  %v2954_v17 = vld [vmem:[%s4052_s1 + $0x324] ss:$8 sps:$4 sm:$0xff]  }
  0x8d   :  { %2135 = vmatprep.subr.bf16.mxu0 %v2867_v42  ;;  %v2946_v42 = vld [vmem:[%s4052_s1 + $0x310] ss:$8 sps:$4 sm:$0xff]   ;;  %v2957_v34 = vld [vmem:[%s4052_s1 + $0x724] ss:$8 sps:$4 sm:$0xff]  }
  0x8f   :  { %1972 = vmatpush1.bf16.msra.mxu1 %v2862_v43  ;;  %v2949_v43 = vld [vmem:[%s4052_s1 + $0x710] ss:$8 sps:$4 sm:$0xff]  }
  0x90   :  { %2136 = vmatpush1.bf16.msra.mxu0 %v2865_v44  ;;  %1973 = vmatprep.subr.bf16.mxu1 %v2870_v45  ;;  %v2952_v44 = vld [vmem:[%s4052_s1 + $0x320] ss:$8 sps:$4 sm:$0xff]  }
  0x91   :  { %2137 = vmatprep.subr.bf16.mxu0 %v2873_v46  ;;  %v2955_v45 = vld [vmem:[%s4052_s1 + $0x720] ss:$8 sps:$4 sm:$0xff]   ;;  %v2960_v46 = vld [vmem:[%s4052_s1 + $0x334] ss:$8 sps:$4 sm:$0xff]  }
  0x93   :  { %1974 = vmatpush1.bf16.msra.mxu1 %v2868_v47  ;;  %v2963_v47 = vld [vmem:[%s4052_s1 + $0x734] ss:$8 sps:$4 sm:$0xff]  }
  0x94   :  { %2138 = vmatpush1.bf16.msra.mxu0 %v2871_v48  ;;  %1975 = vmatprep.subr.bf16.mxu1 %v2876_v50  ;;  %v2958_v48 = vld [vmem:[%s4052_s1 + $0x330] ss:$8 sps:$4 sm:$0xff]  }
  0x95   :  { %2139 = vmatprep.subr.bf16.mxu0 %v2879_v51  ;;  %v2961_v50 = vld [vmem:[%s4052_s1 + $0x730] ss:$8 sps:$4 sm:$0xff]   ;;  %v2966_v51 = vld [vmem:[%s4052_s1 + $0x344] ss:$8 sps:$4 sm:$0xff]  }
  0x97   :  { %1976 = vmatpush1.bf16.msra.mxu1 %v2874_v53  ;;  %v2969_v53 = vld [vmem:[%s4052_s1 + $0x744] ss:$8 sps:$4 sm:$0xff]  }
  0x98   :  { %2140 = vmatpush1.bf16.msra.mxu0 %v2877_v54  ;;  %1977 = vmatprep.subr.bf16.mxu1 %v2882_v55  ;;  %v2964_v54 = vld [vmem:[%s4052_s1 + $0x340] ss:$8 sps:$4 sm:$0xff]  }
  0x99   :  { %2141 = vmatprep.subr.bf16.mxu0 %v2885_v57  ;;  %v2967_v55 = vld [vmem:[%s4052_s1 + $0x740] ss:$8 sps:$4 sm:$0xff]   ;;  %v2972_v57 = vld [vmem:[%s4052_s1 + $0x354] ss:$8 sps:$4 sm:$0xff]  }
  0x9b   :  { %1978 = vmatpush1.bf16.msra.mxu1 %v2880_v58  ;;  %v2975_v58 = vld [vmem:[%s4052_s1 + $0x754] ss:$8 sps:$4 sm:$0xff]  }
  0x9c   :  { %2142 = vmatpush1.bf16.msra.mxu0 %v2883_v59  ;;  %1979 = vmatprep.subr.bf16.mxu1 %v2888_v60  ;;  %v2970_v59 = vld [vmem:[%s4052_s1 + $0x350] ss:$8 sps:$4 sm:$0xff]  }
  0x9d   :  { %2143 = vmatprep.subr.bf16.mxu0 %v2891_v61  ;;  %v2973_v60 = vld [vmem:[%s4052_s1 + $0x750] ss:$8 sps:$4 sm:$0xff]   ;;  %v2978_v61 = vld [vmem:[%s4052_s1 + $0x364] ss:$8 sps:$4 sm:$0xff]  }
  0x9f   :  { %1980 = vmatpush1.bf16.msra.mxu1 %v2886_v62  ;;  %v2981_v62 = vld [vmem:[%s4052_s1 + $0x764] ss:$8 sps:$4 sm:$0xff]  }
  0xa0   :  { %2144 = vmatpush1.bf16.msra.mxu0 %v2889_v63  ;;  %1981 = vmatprep.subr.bf16.mxu1 %v2894_v0  ;;  %v2976_v63 = vld [vmem:[%s4052_s1 + $0x360] ss:$8 sps:$4 sm:$0xff]  }
  0xa1   :  { %2145 = vmatprep.subr.bf16.mxu0 %v2897_v1  ;;  %v2979_v0 = vld [vmem:[%s4052_s1 + $0x760] ss:$8 sps:$4 sm:$0xff]   ;;  %v2984_v1 = vld [vmem:[%s4052_s1 + $0x374] ss:$8 sps:$4 sm:$0xff]  }
  0xa3   :  { %1982 = vmatpush1.bf16.msra.mxu1 %v2892_v2  ;;  %v2987_v2 = vld [vmem:[%s4052_s1 + $0x774] ss:$8 sps:$4 sm:$0xff]  }
  0xa4   :  { %2146 = vmatpush1.bf16.msra.mxu0 %v2895_v3  ;;  %1983 = vmatprep.subr.bf16.mxu1 %v2900_v4  ;;  %v2982_v3 = vld [vmem:[%s4052_s1 + $0x370] ss:$8 sps:$4 sm:$0xff]  }
  0xa5   :  { %2147 = vmatprep.subr.bf16.mxu0 %v2903_v5  ;;  %v2985_v4 = vld [vmem:[%s4052_s1 + $0x770] ss:$8 sps:$4 sm:$0xff]   ;;  %v2990_v5 = vld [vmem:[%s4052_s1 + $0x384] ss:$8 sps:$4 sm:$0xff]  }
  0xa7   :  { %1984 = vmatpush1.bf16.msra.mxu1 %v2898_v6  ;;  %v2993_v6 = vld [vmem:[%s4052_s1 + $0x784] ss:$8 sps:$4 sm:$0xff]  }
  0xa8   :  { %2148 = vmatpush1.bf16.msra.mxu0 %v2901_v7  ;;  %1985 = vmatprep.subr.bf16.mxu1 %v2906_v8  ;;  %v2988_v7 = vld [vmem:[%s4052_s1 + $0x380] ss:$8 sps:$4 sm:$0xff]  }
  0xa9   :  { %2149 = vmatprep.subr.bf16.mxu0 %v2909_v9  ;;  %v2991_v8 = vld [vmem:[%s4052_s1 + $0x780] ss:$8 sps:$4 sm:$0xff]   ;;  %v2996_v9 = vld [vmem:[%s4052_s1 + $0x394] ss:$8 sps:$4 sm:$0xff]  }
  0xab   :  { %1986 = vmatpush1.bf16.msra.mxu1 %v2904_v10  ;;  %v2999_v10 = vld [vmem:[%s4052_s1 + $0x794] ss:$8 sps:$4 sm:$0xff]  }
  0xac   :  { %2150 = vmatpush1.bf16.msra.mxu0 %v2907_v11  ;;  %1987 = vmatprep.subr.bf16.mxu1 %v2912_v12  ;;  %v2994_v11 = vld [vmem:[%s4052_s1 + $0x390] ss:$8 sps:$4 sm:$0xff]  }
  0xad   :  { %2151 = vmatprep.subr.bf16.mxu0 %v2915_v13  ;;  %v2997_v12 = vld [vmem:[%s4052_s1 + $0x790] ss:$8 sps:$4 sm:$0xff]   ;;  %v3002_v13 = vld [vmem:[%s4052_s1 + $0x3a4] ss:$8 sps:$4 sm:$0xff]  }
  0xaf   :  { %1988 = vmatpush1.bf16.msra.mxu1 %v2910_v14  ;;  %v3005_v14 = vld [vmem:[%s4052_s1 + $0x7a4] ss:$8 sps:$4 sm:$0xff]  }
  0xb0   :  { %2152 = vmatpush1.bf16.msra.mxu0 %v2913_v15  ;;  %1989 = vmatprep.subr.bf16.mxu1 %v2918_v18  ;;  %v3000_v15 = vld [vmem:[%s4052_s1 + $0x3a0] ss:$8 sps:$4 sm:$0xff]  }
  0xb1   :  { %2153 = vmatprep.subr.bf16.mxu0 %v2921_v19  ;;  %v3003_v18 = vld [vmem:[%s4052_s1 + $0x7a0] ss:$8 sps:$4 sm:$0xff]   ;;  %v3008_v19 = vld [vmem:[%s4052_s1 + $0x3b4] ss:$8 sps:$4 sm:$0xff]  }
  0xb3   :  { %1990 = vmatpush1.bf16.msra.mxu1 %v2916_v20  ;;  %v3011_v20 = vld [vmem:[%s4052_s1 + $0x7b4] ss:$8 sps:$4 sm:$0xff]  }
  0xb4   :  { %2154 = vmatpush1.bf16.msra.mxu0 %v2919_v21  ;;  %1991 = vmatprep.subr.bf16.mxu1 %v2924_v52  ;;  %v3006_v21 = vld [vmem:[%s4052_s1 + $0x3b0] ss:$8 sps:$4 sm:$0xff]  }
  0xb5   :  { %2155 = vmatprep.subr.bf16.mxu0 %v2927_v23  ;;  %v3009_v52 = vld [vmem:[%s4052_s1 + $0x7b0] ss:$8 sps:$4 sm:$0xff]   ;;  %v3014_v23 = vld [vmem:[%s4052_s1 + $0x3c4] ss:$8 sps:$4 sm:$0xff]  }
  0xb7   :  { %1992 = vmatpush1.bf16.msra.mxu1 %v2922_v24  ;;  %v3017_v24 = vld [vmem:[%s4052_s1 + $0x7c4] ss:$8 sps:$4 sm:$0xff]  }
  0xb8   :  { %2156 = vmatpush1.bf16.msra.mxu0 %v2925_v25  ;;  %1993 = vmatprep.subr.bf16.mxu1 %v2930_v26  ;;  %v3012_v25 = vld [vmem:[%s4052_s1 + $0x3c0] ss:$8 sps:$4 sm:$0xff]  }
  0xb9   :  { %2157 = vmatprep.subr.bf16.mxu0 %v2933_v27  ;;  %v3015_v26 = vld [vmem:[%s4052_s1 + $0x7c0] ss:$8 sps:$4 sm:$0xff]   ;;  %v3020_v27 = vld [vmem:[%s4052_s1 + $0x3d4] ss:$8 sps:$4 sm:$0xff]  }
  0xbb   :  { %1994 = vmatpush1.bf16.msra.mxu1 %v2928_v28  ;;  %v3023_v28 = vld [vmem:[%s4052_s1 + $0x7d4] ss:$8 sps:$4 sm:$0xff]  }
  0xbc   :  { %2158 = vmatpush1.bf16.msra.mxu0 %v2931_v29  ;;  %1995 = vmatprep.subr.bf16.mxu1 %v2936_v30  ;;  %v3018_v29 = vld [vmem:[%s4052_s1 + $0x3d0] ss:$8 sps:$4 sm:$0xff]  }
  0xbd   :  { %2159 = vmatprep.subr.bf16.mxu0 %v2939_v31  ;;  %v3021_v30 = vld [vmem:[%s4052_s1 + $0x7d0] ss:$8 sps:$4 sm:$0xff]   ;;  %v3026_v31 = vld [vmem:[%s4052_s1 + $0x3e4] ss:$8 sps:$4 sm:$0xff]  }
  0xbf   :  { %1996 = vmatpush1.bf16.msra.mxu1 %v2934_v32  ;;  %v3029_v32 = vld [vmem:[%s4052_s1 + $0x7e4] ss:$8 sps:$4 sm:$0xff]  }
  0xc0   :  { %2160 = vmatpush1.bf16.msra.mxu0 %v2937_v33  ;;  %2006 = vmatprep.subr.bf16.mxu1 %v2942_v16  ;;  %v3024_v33 = vld [vmem:[%s4052_s1 + $0x3e0] ss:$8 sps:$4 sm:$0xff]  }
  0xc1   :  { %2170 = vmatprep.subr.bf16.mxu0 %v2945_v35  ;;  %v3027_v16 = vld [vmem:[%s4052_s1 + $0x7e0] ss:$8 sps:$4 sm:$0xff]   ;;  %v3032_v35 = vld [vmem:[%s4052_s1 + $0x3f4] ss:$8 sps:$4 sm:$0xff]  }
  0xc2   :  { %1998 = vmatmul.mubr.bf16.vlgmr.msra.gmra.mrb[0].mxu1 %v3740_v36 }
  0xc3   :  { %2162 = vmatmul.mubr.bf16.vlgmr.msra.gmra.mrb[0].mxu0 %v3744_v37  ;;  %2007 = vmatpush1.bf16.msra.mxu1 %v2940_v38  ;;  %v3035_v38 = vld [vmem:[%s4052_s1 + $0x7f4] ss:$8 sps:$4 sm:$0xff]  }
  0xc4   :  { %2171 = vmatpush1.bf16.msra.mxu0 %v2943_v39  ;;  %2008 = vmatprep.subr.bf16.mxu1 %v2948_v56  ;;  %v3935_v39 = vld.sshfl [vmem:[%s4053_s0 + $0x10] sm:$0x11 pattern:$0x75316420] }
  0xc5   :  { %2172 = vmatprep.subr.bf16.mxu0 %v2951_v22  ;;  %2038 = vmatprep.mubr.bf16.mxu1 %v353_v40  ;;  %v3030_v56 = vld [vmem:[%s4052_s1 + $0x3f0] ss:$8 sps:$4 sm:$0xff]   ;;  %v410_v40 = vcombine.high %v3935_v39, %v3935_v39 }
  0xc6   :  { %2202 = vmatprep.mubr.bf16.mxu0 %v402_v41  ;;  %v3033_v22 = vld [vmem:[%s4052_s1 + $0x7f0] ss:$8 sps:$4 sm:$0xff]   ;;  %v3038_v41 = vld [vmem:[%s4052_s1 + $0x804] ss:$8 sps:$4 sm:$0xff]  }
  0xc7   :  { %2009 = vmatpush1.bf16.msra.mxu1 %v2946_v42  ;;  %v351_v42 = vcombine.high %v3740_v36, %v3740_v36  ;;  %v3039_v36 = vld [vmem:[%s4052_s1 + $0x810] ss:$8 sps:$4 sm:$0xff]  }
  0xc8   :  { %2173 = vmatpush1.bf16.msra.mxu0 %v2949_v43  ;;  %2010 = vmatprep.subr.bf16.mxu1 %v2954_v17  ;;  %v400_v43 = vcombine.high %v3744_v37, %v3744_v37  ;;  %v3036_v17 = vld [vmem:[%s4052_s1 + $0x800] ss:$8 sps:$4 sm:$0xff]   ;;  %v3044_v37 = vld [vmem:[%s4052_s1 + $0x824] ss:$8 sps:$4 sm:$0xff]  }
  0xc9   :  { %2174 = vmatprep.subr.bf16.mxu0 %v2957_v34  ;;  %v424_v34 = vrot.slane %v410_v40, %v3236_v49 }
  0xcb   :  { %2011 = vmatpush1.bf16.msra.mxu1 %v2952_v44  ;;  %v3041_v44 = vld [vmem:[%s4052_s1 + $0x814] ss:$8 sps:$4 sm:$0xff]  }
  0xcc   :  { %2175 = vmatpush1.bf16.msra.mxu0 %v2955_v45  ;;  %2012 = vmatprep.subr.bf16.mxu1 %v2960_v46  ;;  %v3042_v45 = vld [vmem:[%s4052_s1 + $0x820] ss:$8 sps:$4 sm:$0xff]   ;;  %v3047_v46 = vld [vmem:[%s4052_s1 + $0x834] ss:$8 sps:$4 sm:$0xff]  }
  0xcd   :  { %2176 = vmatprep.subr.bf16.mxu0 %v2963_v47  ;;  %v3045_v47 = vld [vmem:[%s4052_s1 + $0x830] ss:$8 sps:$4 sm:$0xff]  }
  0xcf   :  { %2013 = vmatpush1.bf16.msra.mxu1 %v2958_v48  ;;  %v3050_v48 = vld [vmem:[%s4052_s1 + $0x844] ss:$8 sps:$4 sm:$0xff]  }
  0xd0   :  { %2177 = vmatpush1.bf16.msra.mxu0 %v2961_v50  ;;  %2014 = vmatprep.subr.bf16.mxu1 %v2966_v51  ;;  %v3048_v50 = vld [vmem:[%s4052_s1 + $0x840] ss:$8 sps:$4 sm:$0xff]   ;;  %v3053_v51 = vld [vmem:[%s4052_s1 + $0x854] ss:$8 sps:$4 sm:$0xff]  }
  0xd1   :  { %2178 = vmatprep.subr.bf16.mxu0 %v2969_v53  ;;  %v3051_v53 = vld [vmem:[%s4052_s1 + $0x850] ss:$8 sps:$4 sm:$0xff]  }
  0xd3   :  { %2015 = vmatpush1.bf16.msra.mxu1 %v2964_v54  ;;  %v3056_v54 = vld [vmem:[%s4052_s1 + $0x864] ss:$8 sps:$4 sm:$0xff]  }
  0xd4   :  { %2179 = vmatpush1.bf16.msra.mxu0 %v2967_v55  ;;  %2016 = vmatprep.subr.bf16.mxu1 %v2972_v57  ;;  %v3054_v55 = vld [vmem:[%s4052_s1 + $0x860] ss:$8 sps:$4 sm:$0xff]   ;;  %v3059_v57 = vld [vmem:[%s4052_s1 + $0x874] ss:$8 sps:$4 sm:$0xff]  }
  0xd5   :  { %2180 = vmatprep.subr.bf16.mxu0 %v2975_v58  ;;  %v3057_v58 = vld [vmem:[%s4052_s1 + $0x870] ss:$8 sps:$4 sm:$0xff]  }
  0xd7   :  { %2017 = vmatpush1.bf16.msra.mxu1 %v2970_v59  ;;  %v3062_v59 = vld [vmem:[%s4052_s1 + $0x884] ss:$8 sps:$4 sm:$0xff]  }
  0xd8   :  { %2181 = vmatpush1.bf16.msra.mxu0 %v2973_v60  ;;  %2018 = vmatprep.subr.bf16.mxu1 %v2978_v61  ;;  %v3060_v60 = vld [vmem:[%s4052_s1 + $0x880] ss:$8 sps:$4 sm:$0xff]   ;;  %v3065_v61 = vld [vmem:[%s4052_s1 + $0x894] ss:$8 sps:$4 sm:$0xff]  }
  0xd9   :  { %2182 = vmatprep.subr.bf16.mxu0 %v2981_v62  ;;  %v3063_v62 = vld [vmem:[%s4052_s1 + $0x890] ss:$8 sps:$4 sm:$0xff]  }
  0xdb   :  { %2019 = vmatpush1.bf16.msra.mxu1 %v2976_v63  ;;  %v3068_v63 = vld [vmem:[%s4052_s1 + $0x8a4] ss:$8 sps:$4 sm:$0xff]  }
  0xdc   :  { %2183 = vmatpush1.bf16.msra.mxu0 %v2979_v0  ;;  %2020 = vmatprep.subr.bf16.mxu1 %v2984_v1  ;;  %v3066_v0 = vld [vmem:[%s4052_s1 + $0x8a0] ss:$8 sps:$4 sm:$0xff]   ;;  %v3071_v1 = vld [vmem:[%s4052_s1 + $0x8b4] ss:$8 sps:$4 sm:$0xff]  }
  0xdd   :  { %2184 = vmatprep.subr.bf16.mxu0 %v2987_v2  ;;  %v3069_v2 = vld [vmem:[%s4052_s1 + $0x8b0] ss:$8 sps:$4 sm:$0xff]  }
  0xdf   :  { %2021 = vmatpush1.bf16.msra.mxu1 %v2982_v3  ;;  %v3074_v3 = vld [vmem:[%s4052_s1 + $0x8c4] ss:$8 sps:$4 sm:$0xff]  }
  0xe0   :  { %2185 = vmatpush1.bf16.msra.mxu0 %v2985_v4  ;;  %2022 = vmatprep.subr.bf16.mxu1 %v2990_v5  ;;  %v3072_v4 = vld [vmem:[%s4052_s1 + $0x8c0] ss:$8 sps:$4 sm:$0xff]   ;;  %v3077_v5 = vld [vmem:[%s4052_s1 + $0x8d4] ss:$8 sps:$4 sm:$0xff]  }
  0xe1   :  { %2186 = vmatprep.subr.bf16.mxu0 %v2993_v6  ;;  %v3075_v6 = vld [vmem:[%s4052_s1 + $0x8d0] ss:$8 sps:$4 sm:$0xff]  }
  0xe3   :  { %2023 = vmatpush1.bf16.msra.mxu1 %v2988_v7  ;;  %v3080_v7 = vld [vmem:[%s4052_s1 + $0x8e4] ss:$8 sps:$4 sm:$0xff]  }
  0xe4   :  { %2187 = vmatpush1.bf16.msra.mxu0 %v2991_v8  ;;  %2024 = vmatprep.subr.bf16.mxu1 %v2996_v9  ;;  %v3078_v8 = vld [vmem:[%s4052_s1 + $0x8e0] ss:$8 sps:$4 sm:$0xff]   ;;  %v3083_v9 = vld [vmem:[%s4052_s1 + $0x8f4] ss:$8 sps:$4 sm:$0xff]  }
  0xe5   :  { %2188 = vmatprep.subr.bf16.mxu0 %v2999_v10  ;;  %v3081_v10 = vld [vmem:[%s4052_s1 + $0x8f0] ss:$8 sps:$4 sm:$0xff]  }
  0xe7   :  { %2025 = vmatpush1.bf16.msra.mxu1 %v2994_v11  ;;  %v417_v11 = vrot.slane %v3935_v39, %v3236_v49 }
  0xe8   :  { %2189 = vmatpush1.bf16.msra.mxu0 %v2997_v12  ;;  %2026 = vmatprep.subr.bf16.mxu1 %v3002_v13 }
  0xe9   :  { %2190 = vmatprep.subr.bf16.mxu0 %v3005_v14 }
  0xeb   :  { %2027 = vmatpush1.bf16.msra.mxu1 %v3000_v15 }
  0xec   :  { %2191 = vmatpush1.bf16.msra.mxu0 %v3003_v18  ;;  %2028 = vmatprep.subr.bf16.mxu1 %v3008_v19 }
  0xed   :  { %2192 = vmatprep.subr.bf16.mxu0 %v3011_v20 }
  0xef   :  { %2029 = vmatpush1.bf16.msra.mxu1 %v3006_v21 }
  0xf0   :  { %2193 = vmatpush1.bf16.msra.mxu0 %v3009_v52  ;;  %2030 = vmatprep.subr.bf16.mxu1 %v3014_v23 }
  0xf1   :  { %2194 = vmatprep.subr.bf16.mxu0 %v3017_v24 }
  0xf3   :  { %2031 = vmatpush1.bf16.msra.mxu1 %v3012_v25 }
  0xf4   :  { %2195 = vmatpush1.bf16.msra.mxu0 %v3015_v26  ;;  %2032 = vmatprep.subr.bf16.mxu1 %v3020_v27 }
  0xf5   :  { %2196 = vmatprep.subr.bf16.mxu0 %v3023_v28 }
  0xf7   :  { %2033 = vmatpush1.bf16.msra.mxu1 %v3018_v29 }
  0xf8   :  { %2197 = vmatpush1.bf16.msra.mxu0 %v3021_v30  ;;  %2034 = vmatprep.subr.bf16.mxu1 %v3026_v31 }
  0xf9   :  { %2198 = vmatprep.subr.bf16.mxu0 %v3029_v32 }
  0xfb   :  { %2035 = vmatpush1.bf16.msra.mxu1 %v3024_v33 }
  0xfc   :  { %2199 = vmatpush1.bf16.msra.mxu0 %v3027_v16  ;;  %2036 = vmatprep.subr.bf16.mxu1 %v3032_v35 }
  0xfd   :  { %2200 = vmatprep.subr.bf16.mxu0 %v3035_v38 }
  0xff   :  { %2037 = vmatpush1.bf16.msra.mxu1 %v3030_v56 }
 0x100   :  { %2201 = vmatpush1.bf16.msra.mxu0 %v3033_v22 }
 0x101   :  { %2211 = vmatprep.subr.bf16.mxu0 %v3038_v41 }
 0x102   :  { %2039 = vmatmul.mubr.bf16.vlgmr.msra.gmra.mrb[0].mxu1 %v351_v42 }
 0x103   :  { %2203 = vmatmul.mubr.bf16.vlgmr.msra.gmra.mrb[0].mxu0 %v400_v43 }
 0x104   :  { %2212 = vmatpush1.bf16.msra.mxu0 %v3036_v17  ;;  %2243 = vmatprep.mubr.bf16.mxu0 %v424_v34 }
 0x105   :  { %2213 = vmatprep.subr.bf16.mxu0 %v3041_v44 }
 0x108   :  { %2214 = vmatpush1.bf16.msra.mxu0 %v3039_v36 }
 0x109   :  { %2215 = vmatprep.subr.bf16.mxu0 %v3044_v37 }
 0x10c   :  { %2216 = vmatpush1.bf16.msra.mxu0 %v3042_v45 }
 0x10d   :  { %2217 = vmatprep.subr.bf16.mxu0 %v3047_v46 }
 0x110   :  { %2218 = vmatpush1.bf16.msra.mxu0 %v3045_v47 }
 0x111   :  { %2219 = vmatprep.subr.bf16.mxu0 %v3050_v48 }
 0x114   :  { %2220 = vmatpush1.bf16.msra.mxu0 %v3048_v50 }
 0x115   :  { %2221 = vmatprep.subr.bf16.mxu0 %v3053_v51 }
 0x118   :  { %2222 = vmatpush1.bf16.msra.mxu0 %v3051_v53 }
 0x119   :  { %2223 = vmatprep.subr.bf16.mxu0 %v3056_v54 }
 0x11c   :  { %2224 = vmatpush1.bf16.msra.mxu0 %v3054_v55 }
 0x11d   :  { %2225 = vmatprep.subr.bf16.mxu0 %v3059_v57 }
 0x120   :  { %2226 = vmatpush1.bf16.msra.mxu0 %v3057_v58 }
 0x121   :  { %2227 = vmatprep.subr.bf16.mxu0 %v3062_v59 }
 0x124   :  { %2228 = vmatpush1.bf16.msra.mxu0 %v3060_v60 }
 0x125   :  { %2229 = vmatprep.subr.bf16.mxu0 %v3065_v61 }
 0x128   :  { %2230 = vmatpush1.bf16.msra.mxu0 %v3063_v62 }
 0x129   :  { %2231 = vmatprep.subr.bf16.mxu0 %v3068_v63 }
 0x12c   :  { %2232 = vmatpush1.bf16.msra.mxu0 %v3066_v0 }
 0x12d   :  { %2233 = vmatprep.subr.bf16.mxu0 %v3071_v1 }
 0x130   :  { %2234 = vmatpush1.bf16.msra.mxu0 %v3069_v2 }
 0x131   :  { %2235 = vmatprep.subr.bf16.mxu0 %v3074_v3 }
 0x134   :  { %2236 = vmatpush1.bf16.msra.mxu0 %v3072_v4 }
 0x135   :  { %2237 = vmatprep.subr.bf16.mxu0 %v3077_v5 }
 0x138   :  { %2238 = vmatpush1.bf16.msra.mxu0 %v3075_v6 }
 0x139   :  { %2239 = vmatprep.subr.bf16.mxu0 %v3080_v7 }
 0x13c   :  { %2240 = vmatpush1.bf16.msra.mxu0 %v3078_v8 }
 0x13d   :  { %2241 = vmatprep.subr.bf16.mxu0 %v3083_v9 }
 0x140   :  { %2242 = vmatpush1.bf16.msra.mxu0 %v3081_v10 }
 0x143   :  { %2244 = vmatmul.mubr.bf16.vlgmr.msra.gmra.mrb[0].mxu0 %v417_v11 }
 0x1d5   :  { %v2040_v12 = vpop.f32.mrb[0].mxu1 }
 0x1d6   :  { %v2042_v13 = vpop.f32.mrb[1].mxu1 }
 0x1d7   :  { %v2044_v14 = vpop.f32.mrb[2].mxu1 }
 0x1d8   :  { %v2045_v15 = vpop.f32.mrb[3].mxu1 }
 0x216   :  { %v2245_v18 = vpop.f32.mrb[0].mxu0 }
 0x217   :  { %v2619_v19 = vadd.f32 %v2245_v18, %v2040_v12  ;;  %v2247_v20 = vpop.f32.mrb[1].mxu0 }
 0x218   :  { %v2620_v21 = vadd.f32 %v2247_v20, %v2042_v13  ;;  %v2249_v52 = vpop.f32.mrb[2].mxu0 }
 0x219   :  { %v2253_v23 = vsel %vm2252_vm0, %v2619_v19, 0.0  ;;  %v2269_v24 = vmul.f32 %v2619_v19, %v2619_v19  ;;  %v2250_v25 = vpop.f32.mrb[3].mxu0 }
 0x21a   :  { %v2254_v26 = vrot.slane %v2253_v23, 4  ;;  %v2260_v27 = vsel %vm2252_vm0, %v2620_v21, 0.0  ;;  %v2270_v28 = vmul.f32 %v2620_v21, %v2620_v21 }
 0x21b   :  { %v2271_v29 = vsel %vm2252_vm0, %v2269_v24, 0.0  ;;  %v2261_v30 = vrot.slane %v2260_v27, 4 }
 0x21c   :  { %v2255_v31 = vadd.f32 %v2254_v26, %v2253_v23  ;;  %v2272_v32 = vrot.slane %v2271_v29, 4  ;;  %v2278_v33 = vsel %vm2252_vm0, %v2270_v28, 0.0 }
 0x21d   :  { %v2262_v16 = vadd.f32 %v2261_v30, %v2260_v27  ;;  %v2279_v35 = vrot.slane %v2278_v33, 4 }
 0x21e   :  { %v2256_v38 = vrot.slane %v2255_v31, 2  ;;  %v2273_v39 = vadd.f32 %v2272_v32, %v2271_v29 }
 0x21f   :  { %v2263_v56 = vrot.slane %v2262_v16, 2  ;;  %v2280_v22 = vadd.f32 %v2279_v35, %v2278_v33 }
 0x220   :  { %v2257_v40 = vadd.f32 %v2256_v38, %v2255_v31  ;;  %v2274_v41 = vrot.slane %v2273_v39, 2 }
 0x221   :  { %v2264_v42 = vadd.f32 %v2263_v56, %v2262_v16  ;;  %v2281_v43 = vrot.slane %v2280_v22, 2 }
 0x222   :  { %v2258_v17 = vrot.slane %v2257_v40, 1  ;;  %v2275_v34 = vadd.f32 %v2274_v41, %v2273_v39 }
 0x223   :  { %v2265_v44 = vrot.slane %v2264_v42, 1  ;;  %v2282_v36 = vadd.f32 %v2281_v43, %v2280_v22 }
 0x224   :  { %v2259_v37 = vadd.f32 %v2258_v17, %v2257_v40  ;;  %v2276_v45 = vrot.slane %v2275_v34, 1 }
 0x225   :  { %v2266_v46 = vadd.f32 %v2265_v44, %v2264_v42  ;;  %v2283_v47 = vrot.slane %v2282_v36, 1 }
 0x226   :  { %v2267_v48 = vmul.f32 0.5, %v2259_v37  ;;  %v2277_v50 = vadd.f32 %v2276_v45, %v2275_v34 }
 0x227   :  { %v2268_v51 = vmul.f32 0.5, %v2266_v46  ;;  %v2284_v53 = vadd.f32 %v2283_v47, %v2282_v36 }
 0x228   :  { %v2285_v54 = vmul.f32 0.5, %v2277_v50  ;;  %v2287_v55 = vmul.f32 %v2267_v48, %v2267_v48  ;;  %v2293_v1 = vsub.f32 %v2619_v19, %v2267_v48 }
 0x229   :  { %v2286_v57 = vmul.f32 0.5, %v2284_v53  ;;  %v2288_v58 = vmul.f32 %v2268_v51, %v2268_v51  ;;  %v2294_v3 = vsub.f32 %v2620_v21, %v2268_v51 }
 0x22a   :  { %v2289_v59 = vsub.f32 %v2285_v54, %v2287_v55 }
 0x22b   :  { %v2290_v60 = vsub.f32 %v2286_v57, %v2288_v58 }
 0x22c   :  { %v2291_v61 = vmax.f32 %v2289_v59, 0.0 }
 0x22d   :  { %v2292_v62 = vmax.f32 %v2290_v60, 0.0 }
 0x22e   :  { %v2295_v63 = vadd.f32 1e-05, %v2291_v61 }
 0x22f   :  { %v2296_v0 = vadd.f32 1e-05, %v2292_v62 }
 0x230   :  { %3084 = vrsqrt.f32 %v2295_v63 }
 0x231   :  { %3086 = vrsqrt.f32 %v2296_v0 }
 0x23a   :  { %v3085_v2 = vpop.eup %3084 }
 0x23b   :  { %v3087_v4 = vpop.eup %3086  ;;  %v2299_v5 = vmul.f32 %v3085_v2, %v2293_v1 }
 0x23c   :  { %v2300_v6 = vmul.f32 %v3087_v4, %v2294_v3 }
 0x23d   :  { %v2301_v7 = vmax.f32 %v2299_v5, 0.0 }
 0x23e   :  { %v2302_v8 = vmax.f32 %v2300_v6, 0.0 }
 0x240   :  { %v2617_v9 = vpack.c.bf16 %v2302_v8, %v2301_v7 }
 0x242   :  { %v2314_v10 = vrot.slane %v2617_v9, %v3236_v49 }
 0x244   :  { %2618 = vst.sshfl [vmem:[%s4054_s2] sm:$0x5 pattern:$0x73625140] %v2314_v10 }

// kernel: _lambda_.25
= control target key start
LH: loop header
LB: loop body
LE: loop exit
PB: predicated region body
PF: predicated region fallthrough
CT: control target
= control target key end

     0   :  { %vm3244_vm0 = vmmov 0   ;;  %s3953_s1 = inlined_call_operand.vmem [shape: bf16[3456,128], index: 1, kind: input, shape index: {}]   ;;  %s3954_s0 = inlined_call_operand.vmem [shape: bf16[8,3456], index: 0, kind: input, shape index: {}]   ;;  %s3955_s2 = inlined_call_operand.vmem [shape: bf16[8,128], index: 2, kind: output, shape index: {}]  }
   0x1   :  { %v2998_v0 = vld [vmem:[%s3953_s1 + $0x40] sm:$0xff]   ;;  %v3002_v4 = vld [vmem:[%s3953_s1 + $0x48] sm:$0xff]   ;;  %v3006_v8 = vld [vmem:[%s3953_s1 + $0x50] sm:$0xff]  }
   0x2   :  { %v2999_v1 = vld [vmem:[%s3953_s1 + $0xc0] sm:$0xff]   ;;  %2681 = vmatprep.subr.bf16.mxu0 %v2998_v0  ;;  %v3003_v5 = vld [vmem:[%s3953_s1 + $0xc8] sm:$0xff]   ;;  %v3007_v9 = vld [vmem:[%s3953_s1 + $0xd0] sm:$0xff]  }
   0x3   :  { %v3000_v2 = vld [vmem:[%s3953_s1] sm:$0xff]   ;;  %2703 = vmatprep.subr.bf16.mxu1 %v2999_v1  ;;  %v3004_v6 = vld [vmem:[%s3953_s1 + $0x8] sm:$0xff]   ;;  %v3008_v10 = vld [vmem:[%s3953_s1 + $0x10] sm:$0xff]  }
   0x4   :  { %v3001_v3 = vld [vmem:[%s3953_s1 + $0x80] sm:$0xff]   ;;  %2682 = vmatpush3.bf16.msra.mxu0 %v3000_v2  ;;  %v3005_v7 = vld [vmem:[%s3953_s1 + $0x88] sm:$0xff]   ;;  %v3009_v11 = vld [vmem:[%s3953_s1 + $0x90] sm:$0xff]  }
   0x5   :  { %2704 = vmatpush3.bf16.msra.mxu1 %v3001_v3  ;;  %2683 = vmatprep.subr.bf16.mxu0 %v3002_v4  ;;  %v3010_v12 = vld [vmem:[%s3953_s1 + $0x58] sm:$0xff]   ;;  %v3014_v16 = vld [vmem:[%s3953_s1 + $0x60] sm:$0xff]   ;;  %v3018_v20 = vld [vmem:[%s3953_s1 + $0x68] sm:$0xff]  }
   0x6   :  { %2705 = vmatprep.subr.bf16.mxu1 %v3003_v5  ;;  %v3011_v13 = vld [vmem:[%s3953_s1 + $0xd8] sm:$0xff]   ;;  %v3015_v17 = vld [vmem:[%s3953_s1 + $0xe0] sm:$0xff]   ;;  %v3019_v21 = vld [vmem:[%s3953_s1 + $0xe8] sm:$0xff]  }
   0x7   :  { %v3012_v14 = vld [vmem:[%s3953_s1 + $0x18] sm:$0xff]   ;;  %v3016_v18 = vld [vmem:[%s3953_s1 + $0x20] sm:$0xff]   ;;  %v3020_v22 = vld [vmem:[%s3953_s1 + $0x28] sm:$0xff]  }
   0x8   :  { %2684 = vmatpush3.bf16.msra.mxu0 %v3004_v6  ;;  %v3013_v15 = vld [vmem:[%s3953_s1 + $0x98] sm:$0xff]   ;;  %v3017_v19 = vld [vmem:[%s3953_s1 + $0xa0] sm:$0xff]   ;;  %v3021_v23 = vld [vmem:[%s3953_s1 + $0xa8] sm:$0xff]  }
   0x9   :  { %2706 = vmatpush3.bf16.msra.mxu1 %v3005_v7  ;;  %2685 = vmatprep.subr.bf16.mxu0 %v3006_v8  ;;  %v3022_v24 = vld [vmem:[%s3953_s1 + $0x70] sm:$0xff]   ;;  %v3026_v28 = vld [vmem:[%s3953_s1 + $0x78] sm:$0xff]   ;;  %v12_v32 = vld [vmem:[%s3954_s0] sm:$0xff] }
   0xa   :  { %2707 = vmatprep.subr.bf16.mxu1 %v3007_v9  ;;  %v3023_v25 = vld [vmem:[%s3953_s1 + $0xf0] sm:$0xff]   ;;  %v3027_v29 = vld [vmem:[%s3953_s1 + $0xf8] sm:$0xff]   ;;  %v13_v33 = vld [vmem:[%s3954_s0 + $0x8] sm:$0xff]  ;;  %v2438_v34 = vcombine.low %v12_v32, %v12_v32  ;;  %v2439_v35 = vcombine.high %v12_v32, %v12_v32 }
   0xb   :  { %v3024_v26 = vld [vmem:[%s3953_s1 + $0x30] sm:$0xff]   ;;  %v3028_v30 = vld [vmem:[%s3953_s1 + $0x38] sm:$0xff]   ;;  %v2440_v36 = vcombine.low %v13_v33, %v13_v33  ;;  %v2441_v37 = vcombine.high %v13_v33, %v13_v33  ;;  %v3034_v38 = vld [vmem:[%s3953_s1 + $0x140] sm:$0xff]  }
   0xc   :  { %2686 = vmatpush3.bf16.msra.mxu0 %v3008_v10  ;;  %v3025_v27 = vld [vmem:[%s3953_s1 + $0xb0] sm:$0xff]   ;;  %v3029_v31 = vld [vmem:[%s3953_s1 + $0xb8] sm:$0xff]   ;;  %v3035_v39 = vld [vmem:[%s3953_s1 + $0x100] sm:$0xff]   ;;  %1881 = vmatprep.mubr.bf16.mxu0 %v2439_v35 }
   0xd   :  { %2708 = vmatpush3.bf16.msra.mxu1 %v3009_v11  ;;  %2687 = vmatprep.subr.bf16.mxu0 %v3010_v12  ;;  %v3036_v40 = vld [vmem:[%s3953_s1 + $0x1c0] sm:$0xff]   ;;  %v3038_v42 = vld [vmem:[%s3953_s1 + $0x148] sm:$0xff]   ;;  %v3042_v46 = vld [vmem:[%s3953_s1 + $0x150] sm:$0xff]  }
   0xe   :  { %2709 = vmatprep.subr.bf16.mxu1 %v3011_v13  ;;  %1921 = vmatprep.mubr.bf16.mxu1 %v2441_v37  ;;  %v3037_v41 = vld [vmem:[%s3953_s1 + $0x180] sm:$0xff]   ;;  %v3039_v43 = vld [vmem:[%s3953_s1 + $0x108] sm:$0xff]   ;;  %v3043_v47 = vld [vmem:[%s3953_s1 + $0x110] sm:$0xff]  }
   0xf   :  { %v3040_v44 = vld [vmem:[%s3953_s1 + $0x1c8] sm:$0xff]   ;;  %v3044_v48 = vld [vmem:[%s3953_s1 + $0x1d0] sm:$0xff]   ;;  %v3046_v50 = vld [vmem:[%s3953_s1 + $0x158] sm:$0xff]  }
  0x10   :  { %2688 = vmatpush3.bf16.msra.mxu0 %v3012_v14  ;;  %v3041_v45 = vld [vmem:[%s3953_s1 + $0x188] sm:$0xff]   ;;  %v3045_v49 = vld [vmem:[%s3953_s1 + $0x190] sm:$0xff]   ;;  %v3047_v51 = vld [vmem:[%s3953_s1 + $0x118] sm:$0xff]  }
  0x11   :  { %2710 = vmatpush3.bf16.msra.mxu1 %v3013_v15  ;;  %2689 = vmatprep.subr.bf16.mxu0 %v3014_v16  ;;  %v3048_v52 = vld [vmem:[%s3953_s1 + $0x1d8] sm:$0xff]   ;;  %v3050_v54 = vld [vmem:[%s3953_s1 + $0x160] sm:$0xff]   ;;  %v3054_v58 = vld [vmem:[%s3953_s1 + $0x168] sm:$0xff]  }
  0x12   :  { %2711 = vmatprep.subr.bf16.mxu1 %v3015_v17  ;;  %v3049_v53 = vld [vmem:[%s3953_s1 + $0x198] sm:$0xff]   ;;  %v3051_v55 = vld [vmem:[%s3953_s1 + $0x120] sm:$0xff]   ;;  %v3055_v59 = vld [vmem:[%s3953_s1 + $0x128] sm:$0xff]  }
  0x13   :  { %v3052_v56 = vld [vmem:[%s3953_s1 + $0x1e0] sm:$0xff]   ;;  %v3056_v60 = vld [vmem:[%s3953_s1 + $0x1e8] sm:$0xff]   ;;  %v3058_v62 = vld [vmem:[%s3953_s1 + $0x170] sm:$0xff]  }
  0x14   :  { %2690 = vmatpush3.bf16.msra.mxu0 %v3016_v18  ;;  %v3053_v57 = vld [vmem:[%s3953_s1 + $0x1a0] sm:$0xff]   ;;  %v3057_v61 = vld [vmem:[%s3953_s1 + $0x1a8] sm:$0xff]   ;;  %v3059_v63 = vld [vmem:[%s3953_s1 + $0x130] sm:$0xff]  }
  0x15   :  { %2712 = vmatpush3.bf16.msra.mxu1 %v3017_v19  ;;  %2691 = vmatprep.subr.bf16.mxu0 %v3018_v20  ;;  %v3060_v0 = vld [vmem:[%s3953_s1 + $0x1f0] sm:$0xff]   ;;  %v3062_v2 = vld [vmem:[%s3953_s1 + $0x178] sm:$0xff]   ;;  %v3068_v9 = vld [vmem:[%s3953_s1 + $0x240] sm:$0xff]  }
  0x16   :  { %2713 = vmatprep.subr.bf16.mxu1 %v3019_v21  ;;  %v3061_v1 = vld [vmem:[%s3953_s1 + $0x1b0] sm:$0xff]   ;;  %v3063_v3 = vld [vmem:[%s3953_s1 + $0x138] sm:$0xff]   ;;  %v3071_v13 = vld [vmem:[%s3953_s1 + $0x200] sm:$0xff]  }
  0x17   :  { %v3064_v4 = vld [vmem:[%s3953_s1 + $0x1f8] sm:$0xff]   ;;  %v14_v5 = vld [vmem:[%s3954_s0 + $0x10] sm:$0xff]  ;;  %v3072_v14 = vld [vmem:[%s3953_s1 + $0x2c0] sm:$0xff]  }
  0x18   :  { %2692 = vmatpush3.bf16.msra.mxu0 %v3020_v22  ;;  %v2443_v6 = vcombine.high %v14_v5, %v14_v5  ;;  %v3067_v7 = vld [vmem:[%s3953_s1 + $0x1b8] sm:$0xff]   ;;  %v2442_v8 = vcombine.low %v14_v5, %v14_v5  ;;  %v3073_v15 = vld [vmem:[%s3953_s1 + $0x280] sm:$0xff]   ;;  %v3074_v16 = vld [vmem:[%s3953_s1 + $0x248] sm:$0xff]  }
  0x19   :  { %2714 = vmatpush3.bf16.msra.mxu1 %v3021_v23  ;;  %2693 = vmatprep.subr.bf16.mxu0 %v3022_v24  ;;  %v15_v10 = vld [vmem:[%s3954_s0 + $0x18] sm:$0xff]  ;;  %v3075_v17 = vld [vmem:[%s3953_s1 + $0x208] sm:$0xff]   ;;  %v3078_v20 = vld [vmem:[%s3953_s1 + $0x250] sm:$0xff]  }
  0x1a   :  { %2715 = vmatprep.subr.bf16.mxu1 %v3023_v25  ;;  %v2444_v11 = vcombine.low %v15_v10, %v15_v10  ;;  %v2445_v12 = vcombine.high %v15_v10, %v15_v10  ;;  %v3076_v18 = vld [vmem:[%s3953_s1 + $0x2c8] sm:$0xff]   ;;  %v3079_v21 = vld [vmem:[%s3953_s1 + $0x210] sm:$0xff]   ;;  %v3082_v24 = vld [vmem:[%s3953_s1 + $0x258] sm:$0xff]  }
  0x1b   :  { %v3077_v19 = vld [vmem:[%s3953_s1 + $0x288] sm:$0xff]   ;;  %v3080_v22 = vld [vmem:[%s3953_s1 + $0x2d0] sm:$0xff]   ;;  %v3083_v25 = vld [vmem:[%s3953_s1 + $0x218] sm:$0xff]  }
  0x1c   :  { %2694 = vmatpush3.bf16.msra.mxu0 %v3024_v26  ;;  %v3081_v23 = vld [vmem:[%s3953_s1 + $0x290] sm:$0xff]   ;;  %v3084_v26 = vld [vmem:[%s3953_s1 + $0x2d8] sm:$0xff]   ;;  %v3090_v32 = vld [vmem:[%s3953_s1 + $0x268] sm:$0xff]  }
  0x1d   :  { %2716 = vmatpush3.bf16.msra.mxu1 %v3025_v27  ;;  %2695 = vmatprep.subr.bf16.mxu0 %v3026_v28  ;;  %v3085_v27 = vld [vmem:[%s3953_s1 + $0x298] sm:$0xff]   ;;  %v3086_v28 = vld [vmem:[%s3953_s1 + $0x260] sm:$0xff]   ;;  %v3091_v33 = vld [vmem:[%s3953_s1 + $0x228] sm:$0xff]  }
  0x1e   :  { %2717 = vmatprep.subr.bf16.mxu1 %v3027_v29  ;;  %v3087_v29 = vld [vmem:[%s3953_s1 + $0x220] sm:$0xff]   ;;  %v3093_v35 = vld [vmem:[%s3953_s1 + $0x2a8] sm:$0xff]   ;;  %v3095_v37 = vld [vmem:[%s3953_s1 + $0x230] sm:$0xff]  }
  0x1f   :  { %v3125_v5 = vld [vmem:[%s3953_s1 + $0x3a0] sm:$0xff]   ;;  %v3130_v10 = vld [vmem:[%s3953_s1 + $0x370] sm:$0xff]  }
  0x20   :  { %2696 = vmatpush3.bf16.msra.mxu0 %v3028_v30  ;;  %v3088_v30 = vld [vmem:[%s3953_s1 + $0x2e0] sm:$0xff]  }
  0x21   :  { %2718 = vmatpush3.bf16.msra.mxu1 %v3029_v31  ;;  %2725 = vmatprep.subr.bf16.mxu0 %v3034_v38  ;;  %v3089_v31 = vld [vmem:[%s3953_s1 + $0x2a0] sm:$0xff]   ;;  %v3096_v38 = vld [vmem:[%s3953_s1 + $0x2f0] sm:$0xff]  }
  0x22   :  { %2747 = vmatprep.subr.bf16.mxu1 %v3036_v40  ;;  %v3098_v40 = vld [vmem:[%s3953_s1 + $0x278] sm:$0xff]  }
  0x23   :  { %1882 = vmatmul.mubr.bf16.vlgmr.msra.gmra.mrb[0].mxu0 %v2438_v34  ;;  %v3092_v34 = vld [vmem:[%s3953_s1 + $0x2e8] sm:$0xff]  }
  0x24   :  { %1922 = vmatmul.mubr.bf16.vlgmr.msra.gmra.mrb[0].mxu1 %v2440_v36  ;;  %2726 = vmatpush3.bf16.msra.mxu0 %v3035_v39  ;;  %v3094_v36 = vld [vmem:[%s3953_s1 + $0x270] sm:$0xff]  }
  0x25   :  { %2748 = vmatpush3.bf16.msra.mxu1 %v3037_v41  ;;  %2727 = vmatprep.subr.bf16.mxu0 %v3038_v42  ;;  %v3097_v39 = vld [vmem:[%s3953_s1 + $0x2b0] sm:$0xff]   ;;  %v3099_v41 = vld [vmem:[%s3953_s1 + $0x238] sm:$0xff]  }
  0x26   :  { %2749 = vmatprep.subr.bf16.mxu1 %v3040_v44  ;;  %1961 = vmatprep.mubr.bf16.mxu0 %v2443_v6  ;;  %v3100_v42 = vld [vmem:[%s3953_s1 + $0x2f8] sm:$0xff]   ;;  %v3126_v6 = vld [vmem:[%s3953_s1 + $0x368] sm:$0xff]  }
  0x27   :  { %2001 = vmatprep.mubr.bf16.mxu1 %v2445_v12  ;;  %v3132_v12 = vld [vmem:[%s3953_s1 + $0x3f0] sm:$0xff]  }
  0x28   :  { %2728 = vmatpush3.bf16.msra.mxu0 %v3039_v43  ;;  %v16_v43 = vld [vmem:[%s3954_s0 + $0x20] sm:$0xff] }
  0x29   :  { %2750 = vmatpush3.bf16.msra.mxu1 %v3041_v45  ;;  %2729 = vmatprep.subr.bf16.mxu0 %v3042_v46  ;;  %v2446_v44 = vcombine.low %v16_v43, %v16_v43  ;;  %v2447_v45 = vcombine.high %v16_v43, %v16_v43  ;;  %v3103_v46 = vld [vmem:[%s3953_s1 + $0x2b8] sm:$0xff]   ;;  %v3161_v43 = vld [vmem:[%s3953_s1 + $0x4a0] sm:$0xff]  }
  0x2a   :  { %2751 = vmatprep.subr.bf16.mxu1 %v3044_v48  ;;  %v17_v48 = vld [vmem:[%s3954_s0 + $0x28] sm:$0xff] }
  0x2c   :  { %2730 = vmatpush3.bf16.msra.mxu0 %v3043_v47  ;;  %v3104_v47 = vld [vmem:[%s3953_s1 + $0x340] sm:$0xff]  }
  0x2d   :  { %2752 = vmatpush3.bf16.msra.mxu1 %v3045_v49  ;;  %2731 = vmatprep.subr.bf16.mxu0 %v3046_v50  ;;  %v2448_v49 = vcombine.low %v17_v48, %v17_v48  ;;  %v2449_v50 = vcombine.high %v17_v48, %v17_v48  ;;  %v3166_v48 = vld [vmem:[%s3953_s1 + $0x470] sm:$0xff]  }
  0x2e   :  { %2753 = vmatprep.subr.bf16.mxu1 %v3048_v52  ;;  %v3108_v52 = vld [vmem:[%s3953_s1 + $0x3c0] sm:$0xff]  }
  0x30   :  { %2732 = vmatpush3.bf16.msra.mxu0 %v3047_v51  ;;  %v3107_v51 = vld [vmem:[%s3953_s1 + $0x300] sm:$0xff]  }
  0x31   :  { %2754 = vmatpush3.bf16.msra.mxu1 %v3049_v53  ;;  %2733 = vmatprep.subr.bf16.mxu0 %v3050_v54  ;;  %v3109_v53 = vld [vmem:[%s3953_s1 + $0x380] sm:$0xff]   ;;  %v3110_v54 = vld [vmem:[%s3953_s1 + $0x348] sm:$0xff]  }
  0x32   :  { %2755 = vmatprep.subr.bf16.mxu1 %v3052_v56  ;;  %v3112_v56 = vld [vmem:[%s3953_s1 + $0x3c8] sm:$0xff]  }
  0x34   :  { %2734 = vmatpush3.bf16.msra.mxu0 %v3051_v55  ;;  %v3111_v55 = vld [vmem:[%s3953_s1 + $0x308] sm:$0xff]  }
  0x35   :  { %2756 = vmatpush3.bf16.msra.mxu1 %v3053_v57  ;;  %2735 = vmatprep.subr.bf16.mxu0 %v3054_v58  ;;  %v3113_v57 = vld [vmem:[%s3953_s1 + $0x388] sm:$0xff]   ;;  %v3114_v58 = vld [vmem:[%s3953_s1 + $0x350] sm:$0xff]  }
  0x36   :  { %2757 = vmatprep.subr.bf16.mxu1 %v3056_v60  ;;  %v3116_v60 = vld [vmem:[%s3953_s1 + $0x3d0] sm:$0xff]  }
  0x38   :  { %2736 = vmatpush3.bf16.msra.mxu0 %v3055_v59  ;;  %v3115_v59 = vld [vmem:[%s3953_s1 + $0x310] sm:$0xff]  }
  0x39   :  { %2758 = vmatpush3.bf16.msra.mxu1 %v3057_v61  ;;  %2737 = vmatprep.subr.bf16.mxu0 %v3058_v62  ;;  %v3117_v61 = vld [vmem:[%s3953_s1 + $0x390] sm:$0xff]   ;;  %v3118_v62 = vld [vmem:[%s3953_s1 + $0x358] sm:$0xff]  }
  0x3a   :  { %2759 = vmatprep.subr.bf16.mxu1 %v3060_v0  ;;  %v3120_v0 = vld [vmem:[%s3953_s1 + $0x3d8] sm:$0xff]  }
  0x3c   :  { %2738 = vmatpush3.bf16.msra.mxu0 %v3059_v63  ;;  %v3119_v63 = vld [vmem:[%s3953_s1 + $0x318] sm:$0xff]  }
  0x3d   :  { %2760 = vmatpush3.bf16.msra.mxu1 %v3061_v1  ;;  %2739 = vmatprep.subr.bf16.mxu0 %v3062_v2  ;;  %v3121_v1 = vld [vmem:[%s3953_s1 + $0x398] sm:$0xff]   ;;  %v3122_v2 = vld [vmem:[%s3953_s1 + $0x360] sm:$0xff]  }
  0x3e   :  { %2761 = vmatprep.subr.bf16.mxu1 %v3064_v4  ;;  %v3124_v4 = vld [vmem:[%s3953_s1 + $0x3e0] sm:$0xff]  }
  0x40   :  { %2740 = vmatpush3.bf16.msra.mxu0 %v3063_v3  ;;  %v3123_v3 = vld [vmem:[%s3953_s1 + $0x320] sm:$0xff]  }
  0x41   :  { %2762 = vmatpush3.bf16.msra.mxu1 %v3067_v7  ;;  %2769 = vmatprep.subr.bf16.mxu0 %v3068_v9  ;;  %v3127_v7 = vld [vmem:[%s3953_s1 + $0x328] sm:$0xff]  }
  0x42   :  { %2791 = vmatprep.subr.bf16.mxu1 %v3072_v14  ;;  %v3129_v9 = vld [vmem:[%s3953_s1 + $0x3a8] sm:$0xff]   ;;  %v3134_v14 = vld [vmem:[%s3953_s1 + $0x378] sm:$0xff]  }
  0x43   :  { %1962 = vmatmul.mubr.bf16.vlgmr.msra.gmra.mrb[4].mxu0 %v2442_v8  ;;  %v3128_v8 = vld [vmem:[%s3953_s1 + $0x3e8] sm:$0xff]  }
  0x44   :  { %2770 = vmatpush3.bf16.msra.mxu0 %v3071_v13  ;;  %2002 = vmatmul.mubr.bf16.vlgmr.msra.gmra.mrb[4].mxu1 %v2444_v11  ;;  %v3131_v11 = vld [vmem:[%s3953_s1 + $0x330] sm:$0xff]  }
  0x45   :  { %2792 = vmatpush3.bf16.msra.mxu1 %v3073_v15  ;;  %2771 = vmatprep.subr.bf16.mxu0 %v3074_v16  ;;  %v3133_v13 = vld [vmem:[%s3953_s1 + $0x3b0] sm:$0xff]   ;;  %v3135_v15 = vld [vmem:[%s3953_s1 + $0x338] sm:$0xff]  }
  0x46   :  { %2793 = vmatprep.subr.bf16.mxu1 %v3076_v18  ;;  %2041 = vmatprep.mubr.bf16.mxu0 %v2447_v45  ;;  %v3136_v16 = vld [vmem:[%s3953_s1 + $0x3f8] sm:$0xff]   ;;  %v3163_v45 = vld [vmem:[%s3953_s1 + $0x428] sm:$0xff]  }
  0x47   :  { %2081 = vmatprep.mubr.bf16.mxu1 %v2449_v50  ;;  %v3168_v50 = vld [vmem:[%s3953_s1 + $0x4f0] sm:$0xff]  }
  0x48   :  { %2772 = vmatpush3.bf16.msra.mxu0 %v3075_v17  ;;  %v18_v17 = vld [vmem:[%s3954_s0 + $0x30] sm:$0xff] }
  0x49   :  { %2794 = vmatpush3.bf16.msra.mxu1 %v3077_v19  ;;  %2773 = vmatprep.subr.bf16.mxu0 %v3078_v20  ;;  %v2450_v18 = vcombine.low %v18_v17, %v18_v17  ;;  %v2451_v19 = vcombine.high %v18_v17, %v18_v17  ;;  %v3139_v20 = vld [vmem:[%s3953_s1 + $0x3b8] sm:$0xff]   ;;  %v3197_v17 = vld [vmem:[%s3953_s1 + $0x5a0] sm:$0xff]  }
  0x4a   :  { %2795 = vmatprep.subr.bf16.mxu1 %v3080_v22  ;;  %v19_v22 = vld [vmem:[%s3954_s0 + $0x38] sm:$0xff] }
  0x4c   :  { %2774 = vmatpush3.bf16.msra.mxu0 %v3079_v21  ;;  %v3140_v21 = vld [vmem:[%s3953_s1 + $0x440] sm:$0xff]  }
  0x4d   :  { %2796 = vmatpush3.bf16.msra.mxu1 %v3081_v23  ;;  %2775 = vmatprep.subr.bf16.mxu0 %v3082_v24  ;;  %v2452_v23 = vcombine.low %v19_v22, %v19_v22  ;;  %v2453_v24 = vcombine.high %v19_v22, %v19_v22  ;;  %v3202_v22 = vld [vmem:[%s3953_s1 + $0x570] sm:$0xff]  }
  0x4e   :  { %2797 = vmatprep.subr.bf16.mxu1 %v3084_v26  ;;  %v3144_v26 = vld [vmem:[%s3953_s1 + $0x4c0] sm:$0xff]  }
  0x50   :  { %2776 = vmatpush3.bf16.msra.mxu0 %v3083_v25  ;;  %v3143_v25 = vld [vmem:[%s3953_s1 + $0x400] sm:$0xff]  }
  0x51   :  { %2798 = vmatpush3.bf16.msra.mxu1 %v3085_v27  ;;  %2777 = vmatprep.subr.bf16.mxu0 %v3086_v28  ;;  %v3145_v27 = vld [vmem:[%s3953_s1 + $0x480] sm:$0xff]   ;;  %v3146_v28 = vld [vmem:[%s3953_s1 + $0x448] sm:$0xff]  }
  0x52   :  { %2799 = vmatprep.subr.bf16.mxu1 %v3088_v30  ;;  %v3148_v30 = vld [vmem:[%s3953_s1 + $0x4c8] sm:$0xff]  }
  0x54   :  { %2778 = vmatpush3.bf16.msra.mxu0 %v3087_v29  ;;  %v3147_v29 = vld [vmem:[%s3953_s1 + $0x408] sm:$0xff]  }
  0x55   :  { %2800 = vmatpush3.bf16.msra.mxu1 %v3089_v31  ;;  %2779 = vmatprep.subr.bf16.mxu0 %v3090_v32  ;;  %v3149_v31 = vld [vmem:[%s3953_s1 + $0x488] sm:$0xff]   ;;  %v3150_v32 = vld [vmem:[%s3953_s1 + $0x450] sm:$0xff]  }
  0x56   :  { %2801 = vmatprep.subr.bf16.mxu1 %v3092_v34  ;;  %v3152_v34 = vld [vmem:[%s3953_s1 + $0x4d0] sm:$0xff]  }
  0x58   :  { %2780 = vmatpush3.bf16.msra.mxu0 %v3091_v33  ;;  %v3151_v33 = vld [vmem:[%s3953_s1 + $0x410] sm:$0xff]  }
  0x59   :  { %2802 = vmatpush3.bf16.msra.mxu1 %v3093_v35  ;;  %2781 = vmatprep.subr.bf16.mxu0 %v3094_v36  ;;  %v3153_v35 = vld [vmem:[%s3953_s1 + $0x490] sm:$0xff]   ;;  %v3154_v36 = vld [vmem:[%s3953_s1 + $0x458] sm:$0xff]  }
  0x5a   :  { %2803 = vmatprep.subr.bf16.mxu1 %v3096_v38  ;;  %v3156_v38 = vld [vmem:[%s3953_s1 + $0x4d8] sm:$0xff]  }
  0x5c   :  { %2782 = vmatpush3.bf16.msra.mxu0 %v3095_v37  ;;  %v3155_v37 = vld [vmem:[%s3953_s1 + $0x418] sm:$0xff]  }
  0x5d   :  { %2804 = vmatpush3.bf16.msra.mxu1 %v3097_v39  ;;  %2783 = vmatprep.subr.bf16.mxu0 %v3098_v40  ;;  %v3157_v39 = vld [vmem:[%s3953_s1 + $0x498] sm:$0xff]   ;;  %v3158_v40 = vld [vmem:[%s3953_s1 + $0x460] sm:$0xff]  }
  0x5e   :  { %2805 = vmatprep.subr.bf16.mxu1 %v3100_v42  ;;  %v3160_v42 = vld [vmem:[%s3953_s1 + $0x4e0] sm:$0xff]  }
  0x60   :  { %2784 = vmatpush3.bf16.msra.mxu0 %v3099_v41  ;;  %v3159_v41 = vld [vmem:[%s3953_s1 + $0x420] sm:$0xff]  }
  0x61   :  { %2806 = vmatpush3.bf16.msra.mxu1 %v3103_v46  ;;  %2813 = vmatprep.subr.bf16.mxu0 %v3104_v47  ;;  %v3164_v46 = vld [vmem:[%s3953_s1 + $0x4e8] sm:$0xff]  }
  0x62   :  { %2835 = vmatprep.subr.bf16.mxu1 %v3108_v52  ;;  %v3165_v47 = vld [vmem:[%s3953_s1 + $0x4a8] sm:$0xff]   ;;  %v3170_v52 = vld [vmem:[%s3953_s1 + $0x478] sm:$0xff]  }
  0x63   :  { %2042 = vmatmul.mubr.bf16.vlgmr.msra.gmra.mrb[8].mxu0 %v2446_v44  ;;  %v3162_v44 = vld [vmem:[%s3953_s1 + $0x468] sm:$0xff]  }
  0x64   :  { %2814 = vmatpush3.bf16.msra.mxu0 %v3107_v51  ;;  %2082 = vmatmul.mubr.bf16.vlgmr.msra.gmra.mrb[8].mxu1 %v2448_v49  ;;  %v3167_v49 = vld [vmem:[%s3953_s1 + $0x430] sm:$0xff]  }
  0x65   :  { %2836 = vmatpush3.bf16.msra.mxu1 %v3109_v53  ;;  %2815 = vmatprep.subr.bf16.mxu0 %v3110_v54  ;;  %v3169_v51 = vld [vmem:[%s3953_s1 + $0x4b0] sm:$0xff]   ;;  %v3171_v53 = vld [vmem:[%s3953_s1 + $0x438] sm:$0xff]  }
  0x66   :  { %2837 = vmatprep.subr.bf16.mxu1 %v3112_v56  ;;  %2121 = vmatprep.mubr.bf16.mxu0 %v2451_v19  ;;  %v3172_v54 = vld [vmem:[%s3953_s1 + $0x4f8] sm:$0xff]   ;;  %v3199_v19 = vld [vmem:[%s3953_s1 + $0x528] sm:$0xff]  }
  0x67   :  { %2161 = vmatprep.mubr.bf16.mxu1 %v2453_v24  ;;  %v3204_v24 = vld [vmem:[%s3953_s1 + $0x5f0] sm:$0xff]  }
  0x68   :  { %2816 = vmatpush3.bf16.msra.mxu0 %v3111_v55  ;;  %v20_v55 = vld [vmem:[%s3954_s0 + $0x40] sm:$0xff] }
  0x69   :  { %2838 = vmatpush3.bf16.msra.mxu1 %v3113_v57  ;;  %2817 = vmatprep.subr.bf16.mxu0 %v3114_v58  ;;  %v2454_v56 = vcombine.low %v20_v55, %v20_v55  ;;  %v2455_v57 = vcombine.high %v20_v55, %v20_v55  ;;  %v3175_v58 = vld [vmem:[%s3953_s1 + $0x4b8] sm:$0xff]   ;;  %v3231_v55 = vld [vmem:[%s3953_s1 + $0x6a8] sm:$0xff]  }
  0x6a   :  { %2839 = vmatprep.subr.bf16.mxu1 %v3116_v60  ;;  %v21_v60 = vld [vmem:[%s3954_s0 + $0x48] sm:$0xff] }
  0x6c   :  { %2818 = vmatpush3.bf16.msra.mxu0 %v3115_v59  ;;  %v3176_v59 = vld [vmem:[%s3953_s1 + $0x540] sm:$0xff]  }
  0x6d   :  { %2840 = vmatpush3.bf16.msra.mxu1 %v3117_v61  ;;  %2819 = vmatprep.subr.bf16.mxu0 %v3118_v62  ;;  %v2456_v61 = vcombine.low %v21_v60, %v21_v60  ;;  %v2457_v62 = vcombine.high %v21_v60, %v21_v60  ;;  %v3234_v60 = vld [vmem:[%s3953_s1 + $0x6b0] sm:$0xff]  }
  0x6e   :  { %2841 = vmatprep.subr.bf16.mxu1 %v3120_v0  ;;  %v3180_v0 = vld [vmem:[%s3953_s1 + $0x5c0] sm:$0xff]  }
  0x70   :  { %2820 = vmatpush3.bf16.msra.mxu0 %v3119_v63  ;;  %v3179_v63 = vld [vmem:[%s3953_s1 + $0x500] sm:$0xff]  }
  0x71   :  { %2842 = vmatpush3.bf16.msra.mxu1 %v3121_v1  ;;  %2821 = vmatprep.subr.bf16.mxu0 %v3122_v2  ;;  %v3181_v1 = vld [vmem:[%s3953_s1 + $0x580] sm:$0xff]   ;;  %v3182_v2 = vld [vmem:[%s3953_s1 + $0x548] sm:$0xff]  }
  0x72   :  { %2843 = vmatprep.subr.bf16.mxu1 %v3124_v4  ;;  %v3184_v4 = vld [vmem:[%s3953_s1 + $0x5c8] sm:$0xff]  }
  0x74   :  { %2822 = vmatpush3.bf16.msra.mxu0 %v3123_v3  ;;  %v3183_v3 = vld [vmem:[%s3953_s1 + $0x508] sm:$0xff]  }
  0x75   :  { %2844 = vmatpush3.bf16.msra.mxu1 %v3125_v5  ;;  %2823 = vmatprep.subr.bf16.mxu0 %v3126_v6  ;;  %v3185_v5 = vld [vmem:[%s3953_s1 + $0x588] sm:$0xff]   ;;  %v3186_v6 = vld [vmem:[%s3953_s1 + $0x550] sm:$0xff]  }
  0x76   :  { %2845 = vmatprep.subr.bf16.mxu1 %v3128_v8  ;;  %v3188_v8 = vld [vmem:[%s3953_s1 + $0x5d0] sm:$0xff]  }
  0x78   :  { %2824 = vmatpush3.bf16.msra.mxu0 %v3127_v7  ;;  %v3187_v7 = vld [vmem:[%s3953_s1 + $0x510] sm:$0xff]  }
  0x79   :  { %2846 = vmatpush3.bf16.msra.mxu1 %v3129_v9  ;;  %2825 = vmatprep.subr.bf16.mxu0 %v3130_v10  ;;  %v3189_v9 = vld [vmem:[%s3953_s1 + $0x590] sm:$0xff]   ;;  %v3190_v10 = vld [vmem:[%s3953_s1 + $0x558] sm:$0xff]  }
  0x7a   :  { %2847 = vmatprep.subr.bf16.mxu1 %v3132_v12  ;;  %v3192_v12 = vld [vmem:[%s3953_s1 + $0x5d8] sm:$0xff]  }
  0x7c   :  { %2826 = vmatpush3.bf16.msra.mxu0 %v3131_v11  ;;  %v3191_v11 = vld [vmem:[%s3953_s1 + $0x518] sm:$0xff]  }
  0x7d   :  { %2848 = vmatpush3.bf16.msra.mxu1 %v3133_v13  ;;  %2827 = vmatprep.subr.bf16.mxu0 %v3134_v14  ;;  %v3193_v13 = vld [vmem:[%s3953_s1 + $0x598] sm:$0xff]   ;;  %v3194_v14 = vld [vmem:[%s3953_s1 + $0x560] sm:$0xff]  }
  0x7e   :  { %2849 = vmatprep.subr.bf16.mxu1 %v3136_v16  ;;  %v3196_v16 = vld [vmem:[%s3953_s1 + $0x5e0] sm:$0xff]  }
  0x80   :  { %2828 = vmatpush3.bf16.msra.mxu0 %v3135_v15  ;;  %v3195_v15 = vld [vmem:[%s3953_s1 + $0x520] sm:$0xff]  }
  0x81   :  { %2850 = vmatpush3.bf16.msra.mxu1 %v3139_v20  ;;  %2857 = vmatprep.subr.bf16.mxu0 %v3140_v21  ;;  %v3200_v20 = vld [vmem:[%s3953_s1 + $0x5e8] sm:$0xff]  }
  0x82   :  { %2879 = vmatprep.subr.bf16.mxu1 %v3144_v26  ;;  %v3201_v21 = vld [vmem:[%s3953_s1 + $0x5a8] sm:$0xff]   ;;  %v3206_v26 = vld [vmem:[%s3953_s1 + $0x578] sm:$0xff]  }
  0x83   :  { %2122 = vmatmul.mubr.bf16.vlgmr.msra.gmra.mrb[12].mxu0 %v2450_v18  ;;  %v3198_v18 = vld [vmem:[%s3953_s1 + $0x568] sm:$0xff]  }
  0x84   :  { %2858 = vmatpush3.bf16.msra.mxu0 %v3143_v25  ;;  %2162 = vmatmul.mubr.bf16.vlgmr.msra.gmra.mrb[12].mxu1 %v2452_v23  ;;  %v3203_v23 = vld [vmem:[%s3953_s1 + $0x530] sm:$0xff]  }
  0x85   :  { %2880 = vmatpush3.bf16.msra.mxu1 %v3145_v27  ;;  %2859 = vmatprep.subr.bf16.mxu0 %v3146_v28  ;;  %v3205_v25 = vld [vmem:[%s3953_s1 + $0x5b0] sm:$0xff]   ;;  %v3207_v27 = vld [vmem:[%s3953_s1 + $0x538] sm:$0xff]  }
  0x86   :  { %2881 = vmatprep.subr.bf16.mxu1 %v3148_v30  ;;  %2201 = vmatprep.mubr.bf16.mxu0 %v2455_v57  ;;  %v3208_v28 = vld [vmem:[%s3953_s1 + $0x5f8] sm:$0xff]   ;;  %v24_v57 = vld [vmem:[%s3954_s0 + $0x60] sm:$0xff] }
  0x87   :  { %2241 = vmatprep.mubr.bf16.mxu1 %v2457_v62  ;;  %v3239_v62 = vld [vmem:[%s3953_s1 + $0x6b8] sm:$0xff]  }
  0x88   :  { %2860 = vmatpush3.bf16.msra.mxu0 %v3147_v29  ;;  %v22_v29 = vld [vmem:[%s3954_s0 + $0x50] sm:$0xff] }
  0x89   :  { %2882 = vmatpush3.bf16.msra.mxu1 %v3149_v31  ;;  %2861 = vmatprep.subr.bf16.mxu0 %v3150_v32  ;;  %v2458_v30 = vcombine.low %v22_v29, %v22_v29  ;;  %v2459_v31 = vcombine.high %v22_v29, %v22_v29  ;;  %v3211_v32 = vld [vmem:[%s3953_s1 + $0x5b8] sm:$0xff]  }
  0x8a   :  { %2883 = vmatprep.subr.bf16.mxu1 %v3152_v34  ;;  %v23_v34 = vld [vmem:[%s3954_s0 + $0x58] sm:$0xff] }
  0x8c   :  { %2862 = vmatpush3.bf16.msra.mxu0 %v3151_v33  ;;  %v3212_v33 = vld [vmem:[%s3953_s1 + $0x640] sm:$0xff]  }
  0x8d   :  { %2884 = vmatpush3.bf16.msra.mxu1 %v3153_v35  ;;  %2863 = vmatprep.subr.bf16.mxu0 %v3154_v36  ;;  %v2460_v35 = vcombine.low %v23_v34, %v23_v34  ;;  %v2461_v36 = vcombine.high %v23_v34, %v23_v34 }
  0x8e   :  { %2885 = vmatprep.subr.bf16.mxu1 %v3156_v38  ;;  %v3216_v38 = vld [vmem:[%s3953_s1 + $0x680] sm:$0xff]  }
  0x90   :  { %2864 = vmatpush3.bf16.msra.mxu0 %v3155_v37  ;;  %v3215_v37 = vld [vmem:[%s3953_s1 + $0x600] sm:$0xff]  }
  0x91   :  { %2886 = vmatpush3.bf16.msra.mxu1 %v3157_v39  ;;  %2865 = vmatprep.subr.bf16.mxu0 %v3158_v40  ;;  %v3217_v39 = vld [vmem:[%s3953_s1 + $0x648] sm:$0xff]   ;;  %v3243_v40 = vmov 0.0  }
  0x92   :  { %2887 = vmatprep.subr.bf16.mxu1 %v3160_v42  ;;  %v3219_v42 = vld [vmem:[%s3953_s1 + $0x688] sm:$0xff]  }
  0x94   :  { %2866 = vmatpush3.bf16.msra.mxu0 %v3159_v41  ;;  %v3218_v41 = vld [vmem:[%s3953_s1 + $0x608] sm:$0xff]  }
  0x95   :  { %2888 = vmatpush3.bf16.msra.mxu1 %v3161_v43  ;;  %2867 = vmatprep.subr.bf16.mxu0 %v3162_v44  ;;  %v3220_v43 = vld [vmem:[%s3953_s1 + $0x650] sm:$0xff]  }
  0x96   :  { %2889 = vmatprep.subr.bf16.mxu1 %v3164_v46  ;;  %v3221_v44 = vld [vmem:[%s3953_s1 + $0x610] sm:$0xff]   ;;  %v3223_v46 = vld [vmem:[%s3953_s1 + $0x658] sm:$0xff]  }
  0x98   :  { %2868 = vmatpush3.bf16.msra.mxu0 %v3163_v45  ;;  %v3222_v45 = vld [vmem:[%s3953_s1 + $0x690] sm:$0xff]  }
  0x99   :  { %2890 = vmatpush3.bf16.msra.mxu1 %v3165_v47  ;;  %2869 = vmatprep.subr.bf16.mxu0 %v3166_v48  ;;  %v3224_v47 = vld [vmem:[%s3953_s1 + $0x618] sm:$0xff]   ;;  %v3226_v48 = vld [vmem:[%s3953_s1 + $0x660] sm:$0xff]  }
  0x9a   :  { %2891 = vmatprep.subr.bf16.mxu1 %v3168_v50  ;;  %v3227_v50 = vld [vmem:[%s3953_s1 + $0x620] sm:$0xff]  }
  0x9c   :  { %2870 = vmatpush3.bf16.msra.mxu0 %v3167_v49  ;;  %v3225_v49 = vld [vmem:[%s3953_s1 + $0x698] sm:$0xff]  }
  0x9d   :  { %2892 = vmatpush3.bf16.msra.mxu1 %v3169_v51  ;;  %2871 = vmatprep.subr.bf16.mxu0 %v3170_v52  ;;  %v3229_v51 = vld [vmem:[%s3953_s1 + $0x668] sm:$0xff]   ;;  %v3228_v52 = vld [vmem:[%s3953_s1 + $0x6a0] sm:$0xff]  }
  0x9e   :  { %2893 = vmatprep.subr.bf16.mxu1 %v3172_v54  ;;  %v3232_v54 = vld [vmem:[%s3953_s1 + $0x670] sm:$0xff]  }
  0xa0   :  { %2872 = vmatpush3.bf16.msra.mxu0 %v3171_v53  ;;  %v3230_v53 = vld [vmem:[%s3953_s1 + $0x628] sm:$0xff]  }
  0xa1   :  { %2894 = vmatpush3.bf16.msra.mxu1 %v3175_v58  ;;  %2901 = vmatprep.subr.bf16.mxu0 %v3176_v59  ;;  %v3235_v58 = vld [vmem:[%s3953_s1 + $0x678] sm:$0xff]   ;;  %v2463_v59 = vcombine.high %v24_v57, %v24_v57 }
  0xa2   :  { %2923 = vmatprep.subr.bf16.mxu1 %v3180_v0  ;;  %v3240_v0 = vld [vmem:[%s3954_s0 + $0x68] ss:$0 sps:$4 sm:$0xff]  }
  0xa3   :  { %2202 = vmatmul.mubr.bf16.vlgmr.msra.gmra.mrb[16].mxu0 %v2454_v56  ;;  %v3233_v56 = vld [vmem:[%s3953_s1 + $0x630] sm:$0xff]  }
  0xa4   :  { %2902 = vmatpush3.bf16.msra.mxu0 %v3179_v63  ;;  %2242 = vmatmul.mubr.bf16.vlgmr.msra.gmra.mrb[16].mxu1 %v2456_v61  ;;  %v3236_v61 = vld [vmem:[%s3953_s1 + $0x638] sm:$0xff]   ;;  %v2462_v63 = vcombine.low %v24_v57, %v24_v57 }
  0xa5   :  { %2924 = vmatpush3.bf16.msra.mxu1 %v3181_v1  ;;  %2903 = vmatprep.subr.bf16.mxu0 %v3182_v2 }
  0xa6   :  { %2925 = vmatprep.subr.bf16.mxu1 %v3184_v4  ;;  %2281 = vmatprep.mubr.bf16.mxu0 %v2459_v31 }
  0xa7   :  { %2321 = vmatprep.mubr.bf16.mxu1 %v2461_v36 }
  0xa8   :  { %2904 = vmatpush3.bf16.msra.mxu0 %v3183_v3 }
  0xa9   :  { %2926 = vmatpush3.bf16.msra.mxu1 %v3185_v5  ;;  %2905 = vmatprep.subr.bf16.mxu0 %v3186_v6 }
  0xaa   :  { %2927 = vmatprep.subr.bf16.mxu1 %v3188_v8 }
  0xac   :  { %2906 = vmatpush3.bf16.msra.mxu0 %v3187_v7 }
  0xad   :  { %2928 = vmatpush3.bf16.msra.mxu1 %v3189_v9  ;;  %2907 = vmatprep.subr.bf16.mxu0 %v3190_v10 }
  0xae   :  { %2929 = vmatprep.subr.bf16.mxu1 %v3192_v12 }
  0xb0   :  { %2908 = vmatpush3.bf16.msra.mxu0 %v3191_v11 }
  0xb1   :  { %2930 = vmatpush3.bf16.msra.mxu1 %v3193_v13  ;;  %2909 = vmatprep.subr.bf16.mxu0 %v3194_v14 }
  0xb2   :  { %2931 = vmatprep.subr.bf16.mxu1 %v3196_v16 }
  0xb4   :  { %2910 = vmatpush3.bf16.msra.mxu0 %v3195_v15 }
  0xb5   :  { %2932 = vmatpush3.bf16.msra.mxu1 %v3197_v17  ;;  %2911 = vmatprep.subr.bf16.mxu0 %v3198_v18 }
  0xb6   :  { %2933 = vmatprep.subr.bf16.mxu1 %v3200_v20 }
  0xb8   :  { %2912 = vmatpush3.bf16.msra.mxu0 %v3199_v19 }
  0xb9   :  { %2934 = vmatpush3.bf16.msra.mxu1 %v3201_v21  ;;  %2913 = vmatprep.subr.bf16.mxu0 %v3202_v22 }
  0xba   :  { %2935 = vmatprep.subr.bf16.mxu1 %v3204_v24 }
  0xbc   :  { %2914 = vmatpush3.bf16.msra.mxu0 %v3203_v23 }
  0xbd   :  { %2936 = vmatpush3.bf16.msra.mxu1 %v3205_v25  ;;  %2915 = vmatprep.subr.bf16.mxu0 %v3206_v26 }
  0xbe   :  { %2937 = vmatprep.subr.bf16.mxu1 %v3208_v28 }
  0xc0   :  { %2916 = vmatpush3.bf16.msra.mxu0 %v3207_v27 }
  0xc1   :  { %2938 = vmatpush3.bf16.msra.mxu1 %v3211_v32  ;;  %2945 = vmatprep.subr.bf16.mxu0 %v3212_v33 }
  0xc2   :  { %2976 = vmatprep.subr.bf16.mxu1 %v3243_v40 }
  0xc3   :  { %2282 = vmatmul.mubr.bf16.vlgmr.msra.gmra.mrb[20].mxu0 %v2458_v30 }
  0xc4   :  { %2946 = vmatpush3.bf16.msra.mxu0 %v3215_v37  ;;  %2322 = vmatmul.mubr.bf16.vlgmr.msra.gmra.mrb[20].mxu1 %v2460_v35 }
  0xc5   :  { %2977 = vmatpush3.bf16.msra.mxu1 %v3216_v38  ;;  %2947 = vmatprep.subr.bf16.mxu0 %v3217_v39 }
  0xc6   :  { %2978 = vmatprep.subr.bf16.mxu1 %v3243_v40  ;;  %2992 = vmatprep.mubr.msk.bf16.mxu1 %vm3244_vm0, %v3243_v40 }
  0xc7   :  { %2361 = vmatprep.mubr.bf16.mxu0 %v2463_v59 }
  0xc8   :  { %2948 = vmatpush3.bf16.msra.mxu0 %v3218_v41 }
  0xc9   :  { %2949 = vmatprep.subr.bf16.mxu0 %v3220_v43  ;;  %2979 = vmatpush3.bf16.msra.mxu1 %v3219_v42 }
  0xca   :  { %2980 = vmatprep.subr.bf16.mxu1 %v3243_v40 }
  0xcc   :  { %2950 = vmatpush3.bf16.msra.mxu0 %v3221_v44 }
  0xcd   :  { %2951 = vmatprep.subr.bf16.mxu0 %v3223_v46  ;;  %2981 = vmatpush3.bf16.msra.mxu1 %v3222_v45 }
  0xce   :  { %2982 = vmatprep.subr.bf16.mxu1 %v3243_v40 }
  0xd0   :  { %2952 = vmatpush3.bf16.msra.mxu0 %v3224_v47 }
  0xd1   :  { %2953 = vmatprep.subr.bf16.mxu0 %v3226_v48  ;;  %2983 = vmatpush3.bf16.msra.mxu1 %v3225_v49 }
  0xd2   :  { %2984 = vmatprep.subr.bf16.mxu1 %v3243_v40 }
  0xd4   :  { %2954 = vmatpush3.bf16.msra.mxu0 %v3227_v50 }
  0xd5   :  { %2955 = vmatprep.subr.bf16.mxu0 %v3229_v51  ;;  %2985 = vmatpush3.bf16.msra.mxu1 %v3228_v52 }
  0xd6   :  { %2986 = vmatprep.subr.bf16.mxu1 %v3243_v40 }
  0xd8   :  { %2956 = vmatpush3.bf16.msra.mxu0 %v3230_v53 }
  0xd9   :  { %2957 = vmatprep.subr.bf16.mxu0 %v3232_v54  ;;  %2987 = vmatpush3.bf16.msra.mxu1 %v3231_v55 }
  0xda   :  { %2988 = vmatprep.subr.bf16.mxu1 %v3243_v40 }
  0xdc   :  { %2958 = vmatpush3.bf16.msra.mxu0 %v3233_v56 }
  0xdd   :  { %2959 = vmatprep.subr.bf16.mxu0 %v3235_v58  ;;  %2989 = vmatpush3.bf16.msra.mxu1 %v3234_v60 }
  0xde   :  { %2990 = vmatprep.subr.bf16.mxu1 %v3243_v40 }
  0xe0   :  { %2960 = vmatpush3.bf16.msra.mxu0 %v3236_v61 }
  0xe1   :  { %2991 = vmatpush3.bf16.msra.mxu1 %v3239_v62 }
  0xe3   :  { %2362 = vmatmul.mubr.bf16.vlgmr.msra.gmra.mrb[24].mxu0 %v2462_v63 }
  0xe4   :  { %2993 = vmatmul.mubr.bf16.vlgmr.msra.gmra.mrb[24].mxu1 %v3240_v0 }
  0xf6   :  { %v2697_v1 = vpop.f32.mrb[0].mxu0 }
  0xf7   :  { %v2719_v2 = vpop.f32.mrb[0].mxu1  ;;  %v2698_v3 = vpop.f32.mrb[1].mxu0 }
  0xf8   :  { %v2720_v4 = vpop.f32.mrb[1].mxu1  ;;  %v2699_v5 = vadd.f32 %v2698_v3, %v2697_v1  ;;  %v2700_v7 = vpop.f32.mrb[2].mxu0 }
  0xf9   :  { %v2721_v6 = vadd.f32 %v2720_v4, %v2719_v2  ;;  %v2722_v8 = vpop.f32.mrb[2].mxu1  ;;  %v2701_v9 = vpop.f32.mrb[3].mxu0 }
  0xfa   :  { %v2723_v10 = vpop.f32.mrb[3].mxu1 }
  0xfb   :  { %v1924_v11 = vadd.f32 %v2721_v6, %v2699_v5 }
 0x116   :  { %v2741_v12 = vpop.f32.mrb[4].mxu0 }
 0x117   :  { %v2742_v13 = vpop.f32.mrb[5].mxu0  ;;  %v2763_v14 = vpop.f32.mrb[4].mxu1 }
 0x118   :  { %v2743_v15 = vadd.f32 %v2742_v13, %v2741_v12  ;;  %v2744_v16 = vpop.f32.mrb[6].mxu0  ;;  %v2764_v17 = vpop.f32.mrb[5].mxu1 }
 0x119   :  { %v2745_v18 = vpop.f32.mrb[7].mxu0  ;;  %v2765_v19 = vadd.f32 %v2764_v17, %v2763_v14  ;;  %v2766_v20 = vpop.f32.mrb[6].mxu1 }
 0x11a   :  { %v1964_v21 = vadd.f32 %v2743_v15, %v1924_v11  ;;  %v2767_v22 = vpop.f32.mrb[7].mxu1 }
 0x11c   :  { %v2004_v23 = vadd.f32 %v2765_v19, %v1964_v21 }
 0x136   :  { %v2785_v24 = vpop.f32.mrb[8].mxu0 }
 0x137   :  { %v2786_v25 = vpop.f32.mrb[9].mxu0  ;;  %v2807_v28 = vpop.f32.mrb[8].mxu1 }
 0x138   :  { %v2787_v26 = vadd.f32 %v2786_v25, %v2785_v24  ;;  %v2788_v27 = vpop.f32.mrb[10].mxu0  ;;  %v2808_v30 = vpop.f32.mrb[9].mxu1 }
 0x139   :  { %v2789_v29 = vpop.f32.mrb[11].mxu0  ;;  %v2809_v32 = vadd.f32 %v2808_v30, %v2807_v28  ;;  %v2810_v33 = vpop.f32.mrb[10].mxu1 }
 0x13a   :  { %v2044_v31 = vadd.f32 %v2787_v26, %v2004_v23  ;;  %v2811_v34 = vpop.f32.mrb[11].mxu1 }
 0x13c   :  { %v2084_v35 = vadd.f32 %v2809_v32, %v2044_v31 }
 0x156   :  { %v2829_v36 = vpop.f32.mrb[12].mxu0 }
 0x157   :  { %v2830_v37 = vpop.f32.mrb[13].mxu0  ;;  %v2851_v40 = vpop.f32.mrb[12].mxu1 }
 0x158   :  { %v2831_v38 = vadd.f32 %v2830_v37, %v2829_v36  ;;  %v2832_v39 = vpop.f32.mrb[14].mxu0  ;;  %v2852_v42 = vpop.f32.mrb[13].mxu1 }
 0x159   :  { %v2833_v41 = vpop.f32.mrb[15].mxu0  ;;  %v2853_v44 = vadd.f32 %v2852_v42, %v2851_v40  ;;  %v2854_v45 = vpop.f32.mrb[14].mxu1 }
 0x15a   :  { %v2124_v43 = vadd.f32 %v2831_v38, %v2084_v35  ;;  %v2855_v46 = vpop.f32.mrb[15].mxu1 }
 0x15c   :  { %v2164_v47 = vadd.f32 %v2853_v44, %v2124_v43 }
 0x176   :  { %v2873_v48 = vpop.f32.mrb[16].mxu0 }
 0x177   :  { %v2874_v49 = vpop.f32.mrb[17].mxu0  ;;  %v2895_v52 = vpop.f32.mrb[16].mxu1 }
 0x178   :  { %v2875_v50 = vadd.f32 %v2874_v49, %v2873_v48  ;;  %v2876_v51 = vpop.f32.mrb[18].mxu0  ;;  %v2896_v55 = vpop.f32.mrb[17].mxu1 }
 0x179   :  { %v2877_v53 = vpop.f32.mrb[19].mxu0  ;;  %v2897_v56 = vadd.f32 %v2896_v55, %v2895_v52  ;;  %v2898_v57 = vpop.f32.mrb[18].mxu1 }
 0x17a   :  { %v2204_v54 = vadd.f32 %v2875_v50, %v2164_v47  ;;  %v2899_v58 = vpop.f32.mrb[19].mxu1 }
 0x17c   :  { %v2244_v59 = vadd.f32 %v2897_v56, %v2204_v54 }
 0x196   :  { %v2917_v60 = vpop.f32.mrb[20].mxu0 }
 0x197   :  { %v2918_v61 = vpop.f32.mrb[21].mxu0  ;;  %v2939_v0 = vpop.f32.mrb[20].mxu1 }
 0x198   :  { %v2919_v62 = vadd.f32 %v2918_v61, %v2917_v60  ;;  %v2920_v63 = vpop.f32.mrb[22].mxu0  ;;  %v2940_v2 = vpop.f32.mrb[21].mxu1 }
 0x199   :  { %v2921_v1 = vpop.f32.mrb[23].mxu0  ;;  %v2941_v4 = vadd.f32 %v2940_v2, %v2939_v0  ;;  %v2942_v5 = vpop.f32.mrb[22].mxu1 }
 0x19a   :  { %v2284_v3 = vadd.f32 %v2919_v62, %v2244_v59  ;;  %v2943_v6 = vpop.f32.mrb[23].mxu1 }
 0x19c   :  { %v2324_v7 = vadd.f32 %v2941_v4, %v2284_v3 }
 0x1b6   :  { %v2961_v8 = vpop.f32.mrb[24].mxu0 }
 0x1b7   :  { %v2962_v9 = vpop.f32.mrb[25].mxu0  ;;  %v2403_v12 = vpop.f32.mrb[24].mxu1 }
 0x1b8   :  { %v2963_v10 = vadd.f32 %v2962_v9, %v2961_v8  ;;  %v2964_v11 = vpop.f32.mrb[26].mxu0  ;;  %v2994_v14 = vpop.f32.mrb[25].mxu1 }
 0x1b9   :  { %v2965_v13 = vpop.f32.mrb[27].mxu0  ;;  %v2406_v16 = vpop.f32.mrb[26].mxu1 }
 0x1ba   :  { %v2364_v15 = vadd.f32 %v2963_v10, %v2324_v7  ;;  %v2995_v17 = vpop.f32.mrb[27].mxu1 }
 0x1bc   :  { %v2404_v18 = vadd.f32 %v2403_v12, %v2364_v15 }
 0x1be   :  { %v2409_v19 = vrot.slane %v2404_v18, 4  ;;  %v2416_v20 = vmul.f32 %v2404_v18, %v2404_v18 }
 0x1c0   :  { %v2410_v21 = vadd.f32 %v2409_v19, %v2404_v18  ;;  %v2417_v22 = vrot.slane %v2416_v20, 4 }
 0x1c2   :  { %v2411_v23 = vrot.slane %v2410_v21, 2  ;;  %v2418_v24 = vadd.f32 %v2417_v22, %v2416_v20 }
 0x1c4   :  { %v2412_v25 = vadd.f32 %v2411_v23, %v2410_v21  ;;  %v2419_v26 = vrot.slane %v2418_v24, 2 }
 0x1c6   :  { %v2413_v27 = vrot.slane %v2412_v25, 1  ;;  %v2420_v28 = vadd.f32 %v2419_v26, %v2418_v24 }
 0x1c8   :  { %v2414_v29 = vadd.f32 %v2413_v27, %v2412_v25  ;;  %v2421_v30 = vrot.slane %v2420_v28, 1 }
 0x1ca   :  { %v2415_v31 = vmul.f32 0.125, %v2414_v29  ;;  %v2422_v32 = vadd.f32 %v2421_v30, %v2420_v28 }
 0x1cc   :  { %v2423_v33 = vmul.f32 0.125, %v2422_v32  ;;  %v2424_v34 = vmul.f32 %v2415_v31, %v2415_v31  ;;  %v2427_v38 = vsub.f32 %v2404_v18, %v2415_v31 }
 0x1ce   :  { %v2425_v35 = vsub.f32 %v2423_v33, %v2424_v34 }
 0x1d0   :  { %v2426_v36 = vmax.f32 %v2425_v35, 0.0 }
 0x1d2   :  { %v2428_v37 = vadd.f32 1e-05, %v2426_v36 }
 0x1d4   :  { %3241 = vrsqrt.f32 %v2428_v37 }
 0x1de   :  { %v3242_v39 = vpop.eup %3241 }
 0x1df   :  { %v2430_v40 = vmul.f32 %v3242_v39, %v2427_v38 }
 0x1e1   :  { %v2431_v41 = vmax.f32 %v2430_v40, 0.0 }
 0x1e3   :  { %v2432_v42 = vpack.c.bf16 %v2431_v41, %v2431_v41 }
 0x1e5   :  { %2433 = vst [vmem:[%s3955_s2] sm:$0xf] %v2432_v42 }

// kernel: _lambda_.26
= control target key start
LH: loop header
LB: loop body
LE: loop exit
PB: predicated region body
PF: predicated region fallthrough
CT: control target
= control target key end

     0   :  { %vm1042_vm0 = vcmask 523264   ;;  %vm1457_vm1 = vcmask 519168   ;;  %s2391_s1 = inlined_call_operand.vmem [shape: bf16[1728,64], index: 1, kind: input, shape index: {}]   ;;  %s2392_s0 = inlined_call_operand.vmem [shape: bf16[32,1728], index: 0, kind: input, shape index: {}]   ;;  %s2393_s2 = inlined_call_operand.vmem [shape: bf16[32,64], index: 2, kind: output, shape index: {}]  }
   0x1   :  { %v1781_v0 = vld [vmem:[%s2391_s1 + $0x40] sm:$0xff]   ;;  %v1783_v2 = vld [vmem:[%s2391_s1 + $0x48] sm:$0xff]   ;;  %v1785_v4 = vld [vmem:[%s2391_s1 + $0x50] sm:$0xff]  }
   0x2   :  { %v1782_v1 = vld [vmem:[%s2391_s1] sm:$0xff]   ;;  %1612 = vmatprep.subr.bf16.mxu1 %v1781_v0  ;;  %v1784_v3 = vld [vmem:[%s2391_s1 + $0x8] sm:$0xff]   ;;  %v1786_v5 = vld [vmem:[%s2391_s1 + $0x10] sm:$0xff]  }
   0x3   :  { %1613 = vmatpush3.bf16.msra.mxu1 %v1782_v1  ;;  %v1787_v6 = vld [vmem:[%s2391_s1 + $0x58] sm:$0xff]   ;;  %v1791_v8 = vld [vmem:[%s2391_s1 + $0x140] sm:$0xff]   ;;  %v1795_v12 = vld [vmem:[%s2391_s1 + $0x148] sm:$0xff]  }
   0x4   :  { %1614 = vmatprep.subr.bf16.mxu1 %v1783_v2  ;;  %v1788_v7 = vld [vmem:[%s2391_s1 + $0x18] sm:$0xff]   ;;  %v1792_v9 = vld [vmem:[%s2391_s1 + $0x100] sm:$0xff]   ;;  %1668 = vmatprep.subr.bf16.mxu0 %v1791_v8  ;;  %v1796_v13 = vld [vmem:[%s2391_s1 + $0x108] sm:$0xff]  }
   0x5   :  { %v1789_v10 = vld [vmem:[%s2391_s1 + $0x60] sm:$0xff]   ;;  %1669 = vmatpush3.bf16.msra.mxu0 %v1792_v9  ;;  %v1793_v14 = vld [vmem:[%s2391_s1 + $0x68] sm:$0xff]   ;;  %v1799_v16 = vld [vmem:[%s2391_s1 + $0x150] sm:$0xff]  }
   0x6   :  { %v1790_v11 = vld [vmem:[%s2391_s1 + $0x20] sm:$0xff]   ;;  %1670 = vmatprep.subr.bf16.mxu0 %v1795_v12  ;;  %v1794_v15 = vld [vmem:[%s2391_s1 + $0x28] sm:$0xff]   ;;  %v1800_v17 = vld [vmem:[%s2391_s1 + $0x110] sm:$0xff]  }
   0x7   :  { %1615 = vmatpush3.bf16.msra.mxu1 %v1784_v3  ;;  %v1797_v18 = vld [vmem:[%s2391_s1 + $0x70] sm:$0xff]   ;;  %v1803_v20 = vld [vmem:[%s2391_s1 + $0x158] sm:$0xff]   ;;  %v1808_v25 = vld [vmem:[%s2391_s1 + $0xc0] sm:$0xff]  }
   0x8   :  { %1616 = vmatprep.subr.bf16.mxu1 %v1785_v4  ;;  %v1798_v19 = vld [vmem:[%s2391_s1 + $0x30] sm:$0xff]   ;;  %v1801_v21 = vld [vmem:[%s2391_s1 + $0x78] sm:$0xff]   ;;  %v1810_v27 = vld [vmem:[%s2391_s1 + $0x160] sm:$0xff]  }
   0x9   :  { %1671 = vmatpush3.bf16.msra.mxu0 %v1796_v13  ;;  %v1806_v22 = vld [vmem:[%s2392_s0 + $0x4] ss:$56 sps:$4 sm:$0xff]   ;;  %v1804_v26 = vld [vmem:[%s2392_s0] ss:$56 sps:$4 sm:$0xff]   ;;  %v1812_v30 = vld [vmem:[%s2391_s1 + $0xc8] sm:$0xff]  }
   0xa   :  { %1672 = vmatprep.subr.bf16.mxu0 %v1799_v16  ;;  %v1807_v23 = vld [vmem:[%s2391_s1 + $0x118] sm:$0xff]   ;;  %1081 = vmatprep.mubr.bf16.mxu1 %v1806_v22  ;;  %v1811_v28 = vld [vmem:[%s2391_s1 + $0x120] sm:$0xff]   ;;  %v1814_v31 = vld [vmem:[%s2391_s1 + $0x168] sm:$0xff]  }
   0xb   :  { %1617 = vmatpush3.bf16.msra.mxu1 %v1786_v5  ;;  %v1802_v24 = vld [vmem:[%s2391_s1 + $0x38] sm:$0xff]   ;;  %v1809_v29 = vld [vmem:[%s2391_s1 + $0x80] sm:$0xff]   ;;  %v1815_v32 = vld [vmem:[%s2391_s1 + $0x128] sm:$0xff]  }
   0xc   :  { %1618 = vmatprep.subr.bf16.mxu1 %v1787_v6  ;;  %v1813_v33 = vld [vmem:[%s2391_s1 + $0x88] sm:$0xff]   ;;  %v1816_v34 = vld [vmem:[%s2391_s1 + $0xd0] sm:$0xff]   ;;  %v1820_v38 = vld [vmem:[%s2391_s1 + $0xd8] sm:$0xff]  }
   0xd   :  { %1673 = vmatpush3.bf16.msra.mxu0 %v1800_v17  ;;  %v1818_v35 = vld [vmem:[%s2391_s1 + $0x170] sm:$0xff]   ;;  %v1822_v39 = vld [vmem:[%s2391_s1 + $0x178] sm:$0xff]   ;;  %v1824_v42 = vld [vmem:[%s2391_s1 + $0xe0] sm:$0xff]  }
   0xe   :  { %1674 = vmatprep.subr.bf16.mxu0 %v1803_v20  ;;  %v1819_v36 = vld [vmem:[%s2391_s1 + $0x130] sm:$0xff]   ;;  %v1823_v40 = vld [vmem:[%s2391_s1 + $0x138] sm:$0xff]   ;;  %v1825_v45 = vld [vmem:[%s2391_s1 + $0xa0] sm:$0xff]  }
   0xf   :  { %1619 = vmatpush3.bf16.msra.mxu1 %v1788_v7  ;;  %v1817_v37 = vld [vmem:[%s2391_s1 + $0x90] sm:$0xff]   ;;  %v1821_v41 = vld [vmem:[%s2391_s1 + $0x98] sm:$0xff]   ;;  %v1829_v46 = vld [vmem:[%s2391_s1 + $0x240] sm:$0xff]  }
  0x10   :  { %1620 = vmatprep.subr.bf16.mxu1 %v1789_v10  ;;  %v1826_v43 = vld [vmem:[%s2392_s0 + $0x10] ss:$56 sps:$4 sm:$0xff]   ;;  %v1828_v44 = vld [vmem:[%s2392_s0 + $0x14] ss:$56 sps:$4 sm:$0xff]   ;;  %v1830_v47 = vld [vmem:[%s2391_s1 + $0x200] sm:$0xff]  }
  0x11   :  { %1675 = vmatpush3.bf16.msra.mxu0 %v1807_v23  ;;  %1179 = vmatprep.mubr.bf16.mxu0 %v1828_v44  ;;  %v1831_v48 = vld [vmem:[%s2391_s1 + $0xe8] sm:$0xff]   ;;  %v1838_v54 = vld [vmem:[%s2391_s1 + $0xf0] sm:$0xff]   ;;  %v1842_v58 = vld [vmem:[%s2391_s1 + $0xf8] sm:$0xff]   ;;  %v1933_v23 = vmov 0  }
  0x12   :  { %1676 = vmatprep.subr.bf16.mxu0 %v1810_v27  ;;  %v1832_v49 = vld [vmem:[%s2392_s0 + $0x74] ss:$56 sps:$4 sm:$0xff]   ;;  %v1835_v51 = vld [vmem:[%s2392_s0 + $0x70] ss:$56 sps:$4 sm:$0xff]   ;;  %v1844_v59 = vld [vmem:[%s2391_s1 + $0x258] sm:$0xff]  }
  0x13   :  { %1621 = vmatpush3.bf16.msra.mxu1 %v1790_v11  ;;  %v1834_v50 = vld [vmem:[%s2391_s1 + $0xa8] sm:$0xff]   ;;  %v1839_v55 = vld [vmem:[%s2391_s1 + $0xb0] sm:$0xff]   ;;  %v1843_v60 = vld [vmem:[%s2391_s1 + $0xb8] sm:$0xff]  }
  0x14   :  { %1622 = vmatprep.subr.bf16.mxu1 %v1793_v14  ;;  %v1836_v52 = vld [vmem:[%s2391_s1 + $0x248] sm:$0xff]   ;;  %v1840_v56 = vld [vmem:[%s2391_s1 + $0x250] sm:$0xff]   ;;  %v1848_v63 = vld [vmem:[%s2391_s1 + $0x218] sm:$0xff]  }
  0x15   :  { %1677 = vmatpush3.bf16.msra.mxu0 %v1811_v28  ;;  %v1837_v53 = vld [vmem:[%s2391_s1 + $0x208] sm:$0xff]   ;;  %v1841_v57 = vld [vmem:[%s2391_s1 + $0x210] sm:$0xff]   ;;  %v1849_v0 = vld [vmem:[%s2391_s1 + $0x1c0] sm:$0xff]  }
  0x16   :  { %1678 = vmatprep.subr.bf16.mxu0 %v1814_v31  ;;  %v1845_v61 = vld [vmem:[%s2392_s0 + $0x8] ss:$56 sps:$4 sm:$0xff]   ;;  %v1847_v62 = vld [vmem:[%s2392_s0 + $0xc] ss:$56 sps:$4 sm:$0xff]   ;;  %v1856_v7 = vld [vmem:[%s2392_s0 + $0x7c] ss:$56 sps:$4 sm:$0xff]  }
  0x17   :  { %1623 = vmatpush3.bf16.msra.mxu1 %v1794_v15  ;;  %v1850_v1 = vld [vmem:[%s2391_s1 + $0x180] sm:$0xff]   ;;  %v1853_v4 = vld [vmem:[%s2391_s1 + $0x1c8] sm:$0xff]   ;;  %v1859_v9 = vld [vmem:[%s2392_s0 + $0x78] ss:$56 sps:$4 sm:$0xff]  }
  0x18   :  { %1624 = vmatprep.subr.bf16.mxu1 %v1797_v18  ;;  %v1851_v2 = vld [vmem:[%s2391_s1 + $0x260] sm:$0xff]   ;;  %v1854_v5 = vld [vmem:[%s2391_s1 + $0x188] sm:$0xff]   ;;  %v1860_v10 = vld [vmem:[%s2391_s1 + $0x1d0] sm:$0xff]  }
  0x19   :  { %1679 = vmatpush3.bf16.msra.mxu0 %v1815_v32  ;;  %v1852_v3 = vld [vmem:[%s2391_s1 + $0x220] sm:$0xff]   ;;  %v1855_v6 = vld [vmem:[%s2391_s1 + $0x268] sm:$0xff]   ;;  %v1863_v12 = vld [vmem:[%s2391_s1 + $0x190] sm:$0xff]  }
  0x1a   :  { %1680 = vmatprep.subr.bf16.mxu0 %v1818_v35  ;;  %v1858_v8 = vld [vmem:[%s2391_s1 + $0x228] sm:$0xff]   ;;  %v1861_v11 = vld [vmem:[%s2392_s0 + $0x84] ss:$56 sps:$4 sm:$0xff]   ;;  %v1864_v13 = vld [vmem:[%s2392_s0 + $0x80] ss:$56 sps:$4 sm:$0xff]  }
  0x1b   :  { %1625 = vmatpush3.bf16.msra.mxu1 %v1798_v19  ;;  %v1865_v14 = vld [vmem:[%s2391_s1 + $0x270] sm:$0xff]   ;;  %v1867_v16 = vld [vmem:[%s2391_s1 + $0x1d8] sm:$0xff]   ;;  %v1871_v20 = vld [vmem:[%s2391_s1 + $0x1e0] sm:$0xff]  }
  0x1c   :  { %1626 = vmatprep.subr.bf16.mxu1 %v1801_v21  ;;  %v1866_v15 = vld [vmem:[%s2391_s1 + $0x230] sm:$0xff]   ;;  %v1868_v17 = vld [vmem:[%s2391_s1 + $0x198] sm:$0xff]   ;;  %v1872_v21 = vld [vmem:[%s2391_s1 + $0x1a0] sm:$0xff]  }
  0x1d   :  { %1681 = vmatpush3.bf16.msra.mxu0 %v1819_v36  ;;  %v1869_v18 = vld [vmem:[%s2391_s1 + $0x278] sm:$0xff]   ;;  %v1878_v27 = vld [vmem:[%s2391_s1 + $0x1a8] sm:$0xff]   ;;  %v1882_v31 = vld [vmem:[%s2391_s1 + $0x310] sm:$0xff]  }
  0x1e   :  { %1682 = vmatprep.subr.bf16.mxu0 %v1822_v39  ;;  %v1870_v19 = vld [vmem:[%s2391_s1 + $0x238] sm:$0xff]   ;;  %v1879_v28 = vld [vmem:[%s2391_s1 + $0x308] sm:$0xff]   ;;  %v1891_v39 = vld [vmem:[%s2391_s1 + $0x320] sm:$0xff]  }
  0x1f   :  { %1627 = vmatpush3.bf16.msra.mxu1 %v1802_v24  ;;  %v1873_v22 = vld [vmem:[%s2392_s0 + $0x20] ss:$56 sps:$4 sm:$0xff]   ;;  %v1875_v24 = vld [vmem:[%s2392_s0 + $0x24] ss:$56 sps:$4 sm:$0xff]  }
  0x20   :  { %1640 = vmatprep.subr.bf16.mxu1 %v1808_v25  ;;  %v1876_v25 = vld [vmem:[%s2391_s1 + $0x300] sm:$0xff]   ;;  %v1883_v32 = vld [vmem:[%s2391_s1 + $0x1f8] sm:$0xff]  }
  0x21   :  { %1683 = vmatpush3.bf16.msra.mxu0 %v1823_v40  ;;  %v1887_v35 = vld [vmem:[%s2392_s0 + $0x1c] ss:$56 sps:$4 sm:$0xff]   ;;  %v1892_v40 = vld [vmem:[%s2391_s1 + $0x2c8] sm:$0xff]  }
  0x22   :  { %1082 = vmatmul.mubr.bf16.vlgmr.msra.gmra.mrb[0].mxu1 %v1804_v26  ;;  %1724 = vmatprep.subr.bf16.mxu0 %v1829_v46  ;;  %v1877_v26 = vld [vmem:[%s2391_s1 + $0x1e8] sm:$0xff]   ;;  %v1888_v36 = vld [vmem:[%s2391_s1 + $0x318] sm:$0xff]  }
  0x23   :  { %1641 = vmatpush3.bf16.msra.mxu1 %v1809_v29  ;;  %1089 = vmatprep.mubr.bf16.mxu1 %v1832_v49  ;;  %v1880_v29 = vld [vmem:[%s2391_s1 + $0x1f0] sm:$0xff]   ;;  %v1897_v44 = vld [vmem:[%s2392_s0 + $0x88] ss:$56 sps:$4 sm:$0xff]  }
  0x24   :  { %1642 = vmatprep.subr.bf16.mxu1 %v1812_v30  ;;  %1180 = vmatmul.mubr.bf16.vlgmr.msra.gmra.mrb[0].mxu0 %v1826_v43  ;;  %v1881_v30 = vld [vmem:[%s2391_s1 + $0x1b0] sm:$0xff]   ;;  %v1896_v43 = vld [vmem:[%s2391_s1 + $0x328] sm:$0xff]  }
  0x25   :  { %1725 = vmatpush3.bf16.msra.mxu0 %v1830_v47  ;;  %1187 = vmatprep.mubr.bf16.mxu0 %v1861_v11  ;;  %v1899_v46 = vld [vmem:[%s2392_s0 + $0x94] ss:$56 sps:$4 sm:$0xff]  }
  0x26   :  { %1726 = vmatprep.subr.bf16.mxu0 %v1836_v52  ;;  %v1901_v47 = vld [vmem:[%s2391_s1 + $0x290] sm:$0xff]   ;;  %v1907_v52 = vld [vmem:[%s2391_s1 + $0x2e0] sm:$0xff]  }
  0x27   :  { %1643 = vmatpush3.bf16.msra.mxu1 %v1813_v33  ;;  %v1884_v33 = vld [vmem:[%s2391_s1 + $0x1b8] sm:$0xff]   ;;  %v1903_v49 = vld [vmem:[%s2391_s1 + $0x330] sm:$0xff]  }
  0x28   :  { %1644 = vmatprep.subr.bf16.mxu1 %v1816_v34  ;;  %v1885_v34 = vld [vmem:[%s2392_s0 + $0x18] ss:$56 sps:$4 sm:$0xff]  }
  0x29   :  { %1727 = vmatpush3.bf16.msra.mxu0 %v1837_v53  ;;  %v1906_v53 = vld [vmem:[%s2391_s1 + $0x338] sm:$0xff]  }
  0x2a   :  { %1090 = vmatmul.mubr.bf16.gmra.mrb[4].mxu1 %v1835_v51  ;;  %1728 = vmatprep.subr.bf16.mxu0 %v1840_v56  ;;  %v1905_v51 = vld [vmem:[%s2391_s1 + $0x298] sm:$0xff]   ;;  %v1909_v56 = vld [vmem:[%s2391_s1 + $0x340] sm:$0xff]  }
  0x2b   :  { %1645 = vmatpush3.bf16.msra.mxu1 %v1817_v37  ;;  %1130 = vmatprep.mubr.bf16.mxu1 %v1847_v62  ;;  %v1889_v37 = vld [vmem:[%s2391_s1 + $0x2c0] sm:$0xff]  }
  0x2c   :  { %1646 = vmatprep.subr.bf16.mxu1 %v1820_v38  ;;  %1188 = vmatmul.mubr.bf16.gmra.mrb[4].mxu0 %v1864_v13  ;;  %v1890_v38 = vld [vmem:[%s2391_s1 + $0x280] sm:$0xff]  }
  0x2d   :  { %1729 = vmatpush3.bf16.msra.mxu0 %v1841_v57  ;;  %1277 = vmatprep.mubr.bf16.mxu0 %v1875_v24  ;;  %v1911_v57 = vld [vmem:[%s2391_s1 + $0x2a8] sm:$0xff]  }
  0x2e   :  { %1730 = vmatprep.subr.bf16.mxu0 %v1844_v59  ;;  %v1912_v59 = vld [vmem:[%s2391_s1 + $0x348] sm:$0xff]  }
  0x2f   :  { %1647 = vmatpush3.bf16.msra.mxu1 %v1821_v41  ;;  %v1893_v41 = vld [vmem:[%s2391_s1 + $0x288] sm:$0xff]  }
  0x30   :  { %1648 = vmatprep.subr.bf16.mxu1 %v1824_v42  ;;  %v1894_v42 = vld [vmem:[%s2392_s0 + $0x8c] ss:$56 sps:$4 sm:$0xff]  }
  0x31   :  { %1731 = vmatpush3.bf16.msra.mxu0 %v1848_v63  ;;  %v1920_v62 = vld [vmem:[%s2392_s0 + $0x2c] ss:$56 sps:$4 sm:$0xff]   ;;  %v1915_v63 = vld [vmem:[%s2391_s1 + $0x350] sm:$0xff]  }
  0x32   :  { %1732 = vmatprep.subr.bf16.mxu0 %v1851_v2  ;;  %v1918_v2 = vld [vmem:[%s2392_s0 + $0x28] ss:$56 sps:$4 sm:$0xff]  }
  0x33   :  { %1649 = vmatpush3.bf16.msra.mxu1 %v1825_v45  ;;  %v1898_v45 = vld [vmem:[%s2391_s1 + $0x2d0] sm:$0xff]  }
  0x34   :  { %1650 = vmatprep.subr.bf16.mxu1 %v1831_v48  ;;  %v1902_v48 = vld [vmem:[%s2392_s0 + $0x90] ss:$56 sps:$4 sm:$0xff]  }
  0x35   :  { %1733 = vmatpush3.bf16.msra.mxu0 %v1852_v3  ;;  %v1921_v3 = vld [vmem:[%s2391_s1 + $0x358] sm:$0xff]  }
  0x36   :  { %1734 = vmatprep.subr.bf16.mxu0 %v1855_v6  ;;  %v1928_v6 = vld [vmem:[%s2392_s0 + $0xa4] ss:$56 sps:$4 sm:$0xff]  }
  0x37   :  { %1651 = vmatpush3.bf16.msra.mxu1 %v1834_v50  ;;  %v1904_v50 = vld [vmem:[%s2391_s1 + $0x2d8] sm:$0xff]  }
  0x38   :  { %1652 = vmatprep.subr.bf16.mxu1 %v1838_v54  ;;  %v1908_v54 = vld [vmem:[%s2391_s1 + $0x2a0] sm:$0xff]  }
  0x39   :  { %1735 = vmatpush3.bf16.msra.mxu0 %v1858_v8  ;;  %v1930_v8 = vld [vmem:[%s2392_s0 + $0xa0] ss:$56 sps:$4 sm:$0xff]  }
  0x3a   :  { %1736 = vmatprep.subr.bf16.mxu0 %v1865_v14 }
  0x3b   :  { %1653 = vmatpush3.bf16.msra.mxu1 %v1839_v55  ;;  %v1910_v55 = vld [vmem:[%s2391_s1 + $0x2e8] sm:$0xff]  }
  0x3c   :  { %1654 = vmatprep.subr.bf16.mxu1 %v1842_v58  ;;  %v1913_v58 = vld [vmem:[%s2391_s1 + $0x2f0] sm:$0xff]  }
  0x3d   :  { %1737 = vmatpush3.bf16.msra.mxu0 %v1866_v15 }
  0x3e   :  { %1738 = vmatprep.subr.bf16.mxu0 %v1869_v18 }
  0x3f   :  { %1655 = vmatpush3.bf16.msra.mxu1 %v1843_v60  ;;  %v1914_v60 = vld [vmem:[%s2391_s1 + $0x2b0] sm:$0xff]  }
  0x40   :  { %1696 = vmatprep.subr.bf16.mxu1 %v1849_v0  ;;  %v1924_v0 = vld [vmem:[%s2392_s0 + $0x34] ss:$56 sps:$4 sm:$0xff]  }
  0x41   :  { %1739 = vmatpush3.bf16.msra.mxu0 %v1870_v19 }
  0x42   :  { %1131 = vmatmul.mubr.bf16.vlgmr.msra.gmra.mrb[8].mxu1 %v1845_v61  ;;  %1343 = vmatprep.subr.bf16.mxu0 %v1933_v23  ;;  %v1916_v61 = vld [vmem:[%s2391_s1 + $0x2f8] sm:$0xff]  }
  0x43   :  { %1697 = vmatpush3.bf16.msra.mxu1 %v1850_v1  ;;  %1138 = vmatprep.mubr.bf16.mxu1 %v1856_v7  ;;  %v1917_v1 = vld [vmem:[%s2391_s1 + $0x2b8] sm:$0xff]  }
  0x44   :  { %1698 = vmatprep.subr.bf16.mxu1 %v1853_v4  ;;  %1278 = vmatmul.mubr.bf16.vlgmr.msra.gmra.mrb[8].mxu0 %v1873_v22  ;;  %v1925_v4 = vld [vmem:[%s2392_s0 + $0x9c] ss:$56 sps:$4 sm:$0xff]   ;;  %v1927_v7 = vld [vmem:[%s2392_s0 + $0x98] ss:$56 sps:$4 sm:$0xff]  }
  0x45   :  { %1344 = vmatpush1.bf16.msra.mxu0 %v1876_v25  ;;  %1285 = vmatprep.mubr.bf16.mxu0 %v1899_v46 }
  0x46   :  { %1345 = vmatprep.subr.bf16.mxu0 %v1933_v23 }
  0x47   :  { %1699 = vmatpush3.bf16.msra.mxu1 %v1854_v5  ;;  %v1922_v5 = vld [vmem:[%s2392_s0 + $0x30] ss:$56 sps:$4 sm:$0xff]  }
  0x48   :  { %1700 = vmatprep.subr.bf16.mxu1 %v1860_v10 }
  0x49   :  { %1346 = vmatpush1.bf16.msra.mxu0 %v1879_v28 }
  0x4a   :  { %1139 = vmatmul.mubr.bf16.gmra.mrb[12].mxu1 %v1859_v9  ;;  %1347 = vmatprep.subr.bf16.mxu0 %v1933_v23 }
  0x4b   :  { %1701 = vmatpush3.bf16.msra.mxu1 %v1863_v12  ;;  %1228 = vmatprep.mubr.bf16.mxu1 %v1887_v35 }
  0x4c   :  { %1702 = vmatprep.subr.bf16.mxu1 %v1867_v16  ;;  %1286 = vmatmul.mubr.bf16.gmra.mrb[12].mxu0 %v1902_v48 }
  0x4d   :  { %1348 = vmatpush1.bf16.msra.mxu0 %v1882_v31  ;;  %1602 = vmatprep.mubr.msk.bf16.mxu0 %vm1042_vm0, %v1924_v0 }
  0x4e   :  { %1349 = vmatprep.subr.bf16.mxu0 %v1933_v23 }
  0x4f   :  { %1703 = vmatpush3.bf16.msra.mxu1 %v1868_v17 }
  0x50   :  { %1704 = vmatprep.subr.bf16.mxu1 %v1871_v20 }
  0x51   :  { %1350 = vmatpush1.bf16.msra.mxu0 %v1888_v36 }
  0x52   :  { %1351 = vmatprep.subr.bf16.mxu0 %v1933_v23 }
  0x53   :  { %1705 = vmatpush3.bf16.msra.mxu1 %v1872_v21 }
  0x54   :  { %1706 = vmatprep.subr.bf16.mxu1 %v1877_v26 }
  0x55   :  { %1352 = vmatpush1.bf16.msra.mxu0 %v1891_v39 }
  0x56   :  { %1353 = vmatprep.subr.bf16.mxu0 %v1933_v23 }
  0x57   :  { %1707 = vmatpush3.bf16.msra.mxu1 %v1878_v27 }
  0x58   :  { %1708 = vmatprep.subr.bf16.mxu1 %v1880_v29 }
  0x59   :  { %1354 = vmatpush1.bf16.msra.mxu0 %v1896_v43 }
  0x5a   :  { %1355 = vmatprep.subr.bf16.mxu0 %v1933_v23 }
  0x5b   :  { %1709 = vmatpush3.bf16.msra.mxu1 %v1881_v30 }
  0x5c   :  { %1710 = vmatprep.subr.bf16.mxu1 %v1883_v32 }
  0x5d   :  { %1356 = vmatpush1.bf16.msra.mxu0 %v1903_v49 }
  0x5e   :  { %1357 = vmatprep.subr.bf16.mxu0 %v1933_v23 }
  0x5f   :  { %1711 = vmatpush3.bf16.msra.mxu1 %v1884_v33 }
  0x60   :  { %1752 = vmatprep.subr.bf16.mxu1 %v1889_v37 }
  0x61   :  { %1358 = vmatpush1.bf16.msra.mxu0 %v1906_v53 }
  0x62   :  { %1229 = vmatmul.mubr.bf16.vlgmr.msra.gmra.mrb[16].mxu1 %v1885_v34  ;;  %1359 = vmatprep.subr.bf16.mxu0 %v1933_v23 }
  0x63   :  { %1753 = vmatpush3.bf16.msra.mxu1 %v1890_v38  ;;  %1236 = vmatprep.mubr.bf16.mxu1 %v1894_v42 }
  0x64   :  { %1754 = vmatprep.subr.bf16.mxu1 %v1892_v40 }
  0x65   :  { %1360 = vmatpush1.bf16.msra.mxu0 %v1909_v56 }
  0x66   :  { %1361 = vmatprep.subr.bf16.mxu0 %v1933_v23 }
  0x67   :  { %1755 = vmatpush3.bf16.msra.mxu1 %v1893_v41 }
  0x68   :  { %1756 = vmatprep.subr.bf16.mxu1 %v1898_v45 }
  0x69   :  { %1362 = vmatpush1.bf16.msra.mxu0 %v1912_v59 }
  0x6a   :  { %1237 = vmatmul.mubr.bf16.gmra.mrb[20].mxu1 %v1897_v44  ;;  %1363 = vmatprep.subr.bf16.mxu0 %v1933_v23 }
  0x6b   :  { %1757 = vmatpush3.bf16.msra.mxu1 %v1901_v47  ;;  %1326 = vmatprep.mubr.bf16.mxu1 %v1920_v62 }
  0x6c   :  { %1758 = vmatprep.subr.bf16.mxu1 %v1904_v50 }
  0x6d   :  { %1364 = vmatpush1.bf16.msra.mxu0 %v1915_v63 }
  0x6e   :  { %1365 = vmatprep.subr.bf16.mxu0 %v1933_v23 }
  0x6f   :  { %1759 = vmatpush3.bf16.msra.mxu1 %v1905_v51 }
  0x70   :  { %1760 = vmatprep.subr.bf16.mxu1 %v1907_v52 }
  0x71   :  { %1366 = vmatpush1.bf16.msra.mxu0 %v1921_v3 }
  0x73   :  { %1761 = vmatpush3.bf16.msra.mxu1 %v1908_v54 }
  0x74   :  { %1762 = vmatprep.subr.bf16.mxu1 %v1910_v55  ;;  %1376 = vmatmul.mubr.bf16.vlgmr.msra.gmra.mrb[16].mxu0 %v1922_v5 }
  0x75   :  { %1603 = vmatprep.mubr.msk.bf16.mxu0 %vm1042_vm0, %v1928_v6 }
  0x77   :  { %1763 = vmatpush3.bf16.msra.mxu1 %v1911_v57 }
  0x78   :  { %1764 = vmatprep.subr.bf16.mxu1 %v1913_v58 }
  0x7b   :  { %1765 = vmatpush3.bf16.msra.mxu1 %v1914_v60 }
  0x7c   :  { %1766 = vmatprep.subr.bf16.mxu1 %v1916_v61  ;;  %1384 = vmatmul.mubr.bf16.gmra.mrb[20].mxu0 %v1930_v8 }
  0x7f   :  { %1767 = vmatpush3.bf16.msra.mxu1 %v1917_v1 }
  0x82   :  { %1327 = vmatmul.mubr.bf16.vlgmr.msra.gmra.mrb[24].mxu1 %v1918_v2 }
  0x83   :  { %1334 = vmatprep.mubr.bf16.mxu1 %v1925_v4 }
  0x8a   :  { %1335 = vmatmul.mubr.bf16.gmra.mrb[28].mxu1 %v1927_v7 }
  0xf5   :  { %v1628_v9 = vpop.f32.mrb[0].mxu1 }
  0xf6   :  { %v1629_v10 = vpop.f32.mrb[1].mxu1 }
  0xf7   :  { %v1630_v11 = vadd.f32 %v1629_v10, %v1628_v9  ;;  %v1631_v12 = vpop.f32.mrb[2].mxu1  ;;  %v1684_v15 = vpop.f32.mrb[0].mxu0 }
  0xf8   :  { %v1632_v13 = vpop.f32.mrb[3].mxu1  ;;  %v1685_v16 = vpop.f32.mrb[1].mxu0 }
  0xf9   :  { %v1633_v14 = vadd.f32 %v1632_v13, %v1631_v12  ;;  %v1686_v17 = vadd.f32 %v1685_v16, %v1684_v15  ;;  %v1687_v18 = vpop.f32.mrb[2].mxu0 }
  0xfa   :  { %v1688_v19 = vpop.f32.mrb[3].mxu0 }
  0xfb   :  { %v1689_v21 = vadd.f32 %v1688_v19, %v1687_v18 }
  0xfd   :  { %v1634_v20 = vpop.f32.mrb[4].mxu1 }
  0xfe   :  { %v1635_v22 = vpop.f32.mrb[5].mxu1 }
  0xff   :  { %v1636_v23 = vadd.f32 %v1635_v22, %v1634_v20  ;;  %v1637_v24 = vpop.f32.mrb[6].mxu1  ;;  %v1690_v39 = vpop.f32.mrb[4].mxu0 }
 0x100   :  { %v1638_v25 = vpop.f32.mrb[7].mxu1  ;;  %v1691_v42 = vpop.f32.mrb[5].mxu0 }
 0x101   :  { %v1639_v26 = vadd.f32 %v1638_v25, %v1637_v24  ;;  %v1692_v44 = vadd.f32 %v1691_v42, %v1690_v39  ;;  %v1693_v45 = vpop.f32.mrb[6].mxu0 }
 0x102   :  { %v1694_v48 = vpop.f32.mrb[7].mxu0 }
 0x103   :  { %v1695_v49 = vadd.f32 %v1694_v48, %v1693_v45 }
 0x115   :  { %v1656_v27 = vpop.f32.mrb[8].mxu1 }
 0x116   :  { %v1657_v28 = vpop.f32.mrb[9].mxu1 }
 0x117   :  { %v1658_v29 = vadd.f32 %v1657_v28, %v1656_v27  ;;  %v1659_v30 = vpop.f32.mrb[10].mxu1  ;;  %v1740_v53 = vpop.f32.mrb[8].mxu0 }
 0x118   :  { %v1660_v31 = vpop.f32.mrb[11].mxu1  ;;  %v1741_v54 = vpop.f32.mrb[9].mxu0 }
 0x119   :  { %v1133_v32 = vadd.f32 %v1658_v29, %v1630_v11  ;;  %v1661_v33 = vadd.f32 %v1660_v31, %v1659_v30  ;;  %v1742_v55 = vadd.f32 %v1741_v54, %v1740_v53  ;;  %v1743_v56 = vpop.f32.mrb[10].mxu0 }
 0x11a   :  { %v1744_v57 = vpop.f32.mrb[11].mxu0 }
 0x11b   :  { %v1136_v34 = vadd.f32 %v1661_v33, %v1633_v14  ;;  %v1182_v35 = vadd.f32 %v1686_v17, %v1133_v32  ;;  %v1745_v58 = vadd.f32 %v1744_v57, %v1743_v56 }
 0x11d   :  { %v1662_v36 = vpop.f32.mrb[12].mxu1  ;;  %v1185_v37 = vadd.f32 %v1689_v21, %v1136_v34 }
 0x11e   :  { %v1663_v38 = vpop.f32.mrb[13].mxu1 }
 0x11f   :  { %v1664_v40 = vadd.f32 %v1663_v38, %v1662_v36  ;;  %v1665_v41 = vpop.f32.mrb[14].mxu1  ;;  %v1746_v7 = vpop.f32.mrb[12].mxu0 }
 0x120   :  { %v1666_v43 = vpop.f32.mrb[15].mxu1  ;;  %v1747_v10 = vpop.f32.mrb[13].mxu0 }
 0x121   :  { %v1141_v46 = vadd.f32 %v1664_v40, %v1636_v23  ;;  %v1667_v47 = vadd.f32 %v1666_v43, %v1665_v41  ;;  %v1748_v12 = vadd.f32 %v1747_v10, %v1746_v7  ;;  %v1749_v13 = vpop.f32.mrb[14].mxu0 }
 0x122   :  { %v1750_v16 = vpop.f32.mrb[15].mxu0 }
 0x123   :  { %v1144_v50 = vadd.f32 %v1667_v47, %v1639_v26  ;;  %v1190_v51 = vadd.f32 %v1692_v44, %v1141_v46  ;;  %v1751_v17 = vadd.f32 %v1750_v16, %v1749_v13 }
 0x125   :  { %v1193_v52 = vadd.f32 %v1695_v49, %v1144_v50 }
 0x135   :  { %v1712_v59 = vpop.f32.mrb[16].mxu1 }
 0x136   :  { %v1713_v60 = vpop.f32.mrb[17].mxu1 }
 0x137   :  { %v1714_v61 = vadd.f32 %v1713_v60, %v1712_v59  ;;  %v1715_v62 = vpop.f32.mrb[18].mxu1 }
 0x138   :  { %v1716_v63 = vpop.f32.mrb[19].mxu1 }
 0x139   :  { %v1231_v0 = vadd.f32 %v1714_v61, %v1182_v35  ;;  %v1717_v1 = vadd.f32 %v1716_v63, %v1715_v62 }
 0x13b   :  { %v1234_v2 = vadd.f32 %v1717_v1, %v1185_v37  ;;  %v1280_v3 = vadd.f32 %v1742_v55, %v1231_v0 }
 0x13d   :  { %v1718_v4 = vpop.f32.mrb[20].mxu1  ;;  %v1283_v5 = vadd.f32 %v1745_v58, %v1234_v2 }
 0x13e   :  { %v1719_v6 = vpop.f32.mrb[21].mxu1 }
 0x13f   :  { %v1720_v8 = vadd.f32 %v1719_v6, %v1718_v4  ;;  %v1721_v9 = vpop.f32.mrb[22].mxu1 }
 0x140   :  { %v1722_v11 = vpop.f32.mrb[23].mxu1 }
 0x141   :  { %v1239_v14 = vadd.f32 %v1720_v8, %v1190_v51  ;;  %v1723_v15 = vadd.f32 %v1722_v11, %v1721_v9 }
 0x143   :  { %v1242_v18 = vadd.f32 %v1723_v15, %v1193_v52  ;;  %v1288_v19 = vadd.f32 %v1748_v12, %v1239_v14 }
 0x145   :  { %v1291_v20 = vadd.f32 %v1751_v17, %v1242_v18 }
 0x147   :  { %v1377_v25 = vpop.f32.mrb[16].mxu0 }
 0x148   :  { %v1379_v29 = vpop.f32.mrb[17].mxu0 }
 0x149   :  { %v1380_v30 = vpop.f32.mrb[18].mxu0 }
 0x14a   :  { %v1382_v33 = vpop.f32.mrb[19].mxu0 }
 0x14f   :  { %v1385_v44 = vpop.f32.mrb[20].mxu0 }
 0x150   :  { %v1387_v50 = vpop.f32.mrb[21].mxu0 }
 0x151   :  { %v1388_v52 = vpop.f32.mrb[22].mxu0 }
 0x152   :  { %v1390_v55 = vpop.f32.mrb[23].mxu0 }
 0x155   :  { %v1768_v21 = vpop.f32.mrb[24].mxu1 }
 0x156   :  { %v1769_v22 = vpop.f32.mrb[25].mxu1 }
 0x157   :  { %v1770_v23 = vadd.f32 %v1769_v22, %v1768_v21  ;;  %v1771_v24 = vpop.f32.mrb[26].mxu1 }
 0x158   :  { %v1772_v26 = vpop.f32.mrb[27].mxu1 }
 0x159   :  { %v1329_v27 = vadd.f32 %v1770_v23, %v1280_v3  ;;  %v1773_v28 = vadd.f32 %v1772_v26, %v1771_v24 }
 0x15b   :  { %v1378_v31 = vadd.f32 %v1377_v25, %v1329_v27  ;;  %v1332_v32 = vadd.f32 %v1773_v28, %v1283_v5 }
 0x15d   :  { %v1406_v34 = vmul.f32 %v1378_v31, %v1378_v31  ;;  %v1381_v35 = vadd.f32 %v1380_v30, %v1332_v32  ;;  %v1774_v36 = vpop.f32.mrb[28].mxu1  ;;  %v1392_v38 = vsel %vm1042_vm0, %v1378_v31, 0.0 }
 0x15e   :  { %v1775_v37 = vpop.f32.mrb[29].mxu1 }
 0x15f   :  { %v1393_v39 = vsel %vm1042_vm0, %v1381_v35, 0.0  ;;  %v1407_v40 = vmul.f32 %v1381_v35, %v1381_v35  ;;  %v1776_v41 = vadd.f32 %v1775_v37, %v1774_v36  ;;  %v1777_v42 = vpop.f32.mrb[30].mxu1  ;;  %v1410_v46 = vsel %vm1042_vm0, %v1406_v34, 0.0 }
 0x160   :  { %v1394_v43 = vadd.f32 %v1393_v39, %v1392_v38  ;;  %v1778_v45 = vpop.f32.mrb[31].mxu1 }
 0x161   :  { %v1411_v47 = vsel %vm1042_vm0, %v1407_v40, 0.0  ;;  %v1337_v48 = vadd.f32 %v1776_v41, %v1288_v19  ;;  %v1779_v49 = vadd.f32 %v1778_v45, %v1777_v42 }
 0x162   :  { %v1412_v51 = vadd.f32 %v1411_v47, %v1410_v46 }
 0x163   :  { %v1386_v53 = vadd.f32 %v1385_v44, %v1337_v48  ;;  %v1340_v54 = vadd.f32 %v1779_v49, %v1291_v20 }
 0x165   :  { %v1395_v56 = vsel %vm1042_vm0, %v1386_v53, 0.0  ;;  %v1408_v57 = vmul.f32 %v1386_v53, %v1386_v53  ;;  %v1389_v58 = vadd.f32 %v1388_v52, %v1340_v54 }
 0x166   :  { %v1396_v59 = vadd.f32 %v1395_v56, %v1394_v43 }
 0x167   :  { %v1413_v60 = vsel %vm1042_vm0, %v1408_v57, 0.0  ;;  %v1397_v61 = vsel %vm1042_vm0, %v1389_v58, 0.0  ;;  %v1409_v62 = vmul.f32 %v1389_v58, %v1389_v58 }
 0x168   :  { %v1414_v63 = vadd.f32 %v1413_v60, %v1412_v51  ;;  %v1398_v0 = vadd.f32 %v1397_v61, %v1396_v59 }
 0x169   :  { %v1415_v1 = vsel %vm1042_vm0, %v1409_v62, 0.0 }
 0x16a   :  { %v1399_v2 = vrot.slane %v1398_v0, 4  ;;  %v1416_v3 = vadd.f32 %v1415_v1, %v1414_v63 }
 0x16c   :  { %v1400_v4 = vadd.f32 %v1399_v2, %v1398_v0  ;;  %v1417_v5 = vrot.slane %v1416_v3, 4 }
 0x16e   :  { %v1401_v6 = vrot.slane %v1400_v4, 2  ;;  %v1418_v7 = vadd.f32 %v1417_v5, %v1416_v3 }
 0x170   :  { %v1402_v8 = vadd.f32 %v1401_v6, %v1400_v4  ;;  %v1419_v9 = vrot.slane %v1418_v7, 2 }
 0x172   :  { %v1403_v10 = vrot.slane %v1402_v8, 1  ;;  %v1420_v11 = vadd.f32 %v1419_v9, %v1418_v7 }
 0x174   :  { %v1404_v12 = vadd.f32 %v1403_v10, %v1402_v8  ;;  %v1421_v13 = vrot.slane %v1420_v11, 1 }
 0x176   :  { %v1405_v14 = vmul.f32 0.03125, %v1404_v12  ;;  %v1422_v15 = vadd.f32 %v1421_v13, %v1420_v11 }
 0x178   :  { %v1423_v16 = vmul.f32 0.03125, %v1422_v15  ;;  %v1424_v17 = vmul.f32 %v1405_v14, %v1405_v14  ;;  %v1427_v18 = vsub.f32 %v1378_v31, %v1405_v14  ;;  %v1428_v19 = vsub.f32 %v1381_v35, %v1405_v14 }
 0x179   :  { %v1429_v20 = vsub.f32 %v1386_v53, %v1405_v14  ;;  %v1430_v21 = vsub.f32 %v1389_v58, %v1405_v14 }
 0x17a   :  { %v1425_v22 = vsub.f32 %v1423_v16, %v1424_v17 }
 0x17c   :  { %v1426_v23 = vmax.f32 %v1425_v22, 0.0 }
 0x17e   :  { %v1431_v24 = vadd.f32 1e-05, %v1426_v23 }
 0x180   :  { %1931 = vrsqrt.f32 %v1431_v24 }
 0x18a   :  { %v1932_v25 = vpop.eup %1931 }
 0x18b   :  { %v1433_v26 = vmul.f32 %v1932_v25, %v1427_v18  ;;  %v1434_v27 = vmul.f32 %v1932_v25, %v1428_v19  ;;  %v1435_v28 = vmul.f32 %v1932_v25, %v1429_v20  ;;  %v1436_v29 = vmul.f32 %v1932_v25, %v1430_v21 }
 0x18d   :  { %v1437_v30 = vmax.f32 %v1433_v26, 0.0  ;;  %v1438_v32 = vmax.f32 %v1434_v27, 0.0  ;;  %v1439_v33 = vmax.f32 %v1435_v28, 0.0  ;;  %v1440_v34 = vmax.f32 %v1436_v29, 0.0 }
 0x18f   :  { %v1608_v36 = vpack.c.bf16 %v1437_v30, %v1437_v30  ;;  %v1609_v37 = vpack.c.bf16 %v1438_v32, %v1438_v32  ;;  %v1610_v31 = vpack.c.bf16 %v1439_v33, %v1439_v33  ;;  %v1611_v35 = vpack.c.bf16 %v1440_v34, %v1440_v34 }
 0x191   :  { %1458 = vst.msk [vmem:[%s2393_s2] sm:$0xf] %vm1457_vm1, %v1608_v36  ;;  %1459 = vst.msk [vmem:[%s2393_s2 + $0x4] sm:$0xf] %vm1457_vm1, %v1609_v37 }
 0x192   :  { %1460 = vst.msk [vmem:[%s2393_s2 + $0x8] sm:$0xf] %vm1457_vm1, %v1610_v31  ;;  %1461 = vst.msk [vmem:[%s2393_s2 + $0xc] sm:$0xf] %vm1457_vm1, %v1611_v35 }

// kernel: _lambda_.27
= control target key start
LH: loop header
LB: loop body
LE: loop exit
PB: predicated region body
PF: predicated region fallthrough
CT: control target
= control target key end

     0   :  { %s3081_s1 = inlined_call_operand.vmem [shape: bf16[1152,128], index: 1, kind: input, shape index: {}]   ;;  %s3082_s0 = inlined_call_operand.vmem [shape: bf16[128,1152], index: 0, kind: input, shape index: {}]   ;;  %s3083_s2 = inlined_call_operand.vmem [shape: bf16[128,128], index: 2, kind: output, shape index: {}]  }
   0x1   :  { %v2261_v0 = vld [vmem:[%s3081_s1 + $0x40] sm:$0xff]   ;;  %v2265_v4 = vld [vmem:[%s3081_s1 + $0x48] sm:$0xff]   ;;  %v2269_v8 = vld [vmem:[%s3081_s1 + $0x50] sm:$0xff]  }
   0x2   :  { %v2262_v1 = vld [vmem:[%s3081_s1 + $0xc0] sm:$0xff]   ;;  %1941 = vmatprep.subr.bf16.mxu0 %v2261_v0  ;;  %v2266_v5 = vld [vmem:[%s3081_s1 + $0xc8] sm:$0xff]   ;;  %v2270_v9 = vld [vmem:[%s3081_s1 + $0xd0] sm:$0xff]  }
   0x3   :  { %v2263_v2 = vld [vmem:[%s3081_s1] sm:$0xff]   ;;  %2005 = vmatprep.subr.bf16.mxu1 %v2262_v1  ;;  %v2267_v6 = vld [vmem:[%s3081_s1 + $0x8] sm:$0xff]   ;;  %v2271_v10 = vld [vmem:[%s3081_s1 + $0x10] sm:$0xff]  }
   0x4   :  { %v2264_v3 = vld [vmem:[%s3081_s1 + $0x80] sm:$0xff]   ;;  %1942 = vmatpush3.bf16.msra.mxu0 %v2263_v2  ;;  %v2268_v7 = vld [vmem:[%s3081_s1 + $0x88] sm:$0xff]   ;;  %v2272_v11 = vld [vmem:[%s3081_s1 + $0x90] sm:$0xff]  }
   0x5   :  { %2006 = vmatpush3.bf16.msra.mxu1 %v2264_v3  ;;  %1943 = vmatprep.subr.bf16.mxu0 %v2265_v4  ;;  %v2273_v12 = vld [vmem:[%s3081_s1 + $0x58] sm:$0xff]   ;;  %v2277_v16 = vld [vmem:[%s3081_s1 + $0x60] sm:$0xff]   ;;  %v2281_v20 = vld [vmem:[%s3081_s1 + $0x68] sm:$0xff]  }
   0x6   :  { %2007 = vmatprep.subr.bf16.mxu1 %v2266_v5  ;;  %v2274_v13 = vld [vmem:[%s3081_s1 + $0xd8] sm:$0xff]   ;;  %v2278_v17 = vld [vmem:[%s3081_s1 + $0xe0] sm:$0xff]   ;;  %v2282_v21 = vld [vmem:[%s3081_s1 + $0xe8] sm:$0xff]  }
   0x7   :  { %v2275_v14 = vld [vmem:[%s3081_s1 + $0x18] sm:$0xff]   ;;  %v2279_v18 = vld [vmem:[%s3081_s1 + $0x20] sm:$0xff]   ;;  %v2283_v22 = vld [vmem:[%s3081_s1 + $0x28] sm:$0xff]  }
   0x8   :  { %1944 = vmatpush3.bf16.msra.mxu0 %v2267_v6  ;;  %v2276_v15 = vld [vmem:[%s3081_s1 + $0x98] sm:$0xff]   ;;  %v2280_v19 = vld [vmem:[%s3081_s1 + $0xa0] sm:$0xff]   ;;  %v2284_v23 = vld [vmem:[%s3081_s1 + $0xa8] sm:$0xff]  }
   0x9   :  { %2008 = vmatpush3.bf16.msra.mxu1 %v2268_v7  ;;  %1945 = vmatprep.subr.bf16.mxu0 %v2269_v8  ;;  %v2285_v24 = vld [vmem:[%s3081_s1 + $0x70] sm:$0xff]   ;;  %v2289_v28 = vld [vmem:[%s3081_s1 + $0x78] sm:$0xff]   ;;  %v2293_v32 = vld [vmem:[%s3082_s0] ss:$36 sps:$4 sm:$0xff]  }
   0xa   :  { %2009 = vmatprep.subr.bf16.mxu1 %v2270_v9  ;;  %v2286_v25 = vld [vmem:[%s3081_s1 + $0xf0] sm:$0xff]   ;;  %v2290_v29 = vld [vmem:[%s3081_s1 + $0xf8] sm:$0xff]   ;;  %v2295_v33 = vld [vmem:[%s3082_s0 + $0x4] ss:$36 sps:$4 sm:$0xff]  }
   0xb   :  { %v2287_v26 = vld [vmem:[%s3081_s1 + $0x30] sm:$0xff]   ;;  %v2291_v30 = vld [vmem:[%s3081_s1 + $0x38] sm:$0xff]   ;;  %v2296_v34 = vld [vmem:[%s3082_s0 + $0x8] ss:$36 sps:$4 sm:$0xff]   ;;  %1068 = vmatprep.mubr.bf16.mxu0 %v2295_v33 }
   0xc   :  { %1946 = vmatpush3.bf16.msra.mxu0 %v2271_v10  ;;  %v2288_v27 = vld [vmem:[%s3081_s1 + $0xb0] sm:$0xff]   ;;  %v2292_v31 = vld [vmem:[%s3081_s1 + $0xb8] sm:$0xff]   ;;  %v2299_v36 = vld [vmem:[%s3081_s1 + $0x140] sm:$0xff]  }
   0xd   :  { %2010 = vmatpush3.bf16.msra.mxu1 %v2272_v11  ;;  %1947 = vmatprep.subr.bf16.mxu0 %v2273_v12  ;;  %v2298_v35 = vld [vmem:[%s3082_s0 + $0xc] ss:$36 sps:$4 sm:$0xff]   ;;  %v2300_v37 = vld [vmem:[%s3081_s1 + $0x100] sm:$0xff]   ;;  %v2303_v39 = vld [vmem:[%s3082_s0 + $0x54] ss:$36 sps:$4 sm:$0xff]  }
   0xe   :  { %2011 = vmatprep.subr.bf16.mxu1 %v2274_v13  ;;  %1165 = vmatprep.mubr.bf16.mxu1 %v2298_v35  ;;  %v2301_v38 = vld [vmem:[%s3082_s0 + $0x4c] ss:$36 sps:$4 sm:$0xff]   ;;  %v2309_v44 = vld [vmem:[%s3082_s0 + $0x94] ss:$36 sps:$4 sm:$0xff]   ;;  %v2311_v45 = vld [vmem:[%s3082_s0 + $0x9c] ss:$36 sps:$4 sm:$0xff]  }
   0xf   :  { %v2305_v40 = vld [vmem:[%s3082_s0 + $0x48] ss:$36 sps:$4 sm:$0xff]   ;;  %v2306_v41 = vld [vmem:[%s3082_s0 + $0x50] ss:$36 sps:$4 sm:$0xff]   ;;  %v2316_v47 = vld [vmem:[%s3081_s1 + $0x1c0] sm:$0xff]  }
  0x10   :  { %1948 = vmatpush3.bf16.msra.mxu0 %v2275_v14  ;;  %v2307_v42 = vld [vmem:[%s3081_s1 + $0x148] sm:$0xff]   ;;  %v2315_v46 = vld [vmem:[%s3081_s1 + $0x150] sm:$0xff]   ;;  %v2318_v50 = vld [vmem:[%s3081_s1 + $0x180] sm:$0xff]  }
  0x11   :  { %2012 = vmatpush3.bf16.msra.mxu1 %v2276_v15  ;;  %1949 = vmatprep.subr.bf16.mxu0 %v2277_v16  ;;  %v2308_v43 = vld [vmem:[%s3081_s1 + $0x108] sm:$0xff]   ;;  %v2313_v48 = vld [vmem:[%s3082_s0 + $0x90] ss:$36 sps:$4 sm:$0xff]   ;;  %v2314_v51 = vld [vmem:[%s3082_s0 + $0x98] ss:$36 sps:$4 sm:$0xff]  }
  0x12   :  { %2013 = vmatprep.subr.bf16.mxu1 %v2278_v17  ;;  %v2317_v49 = vld [vmem:[%s3081_s1 + $0x110] sm:$0xff]   ;;  %v2319_v52 = vld [vmem:[%s3082_s0 + $0xdc] ss:$36 sps:$4 sm:$0xff]   ;;  %v2321_v53 = vld [vmem:[%s3082_s0 + $0xe4] ss:$36 sps:$4 sm:$0xff]  }
  0x13   :  { %v2325_v54 = vld [vmem:[%s3081_s1 + $0x158] sm:$0xff]   ;;  %v2326_v55 = vld [vmem:[%s3081_s1 + $0x1c8] sm:$0xff]   ;;  %v2324_v59 = vld [vmem:[%s3082_s0 + $0xe0] ss:$36 sps:$4 sm:$0xff]  }
  0x14   :  { %1950 = vmatpush3.bf16.msra.mxu0 %v2279_v18  ;;  %v2327_v56 = vld [vmem:[%s3081_s1 + $0x118] sm:$0xff]   ;;  %v2328_v57 = vld [vmem:[%s3081_s1 + $0x188] sm:$0xff]   ;;  %v2335_v62 = vld [vmem:[%s3081_s1 + $0x160] sm:$0xff]  }
  0x15   :  { %2014 = vmatpush3.bf16.msra.mxu1 %v2280_v19  ;;  %1951 = vmatprep.subr.bf16.mxu0 %v2281_v20  ;;  %v2323_v58 = vld [vmem:[%s3082_s0 + $0xd8] ss:$36 sps:$4 sm:$0xff]   ;;  %v2329_v60 = vld [vmem:[%s3082_s0 + $0x124] ss:$36 sps:$4 sm:$0xff]   ;;  %v2331_v61 = vld [vmem:[%s3082_s0 + $0x12c] ss:$36 sps:$4 sm:$0xff]  }
  0x16   :  { %2015 = vmatprep.subr.bf16.mxu1 %v2282_v21  ;;  %v2336_v63 = vld [vmem:[%s3081_s1 + $0x1d0] sm:$0xff]   ;;  %v2337_v0 = vld [vmem:[%s3081_s1 + $0x120] sm:$0xff]   ;;  %v2334_v3 = vld [vmem:[%s3082_s0 + $0x128] ss:$36 sps:$4 sm:$0xff]  }
  0x17   :  { %v2338_v1 = vld [vmem:[%s3081_s1 + $0x190] sm:$0xff]   ;;  %v2333_v2 = vld [vmem:[%s3082_s0 + $0x120] ss:$36 sps:$4 sm:$0xff]   ;;  %v2345_v6 = vld [vmem:[%s3081_s1 + $0x168] sm:$0xff]  }
  0x18   :  { %1952 = vmatpush3.bf16.msra.mxu0 %v2283_v22  ;;  %v2339_v4 = vld [vmem:[%s3082_s0 + $0x16c] ss:$36 sps:$4 sm:$0xff]   ;;  %v2341_v5 = vld [vmem:[%s3082_s0 + $0x174] ss:$36 sps:$4 sm:$0xff]   ;;  %v2351_v14 = vld [vmem:[%s3082_s0 + $0x1bc] ss:$36 sps:$4 sm:$0xff]  }
  0x19   :  { %2016 = vmatpush3.bf16.msra.mxu1 %v2284_v23  ;;  %1953 = vmatprep.subr.bf16.mxu0 %v2285_v24  ;;  %v2346_v7 = vld [vmem:[%s3081_s1 + $0x1d8] sm:$0xff]   ;;  %v2347_v8 = vld [vmem:[%s3081_s1 + $0x128] sm:$0xff]   ;;  %v2344_v11 = vld [vmem:[%s3082_s0 + $0x170] ss:$36 sps:$4 sm:$0xff]  }
  0x1a   :  { %2017 = vmatprep.subr.bf16.mxu1 %v2286_v25  ;;  %v2348_v9 = vld [vmem:[%s3081_s1 + $0x198] sm:$0xff]   ;;  %v2343_v10 = vld [vmem:[%s3082_s0 + $0x168] ss:$36 sps:$4 sm:$0xff]   ;;  %v2355_v13 = vld [vmem:[%s3081_s1 + $0x170] sm:$0xff]  }
  0x1b   :  { %v2349_v12 = vld [vmem:[%s3082_s0 + $0x1b4] ss:$36 sps:$4 sm:$0xff]   ;;  %v2356_v15 = vld [vmem:[%s3081_s1 + $0x1e0] sm:$0xff]   ;;  %v2359_v18 = vld [vmem:[%s3081_s1 + $0x1e8] sm:$0xff]  }
  0x1c   :  { %1954 = vmatpush3.bf16.msra.mxu0 %v2287_v26  ;;  %v2357_v16 = vld [vmem:[%s3081_s1 + $0x130] sm:$0xff]   ;;  %v2358_v17 = vld [vmem:[%s3081_s1 + $0x1a0] sm:$0xff]   ;;  %v2360_v19 = vld [vmem:[%s3081_s1 + $0x1a8] sm:$0xff]  }
  0x1d   :  { %2018 = vmatpush3.bf16.msra.mxu1 %v2288_v27  ;;  %1955 = vmatprep.subr.bf16.mxu0 %v2289_v28  ;;  %v2353_v20 = vld [vmem:[%s3082_s0 + $0x1b0] ss:$36 sps:$4 sm:$0xff]   ;;  %v2354_v21 = vld [vmem:[%s3082_s0 + $0x1b8] ss:$36 sps:$4 sm:$0xff]   ;;  %v2363_v23 = vld [vmem:[%s3082_s0 + $0x204] ss:$36 sps:$4 sm:$0xff]  }
  0x1e   :  { %2019 = vmatprep.subr.bf16.mxu1 %v2290_v29  ;;  %v2361_v22 = vld [vmem:[%s3082_s0 + $0x1fc] ss:$36 sps:$4 sm:$0xff]   ;;  %v2368_v25 = vld [vmem:[%s3081_s1 + $0x1f0] sm:$0xff]  }
  0x1f   :  { %v2367_v24 = vld [vmem:[%s3081_s1 + $0x178] sm:$0xff]   ;;  %v2370_v27 = vld [vmem:[%s3081_s1 + $0x1b0] sm:$0xff]  }
  0x20   :  { %1956 = vmatpush3.bf16.msra.mxu0 %v2291_v30  ;;  %v2369_v26 = vld [vmem:[%s3081_s1 + $0x138] sm:$0xff]   ;;  %v2366_v30 = vld [vmem:[%s3082_s0 + $0x200] ss:$36 sps:$4 sm:$0xff]   ;;  %v2373_v35 = vld [vmem:[%s3082_s0 + $0x10] ss:$36 sps:$4 sm:$0xff]  }
  0x21   :  { %2020 = vmatpush3.bf16.msra.mxu1 %v2292_v31  ;;  %2069 = vmatprep.subr.bf16.mxu0 %v2299_v36  ;;  %v2371_v28 = vld [vmem:[%s3081_s1 + $0x1f8] sm:$0xff]  }
  0x22   :  { %2133 = vmatprep.subr.bf16.mxu1 %v2316_v47  ;;  %v2365_v29 = vld [vmem:[%s3082_s0 + $0x1f8] ss:$36 sps:$4 sm:$0xff]   ;;  %v2391_v47 = vld [vmem:[%s3082_s0 + $0xa0] ss:$36 sps:$4 sm:$0xff]  }
  0x23   :  { %1069 = vmatmul.mubr.bf16.vlgmr.msra.gmra.mrb[0].mxu0 %v2293_v32  ;;  %v2372_v31 = vld [vmem:[%s3081_s1 + $0x1b8] sm:$0xff]   ;;  %v2379_v32 = vld [vmem:[%s3081_s1 + $0x200] sm:$0xff]  }
  0x24   :  { %1166 = vmatmul.mubr.bf16.vlgmr.msra.gmra.mrb[0].mxu1 %v2296_v34  ;;  %2070 = vmatpush3.bf16.msra.mxu0 %v2300_v37  ;;  %v2375_v33 = vld [vmem:[%s3082_s0 + $0x14] ss:$36 sps:$4 sm:$0xff]   ;;  %v2378_v34 = vld [vmem:[%s3082_s0 + $0x1c] ss:$36 sps:$4 sm:$0xff]  }
  0x25   :  { %1076 = vmatprep.mubr.bf16.mxu0 %v2301_v38  ;;  %1173 = vmatprep.mubr.bf16.mxu1 %v2303_v39  ;;  %v2376_v36 = vld [vmem:[%s3082_s0 + $0x18] ss:$36 sps:$4 sm:$0xff]   ;;  %v2382_v38 = vld [vmem:[%s3082_s0 + $0x64] ss:$36 sps:$4 sm:$0xff]  }
  0x26   :  { %2071 = vmatprep.subr.bf16.mxu0 %v2307_v42  ;;  %2134 = vmatpush3.bf16.msra.mxu1 %v2318_v50  ;;  %v2380_v37 = vld [vmem:[%s3082_s0 + $0x5c] ss:$36 sps:$4 sm:$0xff]   ;;  %v2386_v39 = vld [vmem:[%s3081_s1 + $0x208] sm:$0xff]   ;;  %v2396_v50 = vld [vmem:[%s3082_s0 + $0xf4] ss:$36 sps:$4 sm:$0xff]  }
  0x27   :  { %2135 = vmatprep.subr.bf16.mxu1 %v2326_v55  ;;  %v2385_v42 = vld [vmem:[%s3082_s0 + $0x60] ss:$36 sps:$4 sm:$0xff]   ;;  %v2401_v55 = vld [vmem:[%s3082_s0 + $0x134] ss:$36 sps:$4 sm:$0xff]  }
  0x28   :  { %2072 = vmatpush3.bf16.msra.mxu0 %v2308_v43  ;;  %v2387_v43 = vld [vmem:[%s3082_s0 + $0xa4] ss:$36 sps:$4 sm:$0xff]  }
  0x29   :  { %2073 = vmatprep.subr.bf16.mxu0 %v2315_v46  ;;  %v2407_v46 = vld [vmem:[%s3081_s1 + $0x220] sm:$0xff]  }
  0x2a   :  { %2136 = vmatpush3.bf16.msra.mxu1 %v2328_v57  ;;  %v2428_v57 = vld [vmem:[%s3081_s1 + $0x238] sm:$0xff]  }
  0x2b   :  { %1077 = vmatmul.mubr.bf16.gmra.mrb[4].mxu0 %v2305_v40  ;;  %2137 = vmatprep.subr.bf16.mxu1 %v2336_v63  ;;  %v2393_v40 = vld [vmem:[%s3081_s1 + $0x210] sm:$0xff]   ;;  %v2413_v63 = vld [vmem:[%s3082_s0 + $0x180] ss:$36 sps:$4 sm:$0xff]  }
  0x2c   :  { %1174 = vmatmul.mubr.bf16.gmra.mrb[4].mxu1 %v2306_v41  ;;  %1084 = vmatprep.mubr.bf16.mxu0 %v2309_v44  ;;  %v2384_v41 = vld [vmem:[%s3082_s0 + $0x58] ss:$36 sps:$4 sm:$0xff]   ;;  %v2389_v44 = vld [vmem:[%s3082_s0 + $0xac] ss:$36 sps:$4 sm:$0xff]  }
  0x2d   :  { %1181 = vmatprep.mubr.bf16.mxu1 %v2311_v45  ;;  %2074 = vmatpush3.bf16.msra.mxu0 %v2317_v49  ;;  %v2400_v45 = vld [vmem:[%s3081_s1 + $0x218] sm:$0xff]   ;;  %v2394_v49 = vld [vmem:[%s3082_s0 + $0xec] ss:$36 sps:$4 sm:$0xff]  }
  0x2e   :  { %2075 = vmatprep.subr.bf16.mxu0 %v2325_v54  ;;  %2138 = vmatpush3.bf16.msra.mxu1 %v2338_v1  ;;  %v2399_v54 = vld [vmem:[%s3082_s0 + $0xf0] ss:$36 sps:$4 sm:$0xff]  }
  0x2f   :  { %2139 = vmatprep.subr.bf16.mxu1 %v2346_v7  ;;  %v2417_v1 = vld [vmem:[%s3082_s0 + $0x1cc] ss:$36 sps:$4 sm:$0xff]  }
  0x30   :  { %v2427_v7 = vld [vmem:[%s3082_s0 + $0x210] ss:$36 sps:$4 sm:$0xff]  }
  0x31   :  { %2076 = vmatpush3.bf16.msra.mxu0 %v2327_v56  ;;  %v2403_v56 = vld [vmem:[%s3082_s0 + $0x13c] ss:$36 sps:$4 sm:$0xff]  }
  0x32   :  { %2077 = vmatprep.subr.bf16.mxu0 %v2335_v62  ;;  %2140 = vmatpush3.bf16.msra.mxu1 %v2348_v9  ;;  %v2412_v62 = vld [vmem:[%s3082_s0 + $0x178] ss:$36 sps:$4 sm:$0xff]   ;;  %v2430_v9 = vld [vmem:[%s3082_s0 + $0x140] ss:$36 sps:$4 sm:$0xff]  }
  0x33   :  { %1085 = vmatmul.mubr.bf16.gmra.mrb[8].mxu0 %v2313_v48  ;;  %2141 = vmatprep.subr.bf16.mxu1 %v2356_v15  ;;  %v2392_v48 = vld [vmem:[%s3082_s0 + $0xa8] ss:$36 sps:$4 sm:$0xff]   ;;  %v2436_v15 = vld [vmem:[%s3082_s0 + $0x218] ss:$36 sps:$4 sm:$0xff]  }
  0x34   :  { %1182 = vmatmul.mubr.bf16.gmra.mrb[8].mxu1 %v2314_v51  ;;  %1092 = vmatprep.mubr.bf16.mxu0 %v2319_v52  ;;  %v2414_v51 = vld [vmem:[%s3081_s1 + $0x228] sm:$0xff]  }
  0x35   :  { %1189 = vmatprep.mubr.bf16.mxu1 %v2321_v53  ;;  %2078 = vmatpush3.bf16.msra.mxu0 %v2337_v0  ;;  %v2398_v52 = vld [vmem:[%s3082_s0 + $0xe8] ss:$36 sps:$4 sm:$0xff]   ;;  %v2421_v53 = vld [vmem:[%s3081_s1 + $0x230] sm:$0xff]  }
  0x36   :  { %2079 = vmatprep.subr.bf16.mxu0 %v2345_v6  ;;  %2142 = vmatpush3.bf16.msra.mxu1 %v2358_v17  ;;  %v2415_v0 = vld [vmem:[%s3082_s0 + $0x1c4] ss:$36 sps:$4 sm:$0xff]  }
  0x37   :  { %2143 = vmatprep.subr.bf16.mxu1 %v2359_v18  ;;  %v2426_v6 = vld [vmem:[%s3082_s0 + $0x208] ss:$36 sps:$4 sm:$0xff]  }
  0x39   :  { %2080 = vmatpush3.bf16.msra.mxu0 %v2347_v8  ;;  %v2429_v8 = vld [vmem:[%s3082_s0 + $0x20] ss:$36 sps:$4 sm:$0xff]  }
  0x3a   :  { %2081 = vmatprep.subr.bf16.mxu0 %v2355_v13  ;;  %2144 = vmatpush3.bf16.msra.mxu1 %v2360_v19  ;;  %v2434_v13 = vld [vmem:[%s3082_s0 + $0x1d0] ss:$36 sps:$4 sm:$0xff]  }
  0x3b   :  { %1093 = vmatmul.mubr.bf16.gmra.mrb[12].mxu0 %v2323_v58  ;;  %2145 = vmatprep.subr.bf16.mxu1 %v2368_v25  ;;  %v2405_v58 = vld [vmem:[%s3082_s0 + $0x130] ss:$36 sps:$4 sm:$0xff]  }
  0x3c   :  { %1190 = vmatmul.mubr.bf16.gmra.mrb[12].mxu1 %v2324_v59  ;;  %1100 = vmatprep.mubr.bf16.mxu0 %v2329_v60  ;;  %v2406_v59 = vld [vmem:[%s3082_s0 + $0x138] ss:$36 sps:$4 sm:$0xff]  }
  0x3d   :  { %1197 = vmatprep.mubr.bf16.mxu1 %v2331_v61  ;;  %2082 = vmatpush3.bf16.msra.mxu0 %v2357_v16  ;;  %v2408_v60 = vld [vmem:[%s3082_s0 + $0x17c] ss:$36 sps:$4 sm:$0xff]   ;;  %v2410_v61 = vld [vmem:[%s3082_s0 + $0x184] ss:$36 sps:$4 sm:$0xff]  }
  0x3e   :  { %2083 = vmatprep.subr.bf16.mxu0 %v2367_v24  ;;  %2146 = vmatpush3.bf16.msra.mxu1 %v2370_v27 }
  0x3f   :  { %2147 = vmatprep.subr.bf16.mxu1 %v2371_v28 }
  0x41   :  { %2084 = vmatpush3.bf16.msra.mxu0 %v2369_v26 }
  0x42   :  { %2213 = vmatprep.subr.bf16.mxu0 %v2379_v32  ;;  %2148 = vmatpush3.bf16.msra.mxu1 %v2372_v31 }
  0x43   :  { %1101 = vmatmul.mubr.bf16.gmra.mrb[16].mxu0 %v2333_v2  ;;  %2245 = vmatprep.subr.bf16.mxu1 %v2379_v32  ;;  %v2419_v2 = vld [vmem:[%s3082_s0 + $0x1c0] ss:$36 sps:$4 sm:$0xff]  }
  0x44   :  { %1198 = vmatmul.mubr.bf16.gmra.mrb[16].mxu1 %v2334_v3  ;;  %1108 = vmatprep.mubr.bf16.mxu0 %v2339_v4  ;;  %v2420_v3 = vld [vmem:[%s3082_s0 + $0x1c8] ss:$36 sps:$4 sm:$0xff]  }
  0x45   :  { %1205 = vmatprep.mubr.bf16.mxu1 %v2341_v5  ;;  %v2422_v4 = vld [vmem:[%s3082_s0 + $0x20c] ss:$36 sps:$4 sm:$0xff]   ;;  %v2424_v5 = vld [vmem:[%s3082_s0 + $0x214] ss:$36 sps:$4 sm:$0xff]  }
  0x4b   :  { %1109 = vmatmul.mubr.bf16.gmra.mrb[20].mxu0 %v2343_v10  ;;  %v2431_v10 = vld [vmem:[%s3082_s0 + $0x68] ss:$36 sps:$4 sm:$0xff]  }
  0x4c   :  { %1206 = vmatmul.mubr.bf16.gmra.mrb[20].mxu1 %v2344_v11  ;;  %1116 = vmatprep.mubr.bf16.mxu0 %v2349_v12  ;;  %v2432_v11 = vld [vmem:[%s3082_s0 + $0x188] ss:$36 sps:$4 sm:$0xff]   ;;  %v2433_v12 = vld [vmem:[%s3082_s0 + $0xb0] ss:$36 sps:$4 sm:$0xff]  }
  0x4d   :  { %1213 = vmatprep.mubr.bf16.mxu1 %v2351_v14  ;;  %v2435_v14 = vld [vmem:[%s3082_s0 + $0xf8] ss:$36 sps:$4 sm:$0xff]  }
  0x53   :  { %1117 = vmatmul.mubr.bf16.gmra.mrb[24].mxu0 %v2353_v20 }
  0x54   :  { %1214 = vmatmul.mubr.bf16.gmra.mrb[24].mxu1 %v2354_v21  ;;  %1124 = vmatprep.mubr.bf16.mxu0 %v2361_v22 }
  0x55   :  { %1221 = vmatprep.mubr.bf16.mxu1 %v2363_v23 }
  0x5b   :  { %1125 = vmatmul.mubr.bf16.gmra.mrb[28].mxu0 %v2365_v29 }
  0x5c   :  { %1222 = vmatmul.mubr.bf16.gmra.mrb[28].mxu1 %v2366_v30  ;;  %1262 = vmatprep.mubr.bf16.mxu0 %v2375_v33 }
  0x5d   :  { %1359 = vmatprep.mubr.bf16.mxu1 %v2378_v34 }
  0x63   :  { %1263 = vmatmul.mubr.bf16.vlgmr.msra.gmra.mrb[32].mxu0 %v2373_v35 }
  0x64   :  { %1360 = vmatmul.mubr.bf16.vlgmr.msra.gmra.mrb[32].mxu1 %v2376_v36  ;;  %2214 = vmatpush3.bf16.msra.mxu0 %v2379_v32 }
  0x65   :  { %1270 = vmatprep.mubr.bf16.mxu0 %v2380_v37  ;;  %1367 = vmatprep.mubr.bf16.mxu1 %v2382_v38 }
  0x66   :  { %2215 = vmatprep.subr.bf16.mxu0 %v2386_v39  ;;  %2253 = vmatpush3.bf16.msra.mxu1 %v2379_v32 }
  0x67   :  { %2246 = vmatprep.subr.bf16.mxu1 %v2386_v39 }
  0x68   :  { %2216 = vmatpush3.bf16.msra.mxu0 %v2386_v39 }
  0x69   :  { %2217 = vmatprep.subr.bf16.mxu0 %v2393_v40 }
  0x6a   :  { %2254 = vmatpush3.bf16.msra.mxu1 %v2386_v39 }
  0x6b   :  { %1271 = vmatmul.mubr.bf16.gmra.mrb[36].mxu0 %v2384_v41  ;;  %2247 = vmatprep.subr.bf16.mxu1 %v2393_v40 }
  0x6c   :  { %1368 = vmatmul.mubr.bf16.gmra.mrb[36].mxu1 %v2385_v42  ;;  %1278 = vmatprep.mubr.bf16.mxu0 %v2387_v43 }
  0x6d   :  { %1375 = vmatprep.mubr.bf16.mxu1 %v2389_v44  ;;  %2218 = vmatpush3.bf16.msra.mxu0 %v2393_v40 }
  0x6e   :  { %2219 = vmatprep.subr.bf16.mxu0 %v2400_v45  ;;  %2255 = vmatpush3.bf16.msra.mxu1 %v2393_v40 }
  0x6f   :  { %2248 = vmatprep.subr.bf16.mxu1 %v2400_v45 }
  0x71   :  { %2220 = vmatpush3.bf16.msra.mxu0 %v2400_v45 }
  0x72   :  { %2221 = vmatprep.subr.bf16.mxu0 %v2407_v46  ;;  %2256 = vmatpush3.bf16.msra.mxu1 %v2400_v45 }
  0x73   :  { %1279 = vmatmul.mubr.bf16.gmra.mrb[40].mxu0 %v2391_v47  ;;  %2249 = vmatprep.subr.bf16.mxu1 %v2407_v46 }
  0x74   :  { %1376 = vmatmul.mubr.bf16.gmra.mrb[40].mxu1 %v2392_v48  ;;  %1286 = vmatprep.mubr.bf16.mxu0 %v2394_v49 }
  0x75   :  { %1383 = vmatprep.mubr.bf16.mxu1 %v2396_v50  ;;  %2222 = vmatpush3.bf16.msra.mxu0 %v2407_v46 }
  0x76   :  { %2223 = vmatprep.subr.bf16.mxu0 %v2414_v51  ;;  %2257 = vmatpush3.bf16.msra.mxu1 %v2407_v46 }
  0x77   :  { %2250 = vmatprep.subr.bf16.mxu1 %v2414_v51 }
  0x79   :  { %2224 = vmatpush3.bf16.msra.mxu0 %v2414_v51 }
  0x7a   :  { %2225 = vmatprep.subr.bf16.mxu0 %v2421_v53  ;;  %2258 = vmatpush3.bf16.msra.mxu1 %v2414_v51 }
  0x7b   :  { %1287 = vmatmul.mubr.bf16.gmra.mrb[44].mxu0 %v2398_v52  ;;  %2251 = vmatprep.subr.bf16.mxu1 %v2421_v53 }
  0x7c   :  { %1384 = vmatmul.mubr.bf16.gmra.mrb[44].mxu1 %v2399_v54  ;;  %1294 = vmatprep.mubr.bf16.mxu0 %v2401_v55 }
  0x7d   :  { %1391 = vmatprep.mubr.bf16.mxu1 %v2403_v56  ;;  %2226 = vmatpush3.bf16.msra.mxu0 %v2421_v53 }
  0x7e   :  { %2227 = vmatprep.subr.bf16.mxu0 %v2428_v57  ;;  %2259 = vmatpush3.bf16.msra.mxu1 %v2421_v53 }
  0x7f   :  { %2252 = vmatprep.subr.bf16.mxu1 %v2428_v57 }
  0x81   :  { %2228 = vmatpush3.bf16.msra.mxu0 %v2428_v57 }
  0x82   :  { %2260 = vmatpush3.bf16.msra.mxu1 %v2428_v57 }
  0x83   :  { %1295 = vmatmul.mubr.bf16.gmra.mrb[48].mxu0 %v2405_v58 }
  0x84   :  { %1392 = vmatmul.mubr.bf16.gmra.mrb[48].mxu1 %v2406_v59  ;;  %1302 = vmatprep.mubr.bf16.mxu0 %v2408_v60 }
  0x85   :  { %1399 = vmatprep.mubr.bf16.mxu1 %v2410_v61 }
  0x8b   :  { %1303 = vmatmul.mubr.bf16.gmra.mrb[52].mxu0 %v2412_v62 }
  0x8c   :  { %1400 = vmatmul.mubr.bf16.gmra.mrb[52].mxu1 %v2413_v63  ;;  %1310 = vmatprep.mubr.bf16.mxu0 %v2415_v0 }
  0x8d   :  { %1407 = vmatprep.mubr.bf16.mxu1 %v2417_v1 }
  0x93   :  { %1311 = vmatmul.mubr.bf16.gmra.mrb[56].mxu0 %v2419_v2 }
  0x94   :  { %1408 = vmatmul.mubr.bf16.gmra.mrb[56].mxu1 %v2420_v3  ;;  %1318 = vmatprep.mubr.bf16.mxu0 %v2422_v4 }
  0x95   :  { %1415 = vmatprep.mubr.bf16.mxu1 %v2424_v5 }
  0x9b   :  { %1319 = vmatmul.mubr.bf16.gmra.mrb[60].mxu0 %v2426_v6 }
  0x9c   :  { %1416 = vmatmul.mubr.bf16.gmra.mrb[60].mxu1 %v2427_v7  ;;  %2229 = vmatprep.mubr.bf16.mxu0 %v2429_v8 }
  0x9d   :  { %2237 = vmatprep.mubr.bf16.mxu1 %v2430_v9 }
  0xa3   :  { %2230 = vmatmul.mubr.bf16.vlgmr.msra.gmra.mrb[64].mxu0 %v2431_v10 }
  0xa4   :  { %2238 = vmatmul.mubr.bf16.vlgmr.msra.gmra.mrb[64].mxu1 %v2432_v11  ;;  %2233 = vmatprep.mubr.bf16.mxu0 %v2433_v12 }
  0xa5   :  { %2241 = vmatprep.mubr.bf16.mxu1 %v2434_v13 }
  0xab   :  { %2234 = vmatmul.mubr.bf16.gmra.mrb[68].mxu0 %v2435_v14 }
  0xac   :  { %2242 = vmatmul.mubr.bf16.gmra.mrb[68].mxu1 %v2436_v15 }
  0xf6   :  { %v1957_v16 = vpop.f32.mrb[0].mxu0 }
  0xf7   :  { %v2021_v17 = vpop.f32.mrb[0].mxu1  ;;  %v1958_v18 = vpop.f32.mrb[1].mxu0 }
  0xf8   :  { %v1959_v19 = vadd.f32 %v1958_v18, %v1957_v16  ;;  %v2022_v20 = vpop.f32.mrb[1].mxu1  ;;  %v1960_v21 = vpop.f32.mrb[2].mxu0 }
  0xf9   :  { %v2023_v22 = vadd.f32 %v2022_v20, %v2021_v17  ;;  %v2024_v23 = vpop.f32.mrb[2].mxu1  ;;  %v1961_v24 = vpop.f32.mrb[3].mxu0 }
  0xfa   :  { %v1962_v25 = vadd.f32 %v1961_v24, %v1960_v21  ;;  %v2025_v26 = vpop.f32.mrb[3].mxu1 }
  0xfb   :  { %v2886_v27 = vadd.f32 %v2023_v22, %v1959_v19  ;;  %v2026_v28 = vadd.f32 %v2025_v26, %v2024_v23 }
  0xfd   :  { %v2888_v29 = vadd.f32 %v2026_v28, %v1962_v25 }
  0xfe   :  { %v1963_v30 = vpop.f32.mrb[4].mxu0 }
  0xff   :  { %v2027_v31 = vpop.f32.mrb[4].mxu1  ;;  %v1964_v32 = vpop.f32.mrb[5].mxu0 }
 0x100   :  { %v1965_v33 = vadd.f32 %v1964_v32, %v1963_v30  ;;  %v2028_v34 = vpop.f32.mrb[5].mxu1  ;;  %v1966_v35 = vpop.f32.mrb[6].mxu0 }
 0x101   :  { %v2029_v36 = vadd.f32 %v2028_v34, %v2027_v31  ;;  %v2030_v37 = vpop.f32.mrb[6].mxu1  ;;  %v1967_v38 = vpop.f32.mrb[7].mxu0 }
 0x102   :  { %v1968_v39 = vadd.f32 %v1967_v38, %v1966_v35  ;;  %v2031_v40 = vpop.f32.mrb[7].mxu1 }
 0x103   :  { %v2890_v41 = vadd.f32 %v2029_v36, %v1965_v33  ;;  %v2032_v42 = vadd.f32 %v2031_v40, %v2030_v37 }
 0x105   :  { %v2892_v43 = vadd.f32 %v2032_v42, %v1968_v39 }
 0x106   :  { %v1969_v44 = vpop.f32.mrb[8].mxu0 }
 0x107   :  { %v2033_v45 = vpop.f32.mrb[8].mxu1  ;;  %v1970_v46 = vpop.f32.mrb[9].mxu0 }
 0x108   :  { %v1971_v47 = vadd.f32 %v1970_v46, %v1969_v44  ;;  %v2034_v48 = vpop.f32.mrb[9].mxu1  ;;  %v1972_v49 = vpop.f32.mrb[10].mxu0 }
 0x109   :  { %v2035_v50 = vadd.f32 %v2034_v48, %v2033_v45  ;;  %v2036_v51 = vpop.f32.mrb[10].mxu1  ;;  %v1973_v52 = vpop.f32.mrb[11].mxu0 }
 0x10a   :  { %v1974_v53 = vadd.f32 %v1973_v52, %v1972_v49  ;;  %v2037_v54 = vpop.f32.mrb[11].mxu1 }
 0x10b   :  { %v2894_v55 = vadd.f32 %v2035_v50, %v1971_v47  ;;  %v2038_v56 = vadd.f32 %v2037_v54, %v2036_v51 }
 0x10d   :  { %v2896_v57 = vadd.f32 %v2038_v56, %v1974_v53 }
 0x10e   :  { %v1975_v58 = vpop.f32.mrb[12].mxu0 }
 0x10f   :  { %v2039_v59 = vpop.f32.mrb[12].mxu1  ;;  %v1976_v60 = vpop.f32.mrb[13].mxu0 }
 0x110   :  { %v1977_v61 = vadd.f32 %v1976_v60, %v1975_v58  ;;  %v2040_v62 = vpop.f32.mrb[13].mxu1  ;;  %v1978_v63 = vpop.f32.mrb[14].mxu0 }
 0x111   :  { %v2041_v0 = vadd.f32 %v2040_v62, %v2039_v59  ;;  %v2042_v1 = vpop.f32.mrb[14].mxu1  ;;  %v1979_v2 = vpop.f32.mrb[15].mxu0 }
 0x112   :  { %v1980_v3 = vadd.f32 %v1979_v2, %v1978_v63  ;;  %v2043_v4 = vpop.f32.mrb[15].mxu1 }
 0x113   :  { %v2898_v5 = vadd.f32 %v2041_v0, %v1977_v61  ;;  %v2044_v6 = vadd.f32 %v2043_v4, %v2042_v1 }
 0x115   :  { %v2900_v7 = vadd.f32 %v2044_v6, %v1980_v3 }
 0x116   :  { %v1981_v8 = vpop.f32.mrb[16].mxu0 }
 0x117   :  { %v2045_v9 = vpop.f32.mrb[16].mxu1  ;;  %v1982_v10 = vpop.f32.mrb[17].mxu0 }
 0x118   :  { %v1983_v11 = vadd.f32 %v1982_v10, %v1981_v8  ;;  %v2046_v12 = vpop.f32.mrb[17].mxu1  ;;  %v1984_v13 = vpop.f32.mrb[18].mxu0 }
 0x119   :  { %v2047_v14 = vadd.f32 %v2046_v12, %v2045_v9  ;;  %v2048_v15 = vpop.f32.mrb[18].mxu1  ;;  %v1985_v16 = vpop.f32.mrb[19].mxu0 }
 0x11a   :  { %v1986_v17 = vadd.f32 %v1985_v16, %v1984_v13  ;;  %v2049_v18 = vpop.f32.mrb[19].mxu1 }
 0x11b   :  { %v2902_v19 = vadd.f32 %v2047_v14, %v1983_v11  ;;  %v2050_v20 = vadd.f32 %v2049_v18, %v2048_v15 }
 0x11d   :  { %v2904_v21 = vadd.f32 %v2050_v20, %v1986_v17 }
 0x11e   :  { %v1987_v22 = vpop.f32.mrb[20].mxu0 }
 0x11f   :  { %v2051_v23 = vpop.f32.mrb[20].mxu1  ;;  %v1988_v24 = vpop.f32.mrb[21].mxu0 }
 0x120   :  { %v1989_v25 = vadd.f32 %v1988_v24, %v1987_v22  ;;  %v2052_v26 = vpop.f32.mrb[21].mxu1  ;;  %v1990_v28 = vpop.f32.mrb[22].mxu0 }
 0x121   :  { %v2053_v30 = vadd.f32 %v2052_v26, %v2051_v23  ;;  %v2054_v31 = vpop.f32.mrb[22].mxu1  ;;  %v1991_v32 = vpop.f32.mrb[23].mxu0 }
 0x122   :  { %v1992_v33 = vadd.f32 %v1991_v32, %v1990_v28  ;;  %v2055_v34 = vpop.f32.mrb[23].mxu1 }
 0x123   :  { %v2906_v35 = vadd.f32 %v2053_v30, %v1989_v25  ;;  %v2056_v36 = vadd.f32 %v2055_v34, %v2054_v31 }
 0x125   :  { %v2908_v37 = vadd.f32 %v2056_v36, %v1992_v33 }
 0x126   :  { %v1993_v38 = vpop.f32.mrb[24].mxu0 }
 0x127   :  { %v2057_v39 = vpop.f32.mrb[24].mxu1  ;;  %v1994_v40 = vpop.f32.mrb[25].mxu0 }
 0x128   :  { %v1995_v42 = vadd.f32 %v1994_v40, %v1993_v38  ;;  %v2058_v44 = vpop.f32.mrb[25].mxu1  ;;  %v1996_v45 = vpop.f32.mrb[26].mxu0 }
 0x129   :  { %v2059_v46 = vadd.f32 %v2058_v44, %v2057_v39  ;;  %v2060_v47 = vpop.f32.mrb[26].mxu1  ;;  %v1997_v48 = vpop.f32.mrb[27].mxu0 }
 0x12a   :  { %v1998_v49 = vadd.f32 %v1997_v48, %v1996_v45  ;;  %v2061_v50 = vpop.f32.mrb[27].mxu1 }
 0x12b   :  { %v2910_v51 = vadd.f32 %v2059_v46, %v1995_v42  ;;  %v2062_v52 = vadd.f32 %v2061_v50, %v2060_v47 }
 0x12d   :  { %v2912_v53 = vadd.f32 %v2062_v52, %v1998_v49 }
 0x12e   :  { %v1999_v54 = vpop.f32.mrb[28].mxu0 }
 0x12f   :  { %v2063_v56 = vpop.f32.mrb[28].mxu1  ;;  %v2000_v58 = vpop.f32.mrb[29].mxu0 }
 0x130   :  { %v2001_v59 = vadd.f32 %v2000_v58, %v1999_v54  ;;  %v2064_v60 = vpop.f32.mrb[29].mxu1  ;;  %v2002_v61 = vpop.f32.mrb[30].mxu0 }
 0x131   :  { %v2065_v62 = vadd.f32 %v2064_v60, %v2063_v56  ;;  %v2066_v63 = vpop.f32.mrb[30].mxu1  ;;  %v2003_v0 = vpop.f32.mrb[31].mxu0 }
 0x132   :  { %v2004_v1 = vadd.f32 %v2003_v0, %v2002_v61  ;;  %v2067_v2 = vpop.f32.mrb[31].mxu1 }
 0x133   :  { %v2914_v3 = vadd.f32 %v2065_v62, %v2001_v59  ;;  %v2068_v4 = vadd.f32 %v2067_v2, %v2066_v63 }
 0x135   :  { %v2916_v6 = vadd.f32 %v2068_v4, %v2004_v1 }
 0x136   :  { %v2085_v8 = vpop.f32.mrb[32].mxu0 }
 0x137   :  { %v2086_v9 = vpop.f32.mrb[33].mxu0  ;;  %v2149_v10 = vpop.f32.mrb[32].mxu1 }
 0x138   :  { %v2087_v11 = vadd.f32 %v2086_v9, %v2085_v8  ;;  %v2088_v12 = vpop.f32.mrb[34].mxu0  ;;  %v2150_v13 = vpop.f32.mrb[33].mxu1 }
 0x139   :  { %v2089_v14 = vpop.f32.mrb[35].mxu0  ;;  %v2151_v15 = vadd.f32 %v2150_v13, %v2149_v10  ;;  %v2152_v16 = vpop.f32.mrb[34].mxu1 }
 0x13a   :  { %v1265_v17 = vadd.f32 %v2087_v11, %v2886_v27  ;;  %v2090_v18 = vadd.f32 %v2089_v14, %v2088_v12  ;;  %v2153_v20 = vpop.f32.mrb[35].mxu1 }
 0x13b   :  { %v2154_v22 = vadd.f32 %v2153_v20, %v2152_v16 }
 0x13c   :  { %v1268_v23 = vadd.f32 %v2090_v18, %v2888_v29  ;;  %v2920_v24 = vadd.f32 %v2151_v15, %v1265_v17 }
 0x13e   :  { %v2091_v25 = vpop.f32.mrb[36].mxu0  ;;  %v2922_v26 = vadd.f32 %v2154_v22, %v1268_v23 }
 0x13f   :  { %v2092_v28 = vpop.f32.mrb[37].mxu0  ;;  %v2155_v30 = vpop.f32.mrb[36].mxu1 }
 0x140   :  { %v2093_v31 = vadd.f32 %v2092_v28, %v2091_v25  ;;  %v2094_v32 = vpop.f32.mrb[38].mxu0  ;;  %v2156_v33 = vpop.f32.mrb[37].mxu1 }
 0x141   :  { %v2095_v34 = vpop.f32.mrb[39].mxu0  ;;  %v2157_v36 = vadd.f32 %v2156_v33, %v2155_v30  ;;  %v2158_v38 = vpop.f32.mrb[38].mxu1 }
 0x142   :  { %v1273_v27 = vadd.f32 %v2093_v31, %v2890_v41  ;;  %v2096_v39 = vadd.f32 %v2095_v34, %v2094_v32  ;;  %v2159_v40 = vpop.f32.mrb[39].mxu1 }
 0x143   :  { %v2160_v42 = vadd.f32 %v2159_v40, %v2158_v38 }
 0x144   :  { %v1276_v29 = vadd.f32 %v2096_v39, %v2892_v43  ;;  %v2926_v44 = vadd.f32 %v2157_v36, %v1273_v27 }
 0x146   :  { %v2097_v45 = vpop.f32.mrb[40].mxu0  ;;  %v2928_v46 = vadd.f32 %v2160_v42, %v1276_v29 }
 0x147   :  { %v2098_v47 = vpop.f32.mrb[41].mxu0  ;;  %v2161_v48 = vpop.f32.mrb[40].mxu1 }
 0x148   :  { %v2099_v49 = vadd.f32 %v2098_v47, %v2097_v45  ;;  %v2100_v50 = vpop.f32.mrb[42].mxu0  ;;  %v2162_v52 = vpop.f32.mrb[41].mxu1 }
 0x149   :  { %v2101_v54 = vpop.f32.mrb[43].mxu0  ;;  %v2163_v56 = vadd.f32 %v2162_v52, %v2161_v48  ;;  %v2164_v58 = vpop.f32.mrb[42].mxu1 }
 0x14a   :  { %v1281_v41 = vadd.f32 %v2099_v49, %v2894_v55  ;;  %v2102_v59 = vadd.f32 %v2101_v54, %v2100_v50  ;;  %v2165_v60 = vpop.f32.mrb[43].mxu1 }
 0x14b   :  { %v2166_v61 = vadd.f32 %v2165_v60, %v2164_v58 }
 0x14c   :  { %v1284_v43 = vadd.f32 %v2102_v59, %v2896_v57  ;;  %v2932_v62 = vadd.f32 %v2163_v56, %v1281_v41 }
 0x14e   :  { %v2103_v63 = vpop.f32.mrb[44].mxu0  ;;  %v2934_v0 = vadd.f32 %v2166_v61, %v1284_v43 }
 0x14f   :  { %v2104_v1 = vpop.f32.mrb[45].mxu0  ;;  %v2167_v2 = vpop.f32.mrb[44].mxu1 }
 0x150   :  { %v2105_v4 = vadd.f32 %v2104_v1, %v2103_v63  ;;  %v2106_v8 = vpop.f32.mrb[46].mxu0  ;;  %v2168_v9 = vpop.f32.mrb[45].mxu1 }
 0x151   :  { %v2107_v10 = vpop.f32.mrb[47].mxu0  ;;  %v2169_v11 = vadd.f32 %v2168_v9, %v2167_v2  ;;  %v2170_v12 = vpop.f32.mrb[46].mxu1 }
 0x152   :  { %v1289_v55 = vadd.f32 %v2105_v4, %v2898_v5  ;;  %v2108_v13 = vadd.f32 %v2107_v10, %v2106_v8  ;;  %v2171_v14 = vpop.f32.mrb[47].mxu1 }
 0x153   :  { %v2172_v15 = vadd.f32 %v2171_v14, %v2170_v12 }
 0x154   :  { %v1292_v57 = vadd.f32 %v2108_v13, %v2900_v7  ;;  %v2938_v16 = vadd.f32 %v2169_v11, %v1289_v55 }
 0x156   :  { %v2109_v17 = vpop.f32.mrb[48].mxu0  ;;  %v2940_v18 = vadd.f32 %v2172_v15, %v1292_v57 }
 0x157   :  { %v2110_v20 = vpop.f32.mrb[49].mxu0  ;;  %v2173_v22 = vpop.f32.mrb[48].mxu1 }
 0x158   :  { %v2111_v23 = vadd.f32 %v2110_v20, %v2109_v17  ;;  %v2112_v25 = vpop.f32.mrb[50].mxu0  ;;  %v2174_v28 = vpop.f32.mrb[49].mxu1 }
 0x159   :  { %v2113_v30 = vpop.f32.mrb[51].mxu0  ;;  %v2175_v31 = vadd.f32 %v2174_v28, %v2173_v22  ;;  %v2176_v32 = vpop.f32.mrb[50].mxu1 }
 0x15a   :  { %v1297_v5 = vadd.f32 %v2111_v23, %v2902_v19  ;;  %v2114_v33 = vadd.f32 %v2113_v30, %v2112_v25  ;;  %v2177_v34 = vpop.f32.mrb[51].mxu1 }
 0x15b   :  { %v2178_v36 = vadd.f32 %v2177_v34, %v2176_v32 }
 0x15c   :  { %v1300_v7 = vadd.f32 %v2114_v33, %v2904_v21  ;;  %v1394_v38 = vadd.f32 %v2175_v31, %v1297_v5 }
 0x15e   :  { %v2115_v27 = vpop.f32.mrb[52].mxu0  ;;  %v2944_v39 = vadd.f32 %v2178_v36, %v1300_v7 }
 0x15f   :  { %v2116_v40 = vpop.f32.mrb[53].mxu0  ;;  %v2179_v42 = vpop.f32.mrb[52].mxu1 }
 0x160   :  { %v2117_v29 = vadd.f32 %v2116_v40, %v2115_v27  ;;  %v2118_v45 = vpop.f32.mrb[54].mxu0  ;;  %v2180_v47 = vpop.f32.mrb[53].mxu1 }
 0x161   :  { %v2119_v48 = vpop.f32.mrb[55].mxu0  ;;  %v2181_v49 = vadd.f32 %v2180_v47, %v2179_v42  ;;  %v2182_v50 = vpop.f32.mrb[54].mxu1 }
 0x162   :  { %v1305_v52 = vadd.f32 %v2117_v29, %v2906_v35  ;;  %v2120_v19 = vadd.f32 %v2119_v48, %v2118_v45  ;;  %v2183_v54 = vpop.f32.mrb[55].mxu1 }
 0x163   :  { %v2184_v56 = vadd.f32 %v2183_v54, %v2182_v50 }
 0x164   :  { %v1308_v58 = vadd.f32 %v2120_v19, %v2908_v37  ;;  %v1402_v21 = vadd.f32 %v2181_v49, %v1305_v52 }
 0x166   :  { %v2121_v41 = vpop.f32.mrb[56].mxu0  ;;  %v1405_v59 = vadd.f32 %v2184_v56, %v1308_v58 }
 0x167   :  { %v2122_v60 = vpop.f32.mrb[57].mxu0  ;;  %v2185_v61 = vpop.f32.mrb[56].mxu1 }
 0x168   :  { %v2123_v43 = vadd.f32 %v2122_v60, %v2121_v41  ;;  %v2124_v63 = vpop.f32.mrb[58].mxu0  ;;  %v2186_v1 = vpop.f32.mrb[57].mxu1 }
 0x169   :  { %v2125_v2 = vpop.f32.mrb[59].mxu0  ;;  %v2187_v4 = vadd.f32 %v2186_v1, %v2185_v61  ;;  %v2188_v8 = vpop.f32.mrb[58].mxu1 }
 0x16a   :  { %v1313_v9 = vadd.f32 %v2123_v43, %v2910_v51  ;;  %v2126_v10 = vadd.f32 %v2125_v2, %v2124_v63  ;;  %v2189_v35 = vpop.f32.mrb[59].mxu1 }
 0x16b   :  { %v2190_v11 = vadd.f32 %v2189_v35, %v2188_v8 }
 0x16c   :  { %v1316_v12 = vadd.f32 %v2126_v10, %v2912_v53  ;;  %v1410_v55 = vadd.f32 %v2187_v4, %v1313_v9 }
 0x16e   :  { %v2127_v37 = vpop.f32.mrb[60].mxu0  ;;  %v1413_v13 = vadd.f32 %v2190_v11, %v1316_v12 }
 0x16f   :  { %v2128_v14 = vpop.f32.mrb[61].mxu0  ;;  %v2191_v15 = vpop.f32.mrb[60].mxu1 }
 0x170   :  { %v2129_v57 = vadd.f32 %v2128_v14, %v2127_v37  ;;  %v2130_v17 = vpop.f32.mrb[62].mxu0  ;;  %v2192_v20 = vpop.f32.mrb[61].mxu1 }
 0x171   :  { %v2131_v22 = vpop.f32.mrb[63].mxu0  ;;  %v2193_v23 = vadd.f32 %v2192_v20, %v2191_v15  ;;  %v2194_v25 = vpop.f32.mrb[62].mxu1 }
 0x172   :  { %v1321_v28 = vadd.f32 %v2129_v57, %v2914_v3  ;;  %v2132_v30 = vadd.f32 %v2131_v22, %v2130_v17  ;;  %v2195_v51 = vpop.f32.mrb[63].mxu1 }
 0x173   :  { %v2196_v31 = vadd.f32 %v2195_v51, %v2194_v25 }
 0x174   :  { %v1324_v32 = vadd.f32 %v2132_v30, %v2916_v6  ;;  %v1418_v5 = vadd.f32 %v2193_v23, %v1321_v28 }
 0x176   :  { %v2231_v53 = vpop.f32.mrb[64].mxu0  ;;  %v1421_v33 = vadd.f32 %v2196_v31, %v1324_v32 }
 0x177   :  { %v2953_v34 = vadd.f32 %v2231_v53, %v2926_v44  ;;  %v2239_v36 = vpop.f32.mrb[64].mxu1  ;;  %v1458_v7 = vpop.f32.mrb[65].mxu0 }
 0x178   :  { %v2955_v27 = vadd.f32 %v2239_v36, %v1402_v21  ;;  %v2958_v40 = vadd.f32 %v1458_v7, %v2920_v24  ;;  %v1490_v42 = vpop.f32.mrb[65].mxu1  ;;  %v2232_v3 = vpop.f32.mrb[66].mxu0 }
 0x179   :  { %v2960_v29 = vadd.f32 %v1490_v42, %v1394_v38  ;;  %v2963_v45 = vadd.f32 %v2232_v3, %v2928_v46  ;;  %v2240_v6 = vpop.f32.mrb[66].mxu1  ;;  %v1461_v47 = vpop.f32.mrb[67].mxu0  ;;  %v1545_v52 = vmul.f32 %v2953_v34, %v2953_v34 }
 0x17a   :  { %v2965_v48 = vadd.f32 %v2240_v6, %v1405_v59  ;;  %v2968_v44 = vadd.f32 %v1461_v47, %v2922_v26  ;;  %v1493_v49 = vpop.f32.mrb[67].mxu1  ;;  %v1543_v24 = vmul.f32 %v2958_v40, %v2958_v40  ;;  %v1553_v51 = vmul.f32 %v2955_v27, %v2955_v27 }
 0x17b   :  { %v2971_v50 = vadd.f32 %v1493_v49, %v2944_v39  ;;  %v1546_v39 = vmul.f32 %v2963_v45, %v2963_v45 }
 0x17c   :  { %v1521_v38 = vadd.f32 %v2968_v44, %v2958_v40  ;;  %v1544_v46 = vmul.f32 %v2968_v44, %v2968_v44 }
 0x17d   :  { %v1552_v25 = vmul.f32 %v2971_v50, %v2971_v50 }
 0x17e   :  { %v1522_v19 = vadd.f32 %v1521_v38, %v2953_v34  ;;  %v1559_v26 = vadd.f32 %v1544_v46, %v1543_v24  ;;  %v2235_v54 = vpop.f32.mrb[68].mxu0 }
 0x17f   :  { %v2985_v56 = vadd.f32 %v2235_v54, %v2938_v16  ;;  %v2243_v58 = vpop.f32.mrb[68].mxu1  ;;  %v1474_v21 = vpop.f32.mrb[69].mxu0 }
 0x180   :  { %v1560_v41 = vadd.f32 %v1559_v26, %v1545_v52  ;;  %v2987_v59 = vadd.f32 %v2243_v58, %v1418_v5  ;;  %v2990_v60 = vadd.f32 %v1474_v21, %v2932_v62  ;;  %v1523_v61 = vadd.f32 %v1522_v19, %v2963_v45  ;;  %v1506_v43 = vpop.f32.mrb[69].mxu1  ;;  %v2236_v63 = vpop.f32.mrb[70].mxu0 }
 0x181   :  { %v2993_v1 = vadd.f32 %v1506_v43, %v1410_v55  ;;  %v2996_v2 = vadd.f32 %v2236_v63, %v2940_v18  ;;  %v2244_v4 = vpop.f32.mrb[70].mxu1  ;;  %v1477_v16 = vpop.f32.mrb[71].mxu0  ;;  %v1549_v14 = vmul.f32 %v2985_v56, %v2985_v56  ;;  %v1554_v5 = vmul.f32 %v2965_v48, %v2965_v48 }
 0x182   :  { %v1524_v8 = vadd.f32 %v1523_v61, %v2990_v60  ;;  %v1547_v9 = vmul.f32 %v2990_v60, %v2990_v60  ;;  %v1561_v10 = vadd.f32 %v1560_v41, %v1546_v39  ;;  %v1509_v35 = vpop.f32.mrb[71].mxu1  ;;  %v3001_v62 = vadd.f32 %v2244_v4, %v1421_v33 }
 0x183   :  { %v3004_v11 = vadd.f32 %v1477_v16, %v2934_v0  ;;  %v3006_v55 = vadd.f32 %v1509_v35, %v1413_v13  ;;  %v1550_v17 = vmul.f32 %v2996_v2, %v2996_v2  ;;  %v1551_v13 = vmul.f32 %v2960_v29, %v2960_v29 }
 0x184   :  { %v1562_v12 = vadd.f32 %v1561_v10, %v1547_v9  ;;  %v1555_v36 = vmul.f32 %v2993_v1, %v2993_v1  ;;  %v1557_v49 = vmul.f32 %v2987_v59, %v2987_v59  ;;  %v1558_v46 = vmul.f32 %v3001_v62, %v3001_v62 }
 0x185   :  { %v1525_v18 = vadd.f32 %v1524_v8, %v3004_v11  ;;  %v1548_v37 = vmul.f32 %v3004_v11, %v3004_v11  ;;  %v1556_v6 = vmul.f32 %v3006_v55, %v3006_v55 }
 0x187   :  { %v1526_v15 = vadd.f32 %v1525_v18, %v2985_v56  ;;  %v1563_v57 = vadd.f32 %v1562_v12, %v1548_v37 }
 0x189   :  { %v1527_v0 = vadd.f32 %v1526_v15, %v2996_v2  ;;  %v1564_v20 = vadd.f32 %v1563_v57, %v1549_v14 }
 0x18b   :  { %v1528_v22 = vadd.f32 %v1527_v0, %v2960_v29  ;;  %v1565_v23 = vadd.f32 %v1564_v20, %v1550_v17 }
 0x18d   :  { %v1566_v28 = vadd.f32 %v1565_v23, %v1551_v13  ;;  %v1529_v30 = vadd.f32 %v1528_v22, %v2971_v50 }
 0x18f   :  { %v1530_v31 = vadd.f32 %v1529_v30, %v2955_v27  ;;  %v1567_v32 = vadd.f32 %v1566_v28, %v1552_v25 }
 0x191   :  { %v1531_v53 = vadd.f32 %v1530_v31, %v2965_v48  ;;  %v1568_v33 = vadd.f32 %v1567_v32, %v1553_v51 }
 0x193   :  { %v1532_v7 = vadd.f32 %v1531_v53, %v2993_v1  ;;  %v1569_v42 = vadd.f32 %v1568_v33, %v1554_v5 }
 0x195   :  { %v1533_v3 = vadd.f32 %v1532_v7, %v3006_v55  ;;  %v1570_v47 = vadd.f32 %v1569_v42, %v1555_v36 }
 0x197   :  { %v1534_v24 = vadd.f32 %v1533_v3, %v2987_v59  ;;  %v1571_v38 = vadd.f32 %v1570_v47, %v1556_v6 }
 0x199   :  { %v1535_v52 = vadd.f32 %v1534_v24, %v3001_v62  ;;  %v1572_v19 = vadd.f32 %v1571_v38, %v1557_v49 }
 0x19b   :  { %v1536_v26 = vrot.slane %v1535_v52, 4  ;;  %v1573_v54 = vadd.f32 %v1572_v19, %v1558_v46 }
 0x19d   :  { %v1537_v39 = vadd.f32 %v1536_v26, %v1535_v52  ;;  %v1574_v58 = vrot.slane %v1573_v54, 4 }
 0x19f   :  { %v1538_v21 = vrot.slane %v1537_v39, 2  ;;  %v1575_v41 = vadd.f32 %v1574_v58, %v1573_v54 }
 0x1a1   :  { %v1539_v61 = vadd.f32 %v1538_v21, %v1537_v39  ;;  %v1576_v43 = vrot.slane %v1575_v41, 2 }
 0x1a3   :  { %v1540_v63 = vrot.slane %v1539_v61, 1  ;;  %v1577_v4 = vadd.f32 %v1576_v43, %v1575_v41 }
 0x1a5   :  { %v1541_v16 = vadd.f32 %v1540_v63, %v1539_v61  ;;  %v1578_v8 = vrot.slane %v1577_v4, 1 }
 0x1a7   :  { %v1542_v9 = vmul.f32 0.0078125, %v1541_v16  ;;  %v1579_v10 = vadd.f32 %v1578_v8, %v1577_v4 }
 0x1a9   :  { %v1580_v35 = vmul.f32 0.0078125, %v1579_v10  ;;  %v1581_v12 = vmul.f32 %v1542_v9, %v1542_v9  ;;  %v1584_v18 = vsub.f32 %v2958_v40, %v1542_v9  ;;  %v1585_v37 = vsub.f32 %v2968_v44, %v1542_v9 }
 0x1aa   :  { %v1586_v14 = vsub.f32 %v2953_v34, %v1542_v9  ;;  %v1587_v15 = vsub.f32 %v2963_v45, %v1542_v9  ;;  %v1588_v57 = vsub.f32 %v2990_v60, %v1542_v9  ;;  %v1589_v17 = vsub.f32 %v3004_v11, %v1542_v9 }
 0x1ab   :  { %v1582_v0 = vsub.f32 %v1580_v35, %v1581_v12  ;;  %v1590_v20 = vsub.f32 %v2985_v56, %v1542_v9  ;;  %v1591_v13 = vsub.f32 %v2996_v2, %v1542_v9  ;;  %v1592_v22 = vsub.f32 %v2960_v29, %v1542_v9 }
 0x1ac   :  { %v1593_v23 = vsub.f32 %v2971_v50, %v1542_v9  ;;  %v1594_v40 = vsub.f32 %v2955_v27, %v1542_v9  ;;  %v1595_v44 = vsub.f32 %v2965_v48, %v1542_v9  ;;  %v1596_v34 = vsub.f32 %v2993_v1, %v1542_v9 }
 0x1ad   :  { %v1583_v45 = vmax.f32 %v1582_v0, 0.0  ;;  %v1597_v60 = vsub.f32 %v3006_v55, %v1542_v9  ;;  %v1598_v11 = vsub.f32 %v2987_v59, %v1542_v9  ;;  %v1599_v25 = vsub.f32 %v3001_v62, %v1542_v9 }
 0x1af   :  { %v1600_v56 = vadd.f32 1e-05, %v1583_v45 }
 0x1b1   :  { %2437 = vrsqrt.f32 %v1600_v56 }
 0x1bb   :  { %v2438_v2 = vpop.eup %2437 }
 0x1bc   :  { %v1602_v28 = vmul.f32 %v2438_v2, %v1584_v18  ;;  %v1603_v29 = vmul.f32 %v2438_v2, %v1585_v37  ;;  %v1604_v30 = vmul.f32 %v2438_v2, %v1586_v14  ;;  %v1605_v50 = vmul.f32 %v2438_v2, %v1587_v15 }
 0x1bd   :  { %v1606_v51 = vmul.f32 %v2438_v2, %v1588_v57  ;;  %v1607_v27 = vmul.f32 %v2438_v2, %v1589_v17  ;;  %v1608_v31 = vmul.f32 %v2438_v2, %v1590_v20  ;;  %v1609_v48 = vmul.f32 %v2438_v2, %v1591_v13 }
 0x1be   :  { %v1610_v32 = vmul.f32 %v2438_v2, %v1592_v22  ;;  %v1611_v1 = vmul.f32 %v2438_v2, %v1593_v23  ;;  %v1612_v5 = vmul.f32 %v2438_v2, %v1594_v40  ;;  %v1613_v53 = vmul.f32 %v2438_v2, %v1595_v44 }
 0x1bf   :  { %v1614_v55 = vmul.f32 %v2438_v2, %v1596_v34  ;;  %v1615_v33 = vmul.f32 %v2438_v2, %v1597_v60  ;;  %v1616_v59 = vmul.f32 %v2438_v2, %v1598_v11  ;;  %v1617_v36 = vmul.f32 %v2438_v2, %v1599_v25 }
 0x1c0   :  { %v1618_v62 = vmax.f32 %v1602_v28, 0.0  ;;  %v1619_v7 = vmax.f32 %v1603_v29, 0.0  ;;  %v1620_v42 = vmax.f32 %v1604_v30, 0.0  ;;  %v1621_v3 = vmax.f32 %v1605_v50, 0.0 }
 0x1c1   :  { %v1622_v6 = vmax.f32 %v1606_v51, 0.0  ;;  %v1623_v47 = vmax.f32 %v1607_v27, 0.0  ;;  %v1624_v49 = vmax.f32 %v1608_v31, 0.0  ;;  %v1625_v24 = vmax.f32 %v1609_v48, 0.0 }
 0x1c2   :  { %v1626_v38 = vmax.f32 %v1610_v32, 0.0  ;;  %v1627_v46 = vmax.f32 %v1611_v1, 0.0  ;;  %v1628_v52 = vmax.f32 %v1612_v5, 0.0  ;;  %v1629_v19 = vmax.f32 %v1613_v53, 0.0 }
 0x1c3   :  { %v1630_v26 = vmax.f32 %v1614_v55, 0.0  ;;  %v1631_v54 = vmax.f32 %v1615_v33, 0.0  ;;  %v1632_v39 = vmax.f32 %v1616_v59, 0.0  ;;  %v1633_v58 = vmax.f32 %v1617_v36, 0.0 }
 0x1c4   :  { %v1897_v21 = vpack.c.bf16 %v1619_v7, %v1618_v62  ;;  %v1902_v41 = vpack.c.bf16 %v1621_v3, %v1620_v42  ;;  %v1907_v61 = vpack.c.bf16 %v1623_v47, %v1622_v6  ;;  %v1912_v43 = vpack.c.bf16 %v1625_v24, %v1624_v49 }
 0x1c5   :  { %v1917_v63 = vpack.c.bf16 %v1627_v46, %v1626_v38  ;;  %v1922_v4 = vpack.c.bf16 %v1629_v19, %v1628_v52  ;;  %v1927_v16 = vpack.c.bf16 %v1631_v54, %v1630_v26  ;;  %v1932_v8 = vpack.c.bf16 %v1633_v58, %v1632_v39 }
 0x1c6   :  { %1898 = vst [vmem:[%s3083_s2] sm:$0xff] %v1897_v21   ;;  %1934 = vst [vmem:[%s3083_s2 + $0x8] sm:$0xff] %v1902_v41  }
 0x1c7   :  { %1935 = vst [vmem:[%s3083_s2 + $0x10] sm:$0xff] %v1907_v61   ;;  %1936 = vst [vmem:[%s3083_s2 + $0x18] sm:$0xff] %v1912_v43  }
 0x1c8   :  { %1937 = vst [vmem:[%s3083_s2 + $0x20] sm:$0xff] %v1917_v63   ;;  %1938 = vst [vmem:[%s3083_s2 + $0x28] sm:$0xff] %v1922_v4  }
 0x1c9   :  { %1939 = vst [vmem:[%s3083_s2 + $0x30] sm:$0xff] %v1927_v16   ;;  %1940 = vst [vmem:[%s3083_s2 + $0x38] sm:$0xff] %v1932_v8  }

</bundles_post_ra>
